<compile_context>
chip_gen: v5e
topology: v5e:2x2
jax: 0.10.0
libtpu: 0.0.40
codegen_flags: <defaults>
</compile_context>

<pallas_src>
import jax
import jax.numpy as jnp
from jax.experimental import pallas as pl
from jax.experimental.pallas import tpu as pltpu

CIN, COUT, K = 3, 6, 3
H = W = 32
HC = H - K + 1            # 30 : conv output spatial size
PC = HC // 2              # 15 : pooled spatial size
FEAT = COUT * PC * PC     # 1350
HID, OUT = 120, 10

FSTRIDE = 16              # lanes reserved per (co, ph) pooled row in the flat feature scratch
NROW = COUT * PC          # 90 pooled rows
FEATP = 12 * 128          # 1536 >= NROW*FSTRIDE = 1440, padded to a lane-tile multiple
HIDP = 128                # fc1 output padded 120 -> 128
OUTP = 128                # fc2 output padded 10  -> 128 (sliced back to 10 outside the kernel)
NTAP = CIN * K            # 9 host-prepared parity tap planes (3 per input channel)
TW = 2 * FSTRIDE          # 32 : tap-plane width (even half | odd half)


def fused_kernel(xt_ref, wc_ref, bc_ref, w1_ref, b1_ref, w2_ref, b2_ref, o_ref, feat_ref):
    """One grid step = one batch element: conv + pool + flatten + fc1/ReLU/fc2."""
    # Only the tail vreg (lanes >= NROW*FSTRIDE) is never written by the pooled-row stores;
    # its fc1 weight rows are zero but the values must be finite, so zero exactly that vreg.
    feat_ref[:, pl.ds(FEATP - 128, 128)] = jnp.zeros((1, 128), jnp.float32)

    # ---------- conv1: 3x3 VALID cross-correlation, parity-split shift-and-accumulate -------
    # Host prepared, per input channel ci, three tap planes T_kw [32, 32]:
    #   T_kw[:, pw]      = x[:, 2*pw   + kw]   (feeds EVEN conv output columns), pw < 15
    #   T_kw[:, 16 + pw] = x[:, 2*pw+1 + kw]   (feeds ODD  conv output columns), pw < 15
    #   lanes 15 and 31 are zero.
    # So acc[:, pw] / acc[:, 16+pw] hold conv output columns 2pw / 2pw+1 -> the horizontal
    # pool max comes out lane-dense.  MAC count (162) is unchanged vs. the previous version.
    accs = [jnp.zeros((HC, TW), jnp.float32) for _ in range(COUT)]
    for ci in range(CIN):
        taps = [xt_ref[0, K * ci + kw, :, :] for kw in range(K)]        # 3 x [32, 32]
        for kh in range(K):
            tk = [taps[kw][kh:kh + HC, :] for kw in range(K)]           # 3 x [30, 32]
            for kw in range(K):
                for co in range(COUT):
                    wv = wc_ref[(co * CIN + ci) * (K * K) + kh * K + kw]
                    accs[co] = accs[co] + wv * tk[kw]

    # ---------- 2x2/stride-2 max pool + bias + lane-dense flatten ----------
    for co in range(COUT):
        a = accs[co]                                                    # [30, 32]
        hp = jnp.maximum(a[:, 0:FSTRIDE], a[:, FSTRIDE:TW])             # [30, 16] horiz. pair max (dense)
        vp = jnp.maximum(hp[0:HC - 1, :], hp[1:HC, :]) + bc_ref[co]     # [29, 16] + vert. pair max + bias
        # Row 2*ph of vp holds pooled[co, ph, 0:15] in lanes 0..14 (lane 15 = finite junk whose
        # fc1 weight row is zero).  Aligned 16-lane store fully covers its lane group.
        for ph in range(PC):
            off = (co * PC + ph) * FSTRIDE                              # static, 16-aligned lane offset
            feat_ref[:, pl.ds(off, FSTRIDE)] = vp[2 * ph:2 * ph + 1, :]

    # ---------- fc1 + ReLU + fc2, all resident in VMEM ----------
    feat = feat_ref[...]                                                # [1, FEATP]
    h = jnp.dot(feat, w1_ref[...], preferred_element_type=jnp.float32) + b1_ref[...]
    h = jnp.maximum(h, 0.0)                                             # [1, 128]
    out = jnp.dot(h, w2_ref[...], preferred_element_type=jnp.float32) + b2_ref[...]
    o_ref[0, :, :] = out                                                # full 128-lane unmasked store


def _build_taps(x):
    """Host-side (inside jit, plain XLA) parity split of the image into 9 tap planes.

    Pure layout plumbing: 24 KB -> 36 KB per image, enabling the 2x smaller fc1 weight DMA.
    """
    B = x.shape[0]
    e = x[..., 0::2]                                                    # [B,3,32,16] cols 0,2,...,30
    o = x[..., 1::2]                                                    # [B,3,32,16] cols 1,3,...,31
    z = jnp.zeros((B, CIN, H, 1), x.dtype)
    t0 = jnp.concatenate([e[..., 0:PC], z, o[..., 0:PC], z], axis=-1)        # kw=0: even 0..28 | odd 1..29
    t1 = jnp.concatenate([o[..., 0:PC], z, e[..., 1:PC + 1], z], axis=-1)    # kw=1: odd 1..29  | even 2..30
    t2 = jnp.concatenate([e[..., 1:PC + 1], z, o[..., 1:PC + 1], z], axis=-1)  # kw=2: even 2..30 | odd 3..31
    xt = jnp.stack([t0, t1, t2], axis=2)                                # [B, 3, 3, 32, 32]
    return xt.reshape(B, NTAP, H, TW)


def prepare_params(wc, bc, w1, b1, w2, b2):
    """One-time (outside the jitted forward) repacking of the PyTorch-layout weights."""
    wc_flat = wc.reshape(-1).astype(jnp.float32)                        # [54] for SMEM scalar access
    bc_f = bc.astype(jnp.float32)                                       # [6]

    # fc1: torch weight [HID, FEAT], feature index k = co*225 + ph*15 + pw.
    # Kernel feature layout: lane (co*15 + ph)*16 + pw (pw dense in 0..14; lane 15 of each
    # group and lanes >= 1440 carry zero weight).
    w1r = jnp.transpose(w1.reshape(HID, COUT, PC, PC), (1, 2, 3, 0))    # [6,15,15,120]
    w1p = jnp.zeros((COUT, PC, FSTRIDE, HIDP), jnp.float32)
    w1p = w1p.at[:, :, :PC, :HID].set(w1r)                              # pw -> dense low lanes
    w1p = w1p.reshape(COUT * PC * FSTRIDE, HIDP)                        # [1440, 128]
    w1p = jnp.zeros((FEATP, HIDP), jnp.float32).at[:COUT * PC * FSTRIDE, :].set(w1p)

    b1p = jnp.zeros((1, HIDP), jnp.float32).at[0, :HID].set(b1)
    w2p = jnp.zeros((HIDP, OUTP), jnp.float32).at[:HID, :OUT].set(w2.T)  # pre-transposed + padded
    b2p = jnp.zeros((1, OUTP), jnp.float32).at[0, :OUT].set(b2)
    return wc_flat, bc_f, w1p, b1p, w2p, b2p


@jax.jit
def network_forward(x, prepared):
    wc_flat, bc_f, w1p, b1p, w2p, b2p = prepared
    B = x.shape[0]
    xt = _build_taps(x)
    out = pl.pallas_call(
        fused_kernel,
        out_shape=jax.ShapeDtypeStruct((B, 1, OUTP), jnp.float32),
        grid=(B,),
        in_specs=[
            pl.BlockSpec((1, NTAP, H, TW), lambda b: (b, 0, 0, 0)),     # per-batch parity tap planes
            pl.BlockSpec(memory_space=pltpu.MemorySpace.SMEM),          # conv weights (scalars)
            pl.BlockSpec(memory_space=pltpu.MemorySpace.SMEM),          # conv bias   (scalars)
            pl.BlockSpec((FEATP, HIDP), lambda b: (0, 0)),              # fc1 weight, VMEM-resident
            pl.BlockSpec((1, HIDP), lambda b: (0, 0)),                  # fc1 bias
            pl.BlockSpec((HIDP, OUTP), lambda b: (0, 0)),               # fc2 weight
            pl.BlockSpec((1, OUTP), lambda b: (0, 0)),                  # fc2 bias
        ],
        out_specs=pl.BlockSpec((1, 1, OUTP), lambda b: (b, 0, 0)),
        scratch_shapes=[pltpu.VMEM((1, FEATP), jnp.float32)],           # flat feature vector
        compiler_params=pltpu.CompilerParams(dimension_semantics=("parallel",)),
    )(xt, wc_flat, bc_f, w1p, b1p, w2p, b2p)
    return out.reshape(B, OUTP)[:, :OUT]


if __name__ == "__main__":
    key = jax.random.PRNGKey(0)
    kx, k1, k2, k3, k4, k5, k6 = jax.random.split(key, 7)
    x = jax.random.normal(kx, (2, CIN, H, W), jnp.float32)
    wc = 0.1 * jax.random.normal(k1, (COUT, CIN, K, K), jnp.float32)
    bc = 0.1 * jax.random.normal(k2, (COUT,), jnp.float32)
    w1 = 0.03 * jax.random.normal(k3, (HID, FEAT), jnp.float32)
    b1 = 0.03 * jax.random.normal(k4, (HID,), jnp.float32)
    w2 = 0.1 * jax.random.normal(k5, (OUT, HID), jnp.float32)
    b2 = 0.1 * jax.random.normal(k6, (OUT,), jnp.float32)

    prepared = prepare_params(wc, bc, w1, b1, w2, b2)   # one-time weight repack, outside the jit
    out = jax.block_until_ready(network_forward(x, prepared))

    # pure-JAX reference (same semantics as the PyTorch forward)
    hp = jax.lax.Precision.HIGHEST
    conv = jax.lax.conv_general_dilated(
        x, wc, (1, 1), "VALID", dimension_numbers=("NCHW", "OIHW", "NCHW"), precision=hp
    ) + bc[None, :, None, None]
    pool = jax.lax.reduce_window(conv, -jnp.inf, jax.lax.max,
                                 (1, 1, 2, 2), (1, 1, 2, 2), "VALID")
    flat = pool.reshape(x.shape[0], -1)
    href = jnp.maximum(jnp.dot(flat, w1.T, precision=hp) + b1, 0.0)
    ref = jnp.dot(href, w2.T, precision=hp) + b2

    assert out.shape == (2, OUT)
    err = float(jnp.max(jnp.abs(out - ref)))
    assert jnp.allclose(out, ref, rtol=1e-3, atol=2e-3), f"max abs err {err}"
    print("KERNEL_OK")
</pallas_src>

<mosaic_0001>
module attributes {stable_mosaic.version = 11 : i64} {
  func.func @fused_kernel(%arg0: i32, %arg1: memref<1x9x32x32xf32, #tpu.memory_space<vmem>>, %arg2: memref<162xf32, #tpu.memory_space<smem>>, %arg3: memref<6xf32, #tpu.memory_space<smem>>, %arg4: memref<1536x128xf32, #tpu.memory_space<vmem>>, %arg5: memref<1x128xf32, #tpu.memory_space<vmem>>, %arg6: memref<128x128xf32, #tpu.memory_space<vmem>>, %arg7: memref<1x128xf32, #tpu.memory_space<vmem>>, %arg8: memref<1x1x128xf32, #tpu.memory_space<vmem>>, %arg9: memref<1x1536xf32, #tpu.memory_space<vmem>>) attributes {dimension_semantics = [#tpu.dimension_semantics<parallel>], iteration_bounds = array<i64: 2>, scalar_prefetch = 0 : i64, scratch_operands = 1 : i64, tpu.core_type = #tpu.core_type<tc>, window_params = [{transform_indices = @transform_0, window_bounds = array<i64: 1, 9, 32, 32>}, {transform_indices = @transform_1, window_bounds = array<i64: 162>}, {transform_indices = @transform_2, window_bounds = array<i64: 6>}, {pipeline_mode = #tpu.pipeline_mode<synchronous>, transform_indices = @transform_3, window_bounds = array<i64: 1536, 128>}, {pipeline_mode = #tpu.pipeline_mode<synchronous>, transform_indices = @transform_4, window_bounds = array<i64: 1, 128>}, {pipeline_mode = #tpu.pipeline_mode<synchronous>, transform_indices = @transform_5, window_bounds = array<i64: 128, 128>}, {pipeline_mode = #tpu.pipeline_mode<synchronous>, transform_indices = @transform_6, window_bounds = array<i64: 1, 128>}, {transform_indices = @transform_7, window_bounds = array<i64: 1, 1, 128>}]} {
    %cst = arith.constant 0.000000e+00 : f32
    %0 = vector.broadcast %cst : f32 to vector<1x128xf32>
    %c0 = arith.constant 0 : index
    %c1408 = arith.constant 1408 : index
    %1 = vector.load %arg9[%c0, %c1408] : memref<1x1536xf32, #tpu.memory_space<vmem>>, vector<1x128xf32>
    tpu.vector_store %arg9[%c0, %c1408], %0 {strides = array<i32>} : memref<1x1536xf32, #tpu.memory_space<vmem>>, vector<1x128xf32>,
    %cst_0 = arith.constant 0.000000e+00 : f32
    %2 = vector.broadcast %cst_0 : f32 to vector<30x32xf32>
    %cst_1 = arith.constant 0.000000e+00 : f32
    %3 = vector.broadcast %cst_1 : f32 to vector<30x32xf32>
    %cst_2 = arith.constant 0.000000e+00 : f32
    %4 = vector.broadcast %cst_2 : f32 to vector<30x32xf32>
    %cst_3 = arith.constant 0.000000e+00 : f32
    %5 = vector.broadcast %cst_3 : f32 to vector<30x32xf32>
    %cst_4 = arith.constant 0.000000e+00 : f32
    %6 = vector.broadcast %cst_4 : f32 to vector<30x32xf32>
    %cst_5 = arith.constant 0.000000e+00 : f32
    %7 = vector.broadcast %cst_5 : f32 to vector<30x32xf32>
    %c0_6 = arith.constant 0 : index
    %c0_7 = arith.constant 0 : index
    %c0_8 = arith.constant 0 : index
    %c0_9 = arith.constant 0 : index
    %8 = vector.load %arg1[%c0_6, %c0_7, %c0_8, %c0_9] : memref<1x9x32x32xf32, #tpu.memory_space<vmem>>, vector<1x1x32x32xf32>
    %9 = vector.shape_cast %8 : vector<1x1x32x32xf32> to vector<32x32xf32>
    %c0_10 = arith.constant 0 : index
    %c1 = arith.constant 1 : index
    %c0_11 = arith.constant 0 : index
    %c0_12 = arith.constant 0 : index
    %10 = vector.load %arg1[%c0_10, %c1, %c0_11, %c0_12] : memref<1x9x32x32xf32, #tpu.memory_space<vmem>>, vector<1x1x32x32xf32>
    %11 = vector.shape_cast %10 : vector<1x1x32x32xf32> to vector<32x32xf32>
    %c0_13 = arith.constant 0 : index
    %c2 = arith.constant 2 : index
    %c0_14 = arith.constant 0 : index
    %c0_15 = arith.constant 0 : index
    %12 = vector.load %arg1[%c0_13, %c2, %c0_14, %c0_15] : memref<1x9x32x32xf32, #tpu.memory_space<vmem>>, vector<1x1x32x32xf32>
    %13 = vector.shape_cast %12 : vector<1x1x32x32xf32> to vector<32x32xf32>
    %14 = vector.extract_strided_slice %9 {offsets = [0, 0], sizes = [30, 32], strides = [1, 1]} : vector<32x32xf32> to vector<30x32xf32>
    %15 = vector.extract_strided_slice %11 {offsets = [0, 0], sizes = [30, 32], strides = [1, 1]} : vector<32x32xf32> to vector<30x32xf32>
    %16 = vector.extract_strided_slice %13 {offsets = [0, 0], sizes = [30, 32], strides = [1, 1]} : vector<32x32xf32> to vector<30x32xf32>
    %c0_16 = arith.constant 0 : index
    %17 = memref.load %arg2[%c0_16] : memref<162xf32, #tpu.memory_space<smem>>
    %18 = vector.broadcast %17 : f32 to vector<30x32xf32>
    %19 = arith.mulf %18, %14 : vector<30x32xf32>
    %20 = arith.addf %2, %19 : vector<30x32xf32>
    %c27 = arith.constant 27 : index
    %21 = memref.load %arg2[%c27] : memref<162xf32, #tpu.memory_space<smem>>
    %22 = vector.broadcast %21 : f32 to vector<30x32xf32>
    %23 = arith.mulf %22, %14 : vector<30x32xf32>
    %24 = arith.addf %3, %23 : vector<30x32xf32>
    %c54 = arith.constant 54 : index
    %25 = memref.load %arg2[%c54] : memref<162xf32, #tpu.memory_space<smem>>
    %26 = vector.broadcast %25 : f32 to vector<30x32xf32>
    %27 = arith.mulf %26, %14 : vector<30x32xf32>
    %28 = arith.addf %4, %27 : vector<30x32xf32>
    %c81 = arith.constant 81 : index
    %29 = memref.load %arg2[%c81] : memref<162xf32, #tpu.memory_space<smem>>
    %30 = vector.broadcast %29 : f32 to vector<30x32xf32>
    %31 = arith.mulf %30, %14 : vector<30x32xf32>
    %32 = arith.addf %5, %31 : vector<30x32xf32>
    %c108 = arith.constant 108 : index
    %33 = memref.load %arg2[%c108] : memref<162xf32, #tpu.memory_space<smem>>
    %34 = vector.broadcast %33 : f32 to vector<30x32xf32>
    %35 = arith.mulf %34, %14 : vector<30x32xf32>
    %36 = arith.addf %6, %35 : vector<30x32xf32>
    %c135 = arith.constant 135 : index
    %37 = memref.load %arg2[%c135] : memref<162xf32, #tpu.memory_space<smem>>
    %38 = vector.broadcast %37 : f32 to vector<30x32xf32>
    %39 = arith.mulf %38, %14 : vector<30x32xf32>
    %40 = arith.addf %7, %39 : vector<30x32xf32>
    %c1_17 = arith.constant 1 : index
    %41 = memref.load %arg2[%c1_17] : memref<162xf32, #tpu.memory_space<smem>>
    %42 = vector.broadcast %41 : f32 to vector<30x32xf32>
    %43 = arith.mulf %42, %15 : vector<30x32xf32>
    %44 = arith.addf %20, %43 : vector<30x32xf32>
    %c28 = arith.constant 28 : index
    %45 = memref.load %arg2[%c28] : memref<162xf32, #tpu.memory_space<smem>>
    %46 = vector.broadcast %45 : f32 to vector<30x32xf32>
    %47 = arith.mulf %46, %15 : vector<30x32xf32>
    %48 = arith.addf %24, %47 : vector<30x32xf32>
    %c55 = arith.constant 55 : index
    %49 = memref.load %arg2[%c55] : memref<162xf32, #tpu.memory_space<smem>>
    %50 = vector.broadcast %49 : f32 to vector<30x32xf32>
    %51 = arith.mulf %50, %15 : vector<30x32xf32>
    %52 = arith.addf %28, %51 : vector<30x32xf32>
    %c82 = arith.constant 82 : index
    %53 = memref.load %arg2[%c82] : memref<162xf32, #tpu.memory_space<smem>>
    %54 = vector.broadcast %53 : f32 to vector<30x32xf32>
    %55 = arith.mulf %54, %15 : vector<30x32xf32>
    %56 = arith.addf %32, %55 : vector<30x32xf32>
    %c109 = arith.constant 109 : index
    %57 = memref.load %arg2[%c109] : memref<162xf32, #tpu.memory_space<smem>>
    %58 = vector.broadcast %57 : f32 to vector<30x32xf32>
    %59 = arith.mulf %58, %15 : vector<30x32xf32>
    %60 = arith.addf %36, %59 : vector<30x32xf32>
    %c136 = arith.constant 136 : index
    %61 = memref.load %arg2[%c136] : memref<162xf32, #tpu.memory_space<smem>>
    %62 = vector.broadcast %61 : f32 to vector<30x32xf32>
    %63 = arith.mulf %62, %15 : vector<30x32xf32>
    %64 = arith.addf %40, %63 : vector<30x32xf32>
    %c2_18 = arith.constant 2 : index
    %65 = memref.load %arg2[%c2_18] : memref<162xf32, #tpu.memory_space<smem>>
    %66 = vector.broadcast %65 : f32 to vector<30x32xf32>
    %67 = arith.mulf %66, %16 : vector<30x32xf32>
    %68 = arith.addf %44, %67 : vector<30x32xf32>
    %c29 = arith.constant 29 : index
    %69 = memref.load %arg2[%c29] : memref<162xf32, #tpu.memory_space<smem>>
    %70 = vector.broadcast %69 : f32 to vector<30x32xf32>
    %71 = arith.mulf %70, %16 : vector<30x32xf32>
    %72 = arith.addf %48, %71 : vector<30x32xf32>
    %c56 = arith.constant 56 : index
    %73 = memref.load %arg2[%c56] : memref<162xf32, #tpu.memory_space<smem>>
    %74 = vector.broadcast %73 : f32 to vector<30x32xf32>
    %75 = arith.mulf %74, %16 : vector<30x32xf32>
    %76 = arith.addf %52, %75 : vector<30x32xf32>
    %c83 = arith.constant 83 : index
    %77 = memref.load %arg2[%c83] : memref<162xf32, #tpu.memory_space<smem>>
    %78 = vector.broadcast %77 : f32 to vector<30x32xf32>
    %79 = arith.mulf %78, %16 : vector<30x32xf32>
    %80 = arith.addf %56, %79 : vector<30x32xf32>
    %c110 = arith.constant 110 : index
    %81 = memref.load %arg2[%c110] : memref<162xf32, #tpu.memory_space<smem>>
    %82 = vector.broadcast %81 : f32 to vector<30x32xf32>
    %83 = arith.mulf %82, %16 : vector<30x32xf32>
    %84 = arith.addf %60, %83 : vector<30x32xf32>
    %c137 = arith.constant 137 : index
    %85 = memref.load %arg2[%c137] : memref<162xf32, #tpu.memory_space<smem>>
    %86 = vector.broadcast %85 : f32 to vector<30x32xf32>
    %87 = arith.mulf %86, %16 : vector<30x32xf32>
    %88 = arith.addf %64, %87 : vector<30x32xf32>
    %89 = vector.extract_strided_slice %9 {offsets = [1, 0], sizes = [30, 32], strides = [1, 1]} : vector<32x32xf32> to vector<30x32xf32>
    %90 = vector.extract_strided_slice %11 {offsets = [1, 0], sizes = [30, 32], strides = [1, 1]} : vector<32x32xf32> to vector<30x32xf32>
    %91 = vector.extract_strided_slice %13 {offsets = [1, 0], sizes = [30, 32], strides = [1, 1]} : vector<32x32xf32> to vector<30x32xf32>
    %c3 = arith.constant 3 : index
    %92 = memref.load %arg2[%c3] : memref<162xf32, #tpu.memory_space<smem>>
    %93 = vector.broadcast %92 : f32 to vector<30x32xf32>
    %94 = arith.mulf %93, %89 : vector<30x32xf32>
    %95 = arith.addf %68, %94 : vector<30x32xf32>
    %c30 = arith.constant 30 : index
    %96 = memref.load %arg2[%c30] : memref<162xf32, #tpu.memory_space<smem>>
    %97 = vector.broadcast %96 : f32 to vector<30x32xf32>
    %98 = arith.mulf %97, %89 : vector<30x32xf32>
    %99 = arith.addf %72, %98 : vector<30x32xf32>
    %c57 = arith.constant 57 : index
    %100 = memref.load %arg2[%c57] : memref<162xf32, #tpu.memory_space<smem>>
    %101 = vector.broadcast %100 : f32 to vector<30x32xf32>
    %102 = arith.mulf %101, %89 : vector<30x32xf32>
    %103 = arith.addf %76, %102 : vector<30x32xf32>
    %c84 = arith.constant 84 : index
    %104 = memref.load %arg2[%c84] : memref<162xf32, #tpu.memory_space<smem>>
    %105 = vector.broadcast %104 : f32 to vector<30x32xf32>
    %106 = arith.mulf %105, %89 : vector<30x32xf32>
    %107 = arith.addf %80, %106 : vector<30x32xf32>
    %c111 = arith.constant 111 : index
    %108 = memref.load %arg2[%c111] : memref<162xf32, #tpu.memory_space<smem>>
    %109 = vector.broadcast %108 : f32 to vector<30x32xf32>
    %110 = arith.mulf %109, %89 : vector<30x32xf32>
    %111 = arith.addf %84, %110 : vector<30x32xf32>
    %c138 = arith.constant 138 : index
    %112 = memref.load %arg2[%c138] : memref<162xf32, #tpu.memory_space<smem>>
    %113 = vector.broadcast %112 : f32 to vector<30x32xf32>
    %114 = arith.mulf %113, %89 : vector<30x32xf32>
    %115 = arith.addf %88, %114 : vector<30x32xf32>
    %c4 = arith.constant 4 : index
    %116 = memref.load %arg2[%c4] : memref<162xf32, #tpu.memory_space<smem>>
    %117 = vector.broadcast %116 : f32 to vector<30x32xf32>
    %118 = arith.mulf %117, %90 : vector<30x32xf32>
    %119 = arith.addf %95, %118 : vector<30x32xf32>
    %c31 = arith.constant 31 : index
    %120 = memref.load %arg2[%c31] : memref<162xf32, #tpu.memory_space<smem>>
    %121 = vector.broadcast %120 : f32 to vector<30x32xf32>
    %122 = arith.mulf %121, %90 : vector<30x32xf32>
    %123 = arith.addf %99, %122 : vector<30x32xf32>
    %c58 = arith.constant 58 : index
    %124 = memref.load %arg2[%c58] : memref<162xf32, #tpu.memory_space<smem>>
    %125 = vector.broadcast %124 : f32 to vector<30x32xf32>
    %126 = arith.mulf %125, %90 : vector<30x32xf32>
    %127 = arith.addf %103, %126 : vector<30x32xf32>
    %c85 = arith.constant 85 : index
    %128 = memref.load %arg2[%c85] : memref<162xf32, #tpu.memory_space<smem>>
    %129 = vector.broadcast %128 : f32 to vector<30x32xf32>
    %130 = arith.mulf %129, %90 : vector<30x32xf32>
    %131 = arith.addf %107, %130 : vector<30x32xf32>
    %c112 = arith.constant 112 : index
    %132 = memref.load %arg2[%c112] : memref<162xf32, #tpu.memory_space<smem>>
    %133 = vector.broadcast %132 : f32 to vector<30x32xf32>
    %134 = arith.mulf %133, %90 : vector<30x32xf32>
    %135 = arith.addf %111, %134 : vector<30x32xf32>
    %c139 = arith.constant 139 : index
    %136 = memref.load %arg2[%c139] : memref<162xf32, #tpu.memory_space<smem>>
    %137 = vector.broadcast %136 : f32 to vector<30x32xf32>
    %138 = arith.mulf %137, %90 : vector<30x32xf32>
    %139 = arith.addf %115, %138 : vector<30x32xf32>
    %c5 = arith.constant 5 : index
    %140 = memref.load %arg2[%c5] : memref<162xf32, #tpu.memory_space<smem>>
    %141 = vector.broadcast %140 : f32 to vector<30x32xf32>
    %142 = arith.mulf %141, %91 : vector<30x32xf32>
    %143 = arith.addf %119, %142 : vector<30x32xf32>
    %c32 = arith.constant 32 : index
    %144 = memref.load %arg2[%c32] : memref<162xf32, #tpu.memory_space<smem>>
    %145 = vector.broadcast %144 : f32 to vector<30x32xf32>
    %146 = arith.mulf %145, %91 : vector<30x32xf32>
    %147 = arith.addf %123, %146 : vector<30x32xf32>
    %c59 = arith.constant 59 : index
    %148 = memref.load %arg2[%c59] : memref<162xf32, #tpu.memory_space<smem>>
    %149 = vector.broadcast %148 : f32 to vector<30x32xf32>
    %150 = arith.mulf %149, %91 : vector<30x32xf32>
    %151 = arith.addf %127, %150 : vector<30x32xf32>
    %c86 = arith.constant 86 : index
    %152 = memref.load %arg2[%c86] : memref<162xf32, #tpu.memory_space<smem>>
    %153 = vector.broadcast %152 : f32 to vector<30x32xf32>
    %154 = arith.mulf %153, %91 : vector<30x32xf32>
    %155 = arith.addf %131, %154 : vector<30x32xf32>
    %c113 = arith.constant 113 : index
    %156 = memref.load %arg2[%c113] : memref<162xf32, #tpu.memory_space<smem>>
    %157 = vector.broadcast %156 : f32 to vector<30x32xf32>
    %158 = arith.mulf %157, %91 : vector<30x32xf32>
    %159 = arith.addf %135, %158 : vector<30x32xf32>
    %c140 = arith.constant 140 : index
    %160 = memref.load %arg2[%c140] : memref<162xf32, #tpu.memory_space<smem>>
    %161 = vector.broadcast %160 : f32 to vector<30x32xf32>
    %162 = arith.mulf %161, %91 : vector<30x32xf32>
    %163 = arith.addf %139, %162 : vector<30x32xf32>
    %164 = vector.extract_strided_slice %9 {offsets = [2, 0], sizes = [30, 32], strides = [1, 1]} : vector<32x32xf32> to vector<30x32xf32>
    %165 = vector.extract_strided_slice %11 {offsets = [2, 0], sizes = [30, 32], strides = [1, 1]} : vector<32x32xf32> to vector<30x32xf32>
    %166 = vector.extract_strided_slice %13 {offsets = [2, 0], sizes = [30, 32], strides = [1, 1]} : vector<32x32xf32> to vector<30x32xf32>
    %c6 = arith.constant 6 : index
    %167 = memref.load %arg2[%c6] : memref<162xf32, #tpu.memory_space<smem>>
    %168 = vector.broadcast %167 : f32 to vector<30x32xf32>
    %169 = arith.mulf %168, %164 : vector<30x32xf32>
    %170 = arith.addf %143, %169 : vector<30x32xf32>
    %c33 = arith.constant 33 : index
    %171 = memref.load %arg2[%c33] : memref<162xf32, #tpu.memory_space<smem>>
    %172 = vector.broadcast %171 : f32 to vector<30x32xf32>
    %173 = arith.mulf %172, %164 : vector<30x32xf32>
    %174 = arith.addf %147, %173 : vector<30x32xf32>
    %c60 = arith.constant 60 : index
    %175 = memref.load %arg2[%c60] : memref<162xf32, #tpu.memory_space<smem>>
    %176 = vector.broadcast %175 : f32 to vector<30x32xf32>
    %177 = arith.mulf %176, %164 : vector<30x32xf32>
    %178 = arith.addf %151, %177 : vector<30x32xf32>
    %c87 = arith.constant 87 : index
    %179 = memref.load %arg2[%c87] : memref<162xf32, #tpu.memory_space<smem>>
    %180 = vector.broadcast %179 : f32 to vector<30x32xf32>
    %181 = arith.mulf %180, %164 : vector<30x32xf32>
    %182 = arith.addf %155, %181 : vector<30x32xf32>
    %c114 = arith.constant 114 : index
    %183 = memref.load %arg2[%c114] : memref<162xf32, #tpu.memory_space<smem>>
    %184 = vector.broadcast %183 : f32 to vector<30x32xf32>
    %185 = arith.mulf %184, %164 : vector<30x32xf32>
    %186 = arith.addf %159, %185 : vector<30x32xf32>
    %c141 = arith.constant 141 : index
    %187 = memref.load %arg2[%c141] : memref<162xf32, #tpu.memory_space<smem>>
    %188 = vector.broadcast %187 : f32 to vector<30x32xf32>
    %189 = arith.mulf %188, %164 : vector<30x32xf32>
    %190 = arith.addf %163, %189 : vector<30x32xf32>
    %c7 = arith.constant 7 : index
    %191 = memref.load %arg2[%c7] : memref<162xf32, #tpu.memory_space<smem>>
    %192 = vector.broadcast %191 : f32 to vector<30x32xf32>
    %193 = arith.mulf %192, %165 : vector<30x32xf32>
    %194 = arith.addf %170, %193 : vector<30x32xf32>
    %c34 = arith.constant 34 : index
    %195 = memref.load %arg2[%c34] : memref<162xf32, #tpu.memory_space<smem>>
    %196 = vector.broadcast %195 : f32 to vector<30x32xf32>
    %197 = arith.mulf %196, %165 : vector<30x32xf32>
    %198 = arith.addf %174, %197 : vector<30x32xf32>
    %c61 = arith.constant 61 : index
    %199 = memref.load %arg2[%c61] : memref<162xf32, #tpu.memory_space<smem>>
    %200 = vector.broadcast %199 : f32 to vector<30x32xf32>
    %201 = arith.mulf %200, %165 : vector<30x32xf32>
    %202 = arith.addf %178, %201 : vector<30x32xf32>
    %c88 = arith.constant 88 : index
    %203 = memref.load %arg2[%c88] : memref<162xf32, #tpu.memory_space<smem>>
    %204 = vector.broadcast %203 : f32 to vector<30x32xf32>
    %205 = arith.mulf %204, %165 : vector<30x32xf32>
    %206 = arith.addf %182, %205 : vector<30x32xf32>
    %c115 = arith.constant 115 : index
    %207 = memref.load %arg2[%c115] : memref<162xf32, #tpu.memory_space<smem>>
    %208 = vector.broadcast %207 : f32 to vector<30x32xf32>
    %209 = arith.mulf %208, %165 : vector<30x32xf32>
    %210 = arith.addf %186, %209 : vector<30x32xf32>
    %c142 = arith.constant 142 : index
    %211 = memref.load %arg2[%c142] : memref<162xf32, #tpu.memory_space<smem>>
    %212 = vector.broadcast %211 : f32 to vector<30x32xf32>
    %213 = arith.mulf %212, %165 : vector<30x32xf32>
    %214 = arith.addf %190, %213 : vector<30x32xf32>
    %c8 = arith.constant 8 : index
    %215 = memref.load %arg2[%c8] : memref<162xf32, #tpu.memory_space<smem>>
    %216 = vector.broadcast %215 : f32 to vector<30x32xf32>
    %217 = arith.mulf %216, %166 : vector<30x32xf32>
    %218 = arith.addf %194, %217 : vector<30x32xf32>
    %c35 = arith.constant 35 : index
    %219 = memref.load %arg2[%c35] : memref<162xf32, #tpu.memory_space<smem>>
    %220 = vector.broadcast %219 : f32 to vector<30x32xf32>
    %221 = arith.mulf %220, %166 : vector<30x32xf32>
    %222 = arith.addf %198, %221 : vector<30x32xf32>
    %c62 = arith.constant 62 : index
    %223 = memref.load %arg2[%c62] : memref<162xf32, #tpu.memory_space<smem>>
    %224 = vector.broadcast %223 : f32 to vector<30x32xf32>
    %225 = arith.mulf %224, %166 : vector<30x32xf32>
    %226 = arith.addf %202, %225 : vector<30x32xf32>
    %c89 = arith.constant 89 : index
    %227 = memref.load %arg2[%c89] : memref<162xf32, #tpu.memory_space<smem>>
    %228 = vector.broadcast %227 : f32 to vector<30x32xf32>
    %229 = arith.mulf %228, %166 : vector<30x32xf32>
    %230 = arith.addf %206, %229 : vector<30x32xf32>
    %c116 = arith.constant 116 : index
    %231 = memref.load %arg2[%c116] : memref<162xf32, #tpu.memory_space<smem>>
    %232 = vector.broadcast %231 : f32 to vector<30x32xf32>
    %233 = arith.mulf %232, %166 : vector<30x32xf32>
    %234 = arith.addf %210, %233 : vector<30x32xf32>
    %c143 = arith.constant 143 : index
    %235 = memref.load %arg2[%c143] : memref<162xf32, #tpu.memory_space<smem>>
    %236 = vector.broadcast %235 : f32 to vector<30x32xf32>
    %237 = arith.mulf %236, %166 : vector<30x32xf32>
    %238 = arith.addf %214, %237 : vector<30x32xf32>
    %c0_19 = arith.constant 0 : index
    %c3_20 = arith.constant 3 : index
    %c0_21 = arith.constant 0 : index
    %c0_22 = arith.constant 0 : index
    %239 = vector.load %arg1[%c0_19, %c3_20, %c0_21, %c0_22] : memref<1x9x32x32xf32, #tpu.memory_space<vmem>>, vector<1x1x32x32xf32>
    %240 = vector.shape_cast %239 : vector<1x1x32x32xf32> to vector<32x32xf32>
    %c0_23 = arith.constant 0 : index
    %c4_24 = arith.constant 4 : index
    %c0_25 = arith.constant 0 : index
    %c0_26 = arith.constant 0 : index
    %241 = vector.load %arg1[%c0_23, %c4_24, %c0_25, %c0_26] : memref<1x9x32x32xf32, #tpu.memory_space<vmem>>, vector<1x1x32x32xf32>
    %242 = vector.shape_cast %241 : vector<1x1x32x32xf32> to vector<32x32xf32>
    %c0_27 = arith.constant 0 : index
    %c5_28 = arith.constant 5 : index
    %c0_29 = arith.constant 0 : index
    %c0_30 = arith.constant 0 : index
    %243 = vector.load %arg1[%c0_27, %c5_28, %c0_29, %c0_30] : memref<1x9x32x32xf32, #tpu.memory_space<vmem>>, vector<1x1x32x32xf32>
    %244 = vector.shape_cast %243 : vector<1x1x32x32xf32> to vector<32x32xf32>
    %245 = vector.extract_strided_slice %240 {offsets = [0, 0], sizes = [30, 32], strides = [1, 1]} : vector<32x32xf32> to vector<30x32xf32>
    %246 = vector.extract_strided_slice %242 {offsets = [0, 0], sizes = [30, 32], strides = [1, 1]} : vector<32x32xf32> to vector<30x32xf32>
    %247 = vector.extract_strided_slice %244 {offsets = [0, 0], sizes = [30, 32], strides = [1, 1]} : vector<32x32xf32> to vector<30x32xf32>
    %c9 = arith.constant 9 : index
    %248 = memref.load %arg2[%c9] : memref<162xf32, #tpu.memory_space<smem>>
    %249 = vector.broadcast %248 : f32 to vector<30x32xf32>
    %250 = arith.mulf %249, %245 : vector<30x32xf32>
    %251 = arith.addf %218, %250 : vector<30x32xf32>
    %c36 = arith.constant 36 : index
    %252 = memref.load %arg2[%c36] : memref<162xf32, #tpu.memory_space<smem>>
    %253 = vector.broadcast %252 : f32 to vector<30x32xf32>
    %254 = arith.mulf %253, %245 : vector<30x32xf32>
    %255 = arith.addf %222, %254 : vector<30x32xf32>
    %c63 = arith.constant 63 : index
    %256 = memref.load %arg2[%c63] : memref<162xf32, #tpu.memory_space<smem>>
    %257 = vector.broadcast %256 : f32 to vector<30x32xf32>
    %258 = arith.mulf %257, %245 : vector<30x32xf32>
    %259 = arith.addf %226, %258 : vector<30x32xf32>
    %c90 = arith.constant 90 : index
    %260 = memref.load %arg2[%c90] : memref<162xf32, #tpu.memory_space<smem>>
    %261 = vector.broadcast %260 : f32 to vector<30x32xf32>
    %262 = arith.mulf %261, %245 : vector<30x32xf32>
    %263 = arith.addf %230, %262 : vector<30x32xf32>
    %c117 = arith.constant 117 : index
    %264 = memref.load %arg2[%c117] : memref<162xf32, #tpu.memory_space<smem>>
    %265 = vector.broadcast %264 : f32 to vector<30x32xf32>
    %266 = arith.mulf %265, %245 : vector<30x32xf32>
    %267 = arith.addf %234, %266 : vector<30x32xf32>
    %c144 = arith.constant 144 : index
    %268 = memref.load %arg2[%c144] : memref<162xf32, #tpu.memory_space<smem>>
    %269 = vector.broadcast %268 : f32 to vector<30x32xf32>
    %270 = arith.mulf %269, %245 : vector<30x32xf32>
    %271 = arith.addf %238, %270 : vector<30x32xf32>
    %c10 = arith.constant 10 : index
    %272 = memref.load %arg2[%c10] : memref<162xf32, #tpu.memory_space<smem>>
    %273 = vector.broadcast %272 : f32 to vector<30x32xf32>
    %274 = arith.mulf %273, %246 : vector<30x32xf32>
    %275 = arith.addf %251, %274 : vector<30x32xf32>
    %c37 = arith.constant 37 : index
    %276 = memref.load %arg2[%c37] : memref<162xf32, #tpu.memory_space<smem>>
    %277 = vector.broadcast %276 : f32 to vector<30x32xf32>
    %278 = arith.mulf %277, %246 : vector<30x32xf32>
    %279 = arith.addf %255, %278 : vector<30x32xf32>
    %c64 = arith.constant 64 : index
    %280 = memref.load %arg2[%c64] : memref<162xf32, #tpu.memory_space<smem>>
    %281 = vector.broadcast %280 : f32 to vector<30x32xf32>
    %282 = arith.mulf %281, %246 : vector<30x32xf32>
    %283 = arith.addf %259, %282 : vector<30x32xf32>
    %c91 = arith.constant 91 : index
    %284 = memref.load %arg2[%c91] : memref<162xf32, #tpu.memory_space<smem>>
    %285 = vector.broadcast %284 : f32 to vector<30x32xf32>
    %286 = arith.mulf %285, %246 : vector<30x32xf32>
    %287 = arith.addf %263, %286 : vector<30x32xf32>
    %c118 = arith.constant 118 : index
    %288 = memref.load %arg2[%c118] : memref<162xf32, #tpu.memory_space<smem>>
    %289 = vector.broadcast %288 : f32 to vector<30x32xf32>
    %290 = arith.mulf %289, %246 : vector<30x32xf32>
    %291 = arith.addf %267, %290 : vector<30x32xf32>
    %c145 = arith.constant 145 : index
    %292 = memref.load %arg2[%c145] : memref<162xf32, #tpu.memory_space<smem>>
    %293 = vector.broadcast %292 : f32 to vector<30x32xf32>
    %294 = arith.mulf %293, %246 : vector<30x32xf32>
    %295 = arith.addf %271, %294 : vector<30x32xf32>
    %c11 = arith.constant 11 : index
    %296 = memref.load %arg2[%c11] : memref<162xf32, #tpu.memory_space<smem>>
    %297 = vector.broadcast %296 : f32 to vector<30x32xf32>
    %298 = arith.mulf %297, %247 : vector<30x32xf32>
    %299 = arith.addf %275, %298 : vector<30x32xf32>
    %c38 = arith.constant 38 : index
    %300 = memref.load %arg2[%c38] : memref<162xf32, #tpu.memory_space<smem>>
    %301 = vector.broadcast %300 : f32 to vector<30x32xf32>
    %302 = arith.mulf %301, %247 : vector<30x32xf32>
    %303 = arith.addf %279, %302 : vector<30x32xf32>
    %c65 = arith.constant 65 : index
    %304 = memref.load %arg2[%c65] : memref<162xf32, #tpu.memory_space<smem>>
    %305 = vector.broadcast %304 : f32 to vector<30x32xf32>
    %306 = arith.mulf %305, %247 : vector<30x32xf32>
    %307 = arith.addf %283, %306 : vector<30x32xf32>
    %c92 = arith.constant 92 : index
    %308 = memref.load %arg2[%c92] : memref<162xf32, #tpu.memory_space<smem>>
    %309 = vector.broadcast %308 : f32 to vector<30x32xf32>
    %310 = arith.mulf %309, %247 : vector<30x32xf32>
    %311 = arith.addf %287, %310 : vector<30x32xf32>
    %c119 = arith.constant 119 : index
    %312 = memref.load %arg2[%c119] : memref<162xf32, #tpu.memory_space<smem>>
    %313 = vector.broadcast %312 : f32 to vector<30x32xf32>
    %314 = arith.mulf %313, %247 : vector<30x32xf32>
    %315 = arith.addf %291, %314 : vector<30x32xf32>
    %c146 = arith.constant 146 : index
    %316 = memref.load %arg2[%c146] : memref<162xf32, #tpu.memory_space<smem>>
    %317 = vector.broadcast %316 : f32 to vector<30x32xf32>
    %318 = arith.mulf %317, %247 : vector<30x32xf32>
    %319 = arith.addf %295, %318 : vector<30x32xf32>
    %320 = vector.extract_strided_slice %240 {offsets = [1, 0], sizes = [30, 32], strides = [1, 1]} : vector<32x32xf32> to vector<30x32xf32>
    %321 = vector.extract_strided_slice %242 {offsets = [1, 0], sizes = [30, 32], strides = [1, 1]} : vector<32x32xf32> to vector<30x32xf32>
    %322 = vector.extract_strided_slice %244 {offsets = [1, 0], sizes = [30, 32], strides = [1, 1]} : vector<32x32xf32> to vector<30x32xf32>
    %c12 = arith.constant 12 : index
    %323 = memref.load %arg2[%c12] : memref<162xf32, #tpu.memory_space<smem>>
    %324 = vector.broadcast %323 : f32 to vector<30x32xf32>
    %325 = arith.mulf %324, %320 : vector<30x32xf32>
    %326 = arith.addf %299, %325 : vector<30x32xf32>
    %c39 = arith.constant 39 : index
    %327 = memref.load %arg2[%c39] : memref<162xf32, #tpu.memory_space<smem>>
    %328 = vector.broadcast %327 : f32 to vector<30x32xf32>
    %329 = arith.mulf %328, %320 : vector<30x32xf32>
    %330 = arith.addf %303, %329 : vector<30x32xf32>
    %c66 = arith.constant 66 : index
    %331 = memref.load %arg2[%c66] : memref<162xf32, #tpu.memory_space<smem>>
    %332 = vector.broadcast %331 : f32 to vector<30x32xf32>
    %333 = arith.mulf %332, %320 : vector<30x32xf32>
    %334 = arith.addf %307, %333 : vector<30x32xf32>
    %c93 = arith.constant 93 : index
    %335 = memref.load %arg2[%c93] : memref<162xf32, #tpu.memory_space<smem>>
    %336 = vector.broadcast %335 : f32 to vector<30x32xf32>
    %337 = arith.mulf %336, %320 : vector<30x32xf32>
    %338 = arith.addf %311, %337 : vector<30x32xf32>
    %c120 = arith.constant 120 : index
    %339 = memref.load %arg2[%c120] : memref<162xf32, #tpu.memory_space<smem>>
    %340 = vector.broadcast %339 : f32 to vector<30x32xf32>
    %341 = arith.mulf %340, %320 : vector<30x32xf32>
    %342 = arith.addf %315, %341 : vector<30x32xf32>
    %c147 = arith.constant 147 : index
    %343 = memref.load %arg2[%c147] : memref<162xf32, #tpu.memory_space<smem>>
    %344 = vector.broadcast %343 : f32 to vector<30x32xf32>
    %345 = arith.mulf %344, %320 : vector<30x32xf32>
    %346 = arith.addf %319, %345 : vector<30x32xf32>
    %c13 = arith.constant 13 : index
    %347 = memref.load %arg2[%c13] : memref<162xf32, #tpu.memory_space<smem>>
    %348 = vector.broadcast %347 : f32 to vector<30x32xf32>
    %349 = arith.mulf %348, %321 : vector<30x32xf32>
    %350 = arith.addf %326, %349 : vector<30x32xf32>
    %c40 = arith.constant 40 : index
    %351 = memref.load %arg2[%c40] : memref<162xf32, #tpu.memory_space<smem>>
    %352 = vector.broadcast %351 : f32 to vector<30x32xf32>
    %353 = arith.mulf %352, %321 : vector<30x32xf32>
    %354 = arith.addf %330, %353 : vector<30x32xf32>
    %c67 = arith.constant 67 : index
    %355 = memref.load %arg2[%c67] : memref<162xf32, #tpu.memory_space<smem>>
    %356 = vector.broadcast %355 : f32 to vector<30x32xf32>
    %357 = arith.mulf %356, %321 : vector<30x32xf32>
    %358 = arith.addf %334, %357 : vector<30x32xf32>
    %c94 = arith.constant 94 : index
    %359 = memref.load %arg2[%c94] : memref<162xf32, #tpu.memory_space<smem>>
    %360 = vector.broadcast %359 : f32 to vector<30x32xf32>
    %361 = arith.mulf %360, %321 : vector<30x32xf32>
    %362 = arith.addf %338, %361 : vector<30x32xf32>
    %c121 = arith.constant 121 : index
    %363 = memref.load %arg2[%c121] : memref<162xf32, #tpu.memory_space<smem>>
    %364 = vector.broadcast %363 : f32 to vector<30x32xf32>
    %365 = arith.mulf %364, %321 : vector<30x32xf32>
    %366 = arith.addf %342, %365 : vector<30x32xf32>
    %c148 = arith.constant 148 : index
    %367 = memref.load %arg2[%c148] : memref<162xf32, #tpu.memory_space<smem>>
    %368 = vector.broadcast %367 : f32 to vector<30x32xf32>
    %369 = arith.mulf %368, %321 : vector<30x32xf32>
    %370 = arith.addf %346, %369 : vector<30x32xf32>
    %c14 = arith.constant 14 : index
    %371 = memref.load %arg2[%c14] : memref<162xf32, #tpu.memory_space<smem>>
    %372 = vector.broadcast %371 : f32 to vector<30x32xf32>
    %373 = arith.mulf %372, %322 : vector<30x32xf32>
    %374 = arith.addf %350, %373 : vector<30x32xf32>
    %c41 = arith.constant 41 : index
    %375 = memref.load %arg2[%c41] : memref<162xf32, #tpu.memory_space<smem>>
    %376 = vector.broadcast %375 : f32 to vector<30x32xf32>
    %377 = arith.mulf %376, %322 : vector<30x32xf32>
    %378 = arith.addf %354, %377 : vector<30x32xf32>
    %c68 = arith.constant 68 : index
    %379 = memref.load %arg2[%c68] : memref<162xf32, #tpu.memory_space<smem>>
    %380 = vector.broadcast %379 : f32 to vector<30x32xf32>
    %381 = arith.mulf %380, %322 : vector<30x32xf32>
    %382 = arith.addf %358, %381 : vector<30x32xf32>
    %c95 = arith.constant 95 : index
    %383 = memref.load %arg2[%c95] : memref<162xf32, #tpu.memory_space<smem>>
    %384 = vector.broadcast %383 : f32 to vector<30x32xf32>
    %385 = arith.mulf %384, %322 : vector<30x32xf32>
    %386 = arith.addf %362, %385 : vector<30x32xf32>
    %c122 = arith.constant 122 : index
    %387 = memref.load %arg2[%c122] : memref<162xf32, #tpu.memory_space<smem>>
    %388 = vector.broadcast %387 : f32 to vector<30x32xf32>
    %389 = arith.mulf %388, %322 : vector<30x32xf32>
    %390 = arith.addf %366, %389 : vector<30x32xf32>
    %c149 = arith.constant 149 : index
    %391 = memref.load %arg2[%c149] : memref<162xf32, #tpu.memory_space<smem>>
    %392 = vector.broadcast %391 : f32 to vector<30x32xf32>
    %393 = arith.mulf %392, %322 : vector<30x32xf32>
    %394 = arith.addf %370, %393 : vector<30x32xf32>
    %395 = vector.extract_strided_slice %240 {offsets = [2, 0], sizes = [30, 32], strides = [1, 1]} : vector<32x32xf32> to vector<30x32xf32>
    %396 = vector.extract_strided_slice %242 {offsets = [2, 0], sizes = [30, 32], strides = [1, 1]} : vector<32x32xf32> to vector<30x32xf32>
    %397 = vector.extract_strided_slice %244 {offsets = [2, 0], sizes = [30, 32], strides = [1, 1]} : vector<32x32xf32> to vector<30x32xf32>
    %c15 = arith.constant 15 : index
    %398 = memref.load %arg2[%c15] : memref<162xf32, #tpu.memory_space<smem>>
    %399 = vector.broadcast %398 : f32 to vector<30x32xf32>
    %400 = arith.mulf %399, %395 : vector<30x32xf32>
    %401 = arith.addf %374, %400 : vector<30x32xf32>
    %c42 = arith.constant 42 : index
    %402 = memref.load %arg2[%c42] : memref<162xf32, #tpu.memory_space<smem>>
    %403 = vector.broadcast %402 : f32 to vector<30x32xf32>
    %404 = arith.mulf %403, %395 : vector<30x32xf32>
    %405 = arith.addf %378, %404 : vector<30x32xf32>
    %c69 = arith.constant 69 : index
    %406 = memref.load %arg2[%c69] : memref<162xf32, #tpu.memory_space<smem>>
    %407 = vector.broadcast %406 : f32 to vector<30x32xf32>
    %408 = arith.mulf %407, %395 : vector<30x32xf32>
    %409 = arith.addf %382, %408 : vector<30x32xf32>
    %c96 = arith.constant 96 : index
    %410 = memref.load %arg2[%c96] : memref<162xf32, #tpu.memory_space<smem>>
    %411 = vector.broadcast %410 : f32 to vector<30x32xf32>
    %412 = arith.mulf %411, %395 : vector<30x32xf32>
    %413 = arith.addf %386, %412 : vector<30x32xf32>
    %c123 = arith.constant 123 : index
    %414 = memref.load %arg2[%c123] : memref<162xf32, #tpu.memory_space<smem>>
    %415 = vector.broadcast %414 : f32 to vector<30x32xf32>
    %416 = arith.mulf %415, %395 : vector<30x32xf32>
    %417 = arith.addf %390, %416 : vector<30x32xf32>
    %c150 = arith.constant 150 : index
    %418 = memref.load %arg2[%c150] : memref<162xf32, #tpu.memory_space<smem>>
    %419 = vector.broadcast %418 : f32 to vector<30x32xf32>
    %420 = arith.mulf %419, %395 : vector<30x32xf32>
    %421 = arith.addf %394, %420 : vector<30x32xf32>
    %c16 = arith.constant 16 : index
    %422 = memref.load %arg2[%c16] : memref<162xf32, #tpu.memory_space<smem>>
    %423 = vector.broadcast %422 : f32 to vector<30x32xf32>
    %424 = arith.mulf %423, %396 : vector<30x32xf32>
    %425 = arith.addf %401, %424 : vector<30x32xf32>
    %c43 = arith.constant 43 : index
    %426 = memref.load %arg2[%c43] : memref<162xf32, #tpu.memory_space<smem>>
    %427 = vector.broadcast %426 : f32 to vector<30x32xf32>
    %428 = arith.mulf %427, %396 : vector<30x32xf32>
    %429 = arith.addf %405, %428 : vector<30x32xf32>
    %c70 = arith.constant 70 : index
    %430 = memref.load %arg2[%c70] : memref<162xf32, #tpu.memory_space<smem>>
    %431 = vector.broadcast %430 : f32 to vector<30x32xf32>
    %432 = arith.mulf %431, %396 : vector<30x32xf32>
    %433 = arith.addf %409, %432 : vector<30x32xf32>
    %c97 = arith.constant 97 : index
    %434 = memref.load %arg2[%c97] : memref<162xf32, #tpu.memory_space<smem>>
    %435 = vector.broadcast %434 : f32 to vector<30x32xf32>
    %436 = arith.mulf %435, %396 : vector<30x32xf32>
    %437 = arith.addf %413, %436 : vector<30x32xf32>
    %c124 = arith.constant 124 : index
    %438 = memref.load %arg2[%c124] : memref<162xf32, #tpu.memory_space<smem>>
    %439 = vector.broadcast %438 : f32 to vector<30x32xf32>
    %440 = arith.mulf %439, %396 : vector<30x32xf32>
    %441 = arith.addf %417, %440 : vector<30x32xf32>
    %c151 = arith.constant 151 : index
    %442 = memref.load %arg2[%c151] : memref<162xf32, #tpu.memory_space<smem>>
    %443 = vector.broadcast %442 : f32 to vector<30x32xf32>
    %444 = arith.mulf %443, %396 : vector<30x32xf32>
    %445 = arith.addf %421, %444 : vector<30x32xf32>
    %c17 = arith.constant 17 : index
    %446 = memref.load %arg2[%c17] : memref<162xf32, #tpu.memory_space<smem>>
    %447 = vector.broadcast %446 : f32 to vector<30x32xf32>
    %448 = arith.mulf %447, %397 : vector<30x32xf32>
    %449 = arith.addf %425, %448 : vector<30x32xf32>
    %c44 = arith.constant 44 : index
    %450 = memref.load %arg2[%c44] : memref<162xf32, #tpu.memory_space<smem>>
    %451 = vector.broadcast %450 : f32 to vector<30x32xf32>
    %452 = arith.mulf %451, %397 : vector<30x32xf32>
    %453 = arith.addf %429, %452 : vector<30x32xf32>
    %c71 = arith.constant 71 : index
    %454 = memref.load %arg2[%c71] : memref<162xf32, #tpu.memory_space<smem>>
    %455 = vector.broadcast %454 : f32 to vector<30x32xf32>
    %456 = arith.mulf %455, %397 : vector<30x32xf32>
    %457 = arith.addf %433, %456 : vector<30x32xf32>
    %c98 = arith.constant 98 : index
    %458 = memref.load %arg2[%c98] : memref<162xf32, #tpu.memory_space<smem>>
    %459 = vector.broadcast %458 : f32 to vector<30x32xf32>
    %460 = arith.mulf %459, %397 : vector<30x32xf32>
    %461 = arith.addf %437, %460 : vector<30x32xf32>
    %c125 = arith.constant 125 : index
    %462 = memref.load %arg2[%c125] : memref<162xf32, #tpu.memory_space<smem>>
    %463 = vector.broadcast %462 : f32 to vector<30x32xf32>
    %464 = arith.mulf %463, %397 : vector<30x32xf32>
    %465 = arith.addf %441, %464 : vector<30x32xf32>
    %c152 = arith.constant 152 : index
    %466 = memref.load %arg2[%c152] : memref<162xf32, #tpu.memory_space<smem>>
    %467 = vector.broadcast %466 : f32 to vector<30x32xf32>
    %468 = arith.mulf %467, %397 : vector<30x32xf32>
    %469 = arith.addf %445, %468 : vector<30x32xf32>
    %c0_31 = arith.constant 0 : index
    %c6_32 = arith.constant 6 : index
    %c0_33 = arith.constant 0 : index
    %c0_34 = arith.constant 0 : index
    %470 = vector.load %arg1[%c0_31, %c6_32, %c0_33, %c0_34] : memref<1x9x32x32xf32, #tpu.memory_space<vmem>>, vector<1x1x32x32xf32>
    %471 = vector.shape_cast %470 : vector<1x1x32x32xf32> to vector<32x32xf32>
    %c0_35 = arith.constant 0 : index
    %c7_36 = arith.constant 7 : index
    %c0_37 = arith.constant 0 : index
    %c0_38 = arith.constant 0 : index
    %472 = vector.load %arg1[%c0_35, %c7_36, %c0_37, %c0_38] : memref<1x9x32x32xf32, #tpu.memory_space<vmem>>, vector<1x1x32x32xf32>
    %473 = vector.shape_cast %472 : vector<1x1x32x32xf32> to vector<32x32xf32>
    %c0_39 = arith.constant 0 : index
    %c8_40 = arith.constant 8 : index
    %c0_41 = arith.constant 0 : index
    %c0_42 = arith.constant 0 : index
    %474 = vector.load %arg1[%c0_39, %c8_40, %c0_41, %c0_42] : memref<1x9x32x32xf32, #tpu.memory_space<vmem>>, vector<1x1x32x32xf32>
    %475 = vector.shape_cast %474 : vector<1x1x32x32xf32> to vector<32x32xf32>
    %476 = vector.extract_strided_slice %471 {offsets = [0, 0], sizes = [30, 32], strides = [1, 1]} : vector<32x32xf32> to vector<30x32xf32>
    %477 = vector.extract_strided_slice %473 {offsets = [0, 0], sizes = [30, 32], strides = [1, 1]} : vector<32x32xf32> to vector<30x32xf32>
    %478 = vector.extract_strided_slice %475 {offsets = [0, 0], sizes = [30, 32], strides = [1, 1]} : vector<32x32xf32> to vector<30x32xf32>
    %c18 = arith.constant 18 : index
    %479 = memref.load %arg2[%c18] : memref<162xf32, #tpu.memory_space<smem>>
    %480 = vector.broadcast %479 : f32 to vector<30x32xf32>
    %481 = arith.mulf %480, %476 : vector<30x32xf32>
    %482 = arith.addf %449, %481 : vector<30x32xf32>
    %c45 = arith.constant 45 : index
    %483 = memref.load %arg2[%c45] : memref<162xf32, #tpu.memory_space<smem>>
    %484 = vector.broadcast %483 : f32 to vector<30x32xf32>
    %485 = arith.mulf %484, %476 : vector<30x32xf32>
    %486 = arith.addf %453, %485 : vector<30x32xf32>
    %c72 = arith.constant 72 : index
    %487 = memref.load %arg2[%c72] : memref<162xf32, #tpu.memory_space<smem>>
    %488 = vector.broadcast %487 : f32 to vector<30x32xf32>
    %489 = arith.mulf %488, %476 : vector<30x32xf32>
    %490 = arith.addf %457, %489 : vector<30x32xf32>
    %c99 = arith.constant 99 : index
    %491 = memref.load %arg2[%c99] : memref<162xf32, #tpu.memory_space<smem>>
    %492 = vector.broadcast %491 : f32 to vector<30x32xf32>
    %493 = arith.mulf %492, %476 : vector<30x32xf32>
    %494 = arith.addf %461, %493 : vector<30x32xf32>
    %c126 = arith.constant 126 : index
    %495 = memref.load %arg2[%c126] : memref<162xf32, #tpu.memory_space<smem>>
    %496 = vector.broadcast %495 : f32 to vector<30x32xf32>
    %497 = arith.mulf %496, %476 : vector<30x32xf32>
    %498 = arith.addf %465, %497 : vector<30x32xf32>
    %c153 = arith.constant 153 : index
    %499 = memref.load %arg2[%c153] : memref<162xf32, #tpu.memory_space<smem>>
    %500 = vector.broadcast %499 : f32 to vector<30x32xf32>
    %501 = arith.mulf %500, %476 : vector<30x32xf32>
    %502 = arith.addf %469, %501 : vector<30x32xf32>
    %c19 = arith.constant 19 : index
    %503 = memref.load %arg2[%c19] : memref<162xf32, #tpu.memory_space<smem>>
    %504 = vector.broadcast %503 : f32 to vector<30x32xf32>
    %505 = arith.mulf %504, %477 : vector<30x32xf32>
    %506 = arith.addf %482, %505 : vector<30x32xf32>
    %c46 = arith.constant 46 : index
    %507 = memref.load %arg2[%c46] : memref<162xf32, #tpu.memory_space<smem>>
    %508 = vector.broadcast %507 : f32 to vector<30x32xf32>
    %509 = arith.mulf %508, %477 : vector<30x32xf32>
    %510 = arith.addf %486, %509 : vector<30x32xf32>
    %c73 = arith.constant 73 : index
    %511 = memref.load %arg2[%c73] : memref<162xf32, #tpu.memory_space<smem>>
    %512 = vector.broadcast %511 : f32 to vector<30x32xf32>
    %513 = arith.mulf %512, %477 : vector<30x32xf32>
    %514 = arith.addf %490, %513 : vector<30x32xf32>
    %c100 = arith.constant 100 : index
    %515 = memref.load %arg2[%c100] : memref<162xf32, #tpu.memory_space<smem>>
    %516 = vector.broadcast %515 : f32 to vector<30x32xf32>
    %517 = arith.mulf %516, %477 : vector<30x32xf32>
    %518 = arith.addf %494, %517 : vector<30x32xf32>
    %c127 = arith.constant 127 : index
    %519 = memref.load %arg2[%c127] : memref<162xf32, #tpu.memory_space<smem>>
    %520 = vector.broadcast %519 : f32 to vector<30x32xf32>
    %521 = arith.mulf %520, %477 : vector<30x32xf32>
    %522 = arith.addf %498, %521 : vector<30x32xf32>
    %c154 = arith.constant 154 : index
    %523 = memref.load %arg2[%c154] : memref<162xf32, #tpu.memory_space<smem>>
    %524 = vector.broadcast %523 : f32 to vector<30x32xf32>
    %525 = arith.mulf %524, %477 : vector<30x32xf32>
    %526 = arith.addf %502, %525 : vector<30x32xf32>
    %c20 = arith.constant 20 : index
    %527 = memref.load %arg2[%c20] : memref<162xf32, #tpu.memory_space<smem>>
    %528 = vector.broadcast %527 : f32 to vector<30x32xf32>
    %529 = arith.mulf %528, %478 : vector<30x32xf32>
    %530 = arith.addf %506, %529 : vector<30x32xf32>
    %c47 = arith.constant 47 : index
    %531 = memref.load %arg2[%c47] : memref<162xf32, #tpu.memory_space<smem>>
    %532 = vector.broadcast %531 : f32 to vector<30x32xf32>
    %533 = arith.mulf %532, %478 : vector<30x32xf32>
    %534 = arith.addf %510, %533 : vector<30x32xf32>
    %c74 = arith.constant 74 : index
    %535 = memref.load %arg2[%c74] : memref<162xf32, #tpu.memory_space<smem>>
    %536 = vector.broadcast %535 : f32 to vector<30x32xf32>
    %537 = arith.mulf %536, %478 : vector<30x32xf32>
    %538 = arith.addf %514, %537 : vector<30x32xf32>
    %c101 = arith.constant 101 : index
    %539 = memref.load %arg2[%c101] : memref<162xf32, #tpu.memory_space<smem>>
    %540 = vector.broadcast %539 : f32 to vector<30x32xf32>
    %541 = arith.mulf %540, %478 : vector<30x32xf32>
    %542 = arith.addf %518, %541 : vector<30x32xf32>
    %c128 = arith.constant 128 : index
    %543 = memref.load %arg2[%c128] : memref<162xf32, #tpu.memory_space<smem>>
    %544 = vector.broadcast %543 : f32 to vector<30x32xf32>
    %545 = arith.mulf %544, %478 : vector<30x32xf32>
    %546 = arith.addf %522, %545 : vector<30x32xf32>
    %c155 = arith.constant 155 : index
    %547 = memref.load %arg2[%c155] : memref<162xf32, #tpu.memory_space<smem>>
    %548 = vector.broadcast %547 : f32 to vector<30x32xf32>
    %549 = arith.mulf %548, %478 : vector<30x32xf32>
    %550 = arith.addf %526, %549 : vector<30x32xf32>
    %551 = vector.extract_strided_slice %471 {offsets = [1, 0], sizes = [30, 32], strides = [1, 1]} : vector<32x32xf32> to vector<30x32xf32>
    %552 = vector.extract_strided_slice %473 {offsets = [1, 0], sizes = [30, 32], strides = [1, 1]} : vector<32x32xf32> to vector<30x32xf32>
    %553 = vector.extract_strided_slice %475 {offsets = [1, 0], sizes = [30, 32], strides = [1, 1]} : vector<32x32xf32> to vector<30x32xf32>
    %c21 = arith.constant 21 : index
    %554 = memref.load %arg2[%c21] : memref<162xf32, #tpu.memory_space<smem>>
    %555 = vector.broadcast %554 : f32 to vector<30x32xf32>
    %556 = arith.mulf %555, %551 : vector<30x32xf32>
    %557 = arith.addf %530, %556 : vector<30x32xf32>
    %c48 = arith.constant 48 : index
    %558 = memref.load %arg2[%c48] : memref<162xf32, #tpu.memory_space<smem>>
    %559 = vector.broadcast %558 : f32 to vector<30x32xf32>
    %560 = arith.mulf %559, %551 : vector<30x32xf32>
    %561 = arith.addf %534, %560 : vector<30x32xf32>
    %c75 = arith.constant 75 : index
    %562 = memref.load %arg2[%c75] : memref<162xf32, #tpu.memory_space<smem>>
    %563 = vector.broadcast %562 : f32 to vector<30x32xf32>
    %564 = arith.mulf %563, %551 : vector<30x32xf32>
    %565 = arith.addf %538, %564 : vector<30x32xf32>
    %c102 = arith.constant 102 : index
    %566 = memref.load %arg2[%c102] : memref<162xf32, #tpu.memory_space<smem>>
    %567 = vector.broadcast %566 : f32 to vector<30x32xf32>
    %568 = arith.mulf %567, %551 : vector<30x32xf32>
    %569 = arith.addf %542, %568 : vector<30x32xf32>
    %c129 = arith.constant 129 : index
    %570 = memref.load %arg2[%c129] : memref<162xf32, #tpu.memory_space<smem>>
    %571 = vector.broadcast %570 : f32 to vector<30x32xf32>
    %572 = arith.mulf %571, %551 : vector<30x32xf32>
    %573 = arith.addf %546, %572 : vector<30x32xf32>
    %c156 = arith.constant 156 : index
    %574 = memref.load %arg2[%c156] : memref<162xf32, #tpu.memory_space<smem>>
    %575 = vector.broadcast %574 : f32 to vector<30x32xf32>
    %576 = arith.mulf %575, %551 : vector<30x32xf32>
    %577 = arith.addf %550, %576 : vector<30x32xf32>
    %c22 = arith.constant 22 : index
    %578 = memref.load %arg2[%c22] : memref<162xf32, #tpu.memory_space<smem>>
    %579 = vector.broadcast %578 : f32 to vector<30x32xf32>
    %580 = arith.mulf %579, %552 : vector<30x32xf32>
    %581 = arith.addf %557, %580 : vector<30x32xf32>
    %c49 = arith.constant 49 : index
    %582 = memref.load %arg2[%c49] : memref<162xf32, #tpu.memory_space<smem>>
    %583 = vector.broadcast %582 : f32 to vector<30x32xf32>
    %584 = arith.mulf %583, %552 : vector<30x32xf32>
    %585 = arith.addf %561, %584 : vector<30x32xf32>
    %c76 = arith.constant 76 : index
    %586 = memref.load %arg2[%c76] : memref<162xf32, #tpu.memory_space<smem>>
    %587 = vector.broadcast %586 : f32 to vector<30x32xf32>
    %588 = arith.mulf %587, %552 : vector<30x32xf32>
    %589 = arith.addf %565, %588 : vector<30x32xf32>
    %c103 = arith.constant 103 : index
    %590 = memref.load %arg2[%c103] : memref<162xf32, #tpu.memory_space<smem>>
    %591 = vector.broadcast %590 : f32 to vector<30x32xf32>
    %592 = arith.mulf %591, %552 : vector<30x32xf32>
    %593 = arith.addf %569, %592 : vector<30x32xf32>
    %c130 = arith.constant 130 : index
    %594 = memref.load %arg2[%c130] : memref<162xf32, #tpu.memory_space<smem>>
    %595 = vector.broadcast %594 : f32 to vector<30x32xf32>
    %596 = arith.mulf %595, %552 : vector<30x32xf32>
    %597 = arith.addf %573, %596 : vector<30x32xf32>
    %c157 = arith.constant 157 : index
    %598 = memref.load %arg2[%c157] : memref<162xf32, #tpu.memory_space<smem>>
    %599 = vector.broadcast %598 : f32 to vector<30x32xf32>
    %600 = arith.mulf %599, %552 : vector<30x32xf32>
    %601 = arith.addf %577, %600 : vector<30x32xf32>
    %c23 = arith.constant 23 : index
    %602 = memref.load %arg2[%c23] : memref<162xf32, #tpu.memory_space<smem>>
    %603 = vector.broadcast %602 : f32 to vector<30x32xf32>
    %604 = arith.mulf %603, %553 : vector<30x32xf32>
    %605 = arith.addf %581, %604 : vector<30x32xf32>
    %c50 = arith.constant 50 : index
    %606 = memref.load %arg2[%c50] : memref<162xf32, #tpu.memory_space<smem>>
    %607 = vector.broadcast %606 : f32 to vector<30x32xf32>
    %608 = arith.mulf %607, %553 : vector<30x32xf32>
    %609 = arith.addf %585, %608 : vector<30x32xf32>
    %c77 = arith.constant 77 : index
    %610 = memref.load %arg2[%c77] : memref<162xf32, #tpu.memory_space<smem>>
    %611 = vector.broadcast %610 : f32 to vector<30x32xf32>
    %612 = arith.mulf %611, %553 : vector<30x32xf32>
    %613 = arith.addf %589, %612 : vector<30x32xf32>
    %c104 = arith.constant 104 : index
    %614 = memref.load %arg2[%c104] : memref<162xf32, #tpu.memory_space<smem>>
    %615 = vector.broadcast %614 : f32 to vector<30x32xf32>
    %616 = arith.mulf %615, %553 : vector<30x32xf32>
    %617 = arith.addf %593, %616 : vector<30x32xf32>
    %c131 = arith.constant 131 : index
    %618 = memref.load %arg2[%c131] : memref<162xf32, #tpu.memory_space<smem>>
    %619 = vector.broadcast %618 : f32 to vector<30x32xf32>
    %620 = arith.mulf %619, %553 : vector<30x32xf32>
    %621 = arith.addf %597, %620 : vector<30x32xf32>
    %c158 = arith.constant 158 : index
    %622 = memref.load %arg2[%c158] : memref<162xf32, #tpu.memory_space<smem>>
    %623 = vector.broadcast %622 : f32 to vector<30x32xf32>
    %624 = arith.mulf %623, %553 : vector<30x32xf32>
    %625 = arith.addf %601, %624 : vector<30x32xf32>
    %626 = vector.extract_strided_slice %471 {offsets = [2, 0], sizes = [30, 32], strides = [1, 1]} : vector<32x32xf32> to vector<30x32xf32>
    %627 = vector.extract_strided_slice %473 {offsets = [2, 0], sizes = [30, 32], strides = [1, 1]} : vector<32x32xf32> to vector<30x32xf32>
    %628 = vector.extract_strided_slice %475 {offsets = [2, 0], sizes = [30, 32], strides = [1, 1]} : vector<32x32xf32> to vector<30x32xf32>
    %c24 = arith.constant 24 : index
    %629 = memref.load %arg2[%c24] : memref<162xf32, #tpu.memory_space<smem>>
    %630 = vector.broadcast %629 : f32 to vector<30x32xf32>
    %631 = arith.mulf %630, %626 : vector<30x32xf32>
    %632 = arith.addf %605, %631 : vector<30x32xf32>
    %c51 = arith.constant 51 : index
    %633 = memref.load %arg2[%c51] : memref<162xf32, #tpu.memory_space<smem>>
    %634 = vector.broadcast %633 : f32 to vector<30x32xf32>
    %635 = arith.mulf %634, %626 : vector<30x32xf32>
    %636 = arith.addf %609, %635 : vector<30x32xf32>
    %c78 = arith.constant 78 : index
    %637 = memref.load %arg2[%c78] : memref<162xf32, #tpu.memory_space<smem>>
    %638 = vector.broadcast %637 : f32 to vector<30x32xf32>
    %639 = arith.mulf %638, %626 : vector<30x32xf32>
    %640 = arith.addf %613, %639 : vector<30x32xf32>
    %c105 = arith.constant 105 : index
    %641 = memref.load %arg2[%c105] : memref<162xf32, #tpu.memory_space<smem>>
    %642 = vector.broadcast %641 : f32 to vector<30x32xf32>
    %643 = arith.mulf %642, %626 : vector<30x32xf32>
    %644 = arith.addf %617, %643 : vector<30x32xf32>
    %c132 = arith.constant 132 : index
    %645 = memref.load %arg2[%c132] : memref<162xf32, #tpu.memory_space<smem>>
    %646 = vector.broadcast %645 : f32 to vector<30x32xf32>
    %647 = arith.mulf %646, %626 : vector<30x32xf32>
    %648 = arith.addf %621, %647 : vector<30x32xf32>
    %c159 = arith.constant 159 : index
    %649 = memref.load %arg2[%c159] : memref<162xf32, #tpu.memory_space<smem>>
    %650 = vector.broadcast %649 : f32 to vector<30x32xf32>
    %651 = arith.mulf %650, %626 : vector<30x32xf32>
    %652 = arith.addf %625, %651 : vector<30x32xf32>
    %c25 = arith.constant 25 : index
    %653 = memref.load %arg2[%c25] : memref<162xf32, #tpu.memory_space<smem>>
    %654 = vector.broadcast %653 : f32 to vector<30x32xf32>
    %655 = arith.mulf %654, %627 : vector<30x32xf32>
    %656 = arith.addf %632, %655 : vector<30x32xf32>
    %c52 = arith.constant 52 : index
    %657 = memref.load %arg2[%c52] : memref<162xf32, #tpu.memory_space<smem>>
    %658 = vector.broadcast %657 : f32 to vector<30x32xf32>
    %659 = arith.mulf %658, %627 : vector<30x32xf32>
    %660 = arith.addf %636, %659 : vector<30x32xf32>
    %c79 = arith.constant 79 : index
    %661 = memref.load %arg2[%c79] : memref<162xf32, #tpu.memory_space<smem>>
    %662 = vector.broadcast %661 : f32 to vector<30x32xf32>
    %663 = arith.mulf %662, %627 : vector<30x32xf32>
    %664 = arith.addf %640, %663 : vector<30x32xf32>
    %c106 = arith.constant 106 : index
    %665 = memref.load %arg2[%c106] : memref<162xf32, #tpu.memory_space<smem>>
    %666 = vector.broadcast %665 : f32 to vector<30x32xf32>
    %667 = arith.mulf %666, %627 : vector<30x32xf32>
    %668 = arith.addf %644, %667 : vector<30x32xf32>
    %c133 = arith.constant 133 : index
    %669 = memref.load %arg2[%c133] : memref<162xf32, #tpu.memory_space<smem>>
    %670 = vector.broadcast %669 : f32 to vector<30x32xf32>
    %671 = arith.mulf %670, %627 : vector<30x32xf32>
    %672 = arith.addf %648, %671 : vector<30x32xf32>
    %c160 = arith.constant 160 : index
    %673 = memref.load %arg2[%c160] : memref<162xf32, #tpu.memory_space<smem>>
    %674 = vector.broadcast %673 : f32 to vector<30x32xf32>
    %675 = arith.mulf %674, %627 : vector<30x32xf32>
    %676 = arith.addf %652, %675 : vector<30x32xf32>
    %c26 = arith.constant 26 : index
    %677 = memref.load %arg2[%c26] : memref<162xf32, #tpu.memory_space<smem>>
    %678 = vector.broadcast %677 : f32 to vector<30x32xf32>
    %679 = arith.mulf %678, %628 : vector<30x32xf32>
    %680 = arith.addf %656, %679 : vector<30x32xf32>
    %c53 = arith.constant 53 : index
    %681 = memref.load %arg2[%c53] : memref<162xf32, #tpu.memory_space<smem>>
    %682 = vector.broadcast %681 : f32 to vector<30x32xf32>
    %683 = arith.mulf %682, %628 : vector<30x32xf32>
    %684 = arith.addf %660, %683 : vector<30x32xf32>
    %c80 = arith.constant 80 : index
    %685 = memref.load %arg2[%c80] : memref<162xf32, #tpu.memory_space<smem>>
    %686 = vector.broadcast %685 : f32 to vector<30x32xf32>
    %687 = arith.mulf %686, %628 : vector<30x32xf32>
    %688 = arith.addf %664, %687 : vector<30x32xf32>
    %c107 = arith.constant 107 : index
    %689 = memref.load %arg2[%c107] : memref<162xf32, #tpu.memory_space<smem>>
    %690 = vector.broadcast %689 : f32 to vector<30x32xf32>
    %691 = arith.mulf %690, %628 : vector<30x32xf32>
    %692 = arith.addf %668, %691 : vector<30x32xf32>
    %c134 = arith.constant 134 : index
    %693 = memref.load %arg2[%c134] : memref<162xf32, #tpu.memory_space<smem>>
    %694 = vector.broadcast %693 : f32 to vector<30x32xf32>
    %695 = arith.mulf %694, %628 : vector<30x32xf32>
    %696 = arith.addf %672, %695 : vector<30x32xf32>
    %c161 = arith.constant 161 : index
    %697 = memref.load %arg2[%c161] : memref<162xf32, #tpu.memory_space<smem>>
    %698 = vector.broadcast %697 : f32 to vector<30x32xf32>
    %699 = arith.mulf %698, %628 : vector<30x32xf32>
    %700 = arith.addf %676, %699 : vector<30x32xf32>
    %701 = vector.extract_strided_slice %680 {offsets = [0, 0], sizes = [30, 16], strides = [1, 1]} : vector<30x32xf32> to vector<30x16xf32>
    %702 = vector.extract_strided_slice %680 {offsets = [0, 16], sizes = [30, 16], strides = [1, 1]} : vector<30x32xf32> to vector<30x16xf32>
    %703 = arith.maximumf %701, %702 : vector<30x16xf32>
    %704 = vector.extract_strided_slice %703 {offsets = [0, 0], sizes = [29, 16], strides = [1, 1]} : vector<30x16xf32> to vector<29x16xf32>
    %705 = vector.extract_strided_slice %703 {offsets = [1, 0], sizes = [29, 16], strides = [1, 1]} : vector<30x16xf32> to vector<29x16xf32>
    %706 = arith.maximumf %704, %705 : vector<29x16xf32>
    %c0_43 = arith.constant 0 : index
    %707 = memref.load %arg3[%c0_43] : memref<6xf32, #tpu.memory_space<smem>>
    %708 = vector.broadcast %707 : f32 to vector<29x16xf32>
    %709 = arith.addf %706, %708 : vector<29x16xf32>
    %710 = vector.extract_strided_slice %709 {offsets = [0, 0], sizes = [1, 16], strides = [1, 1]} : vector<29x16xf32> to vector<1x16xf32>
    %c0_44 = arith.constant 0 : index
    %c0_45 = arith.constant 0 : index
    %711 = vector.load %arg9[%c0_44, %c0_45] : memref<1x1536xf32, #tpu.memory_space<vmem>>, vector<1x16xf32>
    tpu.vector_store %arg9[%c0_44, %c0_45], %710 {strides = array<i32>} : memref<1x1536xf32, #tpu.memory_space<vmem>>, vector<1x16xf32>,
    %712 = vector.extract_strided_slice %709 {offsets = [2, 0], sizes = [1, 16], strides = [1, 1]} : vector<29x16xf32> to vector<1x16xf32>
    %c0_46 = arith.constant 0 : index
    %c16_47 = arith.constant 16 : index
    %713 = vector.load %arg9[%c0_46, %c16_47] : memref<1x1536xf32, #tpu.memory_space<vmem>>, vector<1x16xf32>
    tpu.vector_store %arg9[%c0_46, %c16_47], %712 {strides = array<i32>} : memref<1x1536xf32, #tpu.memory_space<vmem>>, vector<1x16xf32>,
    %714 = vector.extract_strided_slice %709 {offsets = [4, 0], sizes = [1, 16], strides = [1, 1]} : vector<29x16xf32> to vector<1x16xf32>
    %c0_48 = arith.constant 0 : index
    %c32_49 = arith.constant 32 : index
    %715 = vector.load %arg9[%c0_48, %c32_49] : memref<1x1536xf32, #tpu.memory_space<vmem>>, vector<1x16xf32>
    tpu.vector_store %arg9[%c0_48, %c32_49], %714 {strides = array<i32>} : memref<1x1536xf32, #tpu.memory_space<vmem>>, vector<1x16xf32>,
    %716 = vector.extract_strided_slice %709 {offsets = [6, 0], sizes = [1, 16], strides = [1, 1]} : vector<29x16xf32> to vector<1x16xf32>
    %c0_50 = arith.constant 0 : index
    %c48_51 = arith.constant 48 : index
    %717 = vector.load %arg9[%c0_50, %c48_51] : memref<1x1536xf32, #tpu.memory_space<vmem>>, vector<1x16xf32>
    tpu.vector_store %arg9[%c0_50, %c48_51], %716 {strides = array<i32>} : memref<1x1536xf32, #tpu.memory_space<vmem>>, vector<1x16xf32>,
    %718 = vector.extract_strided_slice %709 {offsets = [8, 0], sizes = [1, 16], strides = [1, 1]} : vector<29x16xf32> to vector<1x16xf32>
    %c0_52 = arith.constant 0 : index
    %c64_53 = arith.constant 64 : index
    %719 = vector.load %arg9[%c0_52, %c64_53] : memref<1x1536xf32, #tpu.memory_space<vmem>>, vector<1x16xf32>
    tpu.vector_store %arg9[%c0_52, %c64_53], %718 {strides = array<i32>} : memref<1x1536xf32, #tpu.memory_space<vmem>>, vector<1x16xf32>,
    %720 = vector.extract_strided_slice %709 {offsets = [10, 0], sizes = [1, 16], strides = [1, 1]} : vector<29x16xf32> to vector<1x16xf32>
    %c0_54 = arith.constant 0 : index
    %c80_55 = arith.constant 80 : index
    %721 = vector.load %arg9[%c0_54, %c80_55] : memref<1x1536xf32, #tpu.memory_space<vmem>>, vector<1x16xf32>
    tpu.vector_store %arg9[%c0_54, %c80_55], %720 {strides = array<i32>} : memref<1x1536xf32, #tpu.memory_space<vmem>>, vector<1x16xf32>,
    %722 = vector.extract_strided_slice %709 {offsets = [12, 0], sizes = [1, 16], strides = [1, 1]} : vector<29x16xf32> to vector<1x16xf32>
    %c0_56 = arith.constant 0 : index
    %c96_57 = arith.constant 96 : index
    %723 = vector.load %arg9[%c0_56, %c96_57] : memref<1x1536xf32, #tpu.memory_space<vmem>>, vector<1x16xf32>
    tpu.vector_store %arg9[%c0_56, %c96_57], %722 {strides = array<i32>} : memref<1x1536xf32, #tpu.memory_space<vmem>>, vector<1x16xf32>,
    %724 = vector.extract_strided_slice %709 {offsets = [14, 0], sizes = [1, 16], strides = [1, 1]} : vector<29x16xf32> to vector<1x16xf32>
    %c0_58 = arith.constant 0 : index
    %c112_59 = arith.constant 112 : index
    %725 = vector.load %arg9[%c0_58, %c112_59] : memref<1x1536xf32, #tpu.memory_space<vmem>>, vector<1x16xf32>
    tpu.vector_store %arg9[%c0_58, %c112_59], %724 {strides = array<i32>} : memref<1x1536xf32, #tpu.memory_space<vmem>>, vector<1x16xf32>,
    %726 = vector.extract_strided_slice %709 {offsets = [16, 0], sizes = [1, 16], strides = [1, 1]} : vector<29x16xf32> to vector<1x16xf32>
    %c0_60 = arith.constant 0 : index
    %c128_61 = arith.constant 128 : index
    %727 = vector.load %arg9[%c0_60, %c128_61] : memref<1x1536xf32, #tpu.memory_space<vmem>>, vector<1x16xf32>
    tpu.vector_store %arg9[%c0_60, %c128_61], %726 {strides = array<i32>} : memref<1x1536xf32, #tpu.memory_space<vmem>>, vector<1x16xf32>,
    %728 = vector.extract_strided_slice %709 {offsets = [18, 0], sizes = [1, 16], strides = [1, 1]} : vector<29x16xf32> to vector<1x16xf32>
    %c0_62 = arith.constant 0 : index
    %c144_63 = arith.constant 144 : index
    %729 = vector.load %arg9[%c0_62, %c144_63] : memref<1x1536xf32, #tpu.memory_space<vmem>>, vector<1x16xf32>
    tpu.vector_store %arg9[%c0_62, %c144_63], %728 {strides = array<i32>} : memref<1x1536xf32, #tpu.memory_space<vmem>>, vector<1x16xf32>,
    %730 = vector.extract_strided_slice %709 {offsets = [20, 0], sizes = [1, 16], strides = [1, 1]} : vector<29x16xf32> to vector<1x16xf32>
    %c0_64 = arith.constant 0 : index
    %c160_65 = arith.constant 160 : index
    %731 = vector.load %arg9[%c0_64, %c160_65] : memref<1x1536xf32, #tpu.memory_space<vmem>>, vector<1x16xf32>
    tpu.vector_store %arg9[%c0_64, %c160_65], %730 {strides = array<i32>} : memref<1x1536xf32, #tpu.memory_space<vmem>>, vector<1x16xf32>,
    %732 = vector.extract_strided_slice %709 {offsets = [22, 0], sizes = [1, 16], strides = [1, 1]} : vector<29x16xf32> to vector<1x16xf32>
    %c0_66 = arith.constant 0 : index
    %c176 = arith.constant 176 : index
    %733 = vector.load %arg9[%c0_66, %c176] : memref<1x1536xf32, #tpu.memory_space<vmem>>, vector<1x16xf32>
    tpu.vector_store %arg9[%c0_66, %c176], %732 {strides = array<i32>} : memref<1x1536xf32, #tpu.memory_space<vmem>>, vector<1x16xf32>,
    %734 = vector.extract_strided_slice %709 {offsets = [24, 0], sizes = [1, 16], strides = [1, 1]} : vector<29x16xf32> to vector<1x16xf32>
    %c0_67 = arith.constant 0 : index
    %c192 = arith.constant 192 : index
    %735 = vector.load %arg9[%c0_67, %c192] : memref<1x1536xf32, #tpu.memory_space<vmem>>, vector<1x16xf32>
    tpu.vector_store %arg9[%c0_67, %c192], %734 {strides = array<i32>} : memref<1x1536xf32, #tpu.memory_space<vmem>>, vector<1x16xf32>,
    %736 = vector.extract_strided_slice %709 {offsets = [26, 0], sizes = [1, 16], strides = [1, 1]} : vector<29x16xf32> to vector<1x16xf32>
    %c0_68 = arith.constant 0 : index
    %c208 = arith.constant 208 : index
    %737 = vector.load %arg9[%c0_68, %c208] : memref<1x1536xf32, #tpu.memory_space<vmem>>, vector<1x16xf32>
    tpu.vector_store %arg9[%c0_68, %c208], %736 {strides = array<i32>} : memref<1x1536xf32, #tpu.memory_space<vmem>>, vector<1x16xf32>,
    %738 = vector.extract_strided_slice %709 {offsets = [28, 0], sizes = [1, 16], strides = [1, 1]} : vector<29x16xf32> to vector<1x16xf32>
    %c0_69 = arith.constant 0 : index
    %c224 = arith.constant 224 : index
    %739 = vector.load %arg9[%c0_69, %c224] : memref<1x1536xf32, #tpu.memory_space<vmem>>, vector<1x16xf32>
    tpu.vector_store %arg9[%c0_69, %c224], %738 {strides = array<i32>} : memref<1x1536xf32, #tpu.memory_space<vmem>>, vector<1x16xf32>,
    %740 = vector.extract_strided_slice %684 {offsets = [0, 0], sizes = [30, 16], strides = [1, 1]} : vector<30x32xf32> to vector<30x16xf32>
    %741 = vector.extract_strided_slice %684 {offsets = [0, 16], sizes = [30, 16], strides = [1, 1]} : vector<30x32xf32> to vector<30x16xf32>
    %742 = arith.maximumf %740, %741 : vector<30x16xf32>
    %743 = vector.extract_strided_slice %742 {offsets = [0, 0], sizes = [29, 16], strides = [1, 1]} : vector<30x16xf32> to vector<29x16xf32>
    %744 = vector.extract_strided_slice %742 {offsets = [1, 0], sizes = [29, 16], strides = [1, 1]} : vector<30x16xf32> to vector<29x16xf32>
    %745 = arith.maximumf %743, %744 : vector<29x16xf32>
    %c1_70 = arith.constant 1 : index
    %746 = memref.load %arg3[%c1_70] : memref<6xf32, #tpu.memory_space<smem>>
    %747 = vector.broadcast %746 : f32 to vector<29x16xf32>
    %748 = arith.addf %745, %747 : vector<29x16xf32>
    %749 = vector.extract_strided_slice %748 {offsets = [0, 0], sizes = [1, 16], strides = [1, 1]} : vector<29x16xf32> to vector<1x16xf32>
    %c0_71 = arith.constant 0 : index
    %c240 = arith.constant 240 : index
    %750 = vector.load %arg9[%c0_71, %c240] : memref<1x1536xf32, #tpu.memory_space<vmem>>, vector<1x16xf32>
    tpu.vector_store %arg9[%c0_71, %c240], %749 {strides = array<i32>} : memref<1x1536xf32, #tpu.memory_space<vmem>>, vector<1x16xf32>,
    %751 = vector.extract_strided_slice %748 {offsets = [2, 0], sizes = [1, 16], strides = [1, 1]} : vector<29x16xf32> to vector<1x16xf32>
    %c0_72 = arith.constant 0 : index
    %c256 = arith.constant 256 : index
    %752 = vector.load %arg9[%c0_72, %c256] : memref<1x1536xf32, #tpu.memory_space<vmem>>, vector<1x16xf32>
    tpu.vector_store %arg9[%c0_72, %c256], %751 {strides = array<i32>} : memref<1x1536xf32, #tpu.memory_space<vmem>>, vector<1x16xf32>,
    %753 = vector.extract_strided_slice %748 {offsets = [4, 0], sizes = [1, 16], strides = [1, 1]} : vector<29x16xf32> to vector<1x16xf32>
    %c0_73 = arith.constant 0 : index
    %c272 = arith.constant 272 : index
    %754 = vector.load %arg9[%c0_73, %c272] : memref<1x1536xf32, #tpu.memory_space<vmem>>, vector<1x16xf32>
    tpu.vector_store %arg9[%c0_73, %c272], %753 {strides = array<i32>} : memref<1x1536xf32, #tpu.memory_space<vmem>>, vector<1x16xf32>,
    %755 = vector.extract_strided_slice %748 {offsets = [6, 0], sizes = [1, 16], strides = [1, 1]} : vector<29x16xf32> to vector<1x16xf32>
    %c0_74 = arith.constant 0 : index
    %c288 = arith.constant 288 : index
    %756 = vector.load %arg9[%c0_74, %c288] : memref<1x1536xf32, #tpu.memory_space<vmem>>, vector<1x16xf32>
    tpu.vector_store %arg9[%c0_74, %c288], %755 {strides = array<i32>} : memref<1x1536xf32, #tpu.memory_space<vmem>>, vector<1x16xf32>,
    %757 = vector.extract_strided_slice %748 {offsets = [8, 0], sizes = [1, 16], strides = [1, 1]} : vector<29x16xf32> to vector<1x16xf32>
    %c0_75 = arith.constant 0 : index
    %c304 = arith.constant 304 : index
    %758 = vector.load %arg9[%c0_75, %c304] : memref<1x1536xf32, #tpu.memory_space<vmem>>, vector<1x16xf32>
    tpu.vector_store %arg9[%c0_75, %c304], %757 {strides = array<i32>} : memref<1x1536xf32, #tpu.memory_space<vmem>>, vector<1x16xf32>,
    %759 = vector.extract_strided_slice %748 {offsets = [10, 0], sizes = [1, 16], strides = [1, 1]} : vector<29x16xf32> to vector<1x16xf32>
    %c0_76 = arith.constant 0 : index
    %c320 = arith.constant 320 : index
    %760 = vector.load %arg9[%c0_76, %c320] : memref<1x1536xf32, #tpu.memory_space<vmem>>, vector<1x16xf32>
    tpu.vector_store %arg9[%c0_76, %c320], %759 {strides = array<i32>} : memref<1x1536xf32, #tpu.memory_space<vmem>>, vector<1x16xf32>,
    %761 = vector.extract_strided_slice %748 {offsets = [12, 0], sizes = [1, 16], strides = [1, 1]} : vector<29x16xf32> to vector<1x16xf32>
    %c0_77 = arith.constant 0 : index
    %c336 = arith.constant 336 : index
    %762 = vector.load %arg9[%c0_77, %c336] : memref<1x1536xf32, #tpu.memory_space<vmem>>, vector<1x16xf32>
    tpu.vector_store %arg9[%c0_77, %c336], %761 {strides = array<i32>} : memref<1x1536xf32, #tpu.memory_space<vmem>>, vector<1x16xf32>,
    %763 = vector.extract_strided_slice %748 {offsets = [14, 0], sizes = [1, 16], strides = [1, 1]} : vector<29x16xf32> to vector<1x16xf32>
    %c0_78 = arith.constant 0 : index
    %c352 = arith.constant 352 : index
    %764 = vector.load %arg9[%c0_78, %c352] : memref<1x1536xf32, #tpu.memory_space<vmem>>, vector<1x16xf32>
    tpu.vector_store %arg9[%c0_78, %c352], %763 {strides = array<i32>} : memref<1x1536xf32, #tpu.memory_space<vmem>>, vector<1x16xf32>,
    %765 = vector.extract_strided_slice %748 {offsets = [16, 0], sizes = [1, 16], strides = [1, 1]} : vector<29x16xf32> to vector<1x16xf32>
    %c0_79 = arith.constant 0 : index
    %c368 = arith.constant 368 : index
    %766 = vector.load %arg9[%c0_79, %c368] : memref<1x1536xf32, #tpu.memory_space<vmem>>, vector<1x16xf32>
    tpu.vector_store %arg9[%c0_79, %c368], %765 {strides = array<i32>} : memref<1x1536xf32, #tpu.memory_space<vmem>>, vector<1x16xf32>,
    %767 = vector.extract_strided_slice %748 {offsets = [18, 0], sizes = [1, 16], strides = [1, 1]} : vector<29x16xf32> to vector<1x16xf32>
    %c0_80 = arith.constant 0 : index
    %c384 = arith.constant 384 : index
    %768 = vector.load %arg9[%c0_80, %c384] : memref<1x1536xf32, #tpu.memory_space<vmem>>, vector<1x16xf32>
    tpu.vector_store %arg9[%c0_80, %c384], %767 {strides = array<i32>} : memref<1x1536xf32, #tpu.memory_space<vmem>>, vector<1x16xf32>,
    %769 = vector.extract_strided_slice %748 {offsets = [20, 0], sizes = [1, 16], strides = [1, 1]} : vector<29x16xf32> to vector<1x16xf32>
    %c0_81 = arith.constant 0 : index
    %c400 = arith.constant 400 : index
    %770 = vector.load %arg9[%c0_81, %c400] : memref<1x1536xf32, #tpu.memory_space<vmem>>, vector<1x16xf32>
    tpu.vector_store %arg9[%c0_81, %c400], %769 {strides = array<i32>} : memref<1x1536xf32, #tpu.memory_space<vmem>>, vector<1x16xf32>,
    %771 = vector.extract_strided_slice %748 {offsets = [22, 0], sizes = [1, 16], strides = [1, 1]} : vector<29x16xf32> to vector<1x16xf32>
    %c0_82 = arith.constant 0 : index
    %c416 = arith.constant 416 : index
    %772 = vector.load %arg9[%c0_82, %c416] : memref<1x1536xf32, #tpu.memory_space<vmem>>, vector<1x16xf32>
    tpu.vector_store %arg9[%c0_82, %c416], %771 {strides = array<i32>} : memref<1x1536xf32, #tpu.memory_space<vmem>>, vector<1x16xf32>,
    %773 = vector.extract_strided_slice %748 {offsets = [24, 0], sizes = [1, 16], strides = [1, 1]} : vector<29x16xf32> to vector<1x16xf32>
    %c0_83 = arith.constant 0 : index
    %c432 = arith.constant 432 : index
    %774 = vector.load %arg9[%c0_83, %c432] : memref<1x1536xf32, #tpu.memory_space<vmem>>, vector<1x16xf32>
    tpu.vector_store %arg9[%c0_83, %c432], %773 {strides = array<i32>} : memref<1x1536xf32, #tpu.memory_space<vmem>>, vector<1x16xf32>,
    %775 = vector.extract_strided_slice %748 {offsets = [26, 0], sizes = [1, 16], strides = [1, 1]} : vector<29x16xf32> to vector<1x16xf32>
    %c0_84 = arith.constant 0 : index
    %c448 = arith.constant 448 : index
    %776 = vector.load %arg9[%c0_84, %c448] : memref<1x1536xf32, #tpu.memory_space<vmem>>, vector<1x16xf32>
    tpu.vector_store %arg9[%c0_84, %c448], %775 {strides = array<i32>} : memref<1x1536xf32, #tpu.memory_space<vmem>>, vector<1x16xf32>,
    %777 = vector.extract_strided_slice %748 {offsets = [28, 0], sizes = [1, 16], strides = [1, 1]} : vector<29x16xf32> to vector<1x16xf32>
    %c0_85 = arith.constant 0 : index
    %c464 = arith.constant 464 : index
    %778 = vector.load %arg9[%c0_85, %c464] : memref<1x1536xf32, #tpu.memory_space<vmem>>, vector<1x16xf32>
    tpu.vector_store %arg9[%c0_85, %c464], %777 {strides = array<i32>} : memref<1x1536xf32, #tpu.memory_space<vmem>>, vector<1x16xf32>,
    %779 = vector.extract_strided_slice %688 {offsets = [0, 0], sizes = [30, 16], strides = [1, 1]} : vector<30x32xf32> to vector<30x16xf32>
    %780 = vector.extract_strided_slice %688 {offsets = [0, 16], sizes = [30, 16], strides = [1, 1]} : vector<30x32xf32> to vector<30x16xf32>
    %781 = arith.maximumf %779, %780 : vector<30x16xf32>
    %782 = vector.extract_strided_slice %781 {offsets = [0, 0], sizes = [29, 16], strides = [1, 1]} : vector<30x16xf32> to vector<29x16xf32>
    %783 = vector.extract_strided_slice %781 {offsets = [1, 0], sizes = [29, 16], strides = [1, 1]} : vector<30x16xf32> to vector<29x16xf32>
    %784 = arith.maximumf %782, %783 : vector<29x16xf32>
    %c2_86 = arith.constant 2 : index
    %785 = memref.load %arg3[%c2_86] : memref<6xf32, #tpu.memory_space<smem>>
    %786 = vector.broadcast %785 : f32 to vector<29x16xf32>
    %787 = arith.addf %784, %786 : vector<29x16xf32>
    %788 = vector.extract_strided_slice %787 {offsets = [0, 0], sizes = [1, 16], strides = [1, 1]} : vector<29x16xf32> to vector<1x16xf32>
    %c0_87 = arith.constant 0 : index
    %c480 = arith.constant 480 : index
    %789 = vector.load %arg9[%c0_87, %c480] : memref<1x1536xf32, #tpu.memory_space<vmem>>, vector<1x16xf32>
    tpu.vector_store %arg9[%c0_87, %c480], %788 {strides = array<i32>} : memref<1x1536xf32, #tpu.memory_space<vmem>>, vector<1x16xf32>,
    %790 = vector.extract_strided_slice %787 {offsets = [2, 0], sizes = [1, 16], strides = [1, 1]} : vector<29x16xf32> to vector<1x16xf32>
    %c0_88 = arith.constant 0 : index
    %c496 = arith.constant 496 : index
    %791 = vector.load %arg9[%c0_88, %c496] : memref<1x1536xf32, #tpu.memory_space<vmem>>, vector<1x16xf32>
    tpu.vector_store %arg9[%c0_88, %c496], %790 {strides = array<i32>} : memref<1x1536xf32, #tpu.memory_space<vmem>>, vector<1x16xf32>,
    %792 = vector.extract_strided_slice %787 {offsets = [4, 0], sizes = [1, 16], strides = [1, 1]} : vector<29x16xf32> to vector<1x16xf32>
    %c0_89 = arith.constant 0 : index
    %c512 = arith.constant 512 : index
    %793 = vector.load %arg9[%c0_89, %c512] : memref<1x1536xf32, #tpu.memory_space<vmem>>, vector<1x16xf32>
    tpu.vector_store %arg9[%c0_89, %c512], %792 {strides = array<i32>} : memref<1x1536xf32, #tpu.memory_space<vmem>>, vector<1x16xf32>,
    %794 = vector.extract_strided_slice %787 {offsets = [6, 0], sizes = [1, 16], strides = [1, 1]} : vector<29x16xf32> to vector<1x16xf32>
    %c0_90 = arith.constant 0 : index
    %c528 = arith.constant 528 : index
    %795 = vector.load %arg9[%c0_90, %c528] : memref<1x1536xf32, #tpu.memory_space<vmem>>, vector<1x16xf32>
    tpu.vector_store %arg9[%c0_90, %c528], %794 {strides = array<i32>} : memref<1x1536xf32, #tpu.memory_space<vmem>>, vector<1x16xf32>,
    %796 = vector.extract_strided_slice %787 {offsets = [8, 0], sizes = [1, 16], strides = [1, 1]} : vector<29x16xf32> to vector<1x16xf32>
    %c0_91 = arith.constant 0 : index
    %c544 = arith.constant 544 : index
    %797 = vector.load %arg9[%c0_91, %c544] : memref<1x1536xf32, #tpu.memory_space<vmem>>, vector<1x16xf32>
    tpu.vector_store %arg9[%c0_91, %c544], %796 {strides = array<i32>} : memref<1x1536xf32, #tpu.memory_space<vmem>>, vector<1x16xf32>,
    %798 = vector.extract_strided_slice %787 {offsets = [10, 0], sizes = [1, 16], strides = [1, 1]} : vector<29x16xf32> to vector<1x16xf32>
    %c0_92 = arith.constant 0 : index
    %c560 = arith.constant 560 : index
    %799 = vector.load %arg9[%c0_92, %c560] : memref<1x1536xf32, #tpu.memory_space<vmem>>, vector<1x16xf32>
    tpu.vector_store %arg9[%c0_92, %c560], %798 {strides = array<i32>} : memref<1x1536xf32, #tpu.memory_space<vmem>>, vector<1x16xf32>,
    %800 = vector.extract_strided_slice %787 {offsets = [12, 0], sizes = [1, 16], strides = [1, 1]} : vector<29x16xf32> to vector<1x16xf32>
    %c0_93 = arith.constant 0 : index
    %c576 = arith.constant 576 : index
    %801 = vector.load %arg9[%c0_93, %c576] : memref<1x1536xf32, #tpu.memory_space<vmem>>, vector<1x16xf32>
    tpu.vector_store %arg9[%c0_93, %c576], %800 {strides = array<i32>} : memref<1x1536xf32, #tpu.memory_space<vmem>>, vector<1x16xf32>,
    %802 = vector.extract_strided_slice %787 {offsets = [14, 0], sizes = [1, 16], strides = [1, 1]} : vector<29x16xf32> to vector<1x16xf32>
    %c0_94 = arith.constant 0 : index
    %c592 = arith.constant 592 : index
    %803 = vector.load %arg9[%c0_94, %c592] : memref<1x1536xf32, #tpu.memory_space<vmem>>, vector<1x16xf32>
    tpu.vector_store %arg9[%c0_94, %c592], %802 {strides = array<i32>} : memref<1x1536xf32, #tpu.memory_space<vmem>>, vector<1x16xf32>,
    %804 = vector.extract_strided_slice %787 {offsets = [16, 0], sizes = [1, 16], strides = [1, 1]} : vector<29x16xf32> to vector<1x16xf32>
    %c0_95 = arith.constant 0 : index
    %c608 = arith.constant 608 : index
    %805 = vector.load %arg9[%c0_95, %c608] : memref<1x1536xf32, #tpu.memory_space<vmem>>, vector<1x16xf32>
    tpu.vector_store %arg9[%c0_95, %c608], %804 {strides = array<i32>} : memref<1x1536xf32, #tpu.memory_space<vmem>>, vector<1x16xf32>,
    %806 = vector.extract_strided_slice %787 {offsets = [18, 0], sizes = [1, 16], strides = [1, 1]} : vector<29x16xf32> to vector<1x16xf32>
    %c0_96 = arith.constant 0 : index
    %c624 = arith.constant 624 : index
    %807 = vector.load %arg9[%c0_96, %c624] : memref<1x1536xf32, #tpu.memory_space<vmem>>, vector<1x16xf32>
    tpu.vector_store %arg9[%c0_96, %c624], %806 {strides = array<i32>} : memref<1x1536xf32, #tpu.memory_space<vmem>>, vector<1x16xf32>,
    %808 = vector.extract_strided_slice %787 {offsets = [20, 0], sizes = [1, 16], strides = [1, 1]} : vector<29x16xf32> to vector<1x16xf32>
    %c0_97 = arith.constant 0 : index
    %c640 = arith.constant 640 : index
    %809 = vector.load %arg9[%c0_97, %c640] : memref<1x1536xf32, #tpu.memory_space<vmem>>, vector<1x16xf32>
    tpu.vector_store %arg9[%c0_97, %c640], %808 {strides = array<i32>} : memref<1x1536xf32, #tpu.memory_space<vmem>>, vector<1x16xf32>,
    %810 = vector.extract_strided_slice %787 {offsets = [22, 0], sizes = [1, 16], strides = [1, 1]} : vector<29x16xf32> to vector<1x16xf32>
    %c0_98 = arith.constant 0 : index
    %c656 = arith.constant 656 : index
    %811 = vector.load %arg9[%c0_98, %c656] : memref<1x1536xf32, #tpu.memory_space<vmem>>, vector<1x16xf32>
    tpu.vector_store %arg9[%c0_98, %c656], %810 {strides = array<i32>} : memref<1x1536xf32, #tpu.memory_space<vmem>>, vector<1x16xf32>,
    %812 = vector.extract_strided_slice %787 {offsets = [24, 0], sizes = [1, 16], strides = [1, 1]} : vector<29x16xf32> to vector<1x16xf32>
    %c0_99 = arith.constant 0 : index
    %c672 = arith.constant 672 : index
    %813 = vector.load %arg9[%c0_99, %c672] : memref<1x1536xf32, #tpu.memory_space<vmem>>, vector<1x16xf32>
    tpu.vector_store %arg9[%c0_99, %c672], %812 {strides = array<i32>} : memref<1x1536xf32, #tpu.memory_space<vmem>>, vector<1x16xf32>,
    %814 = vector.extract_strided_slice %787 {offsets = [26, 0], sizes = [1, 16], strides = [1, 1]} : vector<29x16xf32> to vector<1x16xf32>
    %c0_100 = arith.constant 0 : index
    %c688 = arith.constant 688 : index
    %815 = vector.load %arg9[%c0_100, %c688] : memref<1x1536xf32, #tpu.memory_space<vmem>>, vector<1x16xf32>
    tpu.vector_store %arg9[%c0_100, %c688], %814 {strides = array<i32>} : memref<1x1536xf32, #tpu.memory_space<vmem>>, vector<1x16xf32>,
    %816 = vector.extract_strided_slice %787 {offsets = [28, 0], sizes = [1, 16], strides = [1, 1]} : vector<29x16xf32> to vector<1x16xf32>
    %c0_101 = arith.constant 0 : index
    %c704 = arith.constant 704 : index
    %817 = vector.load %arg9[%c0_101, %c704] : memref<1x1536xf32, #tpu.memory_space<vmem>>, vector<1x16xf32>
    tpu.vector_store %arg9[%c0_101, %c704], %816 {strides = array<i32>} : memref<1x1536xf32, #tpu.memory_space<vmem>>, vector<1x16xf32>,
    %818 = vector.extract_strided_slice %692 {offsets = [0, 0], sizes = [30, 16], strides = [1, 1]} : vector<30x32xf32> to vector<30x16xf32>
    %819 = vector.extract_strided_slice %692 {offsets = [0, 16], sizes = [30, 16], strides = [1, 1]} : vector<30x32xf32> to vector<30x16xf32>
    %820 = arith.maximumf %818, %819 : vector<30x16xf32>
    %821 = vector.extract_strided_slice %820 {offsets = [0, 0], sizes = [29, 16], strides = [1, 1]} : vector<30x16xf32> to vector<29x16xf32>
    %822 = vector.extract_strided_slice %820 {offsets = [1, 0], sizes = [29, 16], strides = [1, 1]} : vector<30x16xf32> to vector<29x16xf32>
    %823 = arith.maximumf %821, %822 : vector<29x16xf32>
    %c3_102 = arith.constant 3 : index
    %824 = memref.load %arg3[%c3_102] : memref<6xf32, #tpu.memory_space<smem>>
    %825 = vector.broadcast %824 : f32 to vector<29x16xf32>
    %826 = arith.addf %823, %825 : vector<29x16xf32>
    %827 = vector.extract_strided_slice %826 {offsets = [0, 0], sizes = [1, 16], strides = [1, 1]} : vector<29x16xf32> to vector<1x16xf32>
    %c0_103 = arith.constant 0 : index
    %c720 = arith.constant 720 : index
    %828 = vector.load %arg9[%c0_103, %c720] : memref<1x1536xf32, #tpu.memory_space<vmem>>, vector<1x16xf32>
    tpu.vector_store %arg9[%c0_103, %c720], %827 {strides = array<i32>} : memref<1x1536xf32, #tpu.memory_space<vmem>>, vector<1x16xf32>,
    %829 = vector.extract_strided_slice %826 {offsets = [2, 0], sizes = [1, 16], strides = [1, 1]} : vector<29x16xf32> to vector<1x16xf32>
    %c0_104 = arith.constant 0 : index
    %c736 = arith.constant 736 : index
    %830 = vector.load %arg9[%c0_104, %c736] : memref<1x1536xf32, #tpu.memory_space<vmem>>, vector<1x16xf32>
    tpu.vector_store %arg9[%c0_104, %c736], %829 {strides = array<i32>} : memref<1x1536xf32, #tpu.memory_space<vmem>>, vector<1x16xf32>,
    %831 = vector.extract_strided_slice %826 {offsets = [4, 0], sizes = [1, 16], strides = [1, 1]} : vector<29x16xf32> to vector<1x16xf32>
    %c0_105 = arith.constant 0 : index
    %c752 = arith.constant 752 : index
    %832 = vector.load %arg9[%c0_105, %c752] : memref<1x1536xf32, #tpu.memory_space<vmem>>, vector<1x16xf32>
    tpu.vector_store %arg9[%c0_105, %c752], %831 {strides = array<i32>} : memref<1x1536xf32, #tpu.memory_space<vmem>>, vector<1x16xf32>,
    %833 = vector.extract_strided_slice %826 {offsets = [6, 0], sizes = [1, 16], strides = [1, 1]} : vector<29x16xf32> to vector<1x16xf32>
    %c0_106 = arith.constant 0 : index
    %c768 = arith.constant 768 : index
    %834 = vector.load %arg9[%c0_106, %c768] : memref<1x1536xf32, #tpu.memory_space<vmem>>, vector<1x16xf32>
    tpu.vector_store %arg9[%c0_106, %c768], %833 {strides = array<i32>} : memref<1x1536xf32, #tpu.memory_space<vmem>>, vector<1x16xf32>,
    %835 = vector.extract_strided_slice %826 {offsets = [8, 0], sizes = [1, 16], strides = [1, 1]} : vector<29x16xf32> to vector<1x16xf32>
    %c0_107 = arith.constant 0 : index
    %c784 = arith.constant 784 : index
    %836 = vector.load %arg9[%c0_107, %c784] : memref<1x1536xf32, #tpu.memory_space<vmem>>, vector<1x16xf32>
    tpu.vector_store %arg9[%c0_107, %c784], %835 {strides = array<i32>} : memref<1x1536xf32, #tpu.memory_space<vmem>>, vector<1x16xf32>,
    %837 = vector.extract_strided_slice %826 {offsets = [10, 0], sizes = [1, 16], strides = [1, 1]} : vector<29x16xf32> to vector<1x16xf32>
    %c0_108 = arith.constant 0 : index
    %c800 = arith.constant 800 : index
    %838 = vector.load %arg9[%c0_108, %c800] : memref<1x1536xf32, #tpu.memory_space<vmem>>, vector<1x16xf32>
    tpu.vector_store %arg9[%c0_108, %c800], %837 {strides = array<i32>} : memref<1x1536xf32, #tpu.memory_space<vmem>>, vector<1x16xf32>,
    %839 = vector.extract_strided_slice %826 {offsets = [12, 0], sizes = [1, 16], strides = [1, 1]} : vector<29x16xf32> to vector<1x16xf32>
    %c0_109 = arith.constant 0 : index
    %c816 = arith.constant 816 : index
    %840 = vector.load %arg9[%c0_109, %c816] : memref<1x1536xf32, #tpu.memory_space<vmem>>, vector<1x16xf32>
    tpu.vector_store %arg9[%c0_109, %c816], %839 {strides = array<i32>} : memref<1x1536xf32, #tpu.memory_space<vmem>>, vector<1x16xf32>,
    %841 = vector.extract_strided_slice %826 {offsets = [14, 0], sizes = [1, 16], strides = [1, 1]} : vector<29x16xf32> to vector<1x16xf32>
    %c0_110 = arith.constant 0 : index
    %c832 = arith.constant 832 : index
    %842 = vector.load %arg9[%c0_110, %c832] : memref<1x1536xf32, #tpu.memory_space<vmem>>, vector<1x16xf32>
    tpu.vector_store %arg9[%c0_110, %c832], %841 {strides = array<i32>} : memref<1x1536xf32, #tpu.memory_space<vmem>>, vector<1x16xf32>,
    %843 = vector.extract_strided_slice %826 {offsets = [16, 0], sizes = [1, 16], strides = [1, 1]} : vector<29x16xf32> to vector<1x16xf32>
    %c0_111 = arith.constant 0 : index
    %c848 = arith.constant 848 : index
    %844 = vector.load %arg9[%c0_111, %c848] : memref<1x1536xf32, #tpu.memory_space<vmem>>, vector<1x16xf32>
    tpu.vector_store %arg9[%c0_111, %c848], %843 {strides = array<i32>} : memref<1x1536xf32, #tpu.memory_space<vmem>>, vector<1x16xf32>,
    %845 = vector.extract_strided_slice %826 {offsets = [18, 0], sizes = [1, 16], strides = [1, 1]} : vector<29x16xf32> to vector<1x16xf32>
    %c0_112 = arith.constant 0 : index
    %c864 = arith.constant 864 : index
    %846 = vector.load %arg9[%c0_112, %c864] : memref<1x1536xf32, #tpu.memory_space<vmem>>, vector<1x16xf32>
    tpu.vector_store %arg9[%c0_112, %c864], %845 {strides = array<i32>} : memref<1x1536xf32, #tpu.memory_space<vmem>>, vector<1x16xf32>,
    %847 = vector.extract_strided_slice %826 {offsets = [20, 0], sizes = [1, 16], strides = [1, 1]} : vector<29x16xf32> to vector<1x16xf32>
    %c0_113 = arith.constant 0 : index
    %c880 = arith.constant 880 : index
    %848 = vector.load %arg9[%c0_113, %c880] : memref<1x1536xf32, #tpu.memory_space<vmem>>, vector<1x16xf32>
    tpu.vector_store %arg9[%c0_113, %c880], %847 {strides = array<i32>} : memref<1x1536xf32, #tpu.memory_space<vmem>>, vector<1x16xf32>,
    %849 = vector.extract_strided_slice %826 {offsets = [22, 0], sizes = [1, 16], strides = [1, 1]} : vector<29x16xf32> to vector<1x16xf32>
    %c0_114 = arith.constant 0 : index
    %c896 = arith.constant 896 : index
    %850 = vector.load %arg9[%c0_114, %c896] : memref<1x1536xf32, #tpu.memory_space<vmem>>, vector<1x16xf32>
    tpu.vector_store %arg9[%c0_114, %c896], %849 {strides = array<i32>} : memref<1x1536xf32, #tpu.memory_space<vmem>>, vector<1x16xf32>,
    %851 = vector.extract_strided_slice %826 {offsets = [24, 0], sizes = [1, 16], strides = [1, 1]} : vector<29x16xf32> to vector<1x16xf32>
    %c0_115 = arith.constant 0 : index
    %c912 = arith.constant 912 : index
    %852 = vector.load %arg9[%c0_115, %c912] : memref<1x1536xf32, #tpu.memory_space<vmem>>, vector<1x16xf32>
    tpu.vector_store %arg9[%c0_115, %c912], %851 {strides = array<i32>} : memref<1x1536xf32, #tpu.memory_space<vmem>>, vector<1x16xf32>,
    %853 = vector.extract_strided_slice %826 {offsets = [26, 0], sizes = [1, 16], strides = [1, 1]} : vector<29x16xf32> to vector<1x16xf32>
    %c0_116 = arith.constant 0 : index
    %c928 = arith.constant 928 : index
    %854 = vector.load %arg9[%c0_116, %c928] : memref<1x1536xf32, #tpu.memory_space<vmem>>, vector<1x16xf32>
    tpu.vector_store %arg9[%c0_116, %c928], %853 {strides = array<i32>} : memref<1x1536xf32, #tpu.memory_space<vmem>>, vector<1x16xf32>,
    %855 = vector.extract_strided_slice %826 {offsets = [28, 0], sizes = [1, 16], strides = [1, 1]} : vector<29x16xf32> to vector<1x16xf32>
    %c0_117 = arith.constant 0 : index
    %c944 = arith.constant 944 : index
    %856 = vector.load %arg9[%c0_117, %c944] : memref<1x1536xf32, #tpu.memory_space<vmem>>, vector<1x16xf32>
    tpu.vector_store %arg9[%c0_117, %c944], %855 {strides = array<i32>} : memref<1x1536xf32, #tpu.memory_space<vmem>>, vector<1x16xf32>,
    %857 = vector.extract_strided_slice %696 {offsets = [0, 0], sizes = [30, 16], strides = [1, 1]} : vector<30x32xf32> to vector<30x16xf32>
    %858 = vector.extract_strided_slice %696 {offsets = [0, 16], sizes = [30, 16], strides = [1, 1]} : vector<30x32xf32> to vector<30x16xf32>
    %859 = arith.maximumf %857, %858 : vector<30x16xf32>
    %860 = vector.extract_strided_slice %859 {offsets = [0, 0], sizes = [29, 16], strides = [1, 1]} : vector<30x16xf32> to vector<29x16xf32>
    %861 = vector.extract_strided_slice %859 {offsets = [1, 0], sizes = [29, 16], strides = [1, 1]} : vector<30x16xf32> to vector<29x16xf32>
    %862 = arith.maximumf %860, %861 : vector<29x16xf32>
    %c4_118 = arith.constant 4 : index
    %863 = memref.load %arg3[%c4_118] : memref<6xf32, #tpu.memory_space<smem>>
    %864 = vector.broadcast %863 : f32 to vector<29x16xf32>
    %865 = arith.addf %862, %864 : vector<29x16xf32>
    %866 = vector.extract_strided_slice %865 {offsets = [0, 0], sizes = [1, 16], strides = [1, 1]} : vector<29x16xf32> to vector<1x16xf32>
    %c0_119 = arith.constant 0 : index
    %c960 = arith.constant 960 : index
    %867 = vector.load %arg9[%c0_119, %c960] : memref<1x1536xf32, #tpu.memory_space<vmem>>, vector<1x16xf32>
    tpu.vector_store %arg9[%c0_119, %c960], %866 {strides = array<i32>} : memref<1x1536xf32, #tpu.memory_space<vmem>>, vector<1x16xf32>,
    %868 = vector.extract_strided_slice %865 {offsets = [2, 0], sizes = [1, 16], strides = [1, 1]} : vector<29x16xf32> to vector<1x16xf32>
    %c0_120 = arith.constant 0 : index
    %c976 = arith.constant 976 : index
    %869 = vector.load %arg9[%c0_120, %c976] : memref<1x1536xf32, #tpu.memory_space<vmem>>, vector<1x16xf32>
    tpu.vector_store %arg9[%c0_120, %c976], %868 {strides = array<i32>} : memref<1x1536xf32, #tpu.memory_space<vmem>>, vector<1x16xf32>,
    %870 = vector.extract_strided_slice %865 {offsets = [4, 0], sizes = [1, 16], strides = [1, 1]} : vector<29x16xf32> to vector<1x16xf32>
    %c0_121 = arith.constant 0 : index
    %c992 = arith.constant 992 : index
    %871 = vector.load %arg9[%c0_121, %c992] : memref<1x1536xf32, #tpu.memory_space<vmem>>, vector<1x16xf32>
    tpu.vector_store %arg9[%c0_121, %c992], %870 {strides = array<i32>} : memref<1x1536xf32, #tpu.memory_space<vmem>>, vector<1x16xf32>,
    %872 = vector.extract_strided_slice %865 {offsets = [6, 0], sizes = [1, 16], strides = [1, 1]} : vector<29x16xf32> to vector<1x16xf32>
    %c0_122 = arith.constant 0 : index
    %c1008 = arith.constant 1008 : index
    %873 = vector.load %arg9[%c0_122, %c1008] : memref<1x1536xf32, #tpu.memory_space<vmem>>, vector<1x16xf32>
    tpu.vector_store %arg9[%c0_122, %c1008], %872 {strides = array<i32>} : memref<1x1536xf32, #tpu.memory_space<vmem>>, vector<1x16xf32>,
    %874 = vector.extract_strided_slice %865 {offsets = [8, 0], sizes = [1, 16], strides = [1, 1]} : vector<29x16xf32> to vector<1x16xf32>
    %c0_123 = arith.constant 0 : index
    %c1024 = arith.constant 1024 : index
    %875 = vector.load %arg9[%c0_123, %c1024] : memref<1x1536xf32, #tpu.memory_space<vmem>>, vector<1x16xf32>
    tpu.vector_store %arg9[%c0_123, %c1024], %874 {strides = array<i32>} : memref<1x1536xf32, #tpu.memory_space<vmem>>, vector<1x16xf32>,
    %876 = vector.extract_strided_slice %865 {offsets = [10, 0], sizes = [1, 16], strides = [1, 1]} : vector<29x16xf32> to vector<1x16xf32>
    %c0_124 = arith.constant 0 : index
    %c1040 = arith.constant 1040 : index
    %877 = vector.load %arg9[%c0_124, %c1040] : memref<1x1536xf32, #tpu.memory_space<vmem>>, vector<1x16xf32>
    tpu.vector_store %arg9[%c0_124, %c1040], %876 {strides = array<i32>} : memref<1x1536xf32, #tpu.memory_space<vmem>>, vector<1x16xf32>,
    %878 = vector.extract_strided_slice %865 {offsets = [12, 0], sizes = [1, 16], strides = [1, 1]} : vector<29x16xf32> to vector<1x16xf32>
    %c0_125 = arith.constant 0 : index
    %c1056 = arith.constant 1056 : index
    %879 = vector.load %arg9[%c0_125, %c1056] : memref<1x1536xf32, #tpu.memory_space<vmem>>, vector<1x16xf32>
    tpu.vector_store %arg9[%c0_125, %c1056], %878 {strides = array<i32>} : memref<1x1536xf32, #tpu.memory_space<vmem>>, vector<1x16xf32>,
    %880 = vector.extract_strided_slice %865 {offsets = [14, 0], sizes = [1, 16], strides = [1, 1]} : vector<29x16xf32> to vector<1x16xf32>
    %c0_126 = arith.constant 0 : index
    %c1072 = arith.constant 1072 : index
    %881 = vector.load %arg9[%c0_126, %c1072] : memref<1x1536xf32, #tpu.memory_space<vmem>>, vector<1x16xf32>
    tpu.vector_store %arg9[%c0_126, %c1072], %880 {strides = array<i32>} : memref<1x1536xf32, #tpu.memory_space<vmem>>, vector<1x16xf32>,
    %882 = vector.extract_strided_slice %865 {offsets = [16, 0], sizes = [1, 16], strides = [1, 1]} : vector<29x16xf32> to vector<1x16xf32>
    %c0_127 = arith.constant 0 : index
    %c1088 = arith.constant 1088 : index
    %883 = vector.load %arg9[%c0_127, %c1088] : memref<1x1536xf32, #tpu.memory_space<vmem>>, vector<1x16xf32>
    tpu.vector_store %arg9[%c0_127, %c1088], %882 {strides = array<i32>} : memref<1x1536xf32, #tpu.memory_space<vmem>>, vector<1x16xf32>,
    %884 = vector.extract_strided_slice %865 {offsets = [18, 0], sizes = [1, 16], strides = [1, 1]} : vector<29x16xf32> to vector<1x16xf32>
    %c0_128 = arith.constant 0 : index
    %c1104 = arith.constant 1104 : index
    %885 = vector.load %arg9[%c0_128, %c1104] : memref<1x1536xf32, #tpu.memory_space<vmem>>, vector<1x16xf32>
    tpu.vector_store %arg9[%c0_128, %c1104], %884 {strides = array<i32>} : memref<1x1536xf32, #tpu.memory_space<vmem>>, vector<1x16xf32>,
    %886 = vector.extract_strided_slice %865 {offsets = [20, 0], sizes = [1, 16], strides = [1, 1]} : vector<29x16xf32> to vector<1x16xf32>
    %c0_129 = arith.constant 0 : index
    %c1120 = arith.constant 1120 : index
    %887 = vector.load %arg9[%c0_129, %c1120] : memref<1x1536xf32, #tpu.memory_space<vmem>>, vector<1x16xf32>
    tpu.vector_store %arg9[%c0_129, %c1120], %886 {strides = array<i32>} : memref<1x1536xf32, #tpu.memory_space<vmem>>, vector<1x16xf32>,
    %888 = vector.extract_strided_slice %865 {offsets = [22, 0], sizes = [1, 16], strides = [1, 1]} : vector<29x16xf32> to vector<1x16xf32>
    %c0_130 = arith.constant 0 : index
    %c1136 = arith.constant 1136 : index
    %889 = vector.load %arg9[%c0_130, %c1136] : memref<1x1536xf32, #tpu.memory_space<vmem>>, vector<1x16xf32>
    tpu.vector_store %arg9[%c0_130, %c1136], %888 {strides = array<i32>} : memref<1x1536xf32, #tpu.memory_space<vmem>>, vector<1x16xf32>,
    %890 = vector.extract_strided_slice %865 {offsets = [24, 0], sizes = [1, 16], strides = [1, 1]} : vector<29x16xf32> to vector<1x16xf32>
    %c0_131 = arith.constant 0 : index
    %c1152 = arith.constant 1152 : index
    %891 = vector.load %arg9[%c0_131, %c1152] : memref<1x1536xf32, #tpu.memory_space<vmem>>, vector<1x16xf32>
    tpu.vector_store %arg9[%c0_131, %c1152], %890 {strides = array<i32>} : memref<1x1536xf32, #tpu.memory_space<vmem>>, vector<1x16xf32>,
    %892 = vector.extract_strided_slice %865 {offsets = [26, 0], sizes = [1, 16], strides = [1, 1]} : vector<29x16xf32> to vector<1x16xf32>
    %c0_132 = arith.constant 0 : index
    %c1168 = arith.constant 1168 : index
    %893 = vector.load %arg9[%c0_132, %c1168] : memref<1x1536xf32, #tpu.memory_space<vmem>>, vector<1x16xf32>
    tpu.vector_store %arg9[%c0_132, %c1168], %892 {strides = array<i32>} : memref<1x1536xf32, #tpu.memory_space<vmem>>, vector<1x16xf32>,
    %894 = vector.extract_strided_slice %865 {offsets = [28, 0], sizes = [1, 16], strides = [1, 1]} : vector<29x16xf32> to vector<1x16xf32>
    %c0_133 = arith.constant 0 : index
    %c1184 = arith.constant 1184 : index
    %895 = vector.load %arg9[%c0_133, %c1184] : memref<1x1536xf32, #tpu.memory_space<vmem>>, vector<1x16xf32>
    tpu.vector_store %arg9[%c0_133, %c1184], %894 {strides = array<i32>} : memref<1x1536xf32, #tpu.memory_space<vmem>>, vector<1x16xf32>,
    %896 = vector.extract_strided_slice %700 {offsets = [0, 0], sizes = [30, 16], strides = [1, 1]} : vector<30x32xf32> to vector<30x16xf32>
    %897 = vector.extract_strided_slice %700 {offsets = [0, 16], sizes = [30, 16], strides = [1, 1]} : vector<30x32xf32> to vector<30x16xf32>
    %898 = arith.maximumf %896, %897 : vector<30x16xf32>
    %899 = vector.extract_strided_slice %898 {offsets = [0, 0], sizes = [29, 16], strides = [1, 1]} : vector<30x16xf32> to vector<29x16xf32>
    %900 = vector.extract_strided_slice %898 {offsets = [1, 0], sizes = [29, 16], strides = [1, 1]} : vector<30x16xf32> to vector<29x16xf32>
    %901 = arith.maximumf %899, %900 : vector<29x16xf32>
    %c5_134 = arith.constant 5 : index
    %902 = memref.load %arg3[%c5_134] : memref<6xf32, #tpu.memory_space<smem>>
    %903 = vector.broadcast %902 : f32 to vector<29x16xf32>
    %904 = arith.addf %901, %903 : vector<29x16xf32>
    %905 = vector.extract_strided_slice %904 {offsets = [0, 0], sizes = [1, 16], strides = [1, 1]} : vector<29x16xf32> to vector<1x16xf32>
    %c0_135 = arith.constant 0 : index
    %c1200 = arith.constant 1200 : index
    %906 = vector.load %arg9[%c0_135, %c1200] : memref<1x1536xf32, #tpu.memory_space<vmem>>, vector<1x16xf32>
    tpu.vector_store %arg9[%c0_135, %c1200], %905 {strides = array<i32>} : memref<1x1536xf32, #tpu.memory_space<vmem>>, vector<1x16xf32>,
    %907 = vector.extract_strided_slice %904 {offsets = [2, 0], sizes = [1, 16], strides = [1, 1]} : vector<29x16xf32> to vector<1x16xf32>
    %c0_136 = arith.constant 0 : index
    %c1216 = arith.constant 1216 : index
    %908 = vector.load %arg9[%c0_136, %c1216] : memref<1x1536xf32, #tpu.memory_space<vmem>>, vector<1x16xf32>
    tpu.vector_store %arg9[%c0_136, %c1216], %907 {strides = array<i32>} : memref<1x1536xf32, #tpu.memory_space<vmem>>, vector<1x16xf32>,
    %909 = vector.extract_strided_slice %904 {offsets = [4, 0], sizes = [1, 16], strides = [1, 1]} : vector<29x16xf32> to vector<1x16xf32>
    %c0_137 = arith.constant 0 : index
    %c1232 = arith.constant 1232 : index
    %910 = vector.load %arg9[%c0_137, %c1232] : memref<1x1536xf32, #tpu.memory_space<vmem>>, vector<1x16xf32>
    tpu.vector_store %arg9[%c0_137, %c1232], %909 {strides = array<i32>} : memref<1x1536xf32, #tpu.memory_space<vmem>>, vector<1x16xf32>,
    %911 = vector.extract_strided_slice %904 {offsets = [6, 0], sizes = [1, 16], strides = [1, 1]} : vector<29x16xf32> to vector<1x16xf32>
    %c0_138 = arith.constant 0 : index
    %c1248 = arith.constant 1248 : index
    %912 = vector.load %arg9[%c0_138, %c1248] : memref<1x1536xf32, #tpu.memory_space<vmem>>, vector<1x16xf32>
    tpu.vector_store %arg9[%c0_138, %c1248], %911 {strides = array<i32>} : memref<1x1536xf32, #tpu.memory_space<vmem>>, vector<1x16xf32>,
    %913 = vector.extract_strided_slice %904 {offsets = [8, 0], sizes = [1, 16], strides = [1, 1]} : vector<29x16xf32> to vector<1x16xf32>
    %c0_139 = arith.constant 0 : index
    %c1264 = arith.constant 1264 : index
    %914 = vector.load %arg9[%c0_139, %c1264] : memref<1x1536xf32, #tpu.memory_space<vmem>>, vector<1x16xf32>
    tpu.vector_store %arg9[%c0_139, %c1264], %913 {strides = array<i32>} : memref<1x1536xf32, #tpu.memory_space<vmem>>, vector<1x16xf32>,
    %915 = vector.extract_strided_slice %904 {offsets = [10, 0], sizes = [1, 16], strides = [1, 1]} : vector<29x16xf32> to vector<1x16xf32>
    %c0_140 = arith.constant 0 : index
    %c1280 = arith.constant 1280 : index
    %916 = vector.load %arg9[%c0_140, %c1280] : memref<1x1536xf32, #tpu.memory_space<vmem>>, vector<1x16xf32>
    tpu.vector_store %arg9[%c0_140, %c1280], %915 {strides = array<i32>} : memref<1x1536xf32, #tpu.memory_space<vmem>>, vector<1x16xf32>,
    %917 = vector.extract_strided_slice %904 {offsets = [12, 0], sizes = [1, 16], strides = [1, 1]} : vector<29x16xf32> to vector<1x16xf32>
    %c0_141 = arith.constant 0 : index
    %c1296 = arith.constant 1296 : index
    %918 = vector.load %arg9[%c0_141, %c1296] : memref<1x1536xf32, #tpu.memory_space<vmem>>, vector<1x16xf32>
    tpu.vector_store %arg9[%c0_141, %c1296], %917 {strides = array<i32>} : memref<1x1536xf32, #tpu.memory_space<vmem>>, vector<1x16xf32>,
    %919 = vector.extract_strided_slice %904 {offsets = [14, 0], sizes = [1, 16], strides = [1, 1]} : vector<29x16xf32> to vector<1x16xf32>
    %c0_142 = arith.constant 0 : index
    %c1312 = arith.constant 1312 : index
    %920 = vector.load %arg9[%c0_142, %c1312] : memref<1x1536xf32, #tpu.memory_space<vmem>>, vector<1x16xf32>
    tpu.vector_store %arg9[%c0_142, %c1312], %919 {strides = array<i32>} : memref<1x1536xf32, #tpu.memory_space<vmem>>, vector<1x16xf32>,
    %921 = vector.extract_strided_slice %904 {offsets = [16, 0], sizes = [1, 16], strides = [1, 1]} : vector<29x16xf32> to vector<1x16xf32>
    %c0_143 = arith.constant 0 : index
    %c1328 = arith.constant 1328 : index
    %922 = vector.load %arg9[%c0_143, %c1328] : memref<1x1536xf32, #tpu.memory_space<vmem>>, vector<1x16xf32>
    tpu.vector_store %arg9[%c0_143, %c1328], %921 {strides = array<i32>} : memref<1x1536xf32, #tpu.memory_space<vmem>>, vector<1x16xf32>,
    %923 = vector.extract_strided_slice %904 {offsets = [18, 0], sizes = [1, 16], strides = [1, 1]} : vector<29x16xf32> to vector<1x16xf32>
    %c0_144 = arith.constant 0 : index
    %c1344 = arith.constant 1344 : index
    %924 = vector.load %arg9[%c0_144, %c1344] : memref<1x1536xf32, #tpu.memory_space<vmem>>, vector<1x16xf32>
    tpu.vector_store %arg9[%c0_144, %c1344], %923 {strides = array<i32>} : memref<1x1536xf32, #tpu.memory_space<vmem>>, vector<1x16xf32>,
    %925 = vector.extract_strided_slice %904 {offsets = [20, 0], sizes = [1, 16], strides = [1, 1]} : vector<29x16xf32> to vector<1x16xf32>
    %c0_145 = arith.constant 0 : index
    %c1360 = arith.constant 1360 : index
    %926 = vector.load %arg9[%c0_145, %c1360] : memref<1x1536xf32, #tpu.memory_space<vmem>>, vector<1x16xf32>
    tpu.vector_store %arg9[%c0_145, %c1360], %925 {strides = array<i32>} : memref<1x1536xf32, #tpu.memory_space<vmem>>, vector<1x16xf32>,
    %927 = vector.extract_strided_slice %904 {offsets = [22, 0], sizes = [1, 16], strides = [1, 1]} : vector<29x16xf32> to vector<1x16xf32>
    %c0_146 = arith.constant 0 : index
    %c1376 = arith.constant 1376 : index
    %928 = vector.load %arg9[%c0_146, %c1376] : memref<1x1536xf32, #tpu.memory_space<vmem>>, vector<1x16xf32>
    tpu.vector_store %arg9[%c0_146, %c1376], %927 {strides = array<i32>} : memref<1x1536xf32, #tpu.memory_space<vmem>>, vector<1x16xf32>,
    %929 = vector.extract_strided_slice %904 {offsets = [24, 0], sizes = [1, 16], strides = [1, 1]} : vector<29x16xf32> to vector<1x16xf32>
    %c0_147 = arith.constant 0 : index
    %c1392 = arith.constant 1392 : index
    %930 = vector.load %arg9[%c0_147, %c1392] : memref<1x1536xf32, #tpu.memory_space<vmem>>, vector<1x16xf32>
    tpu.vector_store %arg9[%c0_147, %c1392], %929 {strides = array<i32>} : memref<1x1536xf32, #tpu.memory_space<vmem>>, vector<1x16xf32>,
    %931 = vector.extract_strided_slice %904 {offsets = [26, 0], sizes = [1, 16], strides = [1, 1]} : vector<29x16xf32> to vector<1x16xf32>
    %c0_148 = arith.constant 0 : index
    %c1408_149 = arith.constant 1408 : index
    %932 = vector.load %arg9[%c0_148, %c1408_149] : memref<1x1536xf32, #tpu.memory_space<vmem>>, vector<1x16xf32>
    tpu.vector_store %arg9[%c0_148, %c1408_149], %931 {strides = array<i32>} : memref<1x1536xf32, #tpu.memory_space<vmem>>, vector<1x16xf32>,
    %933 = vector.extract_strided_slice %904 {offsets = [28, 0], sizes = [1, 16], strides = [1, 1]} : vector<29x16xf32> to vector<1x16xf32>
    %c0_150 = arith.constant 0 : index
    %c1424 = arith.constant 1424 : index
    %934 = vector.load %arg9[%c0_150, %c1424] : memref<1x1536xf32, #tpu.memory_space<vmem>>, vector<1x16xf32>
    tpu.vector_store %arg9[%c0_150, %c1424], %933 {strides = array<i32>} : memref<1x1536xf32, #tpu.memory_space<vmem>>, vector<1x16xf32>,
    %c0_151 = arith.constant 0 : index
    %c0_152 = arith.constant 0 : index
    %935 = vector.load %arg9[%c0_151, %c0_152] : memref<1x1536xf32, #tpu.memory_space<vmem>>, vector<1x1536xf32>
    %c0_153 = arith.constant 0 : index
    %c0_154 = arith.constant 0 : index
    %936 = vector.load %arg4[%c0_153, %c0_154] : memref<1536x128xf32, #tpu.memory_space<vmem>>, vector<1536x128xf32>
    %cst_155 = arith.constant dense<0.000000e+00> : vector<1x128xf32>
    %937 = tpu.matmul %935, %936, %cst_155 {dimension_numbers = #tpu.dot_dimension_numbers<[1], [0], [0], [1], [0, 0, 1, 1], [], []>} : vector<1x1536xf32>, vector<1536x128xf32>, vector<1x128xf32> -> vector<1x128xf32>
    %c0_156 = arith.constant 0 : index
    %c0_157 = arith.constant 0 : index
    %938 = vector.load %arg5[%c0_156, %c0_157] : memref<1x128xf32, #tpu.memory_space<vmem>>, vector<1x128xf32>
    %939 = arith.addf %937, %938 : vector<1x128xf32>
    %cst_158 = arith.constant 0.000000e+00 : f32
    %940 = vector.broadcast %cst_158 : f32 to vector<1x128xf32>
    %941 = arith.maximumf %939, %940 : vector<1x128xf32>
    %c0_159 = arith.constant 0 : index
    %c0_160 = arith.constant 0 : index
    %942 = vector.load %arg6[%c0_159, %c0_160] : memref<128x128xf32, #tpu.memory_space<vmem>>, vector<128x128xf32>
    %cst_161 = arith.constant dense<0.000000e+00> : vector<1x128xf32>
    %943 = tpu.matmul %941, %942, %cst_161 {dimension_numbers = #tpu.dot_dimension_numbers<[1], [0], [0], [1], [0, 0, 1, 1], [], []>} : vector<1x128xf32>, vector<128x128xf32>, vector<1x128xf32> -> vector<1x128xf32>
    %c0_162 = arith.constant 0 : index
    %c0_163 = arith.constant 0 : index
    %944 = vector.load %arg7[%c0_162, %c0_163] : memref<1x128xf32, #tpu.memory_space<vmem>>, vector<1x128xf32>
    %945 = arith.addf %943, %944 : vector<1x128xf32>
    %c0_164 = arith.constant 0 : index
    %c0_165 = arith.constant 0 : index
    %c0_166 = arith.constant 0 : index
    %946 = vector.load %arg8[%c0_164, %c0_165, %c0_166] : memref<1x1x128xf32, #tpu.memory_space<vmem>>, vector<1x1x128xf32>
    %947 = vector.shape_cast %946 : vector<1x1x128xf32> to vector<1x128xf32>
    %948 = vector.shape_cast %945 : vector<1x128xf32> to vector<1x1x128xf32>
    tpu.vector_store %arg8[%c0_164, %c0_165, %c0_166], %948 {strides = array<i32>} : memref<1x1x128xf32, #tpu.memory_space<vmem>>, vector<1x1x128xf32>,
    return
  }
  func.func @transform_0(%arg0: i32) -> (i32, i32, i32, i32) {
    %c0_i32 = arith.constant 0 : i32
    %c0_i32_0 = arith.constant 0 : i32
    %c0_i32_1 = arith.constant 0 : i32
    %c0_i32_2 = arith.constant 0 : i32
    return %arg0, %c0_i32, %c0_i32_0, %c0_i32_1 : i32, i32, i32, i32
  }
  func.func @transform_1(%arg0: i32) -> i32 {
    %c0_i32 = arith.constant 0 : i32
    %c0_i32_0 = arith.constant 0 : i32
    return %c0_i32 : i32
  }
  func.func @transform_2(%arg0: i32) -> i32 {
    %c0_i32 = arith.constant 0 : i32
    %c0_i32_0 = arith.constant 0 : i32
    return %c0_i32 : i32
  }
  func.func @transform_3(%arg0: i32) -> (i32, i32) {
    %c0_i32 = arith.constant 0 : i32
    %c0_i32_0 = arith.constant 0 : i32
    %c0_i32_1 = arith.constant 0 : i32
    return %c0_i32, %c0_i32_0 : i32, i32
  }
  func.func @transform_4(%arg0: i32) -> (i32, i32) {
    %c0_i32 = arith.constant 0 : i32
    %c0_i32_0 = arith.constant 0 : i32
    %c0_i32_1 = arith.constant 0 : i32
    return %c0_i32, %c0_i32_0 : i32, i32
  }
  func.func @transform_5(%arg0: i32) -> (i32, i32) {
    %c0_i32 = arith.constant 0 : i32
    %c0_i32_0 = arith.constant 0 : i32
    %c0_i32_1 = arith.constant 0 : i32
    return %c0_i32, %c0_i32_0 : i32, i32
  }
  func.func @transform_6(%arg0: i32) -> (i32, i32) {
    %c0_i32 = arith.constant 0 : i32
    %c0_i32_0 = arith.constant 0 : i32
    %c0_i32_1 = arith.constant 0 : i32
    return %c0_i32, %c0_i32_0 : i32, i32
  }
  func.func @transform_7(%arg0: i32) -> (i32, i32, i32) {
    %c0_i32 = arith.constant 0 : i32
    %c0_i32_0 = arith.constant 0 : i32
    %c0_i32_1 = arith.constant 0 : i32
    return %arg0, %c0_i32, %c0_i32_0 : i32, i32, i32
  }
}

</mosaic_0001>

<bundles_post_ra>
// kernel: network_forward.1
= control target key start
LH: loop header
LB: loop body
LE: loop exit
PB: predicated region body
PF: predicated region fallthrough
CT: control target
= control target key end

     0   :  { %12 = vsyncpa [#allocation5], 0  ;;  %s12495_s0 = inlined_call_operand.vmem [shape: f32[2,9,32,32], index: 0, kind: input, shape index: {}]   ;;  %s12496_s1 = inlined_call_operand.vmem [shape: f32[162], index: 1, kind: input, shape index: {}]   ;;  %s12497_s2 = inlined_call_operand.vmem [shape: f32[6], index: 2, kind: input, shape index: {}]   ;;  %s12498_s3 = inlined_call_operand.vmem [shape: f32[1536,128], index: 3, kind: input, shape index: {}]   ;;  %s12499_s4 = inlined_call_operand.vmem [shape: f32[1,128], index: 4, kind: input, shape index: {}]   ;;  %s12500_s5 = inlined_call_operand.vmem [shape: f32[128,128], index: 5, kind: input, shape index: {}]   ;;  %s12501_s6 = inlined_call_operand.vmem [shape: f32[1,128], index: 6, kind: input, shape index: {}]   ;;  %s12502_s7 = inlined_call_operand.hbm [shape: f32[2,1,128], index: 7, kind: output, shape index: {}]  }
   0x1   :  { %13 = vsyncpa [#allocation7], 0 }
   0x2   :  { %14 = vsyncpa [#allocation4], 0 }
   0x3   :  { %16 = vsyncpa [#allocation4 + $0x1], 0  ;;  %s5571_s24 = smov 0   ;;  %s5573_s25 = smov 0  }
   0x4   :  { %s5575_s26 = smov 0   ;;  %s5577_s27 = smov 0  }
   0x5 LB: > { %s5592_s28 = sadd.s32 4294967295, %s5519_s27   ;;  %s5030_s29 = sadd.s32 4294967294, %s5519_s27   ;;  %s5519_s27 = sphi %s5577_s27, %s14456_s27   ;;  %s5515_s26 = sphi %s5575_s26, %s14455_s26   ;;  %s5511_s25 = sphi %s5573_s25, %s14454_s25   ;;  %s5507_s24 = sphi %s5571_s24, %s14453_s24  }
   0x6   : > { %s5596_s30 = sadd.s32 1, %s5519_s27   ;;  %s181_s8 = sadd.s32 1, %s5515_s26 }
   0x7   : > { %s178_s9 = ssub.s32 %s5519_s27, %s5596_s30  ;;  %p191_p0 = scmp.ne.s32.totalorder %s5515_s26, %s5511_s25 }
   0x8   : > { %p179_p1 = scmp.eq.s32.totalorder %s178_s9, 0  ;;  %p192_p2 = scmp.eq.s32.totalorder %s5592_s28, 1 }
   0x9   : > { %p197_p3 = scmp.ne.s32.totalorder %s5511_s25, %s5507_s24  ;;  %p198_p4 = scmp.eq.s32.totalorder %s5030_s29, 1 }
   0xa   : > { %s5607_s10 = scalar_select %p179_p1, %s5515_s26, %s181_s8  }
   0xb   : > { %p5609_p5 = por %p192_p2, %p191_p0  ;;  %p5613_p6 = por %p198_p4, %p197_p3 }
   0xc   : > { %p5031_p7 = scmp.ge.s32.totalorder %s5519_s27, 1  ;;  %p205_p8 = scmp.lt.s32.totalorder %s5519_s27, 3 }
   0xd   : > { %p5261_p9 = scmp.eq.s32.totalorder %s5592_s28, 0  ;;  %s217_s15 = sshll.u32 %s12496_s1, 4  ;;  %s218_s15 = int_to_ptr.vmem [resolvable:$true] %s217_s15 }
   0xe   : > { %p206_p10 = pnand %p5031_p7, %p205_p8  ;;  %s227_s18 = sshll.u32 %s12497_s2, 4  ;;  %s228_s18 = int_to_ptr.vmem [resolvable:$true] %s227_s18 }
   0xf   : > { %s5521_s19 = smov [#allocation3]   ;;  %s5522_s20 = smov [#allocation6]  }
  0x10   : > { %p5250_p11 = pneg %p206_p10 }
  0x11   : > { %260 = sbr.rel (%p206_p10) target bundleno = 1630 (0x65e), region = 48 }
  0x12   : > { %p5251_p12 = pnand %p5261_p9, %p5250_p11 }
  0x14   : > { %5253 = dma.vmem_to_smem (!%p5251_p12), %s218_s15, 32, %s5521_s19, [#allocation5]  }
  0x15   : > { %5256 = dma.vmem_to_smem (!%p5251_p12), %s228_s18, 16, %s5522_s20, [#allocation7]  }
  0x16   : > { %5494 = dma.done.wait (%p5261_p9), [#allocation5], 32  }
  0x17   : > { %5496 = vsyncadd (%p5261_p9), [#allocation5], 4294967264 }
  0x18   : > { %5498 = dma.done.wait (%p5261_p9), [#allocation7], 16  }
  0x19   : > { %5500 = vsyncadd (%p5261_p9), [#allocation7], 4294967280 }
  0x1a   : > { %272 = sfence }
  0x1b   : > { %p298_p13 = scmp.lt.s32.totalorder %s5592_s28, 1  ;;  %s322_s21 = sld [smem:[#allocation3]]  ;;  %vm512_vm0 = vcmask 1046528   ;;  %vm963_vm1 = vcmask 1045504  }
  0x1c   : > { %s5052_s22 = sld [smem:[#allocation3 + $0x1]] }
  0x1d   : > { %s299_s23 = scalar_select %p298_p13, %s5592_s28, 1 }
  0x1e   : > { %s5058_s29 = sld [smem:[#allocation3 + $0x2]] }
  0x1f   : > { %s5239_s8 = smul.u32 288, %s299_s23  ;;  %s5064_s9 = sld [smem:[#allocation3 + $0x3]] }
  0x20   : > { %s5070_s13 = sld [smem:[#allocation3 + $0x4]] }
  0x21   : > { %s5641_s16 = scalar_lea.vmem %s12495_s0, %s5239_s8  ;;  %v5643_v0 = vstv %s322_s21  ;;  %s5076_s17 = sld [smem:[#allocation3 + $0x5]] }
  0x22   : > { %v310_v1 = vld [vmem:[%s5641_s16 + $0x10] sm:$0xff]  ;;  %v5647_v3 = vstv %s5052_s22  ;;  %s5649_s18 = sld [smem:[#allocation3 + $0x6]]  ;;  %v5652_v4 = vld [vmem:[%s5641_s16 + $0x18] sm:$0xff] }
  0x23   : > { %v5041_v2 = vld [vmem:[%s5641_s16 + $0x30] sm:$0xff]  ;;  %v326_v6 = vmul.f32 %v5643_v0, %v310_v1  ;;  %s5088_s19 = sld [smem:[#allocation3 + $0x7]]  ;;  %v5658_v8 = vld [vmem:[%s5641_s16 + $0x38] sm:$0xff] }
  0x24   : > { %v5045_v5 = vld [vmem:[%s5641_s16 + $0x50] sm:$0xff]  ;;  %v386_v7 = vmul.f32 %v5041_v2, %v5647_v3  ;;  %v5660_v9 = vstv %s5058_s29  ;;  %s5662_s20 = sld [smem:[#allocation3 + $0x8]]  ;;  %v5665_v10 = vld [vmem:[%s5641_s16 + $0x58] sm:$0xff] }
  0x25   : > { %v446_v12 = vmul.f32 %v5045_v5, %v5660_v9  ;;  %v5668_v13 = vstv %s5064_s9  ;;  %s5670_s21 = sld [smem:[#allocation3 + $0x9]]  ;;  %v5102_v41 = vld [vmem:[%s5641_s16 + $0x70] sm:$0xff]  ;;  %v5783_v55 = vld [vmem:[%s5641_s16 + $0x78] sm:$0xff] }
  0x26   : > { %v390_v11 = vadd.f32 %v386_v7, %v326_v6  ;;  %v5673_v14 = vmul.f32 %v5668_v13, %v310_v1  ;;  %v5677_v15 = vmul.f32 %v5668_v13, %v5652_v4  ;;  %v5679_v16 = vstv %s5070_s13  ;;  %s5681_s22 = sld [smem:[#allocation3 + $0xa]]  ;;  %v5106_v46 = vld [vmem:[%s5641_s16 + $0x90] sm:$0xff]  ;;  %v5793_v59 = vld [vmem:[%s5641_s16 + $0x98] sm:$0xff] }
  0x27   : > { %v5684_v18 = vmul.f32 %v5041_v2, %v5679_v16  ;;  %v5688_v19 = vmul.f32 %v5658_v8, %v5679_v16  ;;  %v5690_v20 = vstv %s5076_s17  ;;  %s5692_s23 = sld [smem:[#allocation3 + $0xb]]  ;;  %v5766_v49 = vld [vmem:[%s5641_s16 + $0xb0] sm:$0xff]  ;;  %v5817_v6 = vld [vmem:[%s5641_s16 + $0xb8] sm:$0xff] }
  0x28   : > { %13190 = vst [vmem:[#allocation12_spill] sm:$0xff] %v5673_v14  ;;  %v450_v17 = vadd.f32 %v446_v12, %v390_v11  ;;  %v12520_v21 = vrot.slane %v5673_v14, 1  ;;  %v12512_v22 = vrot.slane %v5677_v15, 1  ;;  %v5697_v23 = vmul.f32 %v5045_v5, %v5690_v20  ;;  %s5703_s29 = sld [smem:[#allocation3 + $0xc]]  ;;  %v6081_v14 = vld [vmem:[%s5641_s16 + $0x28] sm:$0xff] }
  0x29   : > { %13191 = vst [vmem:[#allocation13_spill] sm:$0xff] %v5677_v15  ;;  %v5701_v24 = vmul.f32 %v5665_v10, %v5690_v20  ;;  %v12519_v25 = vrot.slane %v5684_v18, 1  ;;  %v12507_v26 = vrot.slane %v5688_v19, 1  ;;  %v5708_v27 = vstv %s5649_s18  ;;  %s5712_s8 = sld [smem:[#allocation3 + $0xd]] }
  0x2a   : > { %13192 = vst [vmem:[#allocation14_spill] sm:$0xff] %v5684_v18  ;;  %v5710_v28 = vstv %s5088_s19  ;;  %v519_v29 = vsel %vm512_vm0, %v12520_v21, %v12512_v22  ;;  %v12518_v30 = vrot.slane %v5697_v23, 1  ;;  %v5722_v32 = vmul.f32 %v5708_v27, %v310_v1  ;;  %s5724_s9 = sld [smem:[#allocation3 + $0xe]]  ;;  %v5896_v22 = vld [vmem:[%s5641_s16 + $0xd0] sm:$0xff] }
  0x2b   : > { %13193 = vst [vmem:[#allocation15_spill] sm:$0xff] %v5688_v19  ;;  %v12506_v31 = vrot.slane %v5701_v24, 1  ;;  %v526_v33 = vadd.f32 %v519_v29, %v450_v17  ;;  %v669_v34 = vsel %vm512_vm0, %v12519_v25, %v12507_v26  ;;  %v5733_v35 = vmul.f32 %v5708_v27, %v5652_v4  ;;  %s5738_s13 = sld [smem:[#allocation3 + $0xf]] }
  0x2c   : > { %13194 = vst [vmem:[#allocation16_spill] sm:$0xff] %v5697_v23  ;;  %v5736_v36 = vmul.f32 %v5041_v2, %v5710_v28  ;;  %v12515_v38 = vrot.slane %v5722_v32, 2  ;;  %v5748_v39 = vmul.f32 %v5658_v8, %v5710_v28  ;;  %v5751_v40 = vstv %s5662_s20  ;;  %s5774_s14 = sld [smem:[#allocation3 + $0x10]] }
  0x2d   : > { %13195 = vst [vmem:[#allocation17_spill] sm:$0xff] %v5701_v24  ;;  %v819_v37 = vsel %vm512_vm0, %v12518_v30, %v12506_v31  ;;  %v676_v42 = vadd.f32 %v669_v34, %v526_v33  ;;  %v12505_v43 = vrot.slane %v5733_v35, 2  ;;  %v5757_v45 = vmul.f32 %v5045_v5, %v5751_v40  ;;  %s5799_s15 = sld [smem:[#allocation3 + $0x11]]  ;;  %v5924_v30 = vld [vmem:[%s5641_s16 + $0x110] sm:$0xff] }
  0x2e   : > { %13196 = vst [vmem:[#allocation18_spill] sm:$0xff] %v5722_v32  ;;  %v12511_v44 = vrot.slane %v5736_v36, 2  ;;  %v12504_v47 = vrot.slane %v5748_v39, 2  ;;  %v5763_v48 = vmul.f32 %v5665_v10, %v5751_v40  ;;  %v5769_v50 = vstv %s5670_s21  ;;  %s5809_s17 = sld [smem:[#allocation3 + $0x12]] }
  0x2f   : > { %13197 = vst [vmem:[#allocation19_spill] sm:$0xff] %v5733_v35  ;;  %v5772_v51 = vstv %s5681_s22  ;;  %v826_v52 = vadd.f32 %v819_v37, %v676_v42  ;;  %v970_v53 = vsel %vm963_vm1, %v12515_v38, %v12505_v43  ;;  %v12510_v54 = vrot.slane %v5757_v45, 2  ;;  %s5829_s18 = sld [smem:[#allocation3 + $0x13]] }
  0x30   : > { %13198 = vst [vmem:[#allocation20_spill] sm:$0xff] %v5736_v36  ;;  %v1423_v56 = vmul.f32 %v5102_v41, %v5769_v50  ;;  %v1120_v57 = vsel %vm963_vm1, %v12511_v44, %v12504_v47  ;;  %v12503_v58 = vrot.slane %v5763_v48, 2  ;;  %v1483_v60 = vmul.f32 %v5106_v46, %v5772_v51  ;;  %s5841_s19 = sld [smem:[#allocation3 + $0x14]]  ;;  %v308_v36 = vld [vmem:[%s5641_s16] sm:$0xff] }
  0x31   : > { %13199 = vst [vmem:[#allocation21_spill] sm:$0xff] %v5748_v39  ;;  %v5797_v61 = vstv %s5692_s23  ;;  %v977_v62 = vadd.f32 %v970_v53, %v826_v52  ;;  %v5804_v1 = vstv %s5703_s29  ;;  %v5807_v2 = vstv %s5712_s8  ;;  %s5850_s20 = sld [smem:[#allocation3 + $0x15]]  ;;  %v5963_v39 = vld [vmem:[%s5641_s16 + $0x118] sm:$0xff] }
  0x32   : > { %13200 = vst [vmem:[#allocation22_spill] sm:$0xff] %v5757_v45  ;;  %v1543_v63 = vmul.f32 %v5766_v49, %v5797_v61  ;;  %v1270_v5 = vsel %vm963_vm1, %v12510_v54, %v12503_v58  ;;  %v5820_v7 = vmul.f32 %v5102_v41, %v5804_v1  ;;  %v5824_v11 = vmul.f32 %v5783_v55, %v5804_v1  ;;  %s5860_s21 = sld [smem:[#allocation3 + $0x16]] }
  0x33   : > { %13201 = vst [vmem:[#allocation23_spill] sm:$0xff] %v5763_v48  ;;  %v5827_v12 = vmul.f32 %v5106_v46, %v5807_v2  ;;  %v1127_v17 = vadd.f32 %v1120_v57, %v977_v62  ;;  %v5833_v29 = vmul.f32 %v5793_v59, %v5807_v2  ;;  %v5836_v33 = vstv %s5724_s9  ;;  %s5875_s22 = sld [smem:[#allocation3 + $0x17]]  ;;  %s5523_s9 = smov 112  }
  0x34   : > { %13202 = vst [vmem:[#allocation24_spill] sm:$0xff] %v5766_v49  ;;  %v5839_v34 = vstv %s5738_s13  ;;  %v12509_v37 = vrot.slane %v5820_v7, 1  ;;  %v12508_v42 = vrot.slane %v5824_v11, 1  ;;  %v5848_v53 = vmul.f32 %v5766_v49, %v5836_v33  ;;  %s5898_s23 = sld [smem:[#allocation3 + $0x18]] }
  0x35   : > { %13203 = vst [vmem:[#allocation25_spill] sm:$0xff] %v5817_v6  ;;  %v12514_v52 = vrot.slane %v5827_v12, 1  ;;  %v1277_v57 = vadd.f32 %v1270_v5, %v1127_v17  ;;  %v12513_v62 = vrot.slane %v5833_v29, 1  ;;  %v5855_v58 = vmul.f32 %v5817_v6, %v5836_v33  ;;  %s5929_s29 = sld [smem:[#allocation3 + $0x19]] }
  0x36   : > { %13204 = vst [vmem:[#allocation26_spill] sm:$0xff] %v5820_v7  ;;  %v5858_v47 = vmul.f32 %v5102_v41, %v5839_v34  ;;  %v1615_v43 = vsel %vm512_vm0, %v12509_v37, %v12508_v42  ;;  %v12517_v5 = vrot.slane %v5848_v53, 1  ;;  %v5870_v17 = vmul.f32 %v5783_v55, %v5839_v34  ;;  %s5938_s8 = sld [smem:[#allocation3 + $0x1a]] }
  0x37   : > { %13205 = vst [vmem:[#allocation27_spill] sm:$0xff] %v5824_v11  ;;  %v5873_v31 = vstv %s5774_s14  ;;  %v1427_v41 = vadd.f32 %v1423_v56, %v1277_v57  ;;  %v1765_v26 = vsel %vm512_vm0, %v12514_v52, %v12513_v62  ;;  %v12516_v42 = vrot.slane %v5855_v58, 1  ;;  %s6346_s13 = sld [smem:[#allocation3 + $0x1b]] }
  0x38   : > { %13206 = vst [vmem:[#allocation28_spill] sm:$0xff] %v5827_v12  ;;  %v12523_v37 = vrot.slane %v5858_v47, 2  ;;  %v12522_v54 = vrot.slane %v5870_v17, 2  ;;  %v5886_v44 = vmul.f32 %v5106_v46, %v5873_v31  ;;  %v5890_v56 = vmul.f32 %v5793_v59, %v5873_v31  ;;  %s6362_s14 = sld [smem:[#allocation3 + $0x1c]] }
  0x39   : > { %13207 = vst [vmem:[#allocation29_spill] sm:$0xff] %v5833_v29  ;;  %v5893_v57 = vstv %s5799_s15  ;;  %v1487_v62 = vadd.f32 %v1483_v60, %v1427_v41  ;;  %v1915_v52 = vsel %vm512_vm0, %v12517_v5, %v12516_v42  ;;  %v5921_v5 = vld [vmem:[%s5641_s16 + $0xf0] sm:$0xff]  ;;  %v5927_v25 = vstv %s5809_s17  ;;  %s6375_s15 = sld [smem:[#allocation3 + $0x1d]] }
  0x3a   : > { %13208 = vst [vmem:[#allocation30_spill] sm:$0xff] %v5848_v53  ;;  %v5907_v46 = vmul.f32 %v5766_v49, %v5893_v57  ;;  %v5911_v38 = vmul.f32 %v5817_v6, %v5893_v57  ;;  %v2065_v60 = vsel %vm963_vm1, %v12523_v37, %v12522_v54  ;;  %v12531_v42 = vrot.slane %v5890_v56, 2  ;;  %v5934_v37 = vld [vmem:[%s5641_s16 + $0xd8] sm:$0xff]  ;;  %s6393_s17 = sld [smem:[#allocation3 + $0x1e]] }
  0x3b   : > { %13209 = vst [vmem:[#allocation31_spill] sm:$0xff] %v5855_v58  ;;  %v1547_v21 = vadd.f32 %v1543_v63, %v1487_v62  ;;  %v2518_v41 = vmul.f32 %v5896_v22, %v5927_v25  ;;  %v5946_v63 = vld [vmem:[%s5641_s16 + $0xf8] sm:$0xff]  ;;  %v5949_v62 = vstv %s5829_s18  ;;  %v5952_v49 = vstv %s5841_s19  ;;  %s6424_s18 = sld [smem:[#allocation3 + $0x1f]] }
  0x3c   : > { %13210 = vst [vmem:[#allocation32_spill] sm:$0xff] %v5858_v47  ;;  %v5955_v54 = vstv %s5850_s20  ;;  %v13222_v11 = vrot.slane %v5911_v38, 2  ;;  %v13223_v48 = vrot.slane %v5907_v46, 2  ;;  %s6461_s19 = sld [smem:[#allocation3 + $0x20]] }
  0x3d   : > { %13211 = vst [vmem:[#allocation33_spill] sm:$0xff] %v5870_v17  ;;  %v13220_v17 = vrot.slane %v5886_v44, 2  ;;  %v1622_v29 = vadd.f32 %v1615_v43, %v1547_v21  ;;  %v5973_v35 = vmul.f32 %v5896_v22, %v5955_v54  ;;  %v5977_v21 = vmul.f32 %v5934_v37, %v5955_v54  ;;  %s6487_s20 = sld [smem:[#allocation3 + $0x21]] }
  0x3e   : > { %13212 = vst [vmem:[#allocation34_spill] sm:$0xff] %v5886_v44  ;;  %v5980_v43 = vstv %s5860_s21  ;;  %s6494_s21 = sld [smem:[#allocation3 + $0x22]] }
  0x3f   : > { %13213 = vst [vmem:[#allocation35_spill] sm:$0xff] %v5890_v56  ;;  %v2215_v58 = vsel %vm963_vm1, %v13220_v17, %v12531_v42  ;;  %v2365_v56 = vsel %vm963_vm1, %v13223_v48, %v13222_v11  ;;  %v2578_v17 = vmul.f32 %v5921_v5, %v5949_v62  ;;  %v5969_v42 = vmul.f32 %v5924_v30, %v5952_v49 }
  0x40   : > { %13214 = vst [vmem:[#allocation36_spill] sm:$0xff] %v5896_v22  ;;  %v5983_v48 = vstv %s5875_s22  ;;  %v1772_v11 = vadd.f32 %v1765_v26, %v1622_v29  ;;  %v12546_v24 = vrot.slane %v5973_v35, 1  ;;  %v12545_v47 = vrot.slane %v5977_v21, 1  ;;  %s6511_s22 = sld [smem:[#allocation3 + $0x23]] }
  0x41   : > { %13215 = vst [vmem:[#allocation37_spill] sm:$0xff] %v5907_v46  ;;  %v5991_v46 = vmul.f32 %v5946_v63, %v5980_v43  ;;  %v5995_v44 = vmul.f32 %v5924_v30, %v5983_v48  ;;  %v6001_v26 = vmul.f32 %v5963_v39, %v5983_v48  ;;  %v6004_v29 = vstv %s5898_s23  ;;  %s6516_s23 = sld [smem:[#allocation3 + $0x24]] }
  0x42   : > { %13216 = vst [vmem:[#allocation38_spill] sm:$0xff] %v5911_v38  ;;  %v5987_v38 = vmul.f32 %v5921_v5, %v5980_v43  ;;  %v1922_v53 = vadd.f32 %v1915_v52, %v1772_v11  ;;  %v2710_v45 = vsel %vm512_vm0, %v12546_v24, %v12545_v47  ;;  %v6017_v15 = vmul.f32 %v5896_v22, %v6004_v29  ;;  %v5039_v22 = vld [vmem:[%s5641_s16 + $0x20] sm:$0xff] }
  0x43   : > { %13217 = vst [vmem:[#allocation39_spill] sm:$0xff] %v5921_v5  ;;  %v12552_v7 = vrot.slane %v5991_v46, 1  ;;  %v6021_v52 = vmul.f32 %v5934_v37, %v6004_v29  ;;  %v6031_v47 = vstv %s5929_s29  ;;  %v6034_v24 = vstv %s5938_s8  ;;  %s6534_s29 = sld [smem:[#allocation3 + $0x25]] }
  0x44   : > { %13218 = vst [vmem:[#allocation40_spill] sm:$0xff] %v5924_v30  ;;  %v12553_v12 = vrot.slane %v5987_v38, 1  ;;  %v2072_v11 = vadd.f32 %v2065_v60, %v1922_v53  ;;  %v5043_v53 = vld [vmem:[%s5641_s16 + $0x40] sm:$0xff]  ;;  %s6541_s8 = sld [smem:[#allocation3 + $0x26]] }
  0x45   : > { %13219 = vst [vmem:[#allocation41_spill] sm:$0xff] %v5934_v37  ;;  %v12569_v60 = vrot.slane %v6021_v52, 2 }
  0x46   : > { %13221 = vst [vmem:[#allocation42_spill] sm:$0xff] %v5946_v63  ;;  %v6028_v19 = vsel %vm512_vm0, %v12553_v12, %v12552_v7  ;;  %v6049_v7 = vmul.f32 %v5921_v5, %v6031_v47  ;;  %v2222_v12 = vadd.f32 %v2215_v58, %v2072_v11  ;;  %v13239_v5 = vrot.slane %v6017_v15, 2 }
  0x47   : > { %13224 = vst [vmem:[#allocation43_spill] sm:$0xff] %v5963_v39 }
  0x48   : > { %13225 = vst [vmem:[#allocation44_spill] sm:$0xff] %v5973_v35  ;;  %v13234_v35 = vrot.slane %v5995_v44, 1  ;;  %v6072_v58 = vsel %vm963_vm1, %v13239_v5, %v12569_v60  ;;  %v444_v5 = vmul.f32 %v5043_v53, %v5660_v9  ;;  %v504_v60 = vmul.f32 %v5668_v13, %v308_v36 }
  0x49   : > { %13226 = vst [vmem:[#allocation45_spill] sm:$0xff] %v5977_v21  ;;  %v13233_v21 = vrot.slane %v6001_v26, 1 }
  0x4a   : > { %13227 = vst [vmem:[#allocation46_spill] sm:$0xff] %v5987_v38  ;;  %v2372_v38 = vadd.f32 %v2365_v56, %v2222_v12  ;;  %v13240_v56 = vrot.slane %v6049_v7, 2  ;;  %v513_v6 = vrot.slane %v504_v60, 1  ;;  %v955_v60 = vmul.f32 %v5708_v27, %v308_v36 }
  0x4b   : > { %13228 = vst [vmem:[#allocation47_spill] sm:$0xff] %v5991_v46  ;;  %v6043_v32 = vsel %vm512_vm0, %v13234_v35, %v13233_v21  ;;  %v6053_v46 = vmul.f32 %v5946_v63, %v6031_v47  ;;  %v6061_v35 = vmul.f32 %v5963_v39, %v6034_v24  ;;  %v6064_v21 = vld [vmem:[%s5641_s16 + $0x8] sm:$0xff] }
  0x4c   : > { %13229 = vst [vmem:[#allocation48_spill] sm:$0xff] %v5995_v44  ;;  %v324_v44 = vmul.f32 %v5643_v0, %v308_v36  ;;  %v6090_v11 = vmul.f32 %v5668_v13, %v6064_v21  ;;  %v2522_v12 = vadd.f32 %v2518_v41, %v2372_v38  ;;  %v6108_v38 = vmul.f32 %v6081_v14, %v5679_v16 }
  0x4d   : > { %13230 = vst [vmem:[#allocation49_spill] sm:$0xff] %v6001_v26  ;;  %v6057_v26 = vmul.f32 %v5924_v30, %v6034_v24  ;;  %v384_v30 = vmul.f32 %v5039_v22, %v5647_v3  ;;  %v12576_v39 = vrot.slane %v6053_v46, 2  ;;  %v12578_v18 = vrot.slane %v6061_v35, 2 }
  0x4e   : > { %13231 = vst [vmem:[#allocation50_spill] sm:$0xff] %v6017_v15  ;;  %v12579_v13 = vrot.slane %v6090_v11, 1  ;;  %v2582_v41 = vadd.f32 %v2578_v17, %v2522_v12  ;;  %v1106_v36 = vmul.f32 %v5039_v22, %v5710_v28 }
  0x4f   : > { %13232 = vst [vmem:[#allocation51_spill] sm:$0xff] %v6021_v52  ;;  %v6084_v52 = vld [vmem:[%s5641_s16 + $0x48] sm:$0xff]  ;;  %v388_v15 = vadd.f32 %v384_v30, %v324_v44  ;;  %v3310_v23 = vsel %vm963_vm1, %v13240_v56, %v12576_v39  ;;  %v13241_v63 = vrot.slane %v6057_v26, 2  ;;  %v655_v44 = vmul.f32 %v5039_v22, %v5679_v16 }
  0x50   : > { %13235 = vst [vmem:[#allocation52_spill] sm:$0xff] %v6049_v7  ;;  %v805_v39 = vmul.f32 %v5043_v53, %v5690_v20  ;;  %v6122_v16 = vmul.f32 %v5708_v27, %v6064_v21  ;;  %v2642_v17 = vadd.f32 %v5969_v42, %v2582_v41  ;;  %v5104_v42 = vld [vmem:[%s5641_s16 + $0x80] sm:$0xff]  ;;  %v1256_v22 = vmul.f32 %v5043_v53, %v5751_v40 }
  0x51   : > { %13236 = vst [vmem:[#allocation53_spill] sm:$0xff] %v6053_v46  ;;  %v6102_v30 = vsel %vm963_vm1, %v13241_v63, %v12578_v18  ;;  %v448_v37 = vadd.f32 %v444_v5, %v388_v15  ;;  %v663_v56 = vrot.slane %v655_v44, 1  ;;  %v515_v15 = vsel %vm512_vm0, %v513_v6, %v12579_v13  ;;  %v5100_v13 = vld [vmem:[%s5641_s16 + $0x60] sm:$0xff] }
  0x52   : > { %13237 = vst [vmem:[#allocation54_spill] sm:$0xff] %v6057_v26  ;;  %v12583_v63 = vrot.slane %v6108_v38, 1  ;;  %v813_v12 = vrot.slane %v805_v39, 1  ;;  %v964_v44 = vrot.slane %v955_v60, 2  ;;  %v12581_v18 = vrot.slane %v6122_v16, 2  ;;  %v5108_v41 = vld [vmem:[%s5641_s16 + $0xa0] sm:$0xff] }
  0x53   : > { %13238 = vst [vmem:[#allocation55_spill] sm:$0xff] %v6061_v35  ;;  %v6113_v35 = vmul.f32 %v6084_v52, %v5690_v20  ;;  %v524_v5 = vadd.f32 %v515_v15, %v448_v37  ;;  %v2717_v27 = vadd.f32 %v2710_v45, %v2642_v17  ;;  %v6137_v37 = vmul.f32 %v6081_v14, %v5710_v28 }
  0x54   : > { %v665_v6 = vsel %vm512_vm0, %v663_v56, %v12583_v63  ;;  %v966_v56 = vsel %vm963_vm1, %v964_v44, %v12581_v18  ;;  %v1114_v15 = vrot.slane %v1106_v36, 2  ;;  %v6147_v45 = vmul.f32 %v6084_v52, %v5751_v40 }
  0x55   : > { %v12582_v20 = vrot.slane %v6113_v35, 1  ;;  %v674_v46 = vadd.f32 %v665_v6, %v524_v5  ;;  %v2867_v60 = vadd.f32 %v6028_v19, %v2717_v27  ;;  %v12584_v28 = vrot.slane %v6137_v37, 2  ;;  %v6152_v5 = vld [vmem:[%s5641_s16 + $0x68] sm:$0xff] }
  0x56   : > { %v1421_v6 = vmul.f32 %v5100_v13, %v5769_v50  ;;  %v1264_v44 = vrot.slane %v1256_v22, 2  ;;  %v12585_v36 = vrot.slane %v6147_v45, 2  ;;  %v1481_v53 = vmul.f32 %v5104_v42, %v5772_v51 }
  0x57   : > { %v815_v39 = vsel %vm512_vm0, %v813_v12, %v12582_v20  ;;  %v6155_v12 = vld [vmem:[%s5641_s16 + $0x88] sm:$0xff]  ;;  %v1541_v18 = vmul.f32 %v5108_v41, %v5797_v61  ;;  %v3017_v40 = vadd.f32 %v6043_v32, %v2867_v60  ;;  %v1116_v19 = vsel %vm963_vm1, %v1114_v15, %v12584_v28 }
  0x58   : > { %v824_v17 = vadd.f32 %v815_v39, %v674_v46  ;;  %v6166_v46 = vld [vmem:[%s5641_s16 + $0xa8] sm:$0xff]  ;;  %v1601_v27 = vmul.f32 %v5100_v13, %v5804_v1  ;;  %v1266_v39 = vsel %vm963_vm1, %v1264_v44, %v12585_v36  ;;  %v6174_v22 = vmul.f32 %v6152_v5, %v5804_v1 }
  0x59   : > { %v1751_v63 = vmul.f32 %v5104_v42, %v5807_v2  ;;  %v6179_v32 = vmul.f32 %v6155_v12, %v5807_v2  ;;  %v6187_v36 = vmul.f32 %v6166_v46, %v5836_v33 }
  0x5a   : > { %v975_v20 = vadd.f32 %v966_v56, %v824_v17  ;;  %v3167_v56 = vadd.f32 %v6072_v58, %v3017_v40  ;;  %v1609_v60 = vrot.slane %v1601_v27, 1  ;;  %v1901_v17 = vmul.f32 %v5108_v41, %v5836_v33 }
  0x5b   : > { %v12591_v28 = vrot.slane %v6174_v22, 1  ;;  %v1759_v44 = vrot.slane %v1751_v63, 1  ;;  %v12589_v1 = vrot.slane %v6179_v32, 1  ;;  %13242 = vst [vmem:[#allocation56_spill] sm:$0xff] %v6187_v36  ;;  %v2051_v58 = vmul.f32 %v5100_v13, %v5839_v34 }
  0x5c   : > { %v1125_v15 = vadd.f32 %v1116_v19, %v975_v20  ;;  %v3317_v26 = vadd.f32 %v3310_v23, %v3167_v56  ;;  %v1909_v7 = vrot.slane %v1901_v17, 1  ;;  %v12588_v40 = vrot.slane %v6187_v36, 1  ;;  %v5166_v23 = vld [vmem:[%s5641_s16 + $0xc0] sm:$0xff] }
  0x5d   : > { %v1611_v20 = vsel %vm512_vm0, %v1609_v60, %v12591_v28  ;;  %v1761_v63 = vsel %vm512_vm0, %v1759_v44, %v12589_v1  ;;  %v6199_v33 = vmul.f32 %v6152_v5, %v5839_v34  ;;  %v2059_v27 = vrot.slane %v2051_v58, 2  ;;  %v5170_v56 = vld [vmem:[%s5641_s16 + $0xe0] sm:$0xff]  ;;  %v6227_v44 = vld [vmem:[%s5641_s16 + $0xe8] sm:$0xff] }
  0x5e   : > { %v1275_v2 = vadd.f32 %v1266_v39, %v1125_v15  ;;  %v6203_v19 = vadd.f32 %v6102_v30, %v3317_v26  ;;  %v2201_v39 = vmul.f32 %v5104_v42, %v5873_v31  ;;  %v1911_v15 = vsel %vm512_vm0, %v1909_v7, %v12588_v40  ;;  %v5174_v26 = vld [vmem:[%s5641_s16 + $0x100] sm:$0xff]  ;;  %v6224_v7 = vld [vmem:[%s5641_s16 + $0xc8] sm:$0xff] }
  0x5f   : > { %13243 = vst [vmem:[#allocation57_spill] sm:$0xff] %v6199_v33  ;;  %v12590_v60 = vrot.slane %v6199_v33, 2  ;;  %v6213_v34 = vmul.f32 %v6155_v12, %v5873_v31  ;;  %v2351_v17 = vmul.f32 %v5108_v41, %v5893_v57  ;;  %v6230_v31 = vmul.f32 %v5166_v23, %v5927_v25 }
  0x60   : > { %13244 = vst [vmem:[#allocation58_spill] sm:$0xff] %v6203_v19  ;;  %v1425_v13 = vadd.f32 %v1421_v6, %v1275_v2  ;;  %3602 = vrot.lane.b32.xlu1 %v6203_v19, %s5523_s9  ;;  %v2209_v42 = vrot.slane %v2201_v39, 2  ;;  %v6221_v6 = vmul.f32 %v6166_v46, %v5893_v57  ;;  %v6241_v39 = vld [vmem:[%s5641_s16 + $0x108] sm:$0xff]  ;;  %v6244_v40 = vmul.f32 %v5174_v26, %v5952_v49 }
  0x61   : > { %13245 = vst [vmem:[#allocation59_spill] sm:$0xff] %v6213_v34  ;;  %v2061_v41 = vsel %vm963_vm1, %v2059_v27, %v12590_v60  ;;  %v12594_v2 = vrot.slane %v6213_v34, 2  ;;  %v2359_v58 = vrot.slane %v2351_v17, 2  ;;  %v2696_v1 = vmul.f32 %v5166_v23, %v5955_v54 }
  0x62   : > { %v1485_v30 = vadd.f32 %v1481_v53, %v1425_v13  ;;  %v6237_v53 = vmul.f32 %v5170_v56, %v5949_v62  ;;  %v12602_v57 = vrot.slane %v6221_v6, 2  ;;  %v6252_v17 = vmul.f32 %v6224_v7, %v5955_v54 }
  0x63   : > { %v2211_v27 = vsel %vm963_vm1, %v2209_v42, %v12594_v2  ;;  %v2846_v60 = vmul.f32 %v5170_v56, %v5980_v43  ;;  %v2704_v19 = vrot.slane %v2696_v1, 1  ;;  %v2996_v34 = vmul.f32 %v5174_v26, %v5983_v48 }
  0x64   : > { %v1545_v13 = vadd.f32 %v1541_v18, %v1485_v30  ;;  %v6257_v18 = vmul.f32 %v6227_v44, %v5980_v43  ;;  %v2361_v28 = vsel %vm963_vm1, %v2359_v58, %v12602_v57  ;;  %v12601_v42 = vrot.slane %v6252_v17, 1 }
  0x65   : > { %v2854_v2 = vrot.slane %v2846_v60, 1  ;;  %v6267_v33 = vmul.f32 %v6241_v39, %v5983_v48  ;;  %v3004_v43 = vrot.slane %v2996_v34, 1  ;;  %v385_v57 = vmul.f32 %v6081_v14, %v5647_v3 }
  0x66   : > { %v1620_v30 = vadd.f32 %v1611_v20, %v1545_v13  ;;  %v12597_v54 = vrot.slane %v6257_v18, 1  ;;  %v3146_v20 = vmul.f32 %v5166_v23, %v6004_v29  ;;  %v6272_v13 = vmul.f32 %v6224_v7, %v6004_v29 }
  0x67   : > { %v6277_v1 = vsel %vm512_vm0, %v2704_v19, %v12601_v42  ;;  %v12600_v48 = vrot.slane %v6267_v33, 1  ;;  %v6289_v29 = vmul.f32 %v6227_v44, %v6031_v47  ;;  %v325_v42 = vmul.f32 %v5643_v0, %v6064_v21 }
  0x68   : > { %v1770_v36 = vadd.f32 %v1761_v63, %v1620_v30  ;;  %v6282_v60 = vsel %vm512_vm0, %v2854_v2, %v12597_v54  ;;  %v3296_v63 = vmul.f32 %v5170_v56, %v6031_v47  ;;  %v3154_v23 = vrot.slane %v3146_v20, 2 }
  0x69   : > { %v12598_v58 = vrot.slane %v6272_v13, 2  ;;  %v6294_v19 = vsel %vm512_vm0, %v3004_v43, %v12600_v48  ;;  %v3446_v2 = vmul.f32 %v5174_v26, %v6034_v24  ;;  %v6299_v54 = vmul.f32 %v6241_v39, %v6034_v24 }
  0x6a   : > { %v1920_v34 = vadd.f32 %v1911_v15, %v1770_v36  ;;  %v3304_v30 = vrot.slane %v3296_v63, 2  ;;  %v12599_v47 = vrot.slane %v6289_v29, 2  ;;  %v327_v15 = vmul.f32 %v5643_v0, %v5652_v4  ;;  %v13253_v0 = vld [vmem:[#allocation14_spill] sm:$0xff] }
  0x6b   : > { %v6304_v56 = vsel %vm963_vm1, %v3154_v23, %v12598_v58  ;;  %v3454_v43 = vrot.slane %v3446_v2, 2  ;;  %v12603_v20 = vrot.slane %v6299_v54, 2  ;;  %v387_v26 = vmul.f32 %v5658_v8, %v5647_v3 }
  0x6c   : > { %v2070_v36 = vadd.f32 %v2061_v41, %v1920_v34  ;;  %v447_v24 = vmul.f32 %v5665_v10, %v5660_v9  ;;  %v6317_v63 = vsel %vm963_vm1, %v3304_v30, %v12599_v47  ;;  %v6321_v34 = vmul.f32 %v5783_v55, %v5769_v50  ;;  %v13247_v30 = vld [vmem:[#allocation41_spill] sm:$0xff] }
  0x6d   : > { %v6325_v23 = vmul.f32 %v5793_v59, %v5772_v51  ;;  %v6330_v2 = vsel %vm963_vm1, %v3454_v43, %v12603_v20  ;;  %v391_v58 = vadd.f32 %v387_v26, %v327_v15  ;;  %v6338_v47 = vmul.f32 %v13247_v30, %v5927_v25  ;;  %v13248_v26 = vld [vmem:[#allocation42_spill] sm:$0xff] }
  0x6e   : > { %v2220_v41 = vadd.f32 %v2211_v27, %v2070_v36  ;;  %v13246_v27 = vld [vmem:[#allocation25_spill] sm:$0xff]  ;;  %v445_v43 = vmul.f32 %v6084_v52, %v5660_v9  ;;  %v6350_v20 = vmul.f32 %v13248_v26, %v5949_v62  ;;  %v13254_v21 = vrot.slane %v13253_v0, 1 }
  0x6f   : > { %v6334_v36 = vmul.f32 %v13246_v27, %v5797_v61  ;;  %v451_v15 = vadd.f32 %v447_v24, %v391_v58  ;;  %v13250_v27 = vld [vmem:[#allocation12_spill] sm:$0xff]  ;;  %v13255_v3 = vrot.slane %v6108_v38, 1  ;;  %v389_v52 = vadd.f32 %v385_v57, %v325_v42  ;;  %v13262_v38 = vld [vmem:[#allocation13_spill] sm:$0xff] }
  0x70   : > { %v2370_v48 = vadd.f32 %v2361_v28, %v2220_v41  ;;  %13249 = vst [vmem:[#allocation60_spill] sm:$0xff] %v6350_v20  ;;  %v13251_v30 = vrot.slane %v13250_v27, 1  ;;  %v13252_v28 = vrot.slane %v6090_v11, 1  ;;  %v13256_v58 = vld [vmem:[#allocation16_spill] sm:$0xff]  ;;  %v13258_v20 = vrot.slane %v6113_v35, 1  ;;  %v13259_v11 = vld [vmem:[#allocation18_spill] sm:$0xff] }
  0x71   : > { %v667_v14 = vsel %vm512_vm0, %v13255_v3, %v13254_v21  ;;  %v13257_v24 = vrot.slane %v13256_v58, 1  ;;  %v13260_v26 = vrot.slane %v13259_v11, 2  ;;  %v13263_v0 = vrot.slane %v13262_v38, 1  ;;  %v13265_v42 = vld [vmem:[#allocation20_spill] sm:$0xff]  ;;  %v13268_v3 = vld [vmem:[#allocation22_spill] sm:$0xff] }
  0x72   : > { %v517_v41 = vsel %vm512_vm0, %v13252_v28, %v13251_v30  ;;  %v2520_v9 = vadd.f32 %v6230_v31, %v2370_v48  ;;  %v13261_v30 = vrot.slane %v6122_v16, 2  ;;  %v13264_v31 = vld [vmem:[#allocation43_spill] sm:$0xff]  ;;  %v13266_v48 = vrot.slane %v13265_v42, 2  ;;  %v13273_v42 = vld [vmem:[#allocation26_spill] sm:$0xff] }
  0x73   : > { %v817_v27 = vsel %vm512_vm0, %v13258_v20, %v13257_v24  ;;  %v527_v21 = vadd.f32 %v13263_v0, %v451_v15  ;;  %v6381_v57 = vmul.f32 %v13264_v31, %v5952_v49  ;;  %v13267_v35 = vrot.slane %v6137_v37, 2 }
  0x74   : > { %v968_v28 = vsel %vm963_vm1, %v13261_v30, %v13260_v26  ;;  %v13269_v58 = vrot.slane %v13268_v3, 2  ;;  %v13270_v16 = vrot.slane %v6147_v45, 2  ;;  %v2580_v15 = vadd.f32 %v6237_v53, %v2520_v9  ;;  %v13271_v30 = vld [vmem:[#allocation15_spill] sm:$0xff]  ;;  %v13283_v3 = vld [vmem:[#allocation32_spill] sm:$0xff] }
  0x75   : > { %v1118_v20 = vsel %vm963_vm1, %v13267_v35, %v13266_v48  ;;  %v449_v24 = vadd.f32 %v445_v43, %v389_v52  ;;  %v6398_v11 = vmul.f32 %v6152_v5, %v5769_v50  ;;  %v6402_v37 = vmul.f32 %v6155_v12, %v5772_v51  ;;  %v13276_v50 = vld [vmem:[#allocation28_spill] sm:$0xff] }
  0x76   : > { %v1268_v26 = vsel %vm963_vm1, %v13270_v16, %v13269_v58  ;;  %v13272_v38 = vrot.slane %v13271_v30, 1  ;;  %v6408_v45 = vmul.f32 %v6166_v46, %v5797_v61  ;;  %v13274_v48 = vrot.slane %v13273_v42, 1  ;;  %v13279_v46 = vld [vmem:[#allocation30_spill] sm:$0xff] }
  0x77   : > { %v13275_v53 = vrot.slane %v6174_v22, 1  ;;  %v13277_v5 = vrot.slane %v13276_v50, 1  ;;  %v13278_v9 = vrot.slane %v6179_v32, 1  ;;  %v2640_v61 = vadd.f32 %v6244_v40, %v2580_v15  ;;  %v13281_v22 = vld [vmem:[#allocation56_spill] sm:$0xff]  ;;  %v13285_v32 = vld [vmem:[#allocation57_spill] sm:$0xff]  ;;  %v13289_v40 = vld [vmem:[#allocation34_spill] sm:$0xff] }
  0x78   : > { %v677_v0 = vadd.f32 %v13272_v38, %v527_v21  ;;  %v525_v12 = vadd.f32 %v517_v41, %v449_v24  ;;  %v13280_v52 = vrot.slane %v13279_v46, 1  ;;  %v13282_v21 = vrot.slane %v13281_v22, 1  ;;  %v13287_v38 = vld [vmem:[#allocation17_spill] sm:$0xff]  ;;  %v13291_v41 = vld [vmem:[#allocation59_spill] sm:$0xff] }
  0x79   : > { %v6415_v43 = vsel %vm512_vm0, %v13275_v53, %v13274_v48  ;;  %v6422_v51 = vsel %vm512_vm0, %v13278_v9, %v13277_v5  ;;  %v13284_v58 = vrot.slane %v13283_v3, 2  ;;  %v13286_v16 = vrot.slane %v13285_v32, 2  ;;  %v13293_v50 = vld [vmem:[#allocation37_spill] sm:$0xff]  ;;  %v13296_v3 = vld [vmem:[#allocation19_spill] sm:$0xff] }
  0x7a   : > { %v6432_v35 = vsel %vm512_vm0, %v13282_v21, %v13280_v52  ;;  %v13288_v42 = vrot.slane %v13287_v38, 1  ;;  %v13290_v15 = vrot.slane %v13289_v40, 2  ;;  %v13292_v24 = vrot.slane %v13291_v41, 2 }
  0x7b   : > { %v6439_v30 = vsel %vm963_vm1, %v13286_v16, %v13284_v58  ;;  %v13294_v5 = vrot.slane %v13293_v50, 2  ;;  %v13295_v9 = vrot.slane %v6221_v6, 2  ;;  %v6459_v52 = vmul.f32 %v6224_v7, %v5927_v25  ;;  %v13298_v25 = vld [vmem:[#allocation44_spill] sm:$0xff] }
  0x7c   : > { %v827_v48 = vadd.f32 %v13288_v42, %v677_v0  ;;  %v6448_v53 = vsel %vm963_vm1, %v13292_v24, %v13290_v15  ;;  %v2715_v0 = vadd.f32 %v6277_v1, %v2640_v61  ;;  %v675_v22 = vadd.f32 %v667_v14, %v525_v12  ;;  %v13305_v42 = vld [vmem:[#allocation46_spill] sm:$0xff] }
  0x7d   : > { %v6455_v46 = vsel %vm963_vm1, %v13295_v9, %v13294_v5  ;;  %v6466_v21 = vmul.f32 %v6227_v44, %v5949_v62  ;;  %v6470_v6 = vmul.f32 %v6241_v39, %v5952_v49  ;;  %v13297_v58 = vrot.slane %v13296_v3, 2 }
  0x7e   : > { %v13299_v7 = vrot.slane %v13298_v25, 1  ;;  %v13300_v16 = vrot.slane %v6252_v17, 1  ;;  %v6482_v14 = vstv %s6346_s13  ;;  %v6485_v61 = vstv %s6362_s14  ;;  %v13303_v17 = vld [vmem:[#allocation21_spill] sm:$0xff]  ;;  %s6555_s13 = sld [smem:[#allocation3 + $0x27]] }
  0x7f   : > { %v978_v32 = vadd.f32 %v13297_v58, %v827_v48  ;;  %13301 = vst [vmem:[#allocation12_spill] sm:$0xff] %v6482_v14  ;;  %v2865_v62 = vadd.f32 %v6282_v60, %v2715_v0  ;;  %v825_v49 = vadd.f32 %v817_v27, %v675_v22  ;;  %v337_v44 = vmul.f32 %v6482_v14, %v5652_v4  ;;  %v13312_v22 = vld [vmem:[#allocation48_spill] sm:$0xff]  ;;  %s6563_s14 = sld [smem:[#allocation3 + $0x28]] }
  0x80   : > { %v6479_v1 = vsel %vm512_vm0, %v13300_v16, %v13299_v7  ;;  %13302 = vst [vmem:[#allocation14_spill] sm:$0xff] %v6485_v61  ;;  %v397_v39 = vmul.f32 %v5658_v8, %v6485_v61  ;;  %v13304_v12 = vrot.slane %v13303_v17, 2  ;;  %v13306_v48 = vrot.slane %v13305_v42, 1 }
  0x81   : > { %v13307_v40 = vrot.slane %v6257_v18, 1  ;;  %v6506_v60 = vstv %s6375_s15  ;;  %v6509_v27 = vstv %s6393_s17  ;;  %v3015_v41 = vadd.f32 %v6294_v19, %v2865_v62  ;;  %v13310_v18 = vld [vmem:[#allocation23_spill] sm:$0xff]  ;;  %s6578_s15 = sld [smem:[#allocation3 + $0x29]] }
  0x82   : > { %v1128_v38 = vadd.f32 %v13304_v12, %v978_v32  ;;  %13308 = vst [vmem:[#allocation16_spill] sm:$0xff] %v6506_v60  ;;  %v976_v24 = vadd.f32 %v968_v28, %v825_v49  ;;  %v401_v50 = vadd.f32 %v397_v39, %v337_v44  ;;  %v457_v5 = vmul.f32 %v5665_v10, %v6506_v60  ;;  %v13316_v49 = vld [vmem:[#allocation50_spill] sm:$0xff]  ;;  %s6589_s17 = sld [smem:[#allocation3 + $0x2a]] }
  0x83   : > { %v6503_v15 = vsel %vm512_vm0, %v13307_v40, %v13306_v48  ;;  %13309 = vst [vmem:[#allocation18_spill] sm:$0xff] %v6509_v27  ;;  %v13311_v9 = vrot.slane %v13310_v18, 2  ;;  %v13313_v3 = vrot.slane %v13312_v22, 1  ;;  %v13314_v58 = vrot.slane %v6267_v33, 1  ;;  %v13319_v48 = vld [vmem:[#allocation52_spill] sm:$0xff] }
  0x84   : > { %v6529_v19 = vmul.f32 %v6509_v27, %v5652_v4  ;;  %v6532_v28 = vstv %s6424_s18  ;;  %v3165_v25 = vadd.f32 %v6304_v56, %v3015_v41  ;;  %v1126_v7 = vadd.f32 %v1118_v20, %v976_v24  ;;  %s6604_s18 = sld [smem:[#allocation3 + $0x2b]] }
  0x85   : > { %v1278_v0 = vadd.f32 %v13311_v9, %v1128_v38  ;;  %v6525_v32 = vsel %vm512_vm0, %v13314_v58, %v13313_v3  ;;  %13315 = vst [vmem:[#allocation13_spill] sm:$0xff] %v6532_v28  ;;  %v461_v16 = vadd.f32 %v457_v5, %v401_v50  ;;  %v6539_v62 = vmul.f32 %v5658_v8, %v6532_v28  ;;  %v13323_v9 = vld [vmem:[#allocation54_spill] sm:$0xff] }
  0x86   : > { %v13317_v44 = vrot.slane %v13316_v49, 2  ;;  %v13318_v39 = vrot.slane %v6272_v13, 2  ;;  %v12609_v56 = vrot.slane %v6529_v19, 1  ;;  %v6553_v20 = vstv %s6461_s19  ;;  %s6617_s19 = sld [smem:[#allocation3 + $0x2c]] }
  0x87   : > { %v1428_v33 = vadd.f32 %v6321_v34, %v1278_v0  ;;  %v3315_v12 = vadd.f32 %v6317_v63, %v3165_v25  ;;  %v1276_v38 = vadd.f32 %v1268_v26, %v1126_v7  ;;  %v12608_v42 = vrot.slane %v6539_v62, 1  ;;  %v13326_v25 = vld [vmem:[#allocation27_spill] sm:$0xff] }
  0x88   : > { %v6549_v17 = vsel %vm963_vm1, %v13318_v39, %v13317_v44  ;;  %v6561_v34 = vmul.f32 %v5665_v10, %v6553_v20  ;;  %v13320_v40 = vrot.slane %v13319_v48, 2  ;;  %v13321_v41 = vrot.slane %v6289_v29, 2 }
  0x89   : > { %v1488_v13 = vadd.f32 %v6325_v23, %v1428_v33  ;;  %v552_v63 = vadd.f32 %v12609_v56, %v461_v16  ;;  %v6576_v26 = vstv %s6487_s20  ;;  %v6581_v50 = vadd.f32 %v6330_v2, %v3315_v12  ;;  %s6630_s20 = sld [smem:[#allocation3 + $0x2d]]  ;;  %v13340_v56 = vld [vmem:[#allocation38_spill] sm:$0xff] }
  0x8a   : > { %v6571_v24 = vsel %vm963_vm1, %v13321_v41, %v13320_v40  ;;  %v1426_v23 = vadd.f32 %v6398_v11, %v1276_v38  ;;  %v12607_v5 = vrot.slane %v6561_v34, 1  ;;  %v6587_v29 = vmul.f32 %v6576_v26, %v5652_v4  ;;  %v13329_v38 = vld [vmem:[#allocation29_spill] sm:$0xff] }
  0x8b   : > { %13322 = vst [vmem:[#allocation43_spill] sm:$0xff] %v6581_v50  ;;  %v1548_v18 = vadd.f32 %v6334_v36, %v1488_v13  ;;  %v13324_v0 = vrot.slane %v13323_v9, 2  ;;  %v13325_v22 = vrot.slane %v6299_v54, 2  ;;  %v702_v11 = vadd.f32 %v12608_v42, %v552_v63  ;;  %3598 = vrot.lane.b32.xlu0 %v6581_v50, %s5523_s9  ;;  %v13332_v9 = vld [vmem:[#allocation31_spill] sm:$0xff] }
  0x8c   : > { %v6602_v3 = vstv %s6494_s21  ;;  %v1486_v4 = vadd.f32 %v6402_v37, %v1426_v23  ;;  %v12606_v36 = vrot.slane %v6587_v29, 2  ;;  %v6615_v58 = vstv %s6511_s22  ;;  %s6639_s21 = sld [smem:[#allocation3 + $0x2e]]  ;;  %v6808_v50 = vld [vmem:[%s5641_s16 + $0x10] sm:$0xff] }
  0x8d   : > { %v6597_v2 = vsel %vm963_vm1, %v13325_v22, %v13324_v0  ;;  %v6612_v54 = vmul.f32 %v5658_v8, %v6602_v3  ;;  %v13327_v7 = vrot.slane %v13326_v25, 1  ;;  %v852_v33 = vadd.f32 %v12607_v5, %v702_v11  ;;  %s6648_s22 = sld [smem:[#allocation3 + $0x2f]] }
  0x8e   : > { %v6625_v37 = vmul.f32 %v5665_v10, %v6615_v58  ;;  %v6628_v49 = vstv %s6516_s23  ;;  %v1546_v8 = vadd.f32 %v6408_v45, %v1486_v4  ;;  %v6637_v12 = vstv %s6534_s29  ;;  %s6660_s23 = sld [smem:[#allocation3 + $0x30]]  ;;  %v13334_v4 = vld [vmem:[#allocation25_spill] sm:$0xff] }
  0x8f   : > { %v1623_v16 = vadd.f32 %v13327_v7, %v1548_v18  ;;  %v12605_v44 = vrot.slane %v6612_v54, 2  ;;  %v1434_v39 = vmul.f32 %v5783_v55, %v6628_v49  ;;  %13328 = vst [vmem:[#allocation20_spill] sm:$0xff] %v6637_v12  ;;  %v13330_v13 = vrot.slane %v13329_v38, 1  ;;  %s6672_s29 = sld [smem:[#allocation3 + $0x31]]  ;;  %v13335_v38 = vld [vmem:[#allocation33_spill] sm:$0xff] }
  0x90   : > { %v1003_v48 = vadd.f32 %v12606_v36, %v852_v33  ;;  %v12604_v40 = vrot.slane %v6625_v37, 2  ;;  %v1494_v45 = vmul.f32 %v5793_v59, %v6637_v12  ;;  %v1621_v41 = vadd.f32 %v6415_v43, %v1546_v8 }
  0x91   : > { %v1773_v10 = vadd.f32 %v13330_v13, %v1623_v16  ;;  %v6652_v63 = vstv %s6541_s8  ;;  %v6655_v23 = vstv %s6555_s13  ;;  %v6658_v18 = vstv %s6563_s14  ;;  %s6685_s8 = sld [smem:[#allocation3 + $0x32]] }
  0x92   : > { %13331 = vst [vmem:[#allocation22_spill] sm:$0xff] %v6652_v63  ;;  %v13333_v0 = vrot.slane %v13332_v9, 1  ;;  %v1153_v11 = vadd.f32 %v12605_v44, %v1003_v48  ;;  %v1554_v25 = vmul.f32 %v13334_v4, %v6652_v63  ;;  %v6670_v43 = vmul.f32 %v5783_v55, %v6655_v23  ;;  %s6696_s13 = sld [smem:[#allocation3 + $0x33]] }
  0x93   : > { %v1771_v7 = vadd.f32 %v6422_v51, %v1621_v41  ;;  %v6677_v16 = vmul.f32 %v5793_v59, %v6658_v18  ;;  %v6680_v33 = vstv %s6578_s15  ;;  %v6683_v8 = vstv %s6589_s17  ;;  %s6707_s14 = sld [smem:[#allocation3 + $0x34]] }
  0x94   : > { %v1923_v22 = vadd.f32 %v13333_v0, %v1773_v10  ;;  %v13336_v13 = vrot.slane %v13335_v38, 2  ;;  %v1303_v48 = vadd.f32 %v12604_v40, %v1153_v11  ;;  %v6694_v41 = vmul.f32 %v13334_v4, %v6680_v33  ;;  %v13337_v11 = vld [vmem:[#allocation35_spill] sm:$0xff]  ;;  %s6731_s15 = sld [smem:[#allocation3 + $0x35]]  ;;  %v13348_v0 = vld [vmem:[#allocation60_spill] sm:$0xff] }
  0x95   : > { %v1921_v9 = vadd.f32 %v6432_v35, %v1771_v7  ;;  %v6705_v38 = vstv %s6604_s18  ;;  %v6719_v5 = vstv %s6617_s19  ;;  %v6722_v42 = vstv %s6630_s20  ;;  %s6966_s17 = sld [smem:[#allocation3 + $0x36]] }
  0x96   : > { %v2073_v10 = vadd.f32 %v13336_v13, %v1923_v22  ;;  %v6702_v22 = vmul.f32 %v5783_v55, %v6683_v8  ;;  %v13338_v13 = vrot.slane %v13337_v11, 2  ;;  %v1438_v44 = vadd.f32 %v1434_v39, %v1303_v48  ;;  %13339 = vst [vmem:[#allocation15_spill] sm:$0xff] %v6722_v42  ;;  %s6972_s18 = sld [smem:[#allocation3 + $0x37]] }
  0x97   : > { %v6714_v35 = vmul.f32 %v5793_v59, %v6705_v38  ;;  %v2071_v7 = vadd.f32 %v6439_v30, %v1921_v9  ;;  %v13341_v11 = vrot.slane %v13340_v56, 2  ;;  %v6729_v59 = vmul.f32 %v13334_v4, %v6719_v5  ;;  %v13342_v9 = vld [vmem:[#allocation41_spill] sm:$0xff]  ;;  %s6982_s19 = sld [smem:[#allocation3 + $0x38]] }
  0x98   : > { %v2223_v40 = vadd.f32 %v13338_v13, %v2073_v10  ;;  %v1498_v39 = vadd.f32 %v1494_v45, %v1438_v44  ;;  %v6736_v13 = vmul.f32 %v13342_v9, %v6722_v42  ;;  %v6739_v56 = vstv %s6639_s21  ;;  %s6996_s20 = sld [smem:[#allocation3 + $0x39]] }
  0x99   : > { %v2221_v30 = vadd.f32 %v6448_v53, %v2071_v7  ;;  %13343 = vst [vmem:[#allocation26_spill] sm:$0xff] %v6739_v56  ;;  %v6756_v55 = vstv %s6660_s23  ;;  %v6759_v36 = vstv %s6672_s29  ;;  %v6777_v4 = vstv %s6696_s13  ;;  %s7023_s21 = sld [smem:[#allocation3 + $0x3a]] }
  0x9a   : > { %v2373_v10 = vadd.f32 %v13341_v11, %v2223_v40  ;;  %v6742_v40 = vstv %s6648_s22  ;;  %v1558_v45 = vadd.f32 %v1554_v25, %v1498_v39  ;;  %v13345_v11 = vld [vmem:[#allocation42_spill] sm:$0xff]  ;;  %13346 = vst [vmem:[#allocation30_spill] sm:$0xff] %v6756_v55  ;;  %s7035_s22 = sld [smem:[#allocation3 + $0x3b]] }
  0x9b   : > { %13344 = vst [vmem:[#allocation28_spill] sm:$0xff] %v6742_v40  ;;  %v6748_v48 = vmul.f32 %v13345_v11, %v6739_v56  ;;  %v2371_v53 = vadd.f32 %v6455_v46, %v2221_v30  ;;  %v6753_v7 = vmul.f32 %v13264_v31, %v6742_v40  ;;  %v6770_v46 = vmul.f32 %v13345_v11, %v6759_v36  ;;  %v6825_v56 = vld [vmem:[%s5641_s16 + $0x30] sm:$0xff]  ;;  %s7053_s23 = sld [smem:[#allocation3 + $0x3c]] }
  0x9c   : > { %v2523_v44 = vadd.f32 %v6338_v47, %v2373_v10  ;;  %13347 = vst [vmem:[#allocation56_spill] sm:$0xff] %v6759_v36  ;;  %v13349_v47 = vrot.slane %v6670_v43, 1  ;;  %v6766_v10 = vmul.f32 %v13342_v9, %v6756_v55  ;;  %v6774_v30 = vstv %s6685_s8  ;;  %s7122_s29 = sld [smem:[#allocation3 + $0x3d]] }
  0x9d   : > { %v2521_v39 = vadd.f32 %v6459_v52, %v2371_v53  ;;  %13350 = vst [vmem:[#allocation32_spill] sm:$0xff] %v6774_v30  ;;  %v6790_v52 = vmul.f32 %v13264_v31, %v6774_v30  ;;  %v6794_v53 = vmul.f32 %v13342_v9, %v6777_v4  ;;  %v13356_v55 = vrot.slane %v6694_v41, 1  ;;  %s7135_s8 = sld [smem:[#allocation3 + $0x3e]] }
  0x9e   : > { %v2583_v51 = vadd.f32 %v13348_v0, %v2523_v44  ;;  %v1648_v25 = vadd.f32 %v13349_v47, %v1558_v45  ;;  %13351 = vst [vmem:[#allocation57_spill] sm:$0xff] %v6777_v4  ;;  %v6780_v0 = vstv %s6707_s14  ;;  %v13353_v45 = vrot.slane %v6677_v16, 1  ;;  %s7158_s13 = sld [smem:[#allocation3 + $0x3f]] }
  0x9f   : > { %13352 = vst [vmem:[#allocation17_spill] sm:$0xff] %v6780_v0  ;;  %v2581_v36 = vadd.f32 %v6466_v21, %v2521_v39  ;;  %v6805_v39 = vstv %s6731_s15  ;;  %v336_v30 = vmul.f32 %v6808_v50, %v6482_v14  ;;  %s7178_s14 = sld [smem:[#allocation3 + $0x40]] }
  0xa0   : > { %v2643_v44 = vadd.f32 %v6381_v57, %v2583_v51  ;;  %v1798_v47 = vadd.f32 %v13353_v45, %v1648_v25  ;;  %v6798_v57 = vmul.f32 %v13345_v11, %v6780_v0  ;;  %v13354_v51 = vld [vmem:[#allocation45_spill] sm:$0xff]  ;;  %13357 = vst [vmem:[#allocation34_spill] sm:$0xff] %v6805_v39  ;;  %v13358_v0 = vld [vmem:[#allocation47_spill] sm:$0xff]  ;;  %v6822_v40 = vmul.f32 %v13264_v31, %v6805_v39  ;;  %s7186_s15 = sld [smem:[#allocation3 + $0x41]] }
  0xa1   : > { %v13355_v25 = vrot.slane %v13354_v51, 1  ;;  %v2641_v9 = vadd.f32 %v6470_v6, %v2581_v36  ;;  %v396_v6 = vmul.f32 %v6825_v56, %v6485_v61  ;;  %v6831_v11 = vld [vmem:[%s5641_s16 + $0x50] sm:$0xff]  ;;  %v6841_v31 = vmul.f32 %v6825_v56, %v6532_v28 }
  0xa2   : > { %v1948_v21 = vadd.f32 %v13356_v55, %v1798_v47  ;;  %v13360_v55 = vrot.slane %v6702_v22, 2  ;;  %v13365_v51 = vrot.slane %v6714_v35, 2  ;;  %v6853_v14 = vmul.f32 %v6831_v11, %v6553_v20  ;;  %v13367_v28 = vld [vmem:[#allocation51_spill] sm:$0xff] }
  0xa3   : > { %v2718_v45 = vadd.f32 %v13355_v25, %v2643_v44  ;;  %v13359_v44 = vrot.slane %v13358_v0, 1  ;;  %v2716_v36 = vadd.f32 %v6479_v1, %v2641_v9  ;;  %v456_v0 = vmul.f32 %v6831_v11, %v6506_v60  ;;  %13362 = vst [vmem:[#allocation37_spill] sm:$0xff] %v6841_v31 }
  0xa4   : > { %v2098_v47 = vadd.f32 %v13360_v55, %v1948_v21  ;;  %v13363_v21 = vld [vmem:[#allocation49_spill] sm:$0xff]  ;;  %v400_v9 = vadd.f32 %v396_v6, %v336_v30  ;;  %13366 = vst [vmem:[#allocation19_spill] sm:$0xff] %v6853_v14  ;;  %v13368_v39 = vrot.slane %v13367_v28, 2  ;;  %v6861_v30 = vmul.f32 %v6808_v50, %v6576_v26 }
  0xa5   : > { %v2868_v25 = vadd.f32 %v13359_v44, %v2718_v45  ;;  %v6837_v45 = vmul.f32 %v6808_v50, %v6509_v27  ;;  %v13364_v44 = vrot.slane %v13363_v21, 1  ;;  %v2866_v61 = vadd.f32 %v6503_v15, %v2716_v36 }
  0xa6   : > { %v2248_v4 = vadd.f32 %v13365_v51, %v2098_v47  ;;  %v12641_v27 = vrot.slane %v6841_v31, 1  ;;  %v460_v51 = vadd.f32 %v456_v0, %v400_v9  ;;  %13370 = vst [vmem:[#allocation44_spill] sm:$0xff] %v6861_v30  ;;  %v13371_v47 = vrot.slane %v6529_v19, 1 }
  0xa7   : > { %13361 = vst [vmem:[#allocation59_spill] sm:$0xff] %v6837_v45  ;;  %v3018_v55 = vadd.f32 %v13364_v44, %v2868_v25  ;;  %v12642_v60 = vrot.slane %v6837_v45, 1  ;;  %v13369_v25 = vrot.slane %v6729_v59, 2  ;;  %v3016_v15 = vadd.f32 %v6525_v32, %v2866_v61  ;;  %v5316_v45 = vld [vmem:[%s5641_s16 + $0x58] sm:$0xff] }
  0xa8   : > { %v13372_v36 = vrot.slane %v6539_v62, 1  ;;  %v12639_v19 = vrot.slane %v6861_v30, 2  ;;  %v13398_v1 = vrot.slane %v6702_v22, 2  ;;  %v13402_v22 = vld [vmem:[#allocation36_spill] sm:$0xff] }
  0xa9   : > { %v3168_v21 = vadd.f32 %v13368_v39, %v3018_v55  ;;  %v2398_v44 = vadd.f32 %v13369_v25, %v2248_v4  ;;  %v544_v6 = vsel %vm512_vm0, %v12642_v60, %v13371_v47  ;;  %v12640_v4 = vrot.slane %v6853_v14, 1  ;;  %v13373_v39 = vld [vmem:[#allocation53_spill] sm:$0xff] }
  0xaa   : > { %v694_v28 = vsel %vm512_vm0, %v12641_v27, %v13372_v36  ;;  %v13374_v0 = vrot.slane %v13373_v39, 2  ;;  %v551_v32 = vadd.f32 %v544_v6, %v460_v51  ;;  %v3166_v9 = vadd.f32 %v6549_v17, %v3016_v15 }
  0xab   : > { %v2533_v61 = vadd.f32 %v6736_v13, %v2398_v44  ;;  %v13375_v25 = vrot.slane %v6561_v34, 1  ;;  %v6887_v47 = vmul.f32 %v6825_v56, %v6602_v3  ;;  %v13378_v13 = vld [vmem:[#allocation55_spill] sm:$0xff]  ;;  %v13381_v15 = vrot.slane %v6587_v29, 2 }
  0xac   : > { %v3318_v55 = vadd.f32 %v13374_v0, %v3168_v21  ;;  %v6891_v21 = vmul.f32 %v6831_v11, %v6615_v58  ;;  %v13379_v44 = vrot.slane %v13378_v13, 2  ;;  %v701_v34 = vadd.f32 %v694_v28, %v551_v32  ;;  %v6915_v28 = vld [vmem:[%s5641_s16 + $0x90] sm:$0xff] }
  0xad   : > { %v844_v62 = vsel %vm512_vm0, %v12640_v4, %v13375_v25  ;;  %13376 = vst [vmem:[#allocation21_spill] sm:$0xff] %v6887_v47  ;;  %v2593_v17 = vadd.f32 %v6748_v48, %v2533_v61  ;;  %v995_v6 = vsel %vm963_vm1, %v12639_v19, %v13381_v15  ;;  %v3316_v36 = vadd.f32 %v6571_v24, %v3166_v9  ;;  %v6907_v25 = vld [vmem:[%s5641_s16 + $0x70] sm:$0xff] }
  0xae   : > { %13377 = vst [vmem:[#allocation46_spill] sm:$0xff] %v6891_v21  ;;  %v6895_v51 = vadd.f32 %v13379_v44, %v3318_v55  ;;  %v12638_v39 = vrot.slane %v6887_v47, 2  ;;  %v12637_v0 = vrot.slane %v6891_v21, 2  ;;  %v1433_v55 = vmul.f32 %v6907_v25, %v6628_v49  ;;  %v13382_v61 = vld [vmem:[#allocation24_spill] sm:$0xff] }
  0xaf   : > { %v2653_v29 = vadd.f32 %v6753_v7, %v2593_v17  ;;  %v851_v48 = vadd.f32 %v844_v62, %v701_v34  ;;  %v1493_v24 = vmul.f32 %v6915_v28, %v6637_v12  ;;  %v1553_v32 = vmul.f32 %v13382_v61, %v6652_v63 }
  0xb0   : > { %13380 = vst [vmem:[#allocation23_spill] sm:$0xff] %v6895_v51  ;;  %3604 = vrot.lane.b32.xlu1 %v6895_v51, %s5523_s9  ;;  %v6922_v9 = vadd.f32 %v6597_v2, %v3316_v36  ;;  %v13384_v13 = vrot.slane %v6612_v54, 2  ;;  %v13385_v7 = vrot.slane %v6625_v37, 2  ;;  %v6936_v17 = vmul.f32 %v6907_v25, %v6655_v23  ;;  %v6945_v36 = vld [vmem:[%s5641_s16 + $0xb0] sm:$0xff] }
  0xb1   : > { %v13387_v34 = vrot.slane %v6766_v10, 1  ;;  %v1002_v15 = vadd.f32 %v995_v6, %v851_v48  ;;  %v6942_v54 = vmul.f32 %v6915_v28, %v6658_v18  ;;  %v6949_v37 = vmul.f32 %v6945_v36, %v6680_v33  ;;  %v13410_v51 = vld [vmem:[#allocation56_spill] sm:$0xff] }
  0xb2   : > { %13383 = vst [vmem:[#allocation48_spill] sm:$0xff] %v6922_v9  ;;  %v1145_v44 = vsel %vm963_vm1, %v12638_v39, %v13384_v13  ;;  %v1295_v62 = vsel %vm963_vm1, %v12637_v0, %v13385_v7  ;;  %3600 = vrot.lane.b32.xlu0 %v6922_v9, %s5523_s9  ;;  %v12643_v61 = vrot.slane %v6936_v17, 1  ;;  %v6956_v13 = vmul.f32 %v6907_v25, %v6683_v8 }
  0xb3   : > { %13386 = vst [vmem:[#allocation50_spill] sm:$0xff] %v6936_v17  ;;  %v2743_v2 = vadd.f32 %v13387_v34, %v2653_v29  ;;  %v6960_v6 = vmul.f32 %v6915_v28, %v6705_v38  ;;  %v6964_v29 = vmul.f32 %v6945_v36, %v6719_v5  ;;  %v13393_v48 = vrot.slane %v6770_v46, 1  ;;  %v13419_v17 = vld [vmem:[#allocation34_spill] sm:$0xff] }
  0xb4   : > { %13388 = vst [vmem:[#allocation52_spill] sm:$0xff] %v6942_v54  ;;  %v1152_v34 = vadd.f32 %v1145_v44, %v1002_v15  ;;  %v12647_v0 = vrot.slane %v6942_v54, 1  ;;  %v12646_v39 = vrot.slane %v6949_v37, 1  ;;  %v13394_v19 = vrot.slane %v6670_v43, 1 }
  0xb5   : > { %13389 = vst [vmem:[#allocation54_spill] sm:$0xff] %v6949_v37  ;;  %v2893_v7 = vadd.f32 %v13393_v48, %v2743_v2  ;;  %v12644_v27 = vrot.slane %v6956_v13, 2  ;;  %v12645_v60 = vrot.slane %v6960_v6, 2  ;;  %v13395_v44 = vrot.slane %v6790_v52, 1  ;;  %v13417_v37 = vld [vmem:[#allocation17_spill] sm:$0xff] }
  0xb6   : > { %13390 = vst [vmem:[#allocation27_spill] sm:$0xff] %v6956_v13  ;;  %v1640_v4 = vsel %vm512_vm0, %v12643_v61, %v13394_v19  ;;  %v1302_v15 = vadd.f32 %v1295_v62, %v1152_v34  ;;  %v13396_v48 = vrot.slane %v6677_v16, 1  ;;  %v13397_v19 = vrot.slane %v6694_v41, 1 }
  0xb7   : > { %13391 = vst [vmem:[#allocation29_spill] sm:$0xff] %v6960_v6  ;;  %v3043_v2 = vadd.f32 %v13395_v44, %v2893_v7  ;;  %v7003_v62 = vsel %vm963_vm1, %v12644_v27, %v13398_v1  ;;  %v13399_v16 = vrot.slane %v6714_v35, 2  ;;  %v13400_v41 = vrot.slane %v6729_v59, 2  ;;  %v13404_v27 = vld [vmem:[#allocation26_spill] sm:$0xff]  ;;  %v13406_v59 = vld [vmem:[#allocation28_spill] sm:$0xff] }
  0xb8   : > { %13392 = vst [vmem:[#allocation31_spill] sm:$0xff] %v6964_v29  ;;  %v1790_v43 = vsel %vm512_vm0, %v12647_v0, %v13396_v48  ;;  %v1940_v61 = vsel %vm512_vm0, %v12646_v39, %v13397_v19  ;;  %v13401_v34 = vrot.slane %v6964_v29, 2  ;;  %v7021_v48 = vmul.f32 %v13402_v22, %v6722_v42  ;;  %v13407_v39 = vld [vmem:[#allocation40_spill] sm:$0xff] }
  0xb9   : > { %v7010_v7 = vsel %vm963_vm1, %v12645_v60, %v13399_v16  ;;  %v13403_v35 = vrot.slane %v6794_v53, 2  ;;  %v1437_v19 = vadd.f32 %v1433_v55, %v1302_v15  ;;  %v13405_v16 = vld [vmem:[#allocation39_spill] sm:$0xff]  ;;  %v7033_v0 = vmul.f32 %v13407_v39, %v13406_v59  ;;  %v13414_v15 = vld [vmem:[#allocation57_spill] sm:$0xff] }
  0xba   : > { %v7017_v44 = vsel %vm963_vm1, %v13401_v34, %v13400_v41  ;;  %v7029_v60 = vmul.f32 %v13405_v16, %v13404_v27  ;;  %v13408_v41 = vld [vmem:[#allocation30_spill] sm:$0xff]  ;;  %v7043_v9 = vmul.f32 %v13405_v16, %v13410_v51  ;;  %v13416_v29 = vrot.slane %v6798_v57, 2 }
  0xbb   : > { %v3193_v1 = vadd.f32 %v13403_v35, %v3043_v2  ;;  %v7039_v34 = vmul.f32 %v13402_v22, %v13408_v41  ;;  %v13412_v2 = vld [vmem:[#allocation32_spill] sm:$0xff]  ;;  %v7051_v35 = vmul.f32 %v13402_v22, %v13414_v15  ;;  %v1497_v13 = vadd.f32 %v1493_v24, %v1437_v19 }
  0xbc   : > { %13411 = vst [vmem:[#allocation33_spill] sm:$0xff] %v7043_v9  ;;  %v7047_v55 = vmul.f32 %v13407_v39, %v13412_v2  ;;  %v7059_v54 = vmul.f32 %v13405_v16, %v13417_v37  ;;  %v7063_v21 = vmul.f32 %v13407_v39, %v13419_v17  ;;  %v12661_v22 = vrot.slane %v7043_v9, 1  ;;  %v5315_v9 = vld [vmem:[%s5641_s16 + $0x38] sm:$0xff] }
  0xbd   : > { %13409 = vst [vmem:[#allocation25_spill] sm:$0xff] %v7039_v34  ;;  %v3343_v6 = vadd.f32 %v13416_v29, %v3193_v1  ;;  %v12662_v47 = vrot.slane %v7039_v34, 1  ;;  %v13421_v29 = vrot.slane %v6822_v40, 2  ;;  %v1557_v1 = vadd.f32 %v1553_v32, %v1497_v13 }
  0xbe   : > { %13413 = vst [vmem:[#allocation35_spill] sm:$0xff] %v7047_v55  ;;  %v12660_v39 = vrot.slane %v7059_v54, 2  ;;  %v13423_v16 = vrot.slane %v6766_v10, 1  ;;  %v13424_v14 = vrot.slane %v6770_v46, 1  ;;  %v13425_v32 = vrot.slane %v6790_v52, 1 }
  0xbf   : > { %13415 = vst [vmem:[#allocation38_spill] sm:$0xff] %v7051_v35  ;;  %v7071_v24 = vadd.f32 %v13421_v29, %v3343_v6  ;;  %v13426_v13 = vrot.slane %v7047_v55, 1  ;;  %v13427_v10 = vrot.slane %v6794_v53, 2  ;;  %v13428_v19 = vrot.slane %v7051_v35, 2 }
  0xc0   : > { %13418 = vst [vmem:[#allocation41_spill] sm:$0xff] %v7059_v54  ;;  %v7080_v30 = vsel %vm512_vm0, %v12662_v47, %v13423_v16  ;;  %v7087_v6 = vsel %vm512_vm0, %v12661_v22, %v13424_v14  ;;  %v1647_v14 = vadd.f32 %v1640_v4, %v1557_v1  ;;  %v13429_v46 = vrot.slane %v6798_v57, 2 }
  0xc1   : > { %13420 = vst [vmem:[#allocation42_spill] sm:$0xff] %v7063_v21  ;;  %v7094_v29 = vsel %vm512_vm0, %v13426_v13, %v13425_v32  ;;  %v7101_v16 = vsel %vm963_vm1, %v13428_v19, %v13427_v10  ;;  %3762 = vrot.lane.b32.xlu1 %v7071_v24, %s5523_s9  ;;  %v13430_v53 = vrot.slane %v6822_v40, 2  ;;  %v13431_v32 = vrot.slane %v7063_v21, 2 }
  0xc2   : > { %13422 = vst [vmem:[#allocation60_spill] sm:$0xff] %v7071_v24  ;;  %v7110_v52 = vsel %vm963_vm1, %v12660_v39, %v13429_v46  ;;  %v7120_v13 = vstv %s6966_s17  ;;  %v7127_v4 = vstv %s6972_s18  ;;  %v7130_v1 = vstv %s6982_s19  ;;  %v5314_v39 = vld [vmem:[%s5641_s16 + $0x18] sm:$0xff]  ;;  %s7196_s17 = sld [smem:[#allocation3 + $0x42]] }
  0xc3   : > { %v7117_v19 = vsel %vm963_vm1, %v13431_v32, %v13430_v53  ;;  %13432 = vst [vmem:[#allocation45_spill] sm:$0xff] %v7120_v13  ;;  %v346_v57 = vmul.f32 %v6808_v50, %v7120_v13  ;;  %v7133_v10 = vstv %s6996_s20  ;;  %v1797_v40 = vadd.f32 %v1790_v43, %v1647_v14  ;;  %s7203_s18 = sld [smem:[#allocation3 + $0x43]] }
  0xc4   : > { %13433 = vst [vmem:[#allocation47_spill] sm:$0xff] %v7127_v4  ;;  %v406_v46 = vmul.f32 %v6825_v56, %v7127_v4  ;;  %v466_v53 = vmul.f32 %v6831_v11, %v7130_v1  ;;  %v7143_v32 = vmul.f32 %v6808_v50, %v7133_v10  ;;  %v7147_v22 = vmul.f32 %v5314_v39, %v7133_v10  ;;  %s7221_s19 = sld [smem:[#allocation3 + $0x44]] }
  0xc5   : > { %13434 = vst [vmem:[#allocation49_spill] sm:$0xff] %v7130_v1  ;;  %v7150_v47 = vstv %s7023_s21  ;;  %v7153_v24 = vstv %s7035_s22  ;;  %v7156_v43 = vstv %s7053_s23  ;;  %v1947_v14 = vadd.f32 %v1940_v61, %v1797_v40  ;;  %s7229_s20 = sld [smem:[#allocation3 + $0x45]] }
  0xc6   : > { %13435 = vst [vmem:[#allocation51_spill] sm:$0xff] %v7133_v10  ;;  %v410_v21 = vadd.f32 %v406_v46, %v346_v57  ;;  %v7163_v35 = vmul.f32 %v6825_v56, %v7150_v47  ;;  %v12678_v55 = vrot.slane %v7147_v22, 1  ;;  %v7168_v34 = vmul.f32 %v5315_v9, %v7150_v47  ;;  %s7263_s21 = sld [smem:[#allocation3 + $0x46]] }
  0xc7   : > { %13436 = vst [vmem:[#allocation53_spill] sm:$0xff] %v7147_v22  ;;  %v7172_v31 = vmul.f32 %v6831_v11, %v7153_v24  ;;  %v7176_v61 = vmul.f32 %v5316_v45, %v7153_v24  ;;  %v2097_v57 = vadd.f32 %v7003_v62, %v1947_v14  ;;  %v7184_v54 = vmul.f32 %v6808_v50, %v7156_v43  ;;  %s7279_s22 = sld [smem:[#allocation3 + $0x47]] }
  0xc8   : > { %13437 = vst [vmem:[#allocation55_spill] sm:$0xff] %v7150_v47  ;;  %v470_v40 = vadd.f32 %v466_v53, %v410_v21  ;;  %v12680_v10 = vrot.slane %v7168_v34, 1  ;;  %v7200_v14 = vmul.f32 %v5314_v39, %v7156_v43  ;;  %v7219_v39 = vstv %s7135_s8  ;;  %s7304_s23 = sld [smem:[#allocation3 + $0x48]] }
  0xc9   : > { %13438 = vst [vmem:[#allocation24_spill] sm:$0xff] %v7153_v24  ;;  %v13442_v24 = vrot.slane %v7143_v32, 1  ;;  %v12681_v21 = vrot.slane %v7172_v31, 1  ;;  %v12679_v62 = vrot.slane %v7176_v61, 1  ;;  %v2247_v53 = vadd.f32 %v7010_v7, %v2097_v57  ;;  %s7319_s8 = sld [smem:[#allocation3 + $0x4a]] }
  0xca   : > { %13439 = vst [vmem:[#allocation36_spill] sm:$0xff] %v7156_v43  ;;  %v7216_v7 = vstv %s7122_s29  ;;  %v12683_v46 = vrot.slane %v7200_v14, 2  ;;  %s7313_s29 = sld [smem:[#allocation3 + $0x49]] }
  0xcb   : > { %13440 = vst [vmem:[#allocation39_spill] sm:$0xff] %v7168_v34  ;;  %v569_v47 = vsel %vm512_vm0, %v13442_v24, %v12678_v55  ;;  %v13444_v24 = vrot.slane %v7163_v35, 1  ;;  %v2397_v57 = vadd.f32 %v7017_v44, %v2247_v53  ;;  %v7239_v44 = vmul.f32 %v5316_v45, %v7219_v39  ;;  %v5318_v34 = vld [vmem:[%s5641_s16 + $0x98] sm:$0xff] }
  0xcc   : > { %13441 = vst [vmem:[#allocation40_spill] sm:$0xff] %v7176_v61  ;;  %v576_v50 = vadd.f32 %v569_v47, %v470_v40  ;;  %v869_v47 = vsel %vm512_vm0, %v12681_v21, %v12679_v62  ;;  %v7232_v62 = vmul.f32 %v5315_v9, %v7216_v7  ;;  %v7311_v22 = vstv %s7229_s20  ;;  %s7917_s20 = sld [smem:[#allocation3 + $0x51]] }
  0xcd   : > { %13443 = vst [vmem:[#allocation30_spill] sm:$0xff] %v7200_v14  ;;  %v719_v55 = vsel %vm512_vm0, %v13444_v24, %v12680_v10  ;;  %v7227_v24 = vmul.f32 %v6825_v56, %v7216_v7  ;;  %v7236_v10 = vmul.f32 %v6831_v11, %v7219_v39  ;;  %v2532_v53 = vadd.f32 %v7021_v48, %v2397_v57 }
  0xce   : > { %13445 = vst [vmem:[#allocation56_spill] sm:$0xff] %v7216_v7  ;;  %v726_v40 = vadd.f32 %v719_v55, %v576_v50  ;;  %v7242_v55 = vstv %s7158_s13  ;;  %v13451_v50 = vrot.slane %v7184_v54, 2  ;;  %v12685_v61 = vrot.slane %v7232_v62, 2  ;;  %s7330_s13 = sld [smem:[#allocation3 + $0x4b]] }
  0xcf   : > { %13446 = vst [vmem:[#allocation32_spill] sm:$0xff] %v7219_v39  ;;  %v12686_v9 = vrot.slane %v7227_v24, 2  ;;  %v12688_v11 = vrot.slane %v7236_v10, 2  ;;  %v12687_v45 = vrot.slane %v7239_v44, 2  ;;  %v1443_v48 = vmul.f32 %v6907_v25, %v7242_v55 }
  0xd0   : > { %13447 = vst [vmem:[#allocation57_spill] sm:$0xff] %v7232_v62  ;;  %v876_v56 = vadd.f32 %v869_v47, %v726_v40  ;;  %v1020_v21 = vsel %vm963_vm1, %v13451_v50, %v12683_v46  ;;  %v2592_v47 = vadd.f32 %v7029_v60, %v2532_v53  ;;  %v7258_v40 = vstv %s7178_s14  ;;  %s7349_s14 = sld [smem:[#allocation3 + $0x4c]] }
  0xd1   : > { %13448 = vst [vmem:[#allocation17_spill] sm:$0xff] %v7236_v10  ;;  %v7261_v50 = vstv %s7186_s15  ;;  %v1170_v46 = vsel %vm963_vm1, %v12686_v9, %v12685_v61  ;;  %v1320_v60 = vsel %vm963_vm1, %v12688_v11, %v12687_v45  ;;  %v7283_v61 = vstv %s7196_s17  ;;  %v5317_v11 = vld [vmem:[%s5641_s16 + $0x78] sm:$0xff]  ;;  %s7354_s15 = sld [smem:[#allocation3 + $0x4d]] }
  0xd2   : > { %13449 = vst [vmem:[#allocation34_spill] sm:$0xff] %v7239_v44  ;;  %v1027_v57 = vadd.f32 %v1020_v21, %v876_v56  ;;  %v1503_v21 = vmul.f32 %v6915_v28, %v7258_v40  ;;  %v1563_v53 = vmul.f32 %v6945_v36, %v7261_v50  ;;  %v2652_v56 = vadd.f32 %v7033_v0, %v2592_v47  ;;  %s7374_s17 = sld [smem:[#allocation3 + $0x4e]] }
  0xd3   : > { %13450 = vst [vmem:[#allocation61_spill] sm:$0xff] %v7242_v55  ;;  %v7286_v9 = vstv %s7203_s18  ;;  %v7290_v45 = vmul.f32 %v6907_v25, %v7283_v61  ;;  %v7294_v44 = vmul.f32 %v5317_v11, %v7283_v61  ;;  %s7404_s18 = sld [smem:[#allocation3 + $0x4f]] }
  0xd4   : > { %13452 = vst [vmem:[#allocation62_spill] sm:$0xff] %v7258_v40  ;;  %v1177_v62 = vadd.f32 %v1170_v46, %v1027_v57  ;;  %v7298_v14 = vmul.f32 %v6915_v28, %v7286_v9  ;;  %v7302_v0 = vmul.f32 %v5318_v34, %v7286_v9  ;;  %v2742_v46 = vadd.f32 %v7080_v30, %v2652_v56 }
  0xd5   : > { %13453 = vst [vmem:[#allocation63_spill] sm:$0xff] %v7261_v50  ;;  %v7308_v57 = vstv %s7221_s19  ;;  %v12705_v10 = vrot.slane %v7290_v45, 1  ;;  %s7435_s19 = sld [smem:[#allocation3 + $0x50]] }
  0xd6   : > { %13454 = vst [vmem:[#allocation64_spill] sm:$0xff] %v7283_v61  ;;  %v1327_v47 = vadd.f32 %v1320_v60, %v1177_v62  ;;  %v12704_v61 = vrot.slane %v7294_v44, 1  ;;  %v2892_v40 = vadd.f32 %v7087_v6, %v2742_v46  ;;  %v7324_v62 = vmul.f32 %v6945_v36, %v7308_v57  ;;  %v5319_v60 = vld [vmem:[%s5641_s16 + $0xb8] sm:$0xff] }
  0xd7   : > { %13455 = vst [vmem:[#allocation65_spill] sm:$0xff] %v7286_v9  ;;  %v12706_v9 = vrot.slane %v7302_v0, 1  ;;  %v7328_v56 = vmul.f32 %v5319_v60, %v7308_v57  ;;  %v13464_v6 = vrot.slane %v7298_v14, 1  ;;  %v7344_v46 = vmul.f32 %v6907_v25, %v7311_v22 }
  0xd8   : > { %13456 = vst [vmem:[#allocation66_spill] sm:$0xff] %v7290_v45  ;;  %v1447_v30 = vadd.f32 %v1443_v48, %v1327_v47  ;;  %v1665_v50 = vsel %vm512_vm0, %v12705_v10, %v12704_v61  ;;  %v7347_v47 = vmul.f32 %v5317_v11, %v7311_v22  ;;  %v12711_v61 = vrot.slane %v7324_v62, 1 }
  0xd9   : > { %13457 = vst [vmem:[#allocation67_spill] sm:$0xff] %v7294_v44  ;;  %v1815_v48 = vsel %vm512_vm0, %v13464_v6, %v12706_v9  ;;  %v3042_v44 = vadd.f32 %v7094_v29, %v2892_v40  ;;  %v12708_v10 = vrot.slane %v7328_v56, 1  ;;  %v12710_v6 = vrot.slane %v7344_v46, 2 }
  0xda   : > { %13458 = vst [vmem:[#allocation68_spill] sm:$0xff] %v7298_v14  ;;  %v1507_v45 = vadd.f32 %v1503_v21, %v1447_v30  ;;  %v12709_v25 = vrot.slane %v7347_v47, 2  ;;  %v7359_v9 = vstv %s7263_s21  ;;  %v7362_v11 = vstv %s7279_s22  ;;  %s7926_s21 = sld [smem:[#allocation3 + $0x52]] }
  0xdb   : > { %13459 = vst [vmem:[#allocation69_spill] sm:$0xff] %v7302_v0  ;;  %v3192_v0 = vadd.f32 %v7101_v16, %v3042_v44  ;;  %v1965_v40 = vsel %vm512_vm0, %v12711_v61, %v12708_v10  ;;  %v7372_v21 = vmul.f32 %v6915_v28, %v7359_v9  ;;  %v7382_v44 = vmul.f32 %v5318_v34, %v7359_v9  ;;  %s7941_s22 = sld [smem:[#allocation3 + $0x54]] }
  0xdc   : > { %13460 = vst [vmem:[#allocation70_spill] sm:$0xff] %v7308_v57  ;;  %v1567_v29 = vadd.f32 %v1563_v53, %v1507_v45  ;;  %v2115_v16 = vsel %vm963_vm1, %v12710_v6, %v12709_v25  ;;  %v7386_v45 = vmul.f32 %v6945_v36, %v7362_v11  ;;  %v7389_v28 = vmul.f32 %v5319_v60, %v7362_v11  ;;  %v7400_v36 = vld [vmem:[%s5641_s16 + $0xd0] sm:$0xff] }
  0xdd   : > { %13461 = vst [vmem:[#allocation71_spill] sm:$0xff] %v7311_v22  ;;  %v3342_v53 = vadd.f32 %v7110_v52, %v3192_v0  ;;  %v12715_v10 = vrot.slane %v7372_v21, 2  ;;  %v7394_v25 = vstv %s7304_s23  ;;  %v12714_v34 = vrot.slane %v7382_v44, 2  ;;  %s7965_s23 = sld [smem:[#allocation3 + $0x53]] }
  0xde   : > { %13462 = vst [vmem:[#allocation72_spill] sm:$0xff] %v7324_v62  ;;  %v1672_v30 = vadd.f32 %v1665_v50, %v1567_v29  ;;  %v12716_v61 = vrot.slane %v7389_v28, 2  ;;  %v2538_v60 = vmul.f32 %v7400_v36, %v7394_v25  ;;  %v7410_v0 = vstv %s7313_s29  ;;  %s7976_s29 = sld [smem:[#allocation3 + $0x55]] }
  0xdf   : > { %13463 = vst [vmem:[#allocation73_spill] sm:$0xff] %v7328_v56  ;;  %v7407_v52 = vadd.f32 %v7117_v19, %v3342_v53  ;;  %v7413_v29 = vstv %s7319_s8  ;;  %v2265_v6 = vsel %vm963_vm1, %v12715_v10, %v12714_v34  ;;  %v7426_v53 = vld [vmem:[%s5641_s16 + $0xf0] sm:$0xff]  ;;  %v7440_v10 = vstv %s7330_s13  ;;  %v5323_v56 = vld [vmem:[%s5641_s16 + $0xd8] sm:$0xff]  ;;  %s7997_s8 = sld [smem:[#allocation3 + $0x56]] }
  0xe0   : > { %13465 = vst [vmem:[#allocation74_spill] sm:$0xff] %v7344_v46  ;;  %v1822_v50 = vadd.f32 %v1815_v48, %v1672_v30  ;;  %v2598_v48 = vmul.f32 %v7426_v53, %v7410_v0  ;;  %v7431_v30 = vld [vmem:[%s5641_s16 + $0x110] sm:$0xff]  ;;  %s8037_s13 = sld [smem:[#allocation3 + $0x57]] }
  0xe1   : > { %13466 = vst [vmem:[#allocation75_spill] sm:$0xff] %v7347_v47  ;;  %v13478_v47 = vrot.slane %v7386_v45, 2  ;;  %3760 = vrot.lane.b32.xlu0 %v7407_v52, %s5523_s9 }
  0xe2   : > { %13467 = vst [vmem:[#allocation76_spill] sm:$0xff] %v7359_v9  ;;  %v1972_v34 = vadd.f32 %v1965_v40, %v1822_v50 }
  0xe3   : > { %13468 = vst [vmem:[#allocation77_spill] sm:$0xff] %v7362_v11  ;;  %v2415_v19 = vsel %vm963_vm1, %v13478_v47, %v12716_v61  ;;  %v7443_v47 = vstv %s7349_s14  ;;  %v7446_v61 = vstv %s7354_s15  ;;  %s8054_s14 = sld [smem:[#allocation3 + $0x58]] }
  0xe4   : > { %13469 = vst [vmem:[#allocation78_spill] sm:$0xff] %v7372_v21  ;;  %v2122_v50 = vadd.f32 %v2115_v16, %v1972_v34  ;;  %s8096_s15 = sld [smem:[#allocation3 + $0x59]] }
  0xe5   : > { %13470 = vst [vmem:[#allocation79_spill] sm:$0xff] %v7382_v44  ;;  %v2658_v44 = vmul.f32 %v7431_v30, %v7413_v29 }
  0xe6   : > { %13471 = vst [vmem:[#allocation80_spill] sm:$0xff] %v7386_v45  ;;  %v7458_v45 = vmul.f32 %v7426_v53, %v7443_v47  ;;  %v2272_v34 = vadd.f32 %v2265_v6, %v2122_v50 }
  0xe7   : > { %13472 = vst [vmem:[#allocation81_spill] sm:$0xff] %v7389_v28  ;;  %v7450_v28 = vmul.f32 %v7400_v36, %v7440_v10 }
  0xe8   : > { %13473 = vst [vmem:[#allocation82_spill] sm:$0xff] %v7394_v25  ;;  %v5325_v25 = vld [vmem:[%s5641_s16 + $0x118] sm:$0xff]  ;;  %v12748_v14 = vrot.slane %v7458_v45, 1  ;;  %v2422_v11 = vadd.f32 %v2415_v19, %v2272_v34  ;;  %v7519_v19 = vld [vmem:[%s5641_s16] sm:$0xff] }
  0xe9   : > { %13474 = vst [vmem:[#allocation83_spill] sm:$0xff] %v7400_v36  ;;  %v7470_v21 = vmul.f32 %v5325_v25, %v7446_v61  ;;  %v12746_v46 = vrot.slane %v7450_v28, 1  ;;  %v13500_v34 = vld [vmem:[#allocation12_spill] sm:$0xff] }
  0xea   : > { %13475 = vst [vmem:[#allocation84_spill] sm:$0xff] %v7407_v52  ;;  %v5324_v52 = vld [vmem:[%s5641_s16 + $0xf8] sm:$0xff] }
  0xeb   : > { %13476 = vst [vmem:[#allocation85_spill] sm:$0xff] %v7410_v0  ;;  %v7462_v40 = vmul.f32 %v5324_v52, %v7443_v47  ;;  %v7466_v0 = vmul.f32 %v7431_v30, %v7446_v61 }
  0xec   : > { %13477 = vst [vmem:[#allocation86_spill] sm:$0xff] %v7413_v29  ;;  %v7454_v29 = vmul.f32 %v5323_v56, %v7440_v10 }
  0xed   : > { %13479 = vst [vmem:[#allocation87_spill] sm:$0xff] %v7426_v53  ;;  %v12747_v16 = vrot.slane %v7462_v40, 1 }
  0xee   : > { %13480 = vst [vmem:[#allocation88_spill] sm:$0xff] %v7431_v30  ;;  %v12745_v62 = vrot.slane %v7454_v29, 1 }
  0xef   : > { %13481 = vst [vmem:[#allocation89_spill] sm:$0xff] %v7440_v10  ;;  %v7473_v10 = vstv %s7374_s17  ;;  %v2910_v6 = vsel %vm512_vm0, %v12748_v14, %v12747_v16  ;;  %v7516_v14 = vstv %s7435_s19  ;;  %s8106_s17 = sld [smem:[#allocation3 + $0x5a]] }
  0xf0   : > { %13482 = vst [vmem:[#allocation90_spill] sm:$0xff] %v7443_v47  ;;  %v2760_v9 = vsel %vm512_vm0, %v12746_v46, %v12745_v62  ;;  %v7496_v50 = vmul.f32 %v5323_v56, %v7473_v10  ;;  %v7499_v47 = vstv %s7404_s18  ;;  %v7526_v62 = vmul.f32 %v7431_v30, %v7516_v14  ;;  %v13508_v30 = vld [vmem:[#allocation16_spill] sm:$0xff]  ;;  %s8124_s18 = sld [smem:[#allocation3 + $0x5b]] }
  0xf1   : > { %13483 = vst [vmem:[#allocation91_spill] sm:$0xff] %v7446_v61  ;;  %v7483_v61 = vmul.f32 %v7400_v36, %v7473_v10  ;;  %v13494_v36 = vrot.slane %v7470_v21, 1  ;;  %v7509_v46 = vmul.f32 %v7426_v53, %v7499_v47  ;;  %v7513_v16 = vmul.f32 %v5324_v52, %v7499_v47  ;;  %s8132_s19 = sld [smem:[#allocation3 + $0x5d]] }
  0xf2   : > { %13484 = vst [vmem:[#allocation92_spill] sm:$0xff] %v7450_v28  ;;  %v7529_v56 = vmul.f32 %v5325_v25, %v7516_v14  ;;  %v13503_v52 = vrot.slane %v7496_v50, 2 }
  0xf3   : > { %13485 = vst [vmem:[#allocation93_spill] sm:$0xff] %v7454_v29  ;;  %v13495_v29 = vrot.slane %v7466_v0, 1 }
  0xf4   : > { %13486 = vst [vmem:[#allocation94_spill] sm:$0xff] %v7458_v45 }
  0xf5   : > { %13487 = vst [vmem:[#allocation95_spill] sm:$0xff] %v7462_v40  ;;  %v3060_v28 = vsel %vm512_vm0, %v13495_v29, %v13494_v36  ;;  %v2542_v36 = vadd.f32 %v2538_v60, %v2422_v11  ;;  %v13504_v40 = vrot.slane %v7483_v61, 2  ;;  %v13506_v11 = vld [vmem:[#allocation14_spill] sm:$0xff] }
  0xf6   : > { %13488 = vst [vmem:[#allocation96_spill] sm:$0xff] %v7466_v0  ;;  %v12769_v0 = vrot.slane %v7513_v16, 2  ;;  %v7543_v29 = vld [vmem:[%s5641_s16 + $0x40] sm:$0xff] }
  0xf7   : > { %13489 = vst [vmem:[#allocation97_spill] sm:$0xff] %v7470_v21  ;;  %v334_v21 = vmul.f32 %v7519_v19, %v13500_v34  ;;  %v3210_v53 = vsel %vm963_vm1, %v13504_v40, %v13503_v52  ;;  %v7538_v34 = vld [vmem:[%s5641_s16 + $0x20] sm:$0xff]  ;;  %v454_v25 = vmul.f32 %v7543_v29, %v13508_v30  ;;  %v2602_v45 = vadd.f32 %v2598_v48, %v2542_v36 }
  0xf8   : > { %13490 = vst [vmem:[#allocation98_spill] sm:$0xff] %v7473_v10  ;;  %v394_v60 = vmul.f32 %v7538_v34, %v13506_v11  ;;  %v13510_v52 = vrot.slane %v7509_v46, 2  ;;  %v7557_v10 = vld [vmem:[%s5641_s16 + $0x8] sm:$0xff]  ;;  %v13511_v36 = vld [vmem:[#allocation13_spill] sm:$0xff]  ;;  %v13512_v30 = vrot.slane %v7529_v56, 2 }
  0xf9   : > { %13491 = vst [vmem:[#allocation99_spill] sm:$0xff] %v7483_v61  ;;  %v2662_v61 = vadd.f32 %v2658_v44, %v2602_v45  ;;  %v830_v44 = vmul.f32 %v7543_v29, %v6553_v20 }
  0xfa   : > { %13492 = vst [vmem:[#allocation100_spill] sm:$0xff] %v7496_v50  ;;  %v398_v11 = vadd.f32 %v394_v60, %v334_v21  ;;  %v680_v50 = vmul.f32 %v7538_v34, %v13511_v36 }
  0xfb   : > { %13493 = vst [vmem:[#allocation101_spill] sm:$0xff] %v7499_v47  ;;  %v3360_v47 = vsel %vm963_vm1, %v13510_v52, %v12769_v0  ;;  %v7571_v52 = vld [vmem:[%s5641_s16 + $0x28] sm:$0xff]  ;;  %v2767_v45 = vadd.f32 %v2760_v9, %v2662_v61  ;;  %v1131_v61 = vmul.f32 %v7538_v34, %v6602_v3 }
  0xfc   : > { %13496 = vst [vmem:[#allocation102_spill] sm:$0xff] %v7509_v46  ;;  %v7575_v21 = vmul.f32 %v7571_v52, %v13511_v36  ;;  %v458_v60 = vadd.f32 %v454_v25, %v398_v11  ;;  %v688_v0 = vrot.slane %v680_v50, 1  ;;  %v838_v50 = vrot.slane %v830_v44, 1 }
  0xfd   : > { %13497 = vst [vmem:[#allocation103_spill] sm:$0xff] %v7513_v16  ;;  %v13513_v16 = vrot.slane %v7526_v62, 2  ;;  %v7595_v25 = vmul.f32 %v7557_v10, %v6576_v26  ;;  %v2917_v9 = vadd.f32 %v2910_v6, %v2767_v45  ;;  %v1139_v44 = vrot.slane %v1131_v61, 2 }
  0xfe   : > { %13498 = vst [vmem:[#allocation104_spill] sm:$0xff] %v7516_v14  ;;  %v13509_v14 = vld [vmem:[#allocation18_spill] sm:$0xff] }
  0xff   : > { %13499 = vst [vmem:[#allocation105_spill] sm:$0xff] %v7519_v19  ;;  %v530_v40 = vmul.f32 %v7519_v19, %v13509_v14  ;;  %v7561_v48 = vmul.f32 %v7557_v10, %v13509_v14  ;;  %v3510_v46 = vsel %vm963_vm1, %v13513_v16, %v13512_v30  ;;  %v981_v16 = vmul.f32 %v7519_v19, %v6576_v26 }
 0x100   : > { %13501 = vst [vmem:[#allocation106_spill] sm:$0xff] %v7526_v62  ;;  %v7582_v62 = vld [vmem:[%s5641_s16 + $0x48] sm:$0xff]  ;;  %v7606_v26 = vmul.f32 %v7571_v52, %v6602_v3 }
 0x101   : > { %13502 = vst [vmem:[#allocation107_spill] sm:$0xff] %v7529_v56  ;;  %v538_v22 = vrot.slane %v530_v40, 1  ;;  %v12774_v14 = vrot.slane %v7561_v48, 1  ;;  %v12780_v56 = vrot.slane %v7575_v21, 1  ;;  %v7586_v30 = vmul.f32 %v7582_v62, %v6553_v20 }
 0x102   : > { %13505 = vst [vmem:[#allocation108_spill] sm:$0xff] %v7538_v34  ;;  %v989_v19 = vrot.slane %v981_v16, 2  ;;  %v12778_v45 = vrot.slane %v7606_v26, 2  ;;  %v7619_v3 = vmul.f32 %v7582_v62, %v6615_v58 }
 0x103   : > { %13507 = vst [vmem:[#allocation109_spill] sm:$0xff] %v7543_v29  ;;  %v540_v11 = vsel %vm512_vm0, %v538_v22, %v12774_v14  ;;  %v690_v20 = vsel %vm512_vm0, %v688_v0, %v12780_v56  ;;  %v12779_v36 = vrot.slane %v7586_v30, 1  ;;  %v12777_v22 = vrot.slane %v7595_v25, 2  ;;  %v7655_v56 = vld [vmem:[%s5641_s16 + $0x88] sm:$0xff] }
 0x104   : > { %v549_v40 = vadd.f32 %v540_v11, %v458_v60  ;;  %v3067_v14 = vadd.f32 %v3060_v28, %v2917_v9  ;;  %v1281_v0 = vmul.f32 %v7543_v29, %v6615_v58  ;;  %v7622_v28 = vld [vmem:[%s5641_s16 + $0x60] sm:$0xff]  ;;  %v12788_v58 = vrot.slane %v7619_v3, 2 }
 0x105   : > { %v840_v6 = vsel %vm512_vm0, %v838_v50, %v12779_v36  ;;  %v991_v60 = vsel %vm963_vm1, %v989_v19, %v12777_v22  ;;  %13514 = vst [vmem:[#allocation18_spill] sm:$0xff] %v7622_v28  ;;  %v1431_v16 = vmul.f32 %v7622_v28, %v6628_v49  ;;  %v7627_v9 = vld [vmem:[%s5641_s16 + $0x80] sm:$0xff] }
 0x106   : > { %v699_v34 = vadd.f32 %v690_v20, %v549_v40  ;;  %v3217_v11 = vadd.f32 %v3210_v53, %v3067_v14  ;;  %v1289_v61 = vrot.slane %v1281_v0, 2  ;;  %13515 = vst [vmem:[#allocation13_spill] sm:$0xff] %v7627_v9  ;;  %v1491_v19 = vmul.f32 %v7627_v9, %v6637_v12  ;;  %v7636_v20 = vld [vmem:[%s5641_s16 + $0xa0] sm:$0xff]  ;;  %v7668_v12 = vld [vmem:[%s5641_s16 + $0xa8] sm:$0xff] }
 0x107   : > { %v1141_v40 = vsel %vm963_vm1, %v1139_v44, %v12778_v45  ;;  %13516 = vst [vmem:[#allocation110_spill] sm:$0xff] %v7636_v20  ;;  %v1551_v22 = vmul.f32 %v7636_v20, %v6652_v63  ;;  %v1626_v53 = vmul.f32 %v7622_v28, %v6655_v23  ;;  %v1776_v44 = vmul.f32 %v7627_v9, %v6658_v18 }
 0x108   : > { %v849_v50 = vadd.f32 %v840_v6, %v699_v34  ;;  %v3367_v34 = vadd.f32 %v3360_v47, %v3217_v11  ;;  %v7643_v6 = vld [vmem:[%s5641_s16 + $0x68] sm:$0xff]  ;;  %v1291_v45 = vsel %vm963_vm1, %v1289_v61, %v12788_v58  ;;  %v7659_v47 = vmul.f32 %v7655_v56, %v6658_v18 }
 0x109   : > { %v7647_v0 = vmul.f32 %v7643_v6, %v6655_v23  ;;  %v1634_v36 = vrot.slane %v1626_v53, 1  ;;  %v1784_v29 = vrot.slane %v1776_v44, 1  ;;  %v7672_v61 = vmul.f32 %v7668_v12, %v6680_v33 }
 0x10a   : > { %v1000_v14 = vadd.f32 %v991_v60, %v849_v50  ;;  %v1926_v60 = vmul.f32 %v7636_v20, %v6680_v33  ;;  %v7663_v11 = vadd.f32 %v3510_v46, %v3367_v34  ;;  %v12786_v63 = vrot.slane %v7659_v47, 1 }
 0x10b   : > { %v12785_v50 = vrot.slane %v7647_v0, 1  ;;  %v2076_v18 = vmul.f32 %v7622_v28, %v6683_v8  ;;  %v7683_v34 = vmul.f32 %v7643_v6, %v6683_v8  ;;  %v2226_v33 = vmul.f32 %v7627_v9, %v6705_v38 }
 0x10c   : > { %13517 = vst [vmem:[#allocation111_spill] sm:$0xff] %v7663_v11  ;;  %v1150_v23 = vadd.f32 %v1141_v40, %v1000_v14  ;;  %v1934_v53 = vrot.slane %v1926_v60, 1  ;;  %3898 = vrot.lane.b32.xlu1 %v7663_v11, %s5523_s9  ;;  %v1786_v14 = vsel %vm512_vm0, %v1784_v29, %v12786_v63  ;;  %v12787_v44 = vrot.slane %v7672_v61, 1 }
 0x10d   : > { %v1636_v40 = vsel %vm512_vm0, %v1634_v36, %v12785_v50  ;;  %13518 = vst [vmem:[#allocation112_spill] sm:$0xff] %v7683_v34  ;;  %v2084_v60 = vrot.slane %v2076_v18, 2  ;;  %v12792_v8 = vrot.slane %v7683_v34, 2  ;;  %v2376_v50 = vmul.f32 %v7636_v20, %v6719_v5  ;;  %v7728_v20 = vld [vmem:[%s5641_s16 + $0x100] sm:$0xff] }
 0x10e   : > { %v1300_v46 = vadd.f32 %v1291_v45, %v1150_v23  ;;  %v7693_v45 = vmul.f32 %v7655_v56, %v6705_v38  ;;  %v2234_v23 = vrot.slane %v2226_v33, 2  ;;  %v1936_v29 = vsel %vm512_vm0, %v1934_v53, %v12787_v44  ;;  %v7707_v38 = vld [vmem:[%s5641_s16 + $0xc0] sm:$0xff]  ;;  %13523 = vst [vmem:[#allocation117_spill] sm:$0xff] %v7728_v20 }
 0x10f   : > { %v7704_v18 = vmul.f32 %v7668_v12, %v6719_v5  ;;  %13521 = vst [vmem:[#allocation115_spill] sm:$0xff] %v7707_v38  ;;  %v2086_v33 = vsel %vm963_vm1, %v2084_v60, %v12792_v8  ;;  %v2384_v53 = vrot.slane %v2376_v50, 2  ;;  %v7717_v44 = vld [vmem:[%s5641_s16 + $0xe0] sm:$0xff]  ;;  %v2721_v50 = vmul.f32 %v7707_v38, %v13408_v41 }
 0x110   : > { %13519 = vst [vmem:[#allocation113_spill] sm:$0xff] %v7693_v45  ;;  %v1435_v36 = vadd.f32 %v1431_v16, %v1300_v46  ;;  %v12793_v63 = vrot.slane %v7693_v45, 2  ;;  %v7711_v16 = vmul.f32 %v7707_v38, %v6722_v42  ;;  %v7721_v5 = vmul.f32 %v7717_v44, %v13404_v27 }
 0x111   : > { %13520 = vst [vmem:[#allocation114_spill] sm:$0xff] %v7704_v18  ;;  %v13524_v9 = vrot.slane %v7704_v18, 2 }
 0x112   : > { %v1495_v46 = vadd.f32 %v1491_v19, %v1435_v36  ;;  %13522 = vst [vmem:[#allocation116_spill] sm:$0xff] %v7717_v44  ;;  %v2236_v58 = vsel %vm963_vm1, %v2234_v23, %v12793_v63  ;;  %v7732_v19 = vmul.f32 %v7728_v20, %v13406_v59  ;;  %v7737_v36 = vld [vmem:[%s5641_s16 + $0xc8] sm:$0xff]  ;;  %v2871_v23 = vmul.f32 %v7717_v44, %v13410_v51 }
 0x113   : > { %v7741_v8 = vmul.f32 %v7737_v36, %v13408_v41  ;;  %v7746_v63 = vld [vmem:[%s5641_s16 + $0xe8] sm:$0xff]  ;;  %v2386_v28 = vsel %vm963_vm1, %v2384_v53, %v13524_v9  ;;  %v3171_v9 = vmul.f32 %v7707_v38, %v13414_v15  ;;  %v7771_v53 = vmul.f32 %v7737_v36, %v13414_v15 }
 0x114   : > { %v1555_v60 = vadd.f32 %v1551_v22, %v1495_v46  ;;  %v7750_v11 = vmul.f32 %v7746_v63, %v13410_v51  ;;  %v2729_v22 = vrot.slane %v2721_v50, 1  ;;  %v3021_v46 = vmul.f32 %v7728_v20, %v13412_v2  ;;  %v7758_v59 = vld [vmem:[%s5641_s16 + $0x108] sm:$0xff] }
 0x115   : > { %v7762_v41 = vmul.f32 %v7758_v59, %v13412_v2  ;;  %v12807_v42 = vrot.slane %v7741_v8, 1  ;;  %v2879_v45 = vrot.slane %v2871_v23, 1  ;;  %v3179_v15 = vrot.slane %v3171_v9, 2 }
 0x116   : > { %v1645_v27 = vadd.f32 %v1636_v40, %v1555_v60  ;;  %v12804_v51 = vrot.slane %v7750_v11, 1  ;;  %v3029_v34 = vrot.slane %v3021_v46, 1  ;;  %v3321_v60 = vmul.f32 %v7717_v44, %v13417_v37 }
 0x117   : > { %v12805_v18 = vrot.slane %v7762_v41, 1  ;;  %v7776_v2 = vsel %vm512_vm0, %v2729_v22, %v12807_v42  ;;  %v13527_v42 = vld [vmem:[#allocation51_spill] sm:$0xff] }
 0x118   : > { %v1795_v50 = vadd.f32 %v1786_v14, %v1645_v27  ;;  %v7781_v40 = vsel %vm512_vm0, %v2879_v45, %v12804_v51  ;;  %v12806_v27 = vrot.slane %v7771_v53, 2  ;;  %v7793_v14 = vmul.f32 %v7746_v63, %v13417_v37 }
 0x119   : > { %v7788_v23 = vsel %vm512_vm0, %v3029_v34, %v12805_v18  ;;  %v3329_v46 = vrot.slane %v3321_v60, 2  ;;  %v3471_v45 = vmul.f32 %v7728_v20, %v13419_v17  ;;  %v7799_v51 = vmul.f32 %v7758_v59, %v13419_v17 }
 0x11a   : > { %13525 = vst [vmem:[#allocation118_spill] sm:$0xff] %v7793_v14  ;;  %v1945_v22 = vadd.f32 %v1936_v29, %v1795_v50  ;;  %v7804_v34 = vsel %vm963_vm1, %v3179_v15, %v12806_v27  ;;  %v12816_v9 = vrot.slane %v7793_v14, 2  ;;  %v345_v37 = vmul.f32 %v7557_v10, %v7120_v13  ;;  %v13529_v13 = vld [vmem:[#allocation55_spill] sm:$0xff] }
 0x11b   : > { %13526 = vst [vmem:[#allocation119_spill] sm:$0xff] %v7799_v51  ;;  %v405_v29 = vmul.f32 %v7571_v52, %v7127_v4  ;;  %v3479_v60 = vrot.slane %v3471_v45, 2  ;;  %v12817_v18 = vrot.slane %v7799_v51, 2  ;;  %v465_v17 = vmul.f32 %v7582_v62, %v7130_v1  ;;  %v13531_v45 = vld [vmem:[#allocation24_spill] sm:$0xff] }
 0x11c   : > { %v2095_v50 = vadd.f32 %v2086_v33, %v1945_v22  ;;  %v7817_v15 = vsel %vm963_vm1, %v3329_v46, %v12816_v9  ;;  %v7821_v20 = vmul.f32 %v7557_v10, %v13527_v42  ;;  %v7825_v4 = vmul.f32 %v7571_v52, %v13529_v13 }
 0x11d   : > { %v409_v27 = vadd.f32 %v405_v29, %v345_v37  ;;  %v7830_v22 = vsel %vm963_vm1, %v3479_v60, %v12817_v18  ;;  %v7834_v1 = vmul.f32 %v7582_v62, %v13531_v45  ;;  %v7838_v46 = vmul.f32 %v7557_v10, %v7156_v43 }
 0x11e   : > { %13528 = vst [vmem:[#allocation120_spill] sm:$0xff] %v7821_v20  ;;  %v2245_v33 = vadd.f32 %v2236_v58, %v2095_v50  ;;  %v12821_v29 = vrot.slane %v7821_v20, 1  ;;  %v12822_v9 = vrot.slane %v7825_v4, 1  ;;  %v7844_v58 = vmul.f32 %v7571_v52, %v7216_v7 }
 0x11f   : > { %13530 = vst [vmem:[#allocation121_spill] sm:$0xff] %v7825_v4  ;;  %v469_v37 = vadd.f32 %v465_v17, %v409_v27  ;;  %v7850_v45 = vmul.f32 %v7582_v62, %v7219_v39  ;;  %v13536_v43 = vrot.slane %v7143_v32, 1  ;;  %v13537_v17 = vrot.slane %v7163_v35, 1 }
 0x120   : > { %13532 = vst [vmem:[#allocation122_spill] sm:$0xff] %v7834_v1  ;;  %v2395_v50 = vadd.f32 %v2386_v28, %v2245_v33  ;;  %v12825_v33 = vrot.slane %v7844_v58, 2  ;;  %v1442_v18 = vmul.f32 %v7643_v6, %v7242_v55  ;;  %v13538_v32 = vrot.slane %v7172_v31, 1 }
 0x121   : > { %13533 = vst [vmem:[#allocation123_spill] sm:$0xff] %v7838_v46  ;;  %v567_v27 = vsel %vm512_vm0, %v12821_v29, %v13536_v43  ;;  %v717_v28 = vsel %vm512_vm0, %v12822_v9, %v13537_v17  ;;  %v13539_v20 = vrot.slane %v7834_v1, 1  ;;  %v13540_v35 = vrot.slane %v7184_v54, 2  ;;  %v13592_v1 = vld [vmem:[#allocation94_spill] sm:$0xff] }
 0x122   : > { %13534 = vst [vmem:[#allocation124_spill] sm:$0xff] %v7844_v58  ;;  %v2530_v60 = vadd.f32 %v7711_v16, %v2395_v50  ;;  %v575_v39 = vadd.f32 %v567_v27, %v469_v37  ;;  %v13541_v29 = vrot.slane %v7838_v46, 2  ;;  %v13542_v9 = vrot.slane %v7227_v24, 2  ;;  %v13543_v37 = vld [vmem:[#allocation62_spill] sm:$0xff]  ;;  %v13544_v50 = vld [vmem:[#allocation63_spill] sm:$0xff]  ;;  %v13547_v24 = vld [vmem:[#allocation65_spill] sm:$0xff] }
 0x123   : > { %13535 = vst [vmem:[#allocation125_spill] sm:$0xff] %v7850_v45  ;;  %v867_v43 = vsel %vm512_vm0, %v13539_v20, %v13538_v32  ;;  %v12827_v16 = vrot.slane %v7850_v45, 2  ;;  %v1502_v31 = vmul.f32 %v7655_v56, %v13543_v37  ;;  %v7886_v20 = vmul.f32 %v7668_v12, %v13544_v50  ;;  %v13545_v32 = vld [vmem:[#allocation64_spill] sm:$0xff] }
 0x124   : > { %v1018_v17 = vsel %vm963_vm1, %v13541_v29, %v13540_v35  ;;  %v1168_v55 = vsel %vm963_vm1, %v12825_v33, %v13542_v9  ;;  %v2590_v54 = vadd.f32 %v7721_v5, %v2530_v60  ;;  %v725_v27 = vadd.f32 %v717_v28, %v575_v39  ;;  %v13549_v9 = vld [vmem:[#allocation17_spill] sm:$0xff]  ;;  %v13552_v5 = vld [vmem:[#allocation71_spill] sm:$0xff]  ;;  %v13554_v60 = vld [vmem:[#allocation76_spill] sm:$0xff] }
 0x125   : > { %v7891_v29 = vmul.f32 %v7643_v6, %v13545_v32  ;;  %v7895_v35 = vmul.f32 %v7655_v56, %v13547_v24  ;;  %v13550_v33 = vrot.slane %v13549_v9, 2  ;;  %v7904_v50 = vmul.f32 %v7668_v12, %v7308_v57  ;;  %v13556_v57 = vld [vmem:[#allocation77_spill] sm:$0xff] }
 0x126   : > { %v7908_v39 = vmul.f32 %v7643_v6, %v13552_v5  ;;  %v7912_v28 = vmul.f32 %v7655_v56, %v13554_v60  ;;  %v2650_v24 = vadd.f32 %v7732_v19, %v2590_v54  ;;  %v875_v32 = vadd.f32 %v867_v43, %v725_v27  ;;  %v13558_v54 = vld [vmem:[#allocation66_spill] sm:$0xff] }
 0x127   : > { %13546 = vst [vmem:[#allocation126_spill] sm:$0xff] %v7891_v29  ;;  %v1318_v37 = vsel %vm963_vm1, %v12827_v16, %v13550_v33  ;;  %v12831_v9 = vrot.slane %v7891_v29, 1  ;;  %v7924_v58 = vmul.f32 %v7668_v12, %v13556_v57  ;;  %v13559_v27 = vrot.slane %v13558_v54, 1  ;;  %v13560_v33 = vld [vmem:[#allocation68_spill] sm:$0xff] }
 0x128   : > { %13548 = vst [vmem:[#allocation127_spill] sm:$0xff] %v7895_v35  ;;  %v2740_v19 = vadd.f32 %v7776_v2, %v2650_v24  ;;  %v1026_v43 = vadd.f32 %v1018_v17, %v875_v32  ;;  %v13561_v60 = vrot.slane %v13560_v33, 1  ;;  %v13562_v16 = vrot.slane %v7895_v35, 1  ;;  %v13563_v57 = vld [vmem:[#allocation72_spill] sm:$0xff]  ;;  %v13566_v32 = vld [vmem:[#allocation74_spill] sm:$0xff]  ;;  %v13585_v35 = vld [vmem:[#allocation101_spill] sm:$0xff] }
 0x129   : > { %13551 = vst [vmem:[#allocation17_spill] sm:$0xff] %v7904_v50  ;;  %v1663_v45 = vsel %vm512_vm0, %v12831_v9, %v13559_v27  ;;  %v13564_v46 = vrot.slane %v13563_v57, 1  ;;  %v13565_v2 = vrot.slane %v7904_v50, 1  ;;  %v13567_v24 = vrot.slane %v13566_v32, 2  ;;  %v13569_v27 = vld [vmem:[#allocation78_spill] sm:$0xff]  ;;  %v13587_v29 = vld [vmem:[#allocation104_spill] sm:$0xff] }
 0x12a   : > { %13553 = vst [vmem:[#allocation128_spill] sm:$0xff] %v7908_v39  ;;  %v7939_v5 = vsel %vm512_vm0, %v13562_v16, %v13561_v60  ;;  %v13568_v54 = vrot.slane %v7908_v39, 2  ;;  %v13570_v9 = vrot.slane %v13569_v27, 2  ;;  %v13571_v16 = vrot.slane %v7912_v28, 2  ;;  %v13572_v32 = vld [vmem:[#allocation82_spill] sm:$0xff]  ;;  %v13574_v27 = vld [vmem:[#allocation80_spill] sm:$0xff] }
 0x12b   : > { %13555 = vst [vmem:[#allocation129_spill] sm:$0xff] %v7912_v28  ;;  %v7948_v17 = vsel %vm512_vm0, %v13565_v2, %v13564_v46  ;;  %v12835_v57 = vrot.slane %v7924_v58, 2  ;;  %v2890_v46 = vadd.f32 %v7781_v40, %v2740_v19  ;;  %v1176_v2 = vadd.f32 %v1168_v55, %v1026_v43  ;;  %v13576_v28 = vld [vmem:[#allocation86_spill] sm:$0xff]  ;;  %v13577_v40 = vld [vmem:[#allocation89_spill] sm:$0xff] }
 0x12c   : > { %13557 = vst [vmem:[#allocation130_spill] sm:$0xff] %v7924_v58  ;;  %v7955_v33 = vsel %vm963_vm1, %v13568_v54, %v13567_v24  ;;  %v7962_v60 = vsel %vm963_vm1, %v13571_v16, %v13570_v9  ;;  %v7970_v39 = vmul.f32 %v7737_v36, %v13572_v32  ;;  %v13573_v24 = vld [vmem:[#allocation85_spill] sm:$0xff]  ;;  %v13575_v9 = vrot.slane %v13574_v27, 2  ;;  %v13579_v43 = vld [vmem:[#allocation90_spill] sm:$0xff]  ;;  %v13581_v32 = vld [vmem:[#allocation91_spill] sm:$0xff] }
 0x12d   : > { %v7974_v54 = vmul.f32 %v7746_v63, %v13573_v24  ;;  %v7987_v55 = vmul.f32 %v7758_v59, %v13576_v28  ;;  %v7991_v19 = vmul.f32 %v7737_v36, %v13577_v40  ;;  %v7995_v24 = vmul.f32 %v7746_v63, %v13579_v43  ;;  %v13589_v40 = vld [vmem:[#allocation92_spill] sm:$0xff] }
 0x12e   : > { %v7983_v16 = vsel %vm963_vm1, %v12835_v57, %v13575_v9  ;;  %v3040_v27 = vadd.f32 %v7788_v23, %v2890_v46  ;;  %v1326_v58 = vadd.f32 %v1318_v37, %v1176_v2  ;;  %v8002_v9 = vmul.f32 %v7758_v59, %v13581_v32  ;;  %v13583_v57 = vld [vmem:[#allocation98_spill] sm:$0xff] }
 0x12f   : > { %13578 = vst [vmem:[#allocation66_spill] sm:$0xff] %v7991_v19  ;;  %v8006_v28 = vmul.f32 %v7737_v36, %v13583_v57  ;;  %v8012_v43 = vmul.f32 %v7746_v63, %v13585_v35  ;;  %v8016_v23 = vmul.f32 %v7758_v59, %v13587_v29  ;;  %v13590_v32 = vrot.slane %v13589_v40, 1 }
 0x130   : > { %13580 = vst [vmem:[#allocation68_spill] sm:$0xff] %v7995_v24  ;;  %v3190_v37 = vadd.f32 %v7804_v34, %v3040_v27  ;;  %v1446_v46 = vadd.f32 %v1442_v18, %v1326_v58  ;;  %v12841_v2 = vrot.slane %v8002_v9, 1  ;;  %v13591_v50 = vrot.slane %v7991_v19, 1  ;;  %v13599_v18 = vld [vmem:[#allocation102_spill] sm:$0xff]  ;;  %v5346_v19 = vld [vmem:[%s5641_s16 + $0x50] sm:$0xff] }
 0x131   : > { %13582 = vst [vmem:[#allocation72_spill] sm:$0xff] %v8002_v9  ;;  %v12842_v57 = vrot.slane %v8006_v28, 2  ;;  %v13593_v4 = vrot.slane %v13592_v1, 1  ;;  %v13594_v29 = vrot.slane %v7995_v24, 1 }
 0x132   : > { %13584 = vst [vmem:[#allocation74_spill] sm:$0xff] %v8006_v28  ;;  %v8026_v35 = vsel %vm512_vm0, %v13591_v50, %v13590_v32  ;;  %v3340_v40 = vadd.f32 %v7817_v15, %v3190_v37  ;;  %v1506_v50 = vadd.f32 %v1502_v31, %v1446_v46  ;;  %v13595_v32 = vld [vmem:[#allocation96_spill] sm:$0xff]  ;;  %v13600_v15 = vrot.slane %v13599_v18, 2  ;;  %v13602_v46 = vld [vmem:[#allocation106_spill] sm:$0xff] }
 0x133   : > { %13586 = vst [vmem:[#allocation78_spill] sm:$0xff] %v8012_v43  ;;  %v8033_v34 = vsel %vm512_vm0, %v13594_v29, %v13593_v4  ;;  %v13596_v1 = vrot.slane %v13595_v32, 1  ;;  %v13597_v29 = vld [vmem:[#allocation99_spill] sm:$0xff]  ;;  %v13601_v31 = vrot.slane %v8012_v43, 2  ;;  %v13603_v32 = vrot.slane %v13602_v46, 2 }
 0x134   : > { %13588 = vst [vmem:[#allocation80_spill] sm:$0xff] %v8016_v23  ;;  %v13598_v27 = vrot.slane %v13597_v29, 2  ;;  %v1566_v18 = vadd.f32 %v7886_v20, %v1506_v50  ;;  %v8085_v46 = vstv %s7965_s23  ;;  %v5344_v43 = vld [vmem:[%s5641_s16 + $0x10] sm:$0xff]  ;;  %s8209_s23 = sld [smem:[#allocation3 + $0x60]] }
 0x135   : > { %v8045_v4 = vsel %vm512_vm0, %v12841_v2, %v13596_v1  ;;  %v8061_v37 = vsel %vm963_vm1, %v13601_v31, %v13600_v15  ;;  %v13604_v1 = vrot.slane %v8016_v23, 2  ;;  %v8071_v2 = vstv %s7917_s20  ;;  %13606 = vst [vmem:[#allocation94_spill] sm:$0xff] %v8085_v46  ;;  %s8138_s20 = sld [smem:[#allocation3 + $0x5c]] }
 0x136   : > { %v8052_v58 = vsel %vm963_vm1, %v12842_v57, %v13598_v27  ;;  %v8074_v27 = vstv %s7926_s21  ;;  %v8077_v57 = vadd.f32 %v7830_v22, %v3340_v40  ;;  %v355_v15 = vmul.f32 %v7557_v10, %v8071_v2  ;;  %s8148_s21 = sld [smem:[#allocation3 + $0x5e]] }
 0x137   : > { %v8068_v29 = vsel %vm963_vm1, %v13604_v1, %v13603_v32  ;;  %v415_v31 = vmul.f32 %v7571_v52, %v8074_v27  ;;  %v8088_v32 = vstv %s7941_s22  ;;  %v8091_v1 = vstv %s7976_s29  ;;  %s8167_s22 = sld [smem:[#allocation3 + $0x5f]] }
 0x138   : > { %13605 = vst [vmem:[#allocation92_spill] sm:$0xff] %v8077_v57  ;;  %v8094_v23 = vstv %s7997_s8  ;;  %3756 = vrot.lane.b32.xlu2 %v8077_v57, %s5523_s9  ;;  %v1671_v22 = vadd.f32 %v1663_v45, %v1566_v18  ;;  %v475_v40 = vmul.f32 %v7582_v62, %v8085_v46  ;;  %v8104_v50 = vmul.f32 %v7557_v10, %v8088_v32  ;;  %v5345_v57 = vld [vmem:[%s5641_s16 + $0x30] sm:$0xff]  ;;  %s8223_s29 = sld [smem:[#allocation3 + $0x61]] }
 0x139   : > { %13607 = vst [vmem:[#allocation96_spill] sm:$0xff] %v8094_v23  ;;  %v419_v20 = vadd.f32 %v415_v31, %v355_v15  ;;  %v8110_v28 = vmul.f32 %v5344_v43, %v8088_v32  ;;  %v8114_v9 = vmul.f32 %v7571_v52, %v8091_v1  ;;  %v8118_v45 = vmul.f32 %v5345_v57, %v8091_v1  ;;  %s8230_s8 = sld [smem:[#allocation3 + $0x62]] }
 0x13a   : > { %v8122_v18 = vmul.f32 %v7582_v62, %v8094_v23  ;;  %v1821_v15 = vadd.f32 %v7939_v5, %v1671_v22  ;;  %v12858_v24 = vrot.slane %v8104_v50, 1  ;;  %v8130_v7 = vmul.f32 %v5346_v19, %v8094_v23 }
 0x13b   : > { %13608 = vst [vmem:[#allocation99_spill] sm:$0xff] %v8110_v28  ;;  %v479_v31 = vadd.f32 %v475_v40, %v419_v20  ;;  %v12857_v13 = vrot.slane %v8110_v28, 1  ;;  %v12860_v44 = vrot.slane %v8118_v45, 1  ;;  %v8143_v20 = vstv %s8037_s13  ;;  %s8255_s13 = sld [smem:[#allocation3 + $0x63]] }
 0x13c   : > { %13609 = vst [vmem:[#allocation102_spill] sm:$0xff] %v8114_v9  ;;  %v1971_v5 = vadd.f32 %v7948_v17, %v1821_v15  ;;  %v8146_v40 = vstv %s8054_s14  ;;  %v13612_v38 = vrot.slane %v8114_v9, 1  ;;  %v8162_v15 = vmul.f32 %v7557_v10, %v8143_v20  ;;  %s8273_s14 = sld [smem:[#allocation3 + $0x64]] }
 0x13d   : > { %13610 = vst [vmem:[#allocation106_spill] sm:$0xff] %v8118_v45  ;;  %v592_v42 = vsel %vm512_vm0, %v12858_v24, %v12857_v13  ;;  %v8165_v22 = vmul.f32 %v5344_v43, %v8143_v20  ;;  %v13614_v13 = vrot.slane %v8130_v7, 1  ;;  %v13615_v24 = vrot.slane %v8122_v18, 1 }
 0x13e   : > { %13611 = vst [vmem:[#allocation131_spill] sm:$0xff] %v8130_v7  ;;  %v742_v17 = vsel %vm512_vm0, %v13612_v38, %v12860_v44  ;;  %v2121_v28 = vadd.f32 %v7955_v33, %v1971_v5  ;;  %v600_v51 = vadd.f32 %v592_v42, %v479_v31  ;;  %v8177_v38 = vmul.f32 %v7571_v52, %v8146_v40 }
 0x13f   : > { %13613 = vst [vmem:[#allocation132_spill] sm:$0xff] %v8165_v22  ;;  %v892_v45 = vsel %vm512_vm0, %v13615_v24, %v13614_v13  ;;  %v12864_v44 = vrot.slane %v8162_v15, 2  ;;  %v12863_v43 = vrot.slane %v8165_v22, 2  ;;  %v8182_v14 = vmul.f32 %v5345_v57, %v8146_v40 }
 0x140   : > { %13616 = vst [vmem:[#allocation133_spill] sm:$0xff] %v8177_v38  ;;  %v8185_v9 = vstv %s8096_s15  ;;  %v2271_v42 = vadd.f32 %v7962_v60, %v2121_v28  ;;  %v750_v33 = vadd.f32 %v742_v17, %v600_v51  ;;  %v8203_v28 = vstv %s8106_s17  ;;  %s8278_s15 = sld [smem:[#allocation3 + $0x66]] }
 0x141   : > { %13617 = vst [vmem:[#allocation134_spill] sm:$0xff] %v8182_v14  ;;  %v8191_v24 = vmul.f32 %v7582_v62, %v8185_v9  ;;  %v1043_v57 = vsel %vm963_vm1, %v12864_v44, %v12863_v43  ;;  %v12866_v31 = vrot.slane %v8182_v14, 2  ;;  %v8200_v5 = vmul.f32 %v5346_v19, %v8185_v9  ;;  %s8284_s17 = sld [smem:[#allocation3 + $0x65]] }
 0x142   : > { %13618 = vst [vmem:[#allocation135_spill] sm:$0xff] %v8185_v9  ;;  %v2421_v51 = vadd.f32 %v7983_v16, %v2271_v42  ;;  %v900_v60 = vadd.f32 %v892_v45, %v750_v33  ;;  %v1452_v13 = vmul.f32 %v7643_v6, %v8203_v28  ;;  %v13622_v19 = vrot.slane %v8177_v38, 2  ;;  %v5347_v38 = vld [vmem:[%s5641_s16 + $0x70] sm:$0xff] }
 0x143   : > { %13619 = vst [vmem:[#allocation136_spill] sm:$0xff] %v8191_v24  ;;  %v12871_v44 = vrot.slane %v8200_v5, 2  ;;  %v8218_v16 = vstv %s8124_s18  ;;  %v8221_v45 = vstv %s8138_s20  ;;  %v8238_v22 = vstv %s8132_s19  ;;  %s8295_s18 = sld [smem:[#allocation3 + $0x67]] }
 0x144   : > { %13620 = vst [vmem:[#allocation137_spill] sm:$0xff] %v8200_v5  ;;  %v1193_v43 = vsel %vm963_vm1, %v13622_v19, %v12866_v31  ;;  %v2541_v42 = vadd.f32 %v7970_v39, %v2421_v51  ;;  %v1051_v33 = vadd.f32 %v1043_v57, %v900_v60  ;;  %v1512_v17 = vmul.f32 %v7655_v56, %v8218_v16  ;;  %s8314_s19 = sld [smem:[#allocation3 + $0x68]] }
 0x145   : > { %13621 = vst [vmem:[#allocation138_spill] sm:$0xff] %v8203_v28  ;;  %v1572_v14 = vmul.f32 %v7668_v12, %v8221_v45  ;;  %v13625_v19 = vrot.slane %v8191_v24, 2  ;;  %v8241_v39 = vstv %s8148_s21  ;;  %v8244_v57 = vstv %s8167_s22  ;;  %s8340_s20 = sld [smem:[#allocation3 + $0x69]] }
 0x146   : > { %13623 = vst [vmem:[#allocation139_spill] sm:$0xff] %v8218_v16  ;;  %v2601_v51 = vadd.f32 %v7974_v54, %v2541_v42  ;;  %v1201_v60 = vadd.f32 %v1193_v43, %v1051_v33  ;;  %v8249_v7 = vmul.f32 %v7643_v6, %v8238_v22  ;;  %v8253_v5 = vmul.f32 %v5347_v38, %v8238_v22  ;;  %v5349_v43 = vld [vmem:[%s5641_s16 + $0xb0] sm:$0xff]  ;;  %s8355_s21 = sld [smem:[#allocation3 + $0x6a]] }
 0x147   : > { %13624 = vst [vmem:[#allocation140_spill] sm:$0xff] %v8221_v45  ;;  %v1343_v31 = vsel %vm963_vm1, %v13625_v19, %v12871_v44  ;;  %v8259_v19 = vmul.f32 %v7655_v56, %v8241_v39  ;;  %v5348_v44 = vld [vmem:[%s5641_s16 + $0x90] sm:$0xff]  ;;  %v8267_v54 = vmul.f32 %v7668_v12, %v8244_v57  ;;  %v8271_v42 = vmul.f32 %v5349_v43, %v8244_v57  ;;  %s8370_s22 = sld [smem:[#allocation3 + $0x6b]] }
 0x148   : > { %13626 = vst [vmem:[#allocation141_spill] sm:$0xff] %v8238_v22  ;;  %v8263_v24 = vmul.f32 %v5348_v44, %v8241_v39  ;;  %v2661_v33 = vadd.f32 %v7987_v55, %v2601_v51  ;;  %v1351_v22 = vadd.f32 %v1343_v31, %v1201_v60  ;;  %v12888_v45 = vrot.slane %v8249_v7, 1 }
 0x149   : > { %13627 = vst [vmem:[#allocation142_spill] sm:$0xff] %v8241_v39  ;;  %v12887_v16 = vrot.slane %v8253_v5, 1  ;;  %v12890_v39 = vrot.slane %v8259_v19, 1  ;;  %v8293_v60 = vstv %s8209_s23  ;;  %s9063_s23 = sld [smem:[#allocation3 + $0x6c]] }
 0x14a   : > { %13628 = vst [vmem:[#allocation143_spill] sm:$0xff] %v8244_v57  ;;  %v12889_v28 = vrot.slane %v8263_v24, 1  ;;  %v12892_v57 = vrot.slane %v8271_v42, 1  ;;  %v2766_v55 = vadd.f32 %v8026_v35, %v2661_v33  ;;  %v1456_v31 = vadd.f32 %v1452_v13, %v1351_v22 }
 0x14b   : > { %13629 = vst [vmem:[#allocation144_spill] sm:$0xff] %v8253_v5  ;;  %v1688_v51 = vsel %vm512_vm0, %v12888_v45, %v12887_v16  ;;  %v13634_v35 = vrot.slane %v8267_v54, 1  ;;  %v8309_v13 = vmul.f32 %v7643_v6, %v8293_v60  ;;  %v8312_v33 = vmul.f32 %v5347_v38, %v8293_v60 }
 0x14c   : > { %13630 = vst [vmem:[#allocation145_spill] sm:$0xff] %v8263_v24  ;;  %v1838_v9 = vsel %vm512_vm0, %v12890_v39, %v12889_v28  ;;  %v2916_v16 = vadd.f32 %v8033_v34, %v2766_v55  ;;  %v1516_v45 = vadd.f32 %v1512_v17, %v1456_v31  ;;  %v8318_v28 = vstv %s8223_s29  ;;  %s9075_s29 = sld [smem:[#allocation3 + $0x6d]] }
 0x14d   : > { %13631 = vst [vmem:[#allocation146_spill] sm:$0xff] %v8267_v54  ;;  %v1988_v22 = vsel %vm512_vm0, %v13634_v35, %v12892_v57  ;;  %v8321_v39 = vstv %s8230_s8  ;;  %v12895_v35 = vrot.slane %v8312_v33, 2  ;;  %v8327_v57 = vmul.f32 %v7655_v56, %v8318_v28  ;;  %s9094_s8 = sld [smem:[#allocation3 + $0x6e]] }
 0x14e   : > { %13632 = vst [vmem:[#allocation147_spill] sm:$0xff] %v8271_v42  ;;  %v12896_v42 = vrot.slane %v8309_v13, 2  ;;  %v8330_v38 = vmul.f32 %v5348_v44, %v8318_v28  ;;  %v3066_v24 = vadd.f32 %v8045_v4, %v2916_v16  ;;  %v1576_v34 = vadd.f32 %v1572_v14, %v1516_v45 }
 0x14f   : > { %13633 = vst [vmem:[#allocation148_spill] sm:$0xff] %v8293_v60  ;;  %v8335_v17 = vmul.f32 %v7668_v12, %v8321_v39  ;;  %v8338_v55 = vmul.f32 %v5349_v43, %v8321_v39  ;;  %v12899_v4 = vrot.slane %v8327_v57, 2  ;;  %v8350_v16 = vstv %s8255_s13  ;;  %s9109_s13 = sld [smem:[#allocation3 + $0x6f]] }
 0x150   : > { %13635 = vst [vmem:[#allocation149_spill] sm:$0xff] %v8309_v13  ;;  %v2138_v44 = vsel %vm963_vm1, %v12896_v42, %v12895_v35  ;;  %v12898_v14 = vrot.slane %v8330_v38, 2  ;;  %v3216_v45 = vadd.f32 %v8052_v58, %v3066_v24  ;;  %v1696_v43 = vadd.f32 %v1688_v51, %v1576_v34 }
 0x151   : > { %13636 = vst [vmem:[#allocation150_spill] sm:$0xff] %v8312_v33  ;;  %v12905_v31 = vrot.slane %v8335_v17, 2  ;;  %v12904_v33 = vrot.slane %v8338_v55, 2  ;;  %v2547_v42 = vmul.f32 %v7737_v36, %v8350_v16  ;;  %v8365_v5 = vstv %s8273_s14  ;;  %s9123_s14 = sld [smem:[#allocation3 + $0x70]] }
 0x152   : > { %13637 = vst [vmem:[#allocation151_spill] sm:$0xff] %v8318_v28  ;;  %v2288_v35 = vsel %vm963_vm1, %v12899_v4, %v12898_v14  ;;  %v8368_v58 = vstv %s8284_s17  ;;  %v3366_v24 = vadd.f32 %v8061_v37, %v3216_v45  ;;  %v1846_v51 = vadd.f32 %v1838_v9, %v1696_v43  ;;  %v13651_v43 = vld [vmem:[#allocation83_spill] sm:$0xff]  ;;  %s9189_s17 = sld [smem:[#allocation3 + $0x72]] }
 0x153   : > { %13638 = vst [vmem:[#allocation152_spill] sm:$0xff] %v8321_v39  ;;  %v2438_v34 = vsel %vm963_vm1, %v12905_v31, %v12904_v33  ;;  %v2607_v14 = vmul.f32 %v7746_v63, %v8365_v5  ;;  %v2667_v4 = vmul.f32 %v7758_v59, %v8368_v58 }
 0x154   : > { %13639 = vst [vmem:[#allocation153_spill] sm:$0xff] %v8327_v57  ;;  %v8386_v57 = vstv %s8295_s18  ;;  %v8392_v9 = vadd.f32 %v8068_v29, %v3366_v24  ;;  %v1996_v37 = vadd.f32 %v1988_v22, %v1846_v51  ;;  %v13657_v22 = vld [vmem:[#allocation88_spill] sm:$0xff]  ;;  %s9198_s18 = sld [smem:[#allocation3 + $0x73]] }
 0x155   : > { %13640 = vst [vmem:[#allocation154_spill] sm:$0xff] %v8330_v38  ;;  %v8383_v38 = vstv %s8278_s15  ;;  %v8404_v31 = vmul.f32 %v7746_v63, %v8386_v57  ;;  %s9163_s15 = sld [smem:[#allocation3 + $0x71]] }
 0x156   : > { %13641 = vst [vmem:[#allocation155_spill] sm:$0xff] %v8335_v17  ;;  %v8396_v45 = vmul.f32 %v7737_v36, %v8383_v38  ;;  %v8400_v33 = vmul.f32 %v13651_v43, %v8383_v38  ;;  %3896 = vrot.lane.b32.xlu0 %v8392_v9, %s5523_s9  ;;  %v2146_v51 = vadd.f32 %v2138_v44, %v1996_v37 }
 0x157   : > { %13642 = vst [vmem:[#allocation156_spill] sm:$0xff] %v8338_v55  ;;  %v13654_v55 = vld [vmem:[#allocation87_spill] sm:$0xff]  ;;  %v13662_v54 = vrot.slane %v8404_v31, 1 }
 0x158   : > { %13643 = vst [vmem:[#allocation157_spill] sm:$0xff] %v8350_v16  ;;  %v8389_v16 = vstv %s8314_s19  ;;  %v8408_v17 = vmul.f32 %v13654_v55, %v8386_v57  ;;  %v2296_v39 = vadd.f32 %v2288_v35, %v2146_v51  ;;  %s9213_s19 = sld [smem:[#allocation3 + $0x74]] }
 0x159   : > { %13644 = vst [vmem:[#allocation158_spill] sm:$0xff] %v8365_v5  ;;  %v8412_v29 = vmul.f32 %v7758_v59, %v8389_v16  ;;  %v8416_v24 = vmul.f32 %v13657_v22, %v8389_v16 }
 0x15a   : > { %13645 = vst [vmem:[#allocation159_spill] sm:$0xff] %v8368_v58  ;;  %v12922_v58 = vrot.slane %v8400_v33, 1  ;;  %v12929_v13 = vrot.slane %v8408_v17, 1 }
 0x15b   : > { %13646 = vst [vmem:[#allocation160_spill] sm:$0xff] %v8383_v38  ;;  %v12923_v38 = vrot.slane %v8396_v45, 1  ;;  %v13663_v51 = vrot.slane %v8412_v29, 1 }
 0x15c   : > { %13647 = vst [vmem:[#allocation161_spill] sm:$0xff] %v8386_v57  ;;  %v8423_v57 = vstv %s8340_s20  ;;  %v2933_v35 = vsel %vm512_vm0, %v13662_v54, %v12929_v13  ;;  %s9235_s20 = sld [smem:[#allocation3 + $0x75]] }
 0x15d   : > { %13648 = vst [vmem:[#allocation162_spill] sm:$0xff] %v8389_v16  ;;  %v12928_v16 = vrot.slane %v8416_v24, 1  ;;  %v2783_v44 = vsel %vm512_vm0, %v12923_v38, %v12922_v58  ;;  %v8436_v37 = vmul.f32 %v7737_v36, %v8423_v57  ;;  %v8440_v5 = vmul.f32 %v13651_v43, %v8423_v57 }
 0x15e   : > { %13649 = vst [vmem:[#allocation163_spill] sm:$0xff] %v8392_v9  ;;  %v8453_v38 = vstv %s8355_s21  ;;  %v8456_v9 = vstv %s8370_s22  ;;  %s9259_s21 = sld [smem:[#allocation3 + $0x76]] }
 0x15f   : > { %13650 = vst [vmem:[#allocation164_spill] sm:$0xff] %v8396_v45  ;;  %v3083_v58 = vsel %vm512_vm0, %v13663_v51, %v12928_v16  ;;  %v12941_v43 = vrot.slane %v8436_v37, 2  ;;  %v12940_v45 = vrot.slane %v8440_v5, 2  ;;  %v8466_v54 = vmul.f32 %v13654_v55, %v8453_v38  ;;  %v13674_v55 = vld [vmem:[#allocation37_spill] sm:$0xff]  ;;  %s9267_s22 = sld [smem:[#allocation3 + $0x77]] }
 0x160   : > { %13652 = vst [vmem:[#allocation83_spill] sm:$0xff] %v8400_v33  ;;  %v2446_v33 = vadd.f32 %v2438_v34, %v2296_v39  ;;  %v8470_v51 = vmul.f32 %v7758_v59, %v8456_v9  ;;  %v8474_v16 = vmul.f32 %v13657_v22, %v8456_v9  ;;  %v13668_v39 = vld [vmem:[#allocation12_spill] sm:$0xff] }
 0x161   : > { %13653 = vst [vmem:[#allocation165_spill] sm:$0xff] %v8404_v31  ;;  %v335_v34 = vmul.f32 %v7557_v10, %v13668_v39  ;;  %v13671_v39 = vld [vmem:[#allocation59_spill] sm:$0xff] }
 0x162   : > { %13655 = vst [vmem:[#allocation87_spill] sm:$0xff] %v8408_v17  ;;  %v8462_v17 = vmul.f32 %v7746_v63, %v8453_v38  ;;  %v2551_v13 = vadd.f32 %v2547_v42, %v2446_v33 }
 0x163   : > { %13656 = vst [vmem:[#allocation166_spill] sm:$0xff] %v8412_v29  ;;  %v13669_v29 = vld [vmem:[#allocation14_spill] sm:$0xff] }
 0x164   : > { %13658 = vst [vmem:[#allocation88_spill] sm:$0xff] %v8416_v24  ;;  %v3233_v24 = vsel %vm963_vm1, %v12941_v43, %v12940_v45  ;;  %v395_v31 = vmul.f32 %v7571_v52, %v13669_v29  ;;  %v2611_v42 = vadd.f32 %v2607_v14, %v2551_v13  ;;  %v13673_v45 = vrot.slane %v7561_v48, 1  ;;  %v13679_v13 = vld [vmem:[#allocation19_spill] sm:$0xff] }
 0x165   : > { %13659 = vst [vmem:[#allocation167_spill] sm:$0xff] %v8423_v57  ;;  %v13670_v57 = vld [vmem:[#allocation16_spill] sm:$0xff]  ;;  %v13676_v52 = vrot.slane %v7575_v21, 1  ;;  %v13677_v22 = vrot.slane %v8462_v17, 2  ;;  %v13681_v14 = vrot.slane %v7586_v30, 1  ;;  %v13690_v30 = vrot.slane %v7619_v3, 2 }
 0x166   : > { %13660 = vst [vmem:[#allocation168_spill] sm:$0xff] %v8436_v37  ;;  %v455_v10 = vmul.f32 %v7582_v62, %v13670_v57  ;;  %v399_v33 = vadd.f32 %v395_v31, %v335_v34  ;;  %v13675_v37 = vrot.slane %v13674_v55, 1  ;;  %v13678_v57 = vrot.slane %v8470_v51, 2  ;;  %v13682_v31 = vld [vmem:[#allocation44_spill] sm:$0xff] }
 0x167   : > { %13661 = vst [vmem:[#allocation169_spill] sm:$0xff] %v8440_v5  ;;  %v13672_v5 = vrot.slane %v13671_v39, 1  ;;  %v2671_v55 = vadd.f32 %v2667_v4, %v2611_v42  ;;  %v13685_v39 = vld [vmem:[#allocation21_spill] sm:$0xff]  ;;  %v13692_v4 = vld [vmem:[#allocation22_spill] sm:$0xff] }
 0x168   : > { %13664 = vst [vmem:[#allocation170_spill] sm:$0xff] %v8453_v38  ;;  %v12943_v38 = vrot.slane %v8466_v54, 2  ;;  %v692_v29 = vsel %vm512_vm0, %v13676_v52, %v13675_v37  ;;  %v13684_v37 = vrot.slane %v7595_v25, 2  ;;  %v13686_v52 = vrot.slane %v13685_v39, 2  ;;  %v13691_v25 = vld [vmem:[#allocation20_spill] sm:$0xff]  ;;  %v13693_v42 = vld [vmem:[#allocation50_spill] sm:$0xff] }
 0x169   : > { %13665 = vst [vmem:[#allocation171_spill] sm:$0xff] %v8456_v9  ;;  %v12944_v9 = vrot.slane %v8474_v16, 2  ;;  %v542_v43 = vsel %vm512_vm0, %v13673_v45, %v13672_v5  ;;  %v13680_v5 = vrot.slane %v13679_v13, 1  ;;  %v13683_v45 = vrot.slane %v13682_v31, 2 }
 0x16a   : > { %13666 = vst [vmem:[#allocation172_spill] sm:$0xff] %v8466_v54  ;;  %v3383_v62 = vsel %vm963_vm1, %v13677_v22, %v12943_v38  ;;  %v459_v22 = vadd.f32 %v455_v10, %v399_v33  ;;  %v13687_v38 = vrot.slane %v7606_v26, 2  ;;  %v1492_v31 = vmul.f32 %v7655_v56, %v13691_v25  ;;  %v13699_v56 = vld [vmem:[#allocation54_spill] sm:$0xff] }
 0x16b   : > { %13667 = vst [vmem:[#allocation173_spill] sm:$0xff] %v8474_v16  ;;  %v3533_v48 = vsel %vm963_vm1, %v13678_v57, %v12944_v9  ;;  %v842_v21 = vsel %vm512_vm0, %v13681_v14, %v13680_v5  ;;  %v993_v34 = vsel %vm963_vm1, %v13684_v37, %v13683_v45  ;;  %v13688_v9 = vld [vmem:[#allocation46_spill] sm:$0xff]  ;;  %v1432_v14 = vmul.f32 %v7643_v6, %v6628_v49  ;;  %v13696_v45 = vld [vmem:[#allocation52_spill] sm:$0xff] }
 0x16c   : > { %v1143_v57 = vsel %vm963_vm1, %v13687_v38, %v13686_v52  ;;  %v13689_v13 = vrot.slane %v13688_v9, 2  ;;  %v8537_v10 = vmul.f32 %v7668_v12, %v13692_v4  ;;  %v13694_v26 = vrot.slane %v13693_v42, 1  ;;  %v13710_v42 = vld [vmem:[#allocation31_spill] sm:$0xff]  ;;  %v13729_v54 = vld [vmem:[#allocation38_spill] sm:$0xff] }
 0x16d   : > { %v13695_v38 = vrot.slane %v7647_v0, 1  ;;  %v2791_v3 = vadd.f32 %v2783_v44, %v2671_v55  ;;  %v550_v33 = vadd.f32 %v542_v43, %v459_v22  ;;  %v13697_v37 = vrot.slane %v13696_v45, 1  ;;  %v13702_v0 = vld [vmem:[#allocation27_spill] sm:$0xff]  ;;  %v13706_v43 = vld [vmem:[#allocation29_spill] sm:$0xff] }
 0x16e   : > { %v1293_v5 = vsel %vm963_vm1, %v13690_v30, %v13689_v13  ;;  %v13698_v49 = vrot.slane %v7659_v47, 1  ;;  %v13700_v39 = vrot.slane %v13699_v56, 1  ;;  %v13701_v12 = vrot.slane %v7672_v61, 1  ;;  %v13704_v30 = vld [vmem:[#allocation112_spill] sm:$0xff]  ;;  %v13708_v47 = vld [vmem:[#allocation113_spill] sm:$0xff]  ;;  %v13712_v61 = vld [vmem:[#allocation114_spill] sm:$0xff] }
 0x16f   : > { %v8544_v9 = vsel %vm512_vm0, %v13695_v38, %v13694_v26  ;;  %v13703_v13 = vrot.slane %v13702_v0, 2  ;;  %v13705_v25 = vrot.slane %v13704_v30, 2  ;;  %v13707_v55 = vrot.slane %v13706_v43, 2 }
 0x170   : > { %v8551_v6 = vsel %vm512_vm0, %v13698_v49, %v13697_v37  ;;  %v8558_v52 = vsel %vm512_vm0, %v13701_v12, %v13700_v39  ;;  %v13709_v22 = vrot.slane %v13708_v47, 2  ;;  %v13711_v26 = vrot.slane %v13710_v42, 2  ;;  %v13714_v37 = vld [vmem:[#allocation15_spill] sm:$0xff]  ;;  %v13715_v12 = vld [vmem:[#allocation26_spill] sm:$0xff] }
 0x171   : > { %v8565_v44 = vsel %vm963_vm1, %v13705_v25, %v13703_v13  ;;  %v13713_v38 = vrot.slane %v13712_v61, 2  ;;  %v8583_v49 = vmul.f32 %v7737_v36, %v13714_v37  ;;  %v2941_v56 = vadd.f32 %v2933_v35, %v2791_v3  ;;  %v13716_v13 = vld [vmem:[#allocation28_spill] sm:$0xff]  ;;  %v13717_v25 = vld [vmem:[#allocation25_spill] sm:$0xff] }
 0x172   : > { %v8572_v4 = vsel %vm963_vm1, %v13709_v22, %v13707_v55  ;;  %v700_v39 = vadd.f32 %v692_v29, %v550_v33  ;;  %v8587_v0 = vmul.f32 %v7746_v63, %v13715_v12  ;;  %v8591_v30 = vmul.f32 %v7758_v59, %v13716_v13  ;;  %v13720_v36 = vld [vmem:[#allocation105_spill] sm:$0xff]  ;;  %v13721_v35 = vld [vmem:[#allocation108_spill] sm:$0xff] }
 0x173   : > { %v8579_v45 = vsel %vm963_vm1, %v13713_v38, %v13711_v26  ;;  %v13718_v43 = vrot.slane %v13717_v25, 1  ;;  %v13719_v55 = vrot.slane %v7741_v8, 1  ;;  %v354_v22 = vmul.f32 %v13720_v36, %v8071_v2  ;;  %v13722_v63 = vld [vmem:[#allocation109_spill] sm:$0xff] }
 0x174   : > { %v414_v29 = vmul.f32 %v13721_v35, %v8074_v27  ;;  %v474_v3 = vmul.f32 %v13722_v63, %v8085_v46  ;;  %v3091_v33 = vadd.f32 %v3083_v58, %v2941_v56  ;;  %v850_v42 = vadd.f32 %v842_v21, %v700_v39  ;;  %v13723_v59 = vld [vmem:[#allocation33_spill] sm:$0xff]  ;;  %v13726_v39 = vld [vmem:[#allocation35_spill] sm:$0xff] }
 0x175   : > { %v8598_v47 = vsel %vm512_vm0, %v13719_v55, %v13718_v43  ;;  %v13724_v26 = vrot.slane %v13723_v59, 1  ;;  %v13725_v61 = vrot.slane %v7750_v11, 1  ;;  %v580_v38 = vmul.f32 %v13720_v36, %v8088_v32 }
 0x176   : > { %v418_v37 = vadd.f32 %v414_v29, %v354_v22  ;;  %v730_v12 = vmul.f32 %v13721_v35, %v8091_v1  ;;  %v880_v13 = vmul.f32 %v13722_v63, %v8094_v23  ;;  %v1031_v58 = vmul.f32 %v13720_v36, %v8143_v20 }
 0x177   : > { %v8611_v8 = vsel %vm512_vm0, %v13725_v61, %v13724_v26  ;;  %v3241_v21 = vadd.f32 %v3233_v24, %v3091_v33  ;;  %v1001_v56 = vadd.f32 %v993_v34, %v850_v42  ;;  %v13727_v11 = vrot.slane %v13726_v39, 1  ;;  %v13733_v42 = vld [vmem:[#allocation102_spill] sm:$0xff]  ;;  %v13742_v39 = vld [vmem:[#allocation135_spill] sm:$0xff] }
 0x178   : > { %v13728_v25 = vrot.slane %v7762_v41, 1  ;;  %v588_v55 = vrot.slane %v580_v38, 1  ;;  %v478_v22 = vadd.f32 %v474_v3, %v418_v37  ;;  %v738_v29 = vrot.slane %v730_v12, 1  ;;  %v13738_v12 = vld [vmem:[#allocation41_spill] sm:$0xff] }
 0x179   : > { %v888_v59 = vrot.slane %v880_v13, 1  ;;  %v1039_v26 = vrot.slane %v1031_v58, 2  ;;  %v3391_v61 = vadd.f32 %v3383_v62, %v3241_v21  ;;  %v1151_v16 = vadd.f32 %v1143_v57, %v1001_v56  ;;  %v13740_v13 = vld [vmem:[#allocation118_spill] sm:$0xff] }
 0x17a   : > { %v8626_v43 = vsel %vm512_vm0, %v13728_v25, %v13727_v11  ;;  %v13730_v23 = vrot.slane %v13729_v54, 2  ;;  %v13731_v36 = vrot.slane %v7771_v53, 2  ;;  %v13732_v34 = vrot.slane %v8104_v50, 1  ;;  %v13744_v25 = vld [vmem:[#allocation18_spill] sm:$0xff] }
 0x17b   : > { %v13734_v38 = vrot.slane %v13733_v42, 1  ;;  %v13735_v37 = vrot.slane %v8122_v18, 1  ;;  %v13736_v54 = vrot.slane %v8162_v15, 2  ;;  %v8647_v57 = vadd.f32 %v3533_v48, %v3391_v61  ;;  %v13743_v15 = vld [vmem:[#allocation138_spill] sm:$0xff]  ;;  %v13745_v48 = vld [vmem:[#allocation139_spill] sm:$0xff] }
 0x17c   : > { %v8633_v24 = vsel %vm963_vm1, %v13731_v36, %v13730_v23  ;;  %v590_v41 = vsel %vm512_vm0, %v588_v55, %v13732_v34  ;;  %v1301_v23 = vadd.f32 %v1293_v5, %v1151_v16  ;;  %v13739_v50 = vrot.slane %v13738_v12, 2  ;;  %v13751_v34 = vld [vmem:[#allocation140_spill] sm:$0xff] }
 0x17d   : > { %v599_v33 = vadd.f32 %v590_v41, %v478_v22  ;;  %v740_v3 = vsel %vm512_vm0, %v738_v29, %v13734_v38  ;;  %v890_v62 = vsel %vm512_vm0, %v888_v59, %v13735_v37  ;;  %v1041_v53 = vsel %vm963_vm1, %v1039_v26, %v13736_v54  ;;  %13737 = vst [vmem:[#allocation12_spill] sm:$0xff] %v8647_v57  ;;  %v13746_v22 = vld [vmem:[#allocation13_spill] sm:$0xff]  ;;  %v13747_v29 = vld [vmem:[#allocation42_spill] sm:$0xff]  ;;  %v13749_v26 = vld [vmem:[#allocation119_spill] sm:$0xff] }
 0x17e   : > { %v13741_v58 = vrot.slane %v13740_v13, 2  ;;  %v1181_v56 = vmul.f32 %v13721_v35, %v8146_v40  ;;  %v1331_v11 = vmul.f32 %v13722_v63, %v13742_v39  ;;  %v1451_v55 = vmul.f32 %v13744_v25, %v13743_v15  ;;  %4034 = vrot.lane.b32.xlu1 %v8647_v57, %s5523_s9  ;;  %v13752_v63 = vld [vmem:[#allocation110_spill] sm:$0xff]  ;;  %v13753_v38 = vld [vmem:[#allocation141_spill] sm:$0xff]  ;;  %v13757_v13 = vld [vmem:[#allocation143_spill] sm:$0xff] }
 0x17f   : > { %v749_v18 = vadd.f32 %v740_v3, %v599_v33  ;;  %v1511_v16 = vmul.f32 %v13746_v22, %v13745_v48  ;;  %v1436_v5 = vadd.f32 %v1432_v14, %v1301_v23  ;;  %v13748_v59 = vrot.slane %v13747_v29, 2  ;;  %v13754_v37 = vld [vmem:[#allocation142_spill] sm:$0xff]  ;;  %v13755_v23 = vld [vmem:[#allocation133_spill] sm:$0xff] }
 0x180   : > { %v8654_v21 = vsel %vm963_vm1, %v13741_v58, %v13739_v50  ;;  %v13750_v61 = vrot.slane %v13749_v26, 2  ;;  %v1189_v36 = vrot.slane %v1181_v56, 2  ;;  %v1571_v41 = vmul.f32 %v13752_v63, %v13751_v34 }
 0x181   : > { %v899_v33 = vadd.f32 %v890_v62, %v749_v18  ;;  %v1339_v42 = vrot.slane %v1331_v11, 2  ;;  %v1676_v3 = vmul.f32 %v13744_v25, %v13753_v38  ;;  %v1826_v54 = vmul.f32 %v13746_v22, %v13754_v37  ;;  %v13758_v62 = vld [vmem:[#allocation136_spill] sm:$0xff] }
 0x182   : > { %v8671_v35 = vsel %vm963_vm1, %v13750_v61, %v13748_v59  ;;  %v1496_v14 = vadd.f32 %v1492_v31, %v1436_v5  ;;  %v13756_v12 = vrot.slane %v13755_v23, 2  ;;  %v1976_v58 = vmul.f32 %v13752_v63, %v13757_v13 }
 0x183   : > { %v2126_v56 = vmul.f32 %v13744_v25, %v8293_v60  ;;  %v1050_v29 = vadd.f32 %v1041_v53, %v899_v33  ;;  %v13759_v18 = vrot.slane %v13758_v62, 2  ;;  %v1684_v59 = vrot.slane %v1676_v3, 1  ;;  %v13762_v33 = vld [vmem:[#allocation152_spill] sm:$0xff] }
 0x184   : > { %v1191_v50 = vsel %vm963_vm1, %v1189_v36, %v13756_v12  ;;  %v1834_v26 = vrot.slane %v1826_v54, 1  ;;  %v1556_v61 = vadd.f32 %v8537_v10, %v1496_v14  ;;  %v1984_v31 = vrot.slane %v1976_v58, 1  ;;  %v13763_v10 = vld [vmem:[#allocation146_spill] sm:$0xff]  ;;  %v13765_v58 = vld [vmem:[#allocation149_spill] sm:$0xff] }
 0x185   : > { %v1341_v11 = vsel %vm963_vm1, %v1339_v42, %v13759_v18  ;;  %v2134_v5 = vrot.slane %v2126_v56, 2  ;;  %v2276_v36 = vmul.f32 %v13746_v22, %v8318_v28  ;;  %v1200_v23 = vadd.f32 %v1191_v50, %v1050_v29  ;;  %v13767_v18 = vld [vmem:[#allocation157_spill] sm:$0xff]  ;;  %v13781_v28 = vld [vmem:[#allocation170_spill] sm:$0xff] }
 0x186   : > { %v13760_v12 = vrot.slane %v8249_v7, 1  ;;  %v13761_v53 = vrot.slane %v8259_v19, 1  ;;  %v2426_v42 = vmul.f32 %v13752_v63, %v13762_v33  ;;  %v1646_v3 = vadd.f32 %v8544_v9, %v1556_v61  ;;  %v13768_v19 = vld [vmem:[#allocation115_spill] sm:$0xff]  ;;  %v13771_v61 = vld [vmem:[#allocation153_spill] sm:$0xff] }
 0x187   : > { %v13764_v54 = vrot.slane %v13763_v10, 1  ;;  %v13766_v56 = vrot.slane %v13765_v58, 2  ;;  %v2284_v7 = vrot.slane %v2276_v36, 2  ;;  %v1350_v29 = vadd.f32 %v1341_v11, %v1200_v23  ;;  %v13775_v11 = vld [vmem:[#allocation160_spill] sm:$0xff]  ;;  %v13776_v58 = vld [vmem:[#allocation155_spill] sm:$0xff] }
 0x188   : > { %v1686_v57 = vsel %vm512_vm0, %v1684_v59, %v13760_v12  ;;  %v1836_v25 = vsel %vm512_vm0, %v1834_v26, %v13761_v53  ;;  %v2434_v62 = vrot.slane %v2426_v42, 2  ;;  %v8709_v59 = vmul.f32 %v13768_v19, %v13767_v18  ;;  %v13769_v26 = vld [vmem:[#allocation158_spill] sm:$0xff]  ;;  %v13770_v12 = vld [vmem:[#allocation116_spill] sm:$0xff]  ;;  %v13778_v18 = vld [vmem:[#allocation161_spill] sm:$0xff] }
 0x189   : > { %v1986_v14 = vsel %vm512_vm0, %v1984_v31, %v13764_v54  ;;  %v2136_v50 = vsel %vm963_vm1, %v2134_v5, %v13766_v56  ;;  %v8713_v53 = vmul.f32 %v13770_v12, %v13769_v26  ;;  %v1796_v9 = vadd.f32 %v8551_v6, %v1646_v3  ;;  %v13773_v54 = vld [vmem:[#allocation159_spill] sm:$0xff]  ;;  %v13774_v5 = vld [vmem:[#allocation117_spill] sm:$0xff]  ;;  %v13779_v3 = vld [vmem:[#allocation162_spill] sm:$0xff] }
 0x18a   : > { %v13772_v10 = vrot.slane %v13771_v61, 2  ;;  %v8723_v36 = vmul.f32 %v13774_v5, %v13773_v54  ;;  %v2771_v23 = vmul.f32 %v13768_v19, %v13775_v11  ;;  %v1455_v42 = vadd.f32 %v1451_v55, %v1350_v29  ;;  %v13780_v54 = vld [vmem:[#allocation167_spill] sm:$0xff] }
 0x18b   : > { %v13777_v56 = vrot.slane %v13776_v58, 2  ;;  %v2921_v6 = vmul.f32 %v13770_v12, %v13778_v18  ;;  %v1946_v61 = vadd.f32 %v8558_v52, %v1796_v9  ;;  %v3221_v33 = vmul.f32 %v13768_v19, %v13780_v54 }
 0x18c   : > { %v8719_v31 = vsel %vm963_vm1, %v2284_v7, %v13772_v10  ;;  %v3071_v7 = vmul.f32 %v13774_v5, %v13779_v3  ;;  %v2779_v10 = vrot.slane %v2771_v23, 1  ;;  %v3371_v55 = vmul.f32 %v13770_v12, %v13781_v28  ;;  %v13783_v3 = vld [vmem:[#allocation164_spill] sm:$0xff]  ;;  %v13785_v28 = vld [vmem:[#allocation165_spill] sm:$0xff] }
 0x18d   : > { %v8730_v26 = vsel %vm963_vm1, %v2434_v62, %v13777_v56  ;;  %v1515_v29 = vadd.f32 %v1511_v16, %v1455_v42  ;;  %v2929_v58 = vrot.slane %v2921_v6, 1  ;;  %v13782_v56 = vld [vmem:[#allocation171_spill] sm:$0xff]  ;;  %v2096_v18 = vadd.f32 %v8565_v44, %v1946_v61  ;;  %v13787_v42 = vld [vmem:[#allocation166_spill] sm:$0xff]  ;;  %v13789_v61 = vld [vmem:[#allocation168_spill] sm:$0xff] }
 0x18e   : > { %v3079_v62 = vrot.slane %v3071_v7, 1  ;;  %v3521_v11 = vmul.f32 %v13774_v5, %v13782_v56  ;;  %v13784_v60 = vrot.slane %v13783_v3, 1  ;;  %v3229_v9 = vrot.slane %v3221_v33, 2  ;;  %v13792_v33 = vld [vmem:[#allocation45_spill] sm:$0xff]  ;;  %v13801_v56 = vld [vmem:[#allocation56_spill] sm:$0xff] }
 0x18f   : > { %v3379_v23 = vrot.slane %v3371_v55, 2  ;;  %v1575_v54 = vadd.f32 %v1571_v41, %v1515_v29  ;;  %v13786_v13 = vrot.slane %v13785_v28, 1  ;;  %v13788_v6 = vrot.slane %v13787_v42, 1 }
 0x190   : > { %v8747_v52 = vsel %vm512_vm0, %v2779_v10, %v13784_v60  ;;  %v3529_v44 = vrot.slane %v3521_v11, 2  ;;  %v2246_v3 = vadd.f32 %v8572_v4, %v2096_v18  ;;  %v13790_v60 = vrot.slane %v13789_v61, 2  ;;  %v8781_v18 = vld [vmem:[%s5641_s16 + $0x20] sm:$0xff] }
 0x191   : > { %v8752_v16 = vsel %vm512_vm0, %v2929_v58, %v13786_v13  ;;  %v8757_v7 = vsel %vm512_vm0, %v3079_v62, %v13788_v6  ;;  %v13791_v41 = vrot.slane %v8462_v17, 2  ;;  %v8771_v13 = vld [vmem:[%s5641_s16] sm:$0xff]  ;;  %v1695_v29 = vadd.f32 %v1686_v57, %v1575_v54  ;;  %13794 = vst [vmem:[#allocation14_spill] sm:$0xff] %v8781_v18  ;;  %v13795_v58 = vld [vmem:[#allocation47_spill] sm:$0xff] }
 0x192   : > { %v8763_v10 = vsel %vm963_vm1, %v3229_v9, %v13790_v60  ;;  %v344_v55 = vmul.f32 %v8771_v13, %v13792_v33  ;;  %v13793_v11 = vrot.slane %v8470_v51, 2  ;;  %v404_v62 = vmul.f32 %v8781_v18, %v13795_v58  ;;  %v8786_v17 = vld [vmem:[%s5641_s16 + $0x40] sm:$0xff]  ;;  %v13797_v6 = vld [vmem:[#allocation51_spill] sm:$0xff] }
 0x193   : > { %v8768_v28 = vsel %vm963_vm1, %v3379_v23, %v13791_v41  ;;  %v13796_v9 = vld [vmem:[#allocation49_spill] sm:$0xff]  ;;  %v2396_v42 = vadd.f32 %v8579_v45, %v2246_v3  ;;  %v555_v57 = vmul.f32 %v8771_v13, %v13797_v6  ;;  %v13798_v54 = vld [vmem:[#allocation55_spill] sm:$0xff]  ;;  %v1845_v60 = vadd.f32 %v1836_v25, %v1695_v29  ;;  %v13802_v25 = vld [vmem:[#allocation120_spill] sm:$0xff] }
 0x194   : > { %v8778_v4 = vsel %vm963_vm1, %v3529_v44, %v13793_v11  ;;  %v464_v23 = vmul.f32 %v8786_v17, %v13796_v9  ;;  %v705_v51 = vmul.f32 %v8781_v18, %v13798_v54  ;;  %v13799_v44 = vld [vmem:[#allocation24_spill] sm:$0xff]  ;;  %v408_v41 = vadd.f32 %v404_v62, %v344_v55  ;;  %v13804_v62 = vld [vmem:[#allocation121_spill] sm:$0xff] }
 0x195   : > { %v855_v61 = vmul.f32 %v8786_v17, %v13799_v44  ;;  %v13800_v11 = vld [vmem:[#allocation36_spill] sm:$0xff]  ;;  %v1156_v33 = vmul.f32 %v8781_v18, %v13801_v56  ;;  %v2531_v9 = vadd.f32 %v8583_v49, %v2396_v42  ;;  %v563_v45 = vrot.slane %v555_v57, 1  ;;  %v13806_v18 = vld [vmem:[#allocation122_spill] sm:$0xff] }
 0x196   : > { %v1006_v58 = vmul.f32 %v8771_v13, %v13800_v11  ;;  %v713_v3 = vrot.slane %v705_v51, 1  ;;  %v1995_v37 = vadd.f32 %v1986_v14, %v1845_v60  ;;  %v468_v38 = vadd.f32 %v464_v23, %v408_v41  ;;  %v13808_v23 = vld [vmem:[#allocation123_spill] sm:$0xff]  ;;  %v13812_v60 = vld [vmem:[#allocation32_spill] sm:$0xff] }
 0x197   : > { %v863_v6 = vrot.slane %v855_v61, 1  ;;  %v1164_v34 = vrot.slane %v1156_v33, 2  ;;  %v2591_v44 = vadd.f32 %v8587_v0, %v2531_v9  ;;  %v13803_v55 = vrot.slane %v13802_v25, 1  ;;  %v13810_v33 = vld [vmem:[#allocation124_spill] sm:$0xff] }
 0x198   : > { %v1014_v54 = vrot.slane %v1006_v58, 2  ;;  %v13805_v11 = vrot.slane %v13804_v62, 1  ;;  %v13807_v49 = vrot.slane %v13806_v18, 1  ;;  %v2145_v57 = vadd.f32 %v2136_v50, %v1995_v37  ;;  %v8822_v18 = vld [vmem:[%s5641_s16 + $0x60] sm:$0xff] }
 0x199   : > { %v565_v29 = vsel %vm512_vm0, %v563_v45, %v13803_v55  ;;  %v13809_v58 = vrot.slane %v13808_v23, 2  ;;  %v13811_v9 = vrot.slane %v13810_v33, 2  ;;  %v2651_v61 = vadd.f32 %v8591_v30, %v2591_v44  ;;  %v13813_v45 = vld [vmem:[#allocation61_spill] sm:$0xff] }
 0x19a   : > { %v715_v56 = vsel %vm512_vm0, %v713_v3, %v13805_v11  ;;  %v865_v42 = vsel %vm512_vm0, %v863_v6, %v13807_v49  ;;  %v574_v14 = vadd.f32 %v565_v29, %v468_v38  ;;  %v1306_v41 = vmul.f32 %v8786_v17, %v13812_v60  ;;  %v13814_v38 = vld [vmem:[#allocation62_spill] sm:$0xff]  ;;  %v13817_v62 = vld [vmem:[#allocation65_spill] sm:$0xff] }
 0x19b   : > { %v1016_v0 = vsel %vm963_vm1, %v1014_v54, %v13809_v58  ;;  %v1166_v51 = vsel %vm963_vm1, %v1164_v34, %v13811_v9  ;;  %v1441_v37 = vmul.f32 %v8822_v18, %v13813_v45  ;;  %v1501_v50 = vmul.f32 %v13746_v22, %v13814_v38  ;;  %v13815_v54 = vld [vmem:[#allocation63_spill] sm:$0xff]  ;;  %v13816_v34 = vld [vmem:[#allocation64_spill] sm:$0xff]  ;;  %v8835_v29 = vld [vmem:[%s5641_s16 + $0x80] sm:$0xff] }
 0x19c   : > { %v2295_v3 = vadd.f32 %v8719_v31, %v2145_v57  ;;  %v724_v6 = vadd.f32 %v715_v56, %v574_v14  ;;  %v1561_v25 = vmul.f32 %v13752_v63, %v13815_v54  ;;  %v1651_v30 = vmul.f32 %v8822_v18, %v13816_v34  ;;  %v8840_v49 = vld [vmem:[%s5641_s16 + $0xa0] sm:$0xff]  ;;  %v13819_v14 = vld [vmem:[#allocation71_spill] sm:$0xff] }
 0x19d   : > { %v2741_v44 = vadd.f32 %v8598_v47, %v2651_v61  ;;  %v1314_v55 = vrot.slane %v1306_v41, 2  ;;  %v1801_v11 = vmul.f32 %v8835_v29, %v13817_v62  ;;  %v13818_v22 = vld [vmem:[#allocation70_spill] sm:$0xff]  ;;  %v2101_v23 = vmul.f32 %v8822_v18, %v13819_v14  ;;  %v13820_v58 = vld [vmem:[#allocation125_spill] sm:$0xff] }
 0x19e   : > { %v1951_v31 = vmul.f32 %v8840_v49, %v13818_v22  ;;  %v2445_v56 = vadd.f32 %v8730_v26, %v2295_v3  ;;  %v874_v57 = vadd.f32 %v865_v42, %v724_v6  ;;  %v1659_v63 = vrot.slane %v1651_v30, 1  ;;  %v13822_v62 = vld [vmem:[#allocation126_spill] sm:$0xff]  ;;  %v13824_v6 = vld [vmem:[#allocation127_spill] sm:$0xff] }
 0x19f   : > { %v2891_v47 = vadd.f32 %v8611_v8, %v2741_v44  ;;  %v13821_v33 = vrot.slane %v13820_v58, 2  ;;  %v1809_v61 = vrot.slane %v1801_v11, 1  ;;  %v13823_v22 = vrot.slane %v13822_v62, 1  ;;  %v13826_v44 = vld [vmem:[#allocation17_spill] sm:$0xff]  ;;  %v13828_v11 = vld [vmem:[#allocation76_spill] sm:$0xff] }
 0x1a0   : > { %v1959_v60 = vrot.slane %v1951_v31, 1  ;;  %v2550_v41 = vadd.f32 %v8709_v59, %v2445_v56  ;;  %v1025_v34 = vadd.f32 %v1016_v0, %v874_v57  ;;  %v2109_v42 = vrot.slane %v2101_v23, 2  ;;  %v13829_v56 = vld [vmem:[#allocation128_spill] sm:$0xff] }
 0x1a1   : > { %v1316_v9 = vsel %vm963_vm1, %v1314_v55, %v13821_v33  ;;  %v1661_v26 = vsel %vm512_vm0, %v1659_v63, %v13823_v22  ;;  %v3041_v3 = vadd.f32 %v8626_v43, %v2891_v47  ;;  %v13825_v30 = vrot.slane %v13824_v6, 1  ;;  %v13831_v63 = vld [vmem:[#allocation77_spill] sm:$0xff]  ;;  %v13832_v33 = vld [vmem:[#allocation82_spill] sm:$0xff] }
 0x1a2   : > { %v13827_v14 = vrot.slane %v13826_v44, 1  ;;  %v2251_v59 = vmul.f32 %v8835_v29, %v13828_v11  ;;  %v2610_v0 = vadd.f32 %v8713_v53, %v2550_v41  ;;  %v1175_v31 = vadd.f32 %v1166_v51, %v1025_v34  ;;  %v13834_v34 = vld [vmem:[#allocation86_spill] sm:$0xff] }
 0x1a3   : > { %v1811_v8 = vsel %vm512_vm0, %v1809_v61, %v13825_v30  ;;  %v13830_v57 = vrot.slane %v13829_v56, 2  ;;  %v2401_v23 = vmul.f32 %v8840_v49, %v13831_v63  ;;  %v3191_v47 = vadd.f32 %v8633_v24, %v3041_v3  ;;  %v13835_v24 = vld [vmem:[#allocation129_spill] sm:$0xff] }
 0x1a4   : > { %v8862_v55 = vsel %vm512_vm0, %v1959_v60, %v13827_v14  ;;  %v2259_v58 = vrot.slane %v2251_v59, 2  ;;  %v8877_v61 = vmul.f32 %v13768_v19, %v13832_v33  ;;  %v13833_v60 = vld [vmem:[#allocation85_spill] sm:$0xff]  ;;  %v2670_v53 = vadd.f32 %v8723_v36, %v2610_v0  ;;  %v13838_v36 = vld [vmem:[#allocation90_spill] sm:$0xff] }
 0x1a5   : > { %v8870_v43 = vsel %vm963_vm1, %v2109_v42, %v13830_v57  ;;  %v8881_v62 = vmul.f32 %v13770_v12, %v13833_v60  ;;  %v1325_v51 = vadd.f32 %v1316_v9, %v1175_v31  ;;  %v2409_v41 = vrot.slane %v2401_v23, 2  ;;  %v8895_v6 = vld [vmem:[%s5641_s16 + $0xc0] sm:$0xff]  ;;  %v13841_v31 = vld [vmem:[#allocation91_spill] sm:$0xff] }
 0x1a6   : > { %v8886_v22 = vmul.f32 %v13774_v5, %v13834_v34  ;;  %v3341_v42 = vadd.f32 %v8654_v21, %v3191_v47  ;;  %v13836_v3 = vrot.slane %v13835_v24, 2  ;;  %v13837_v30 = vld [vmem:[#allocation89_spill] sm:$0xff]  ;;  %v2896_v9 = vmul.f32 %v13770_v12, %v13838_v36  ;;  %v13839_v59 = vld [vmem:[#allocation130_spill] sm:$0xff]  ;;  %v13847_v24 = vld [vmem:[#allocation68_spill] sm:$0xff] }
 0x1a7   : > { %v2746_v44 = vmul.f32 %v8895_v6, %v13837_v30  ;;  %v2790_v14 = vadd.f32 %v8747_v52, %v2670_v53  ;;  %v1445_v11 = vadd.f32 %v1441_v37, %v1325_v51  ;;  %v13840_v0 = vrot.slane %v13839_v59, 2  ;;  %v13843_v47 = vld [vmem:[#allocation98_spill] sm:$0xff]  ;;  %v13844_v51 = vld [vmem:[#allocation101_spill] sm:$0xff] }
 0x1a8   : > { %v8892_v19 = vsel %vm963_vm1, %v2259_v58, %v13836_v3  ;;  %v3046_v56 = vmul.f32 %v13774_v5, %v13841_v31  ;;  %v8910_v57 = vadd.f32 %v8671_v35, %v3341_v42  ;;  %v2904_v23 = vrot.slane %v2896_v9, 1  ;;  %v8916_v53 = vld [vmem:[%s5641_s16 + $0xe0] sm:$0xff] }
 0x1a9   : > { %v8905_v21 = vsel %vm963_vm1, %v2409_v41, %v13840_v0  ;;  %v2754_v63 = vrot.slane %v2746_v44, 1  ;;  %v3196_v12 = vmul.f32 %v8895_v6, %v13843_v47  ;;  %v2940_v52 = vadd.f32 %v8752_v16, %v2790_v14  ;;  %v13845_v35 = vld [vmem:[#allocation66_spill] sm:$0xff]  ;;  %v13849_v44 = vld [vmem:[#allocation104_spill] sm:$0xff] }
 0x1aa   : > { %13842 = vst [vmem:[#allocation16_spill] sm:$0xff] %v8910_v57  ;;  %v1505_v37 = vadd.f32 %v1501_v50, %v1445_v11  ;;  %v3054_v58 = vrot.slane %v3046_v56, 1  ;;  %v3346_v41 = vmul.f32 %v8916_v53, %v13844_v51  ;;  %3758 = vrot.lane.b32.xlu2 %v8910_v57, %s5523_s9  ;;  %v13846_v5 = vrot.slane %v13845_v35, 1  ;;  %v8933_v30 = vld [vmem:[%s5641_s16 + $0x100] sm:$0xff]  ;;  %v13850_v11 = vld [vmem:[#allocation72_spill] sm:$0xff] }
 0x1ab   : > { %v13848_v3 = vrot.slane %v13847_v24, 1  ;;  %v3204_v50 = vrot.slane %v3196_v12, 2  ;;  %v3496_v36 = vmul.f32 %v8933_v30, %v13849_v44  ;;  %v3090_v9 = vadd.f32 %v8757_v7, %v2940_v52  ;;  %v13852_v56 = vld [vmem:[#allocation74_spill] sm:$0xff]  ;;  %v8949_v12 = vld [vmem:[%s5641_s16 + $0x18] sm:$0xff] }
 0x1ac   : > { %v8925_v42 = vsel %vm512_vm0, %v2754_v63, %v13846_v5  ;;  %v1565_v14 = vadd.f32 %v1561_v25, %v1505_v37  ;;  %v13851_v59 = vrot.slane %v13850_v11, 1  ;;  %v3354_v31 = vrot.slane %v3346_v41, 2  ;;  %v8954_v35 = vld [vmem:[%s5641_s16 + $0x38] sm:$0xff]  ;;  %v13855_v37 = vld [vmem:[#allocation78_spill] sm:$0xff] }
 0x1ad   : > { %v8930_v16 = vsel %vm512_vm0, %v2904_v23, %v13848_v3  ;;  %v13853_v63 = vrot.slane %v13852_v56, 2  ;;  %v3504_v47 = vrot.slane %v3496_v36, 2  ;;  %v357_v51 = vmul.f32 %v8949_v12, %v8071_v2  ;;  %13854 = vst [vmem:[#allocation59_spill] sm:$0xff] %v8954_v35  ;;  %v8965_v5 = vld [vmem:[%s5641_s16 + $0x58] sm:$0xff] }
 0x1ae   : > { %v8941_v0 = vsel %vm512_vm0, %v3054_v58, %v13851_v59  ;;  %v417_v7 = vmul.f32 %v8954_v35, %v8074_v27  ;;  %v3240_v25 = vadd.f32 %v8763_v10, %v3090_v9  ;;  %v1670_v52 = vadd.f32 %v1661_v26, %v1565_v14  ;;  %13857 = vst [vmem:[#allocation37_spill] sm:$0xff] %v8965_v5  ;;  %v13858_v3 = vld [vmem:[#allocation80_spill] sm:$0xff] }
 0x1af   : > { %v8946_v23 = vsel %vm963_vm1, %v3204_v50, %v13853_v63  ;;  %v13856_v58 = vrot.slane %v13855_v37, 2  ;;  %v477_v24 = vmul.f32 %v8965_v5, %v8085_v46  ;;  %v13859_v50 = vrot.slane %v13858_v3, 2  ;;  %v13862_v11 = vld [vmem:[#allocation96_spill] sm:$0xff]  ;;  %v13871_v3 = vld [vmem:[#allocation141_spill] sm:$0xff]  ;;  %v13892_v46 = vld [vmem:[#allocation171_spill] sm:$0xff] }
 0x1b0   : > { %v421_v36 = vadd.f32 %v417_v7, %v357_v51  ;;  %v8976_v10 = vmul.f32 %v8949_v12, %v8088_v32  ;;  %v8980_v26 = vmul.f32 %v8954_v35, %v8091_v1  ;;  %v3390_v9 = vadd.f32 %v8768_v28, %v3240_v25 }
 0x1b1   : > { %v8962_v41 = vsel %vm963_vm1, %v3354_v31, %v13856_v58  ;;  %v8972_v44 = vsel %vm963_vm1, %v3504_v47, %v13859_v50  ;;  %v1820_v14 = vadd.f32 %v1811_v8, %v1670_v52  ;;  %v8985_v59 = vmul.f32 %v8965_v5, %v13862_v11  ;;  %v9019_v52 = vld [vmem:[%s5641_s16 + $0x98] sm:$0xff]  ;;  %v13873_v11 = vld [vmem:[#allocation143_spill] sm:$0xff] }
 0x1b2   : > { %13860 = vst [vmem:[#allocation19_spill] sm:$0xff] %v8976_v10  ;;  %v8989_v31 = vmul.f32 %v8949_v12, %v8143_v20  ;;  %v481_v56 = vadd.f32 %v477_v24, %v421_v36  ;;  %v12953_v32 = vrot.slane %v8976_v10, 1  ;;  %v12954_v1 = vrot.slane %v8980_v26, 1  ;;  %v9024_v58 = vld [vmem:[%s5641_s16 + $0xb8] sm:$0xff] }
 0x1b3   : > { %13861 = vst [vmem:[#allocation44_spill] sm:$0xff] %v8980_v26  ;;  %v8995_v63 = vmul.f32 %v8954_v35, %v8146_v40  ;;  %v8998_v28 = vadd.f32 %v8778_v4, %v3390_v9  ;;  %v1970_v8 = vadd.f32 %v8862_v55, %v1820_v14  ;;  %v12956_v47 = vrot.slane %v8985_v59, 1  ;;  %v9011_v40 = vld [vmem:[%s5641_s16 + $0x78] sm:$0xff]  ;;  %v13872_v9 = vld [vmem:[#allocation142_spill] sm:$0xff] }
 0x1b4   : > { %13863 = vst [vmem:[#allocation21_spill] sm:$0xff] %v8985_v59  ;;  %v602_v51 = vadd.f32 %v12953_v32, %v481_v56  ;;  %v9008_v25 = vmul.f32 %v8965_v5, %v13742_v39  ;;  %v1454_v4 = vmul.f32 %v9011_v40, %v13743_v15  ;;  %v1514_v37 = vmul.f32 %v9019_v52, %v13745_v48  ;;  %v13870_v24 = vld [vmem:[#allocation140_spill] sm:$0xff]  ;;  %v13883_v32 = vld [vmem:[#allocation159_spill] sm:$0xff]  ;;  %v13890_v59 = vld [vmem:[#allocation45_spill] sm:$0xff] }
 0x1b5   : > { %13864 = vst [vmem:[#allocation46_spill] sm:$0xff] %v8989_v31  ;;  %4032 = vrot.lane.b32.xlu0 %v8998_v28, %s5523_s9  ;;  %v2120_v55 = vadd.f32 %v8870_v43, %v1970_v8  ;;  %v9028_v39 = vmul.f32 %v9024_v58, %v13870_v24  ;;  %v9032_v50 = vmul.f32 %v9011_v40, %v13871_v3  ;;  %v13874_v3 = vld [vmem:[#allocation148_spill] sm:$0xff]  ;;  %v9184_v10 = vstv %s9109_s13  ;;  %s9336_s13 = sld [smem:[#allocation3 + $0x7b]] }
 0x1b6   : > { %13865 = vst [vmem:[#allocation20_spill] sm:$0xff] %v8995_v63  ;;  %v752_v36 = vadd.f32 %v12954_v1, %v602_v51  ;;  %v9039_v14 = vmul.f32 %v9019_v52, %v13872_v9  ;;  %v9043_v56 = vmul.f32 %v9024_v58, %v13873_v11  ;;  %v9049_v7 = vmul.f32 %v9011_v40, %v13874_v3  ;;  %v13875_v51 = vld [vmem:[#allocation151_spill] sm:$0xff]  ;;  %v9069_v20 = vld [vmem:[%s5641_s16 + $0xd8] sm:$0xff] }
 0x1b7   : > { %13866 = vst [vmem:[#allocation22_spill] sm:$0xff] %v8998_v28  ;;  %v2270_v8 = vadd.f32 %v8892_v19, %v2120_v55  ;;  %v9053_v1 = vmul.f32 %v9019_v52, %v13875_v51  ;;  %v13876_v19 = vld [vmem:[#allocation152_spill] sm:$0xff]  ;;  %v13878_v28 = vld [vmem:[#allocation157_spill] sm:$0xff] }
 0x1b8   : > { %13867 = vst [vmem:[#allocation50_spill] sm:$0xff] %v9011_v40  ;;  %v902_v9 = vadd.f32 %v12956_v47, %v752_v36  ;;  %v9061_v55 = vmul.f32 %v9024_v58, %v13876_v19  ;;  %v9073_v36 = vmul.f32 %v9069_v20, %v13878_v28  ;;  %v13879_v47 = vrot.slane %v8989_v31, 2  ;;  %v9081_v11 = vld [vmem:[%s5641_s16 + $0xf8] sm:$0xff]  ;;  %v13888_v31 = vld [vmem:[#allocation167_spill] sm:$0xff] }
 0x1b9   : > { %13868 = vst [vmem:[#allocation52_spill] sm:$0xff] %v9019_v52  ;;  %v2420_v3 = vadd.f32 %v8905_v21, %v2270_v8  ;;  %v13881_v21 = vld [vmem:[#allocation158_spill] sm:$0xff]  ;;  %v9088_v51 = vld [vmem:[%s5641_s16 + $0x118] sm:$0xff] }
 0x1ba   : > { %13869 = vst [vmem:[#allocation54_spill] sm:$0xff] %v9024_v58  ;;  %v1053_v19 = vadd.f32 %v13879_v47, %v902_v9  ;;  %v9085_v8 = vmul.f32 %v9081_v11, %v13881_v21  ;;  %v9092_v57 = vmul.f32 %v9088_v51, %v13883_v32  ;;  %v13884_v24 = vld [vmem:[#allocation160_spill] sm:$0xff]  ;;  %v13885_v9 = vld [vmem:[#allocation161_spill] sm:$0xff]  ;;  %v13886_v21 = vld [vmem:[#allocation162_spill] sm:$0xff]  ;;  %v13887_v32 = vrot.slane %v8995_v63, 2 }
 0x1bb   : > { %13877 = vst [vmem:[#allocation27_spill] sm:$0xff] %v9069_v20  ;;  %v2540_v28 = vadd.f32 %v8877_v61, %v2420_v3  ;;  %v9099_v47 = vmul.f32 %v9069_v20, %v13884_v24  ;;  %v9103_v43 = vmul.f32 %v9081_v11, %v13885_v9  ;;  %v9107_v48 = vmul.f32 %v9088_v51, %v13886_v21  ;;  %v13889_v3 = vld [vmem:[#allocation170_spill] sm:$0xff] }
 0x1bc   : > { %13880 = vst [vmem:[#allocation112_spill] sm:$0xff] %v9081_v11  ;;  %v1203_v15 = vadd.f32 %v13887_v32, %v1053_v19  ;;  %v9115_v61 = vmul.f32 %v9069_v20, %v13888_v31  ;;  %v9119_v24 = vmul.f32 %v9081_v11, %v13889_v3  ;;  %v347_v9 = vmul.f32 %v8949_v12, %v13890_v59  ;;  %v13894_v32 = vld [vmem:[#allocation49_spill] sm:$0xff] }
 0x1bd   : > { %13882 = vst [vmem:[#allocation29_spill] sm:$0xff] %v9088_v51  ;;  %v2600_v21 = vadd.f32 %v8881_v62, %v2540_v28  ;;  %v13891_v31 = vrot.slane %v9008_v25, 2  ;;  %v9135_v59 = vmul.f32 %v9088_v51, %v13892_v46  ;;  %v13893_v28 = vld [vmem:[#allocation47_spill] sm:$0xff]  ;;  %v467_v26 = vmul.f32 %v8965_v5, %v13894_v32 }
 0x1be   : > { %v407_v63 = vmul.f32 %v8954_v35, %v13893_v28  ;;  %v9149_v46 = vmul.f32 %v9019_v52, %v13814_v38  ;;  %v9168_v28 = vstv %s9075_s29  ;;  %v9187_v3 = vstv %s9123_s14  ;;  %s9292_s29 = sld [smem:[#allocation3 + $0x79]] }
 0x1bf   : > { %v1353_v19 = vadd.f32 %v13891_v31, %v1203_v15  ;;  %v2660_v62 = vadd.f32 %v8886_v22, %v2600_v21  ;;  %v9144_v15 = vmul.f32 %v9011_v40, %v13813_v45  ;;  %v9153_v22 = vmul.f32 %v9024_v58, %v13815_v54  ;;  %13896 = vst [vmem:[#allocation31_spill] sm:$0xff] %v9168_v28  ;;  %v9205_v58 = vld [vmem:[%s5641_s16 + $0x8] sm:$0xff]  ;;  %s9344_s14 = sld [smem:[#allocation3 + $0x7c]] }
 0x1c0   : > { %v411_v32 = vadd.f32 %v407_v63, %v347_v9  ;;  %v9158_v45 = vmul.f32 %v9069_v20, %v13832_v33  ;;  %v9171_v54 = vstv %s9094_s8  ;;  %v9176_v33 = vmul.f32 %v9081_v11, %v13833_v60  ;;  %v13898_v9 = vld [vmem:[#allocation14_spill] sm:$0xff]  ;;  %13902 = vst [vmem:[#allocation15_spill] sm:$0xff] %v9205_v58  ;;  %s9307_s8 = sld [smem:[#allocation3 + $0x7a]] }
 0x1c1   : > { %v1458_v31 = vadd.f32 %v1454_v4, %v1353_v19  ;;  %v2765_v21 = vadd.f32 %v8925_v42, %v2660_v62  ;;  %v9161_v4 = vstv %s9063_s23  ;;  %13897 = vst [vmem:[#allocation114_spill] sm:$0xff] %v9171_v54  ;;  %v424_v62 = vmul.f32 %v13898_v9, %v9168_v28  ;;  %s9279_s23 = sld [smem:[#allocation3 + $0x78]] }
 0x1c2   : > { %13895 = vst [vmem:[#allocation113_spill] sm:$0xff] %v9161_v4  ;;  %v364_v38 = vmul.f32 %v8771_v13, %v9161_v4  ;;  %v471_v63 = vadd.f32 %v467_v26, %v411_v32  ;;  %v13899_v26 = vld [vmem:[#allocation53_spill] sm:$0xff]  ;;  %v9196_v32 = vmul.f32 %v9088_v51, %v13834_v34  ;;  %v605_v20 = vmul.f32 %v8771_v13, %v9184_v10 }
 0x1c3   : > { %v1518_v19 = vadd.f32 %v1514_v37, %v1458_v31  ;;  %v2915_v42 = vadd.f32 %v8930_v16, %v2765_v21  ;;  %v484_v31 = vmul.f32 %v8786_v17, %v9171_v54  ;;  %v13900_v60 = vrot.slane %v13899_v26, 1  ;;  %v9219_v26 = vld [vmem:[%s5641_s16 + $0x28] sm:$0xff] }
 0x1c4   : > { %v755_v34 = vmul.f32 %v13898_v9, %v9187_v3  ;;  %13906 = vst [vmem:[#allocation28_spill] sm:$0xff] %v9219_v26  ;;  %v613_v52 = vrot.slane %v605_v20, 1 }
 0x1c5   : > { %v1578_v37 = vadd.f32 %v9028_v39, %v1518_v19  ;;  %v3065_v16 = vadd.f32 %v8941_v0, %v2915_v42  ;;  %v577_v21 = vadd.f32 %v13900_v60, %v471_v63  ;;  %v428_v39 = vadd.f32 %v424_v62, %v364_v38  ;;  %v13904_v42 = vld [vmem:[#allocation39_spill] sm:$0xff] }
 0x1c6   : > { %v13901_v19 = vrot.slane %v9032_v50, 1  ;;  %v9209_v0 = vmul.f32 %v9205_v58, %v9184_v10  ;;  %v13905_v63 = vrot.slane %v13904_v42, 1  ;;  %v9223_v60 = vmul.f32 %v9219_v26, %v9187_v3 }
 0x1c7   : > { %v3215_v38 = vadd.f32 %v8946_v23, %v3065_v16  ;;  %v763_v5 = vrot.slane %v755_v34, 1  ;;  %v13909_v16 = vld [vmem:[#allocation40_spill] sm:$0xff] }
 0x1c8   : > { %v1698_v11 = vadd.f32 %v13901_v19, %v1578_v37  ;;  %13903 = vst [vmem:[#allocation26_spill] sm:$0xff] %v9209_v0  ;;  %v727_v62 = vadd.f32 %v13905_v63, %v577_v21  ;;  %v488_v37 = vadd.f32 %v484_v31, %v428_v39  ;;  %v13908_v19 = vrot.slane %v9039_v14, 1 }
 0x1c9   : > { %13907 = vst [vmem:[#allocation25_spill] sm:$0xff] %v9223_v60  ;;  %v12982_v40 = vrot.slane %v9209_v0, 1  ;;  %v3365_v23 = vadd.f32 %v8962_v41, %v3215_v38  ;;  %v13910_v42 = vrot.slane %v13909_v16, 1  ;;  %v12984_v31 = vrot.slane %v9223_v60, 1 }
 0x1ca   : > { %v1848_v51 = vadd.f32 %v13908_v19, %v1698_v11  ;;  %v9233_v39 = vstv %s9163_s15  ;;  %v13911_v63 = vrot.slane %v9043_v56, 1  ;;  %v9245_v11 = vld [vmem:[%s5641_s16 + $0x48] sm:$0xff]  ;;  %s9355_s15 = sld [smem:[#allocation3 + $0x7d]] }
 0x1cb   : > { %v877_v21 = vadd.f32 %v13910_v42, %v727_v62  ;;  %v615_v20 = vsel %vm512_vm0, %v613_v52, %v12982_v40  ;;  %v905_v41 = vmul.f32 %v8786_v17, %v9233_v39  ;;  %13912 = vst [vmem:[#allocation105_spill] sm:$0xff] %v9245_v11  ;;  %v9249_v34 = vmul.f32 %v9245_v11, %v9233_v39  ;;  %v13915_v62 = vld [vmem:[#allocation30_spill] sm:$0xff] }
 0x1cc   : > { %v1998_v35 = vadd.f32 %v13911_v63, %v1848_v51  ;;  %v9252_v38 = vadd.f32 %v8972_v44, %v3365_v23  ;;  %v13916_v19 = vrot.slane %v13915_v62, 2  ;;  %v624_v51 = vadd.f32 %v615_v20, %v488_v37  ;;  %v13918_v37 = vld [vmem:[#allocation57_spill] sm:$0xff] }
 0x1cd   : > { %13913 = vst [vmem:[#allocation108_spill] sm:$0xff] %v9249_v34  ;;  %v765_v52 = vsel %vm512_vm0, %v763_v5, %v12984_v31  ;;  %v13917_v42 = vrot.slane %v9049_v7, 2  ;;  %v913_v40 = vrot.slane %v905_v41, 1  ;;  %v12985_v0 = vrot.slane %v9249_v34, 1 }
 0x1ce   : > { %13914 = vst [vmem:[#allocation109_spill] sm:$0xff] %v9252_v38  ;;  %v1028_v16 = vadd.f32 %v13916_v19, %v877_v21  ;;  %v9265_v44 = vstv %s9189_s17  ;;  %3894 = vrot.lane.b32.xlu2 %v9252_v38, %s5523_s9  ;;  %v13919_v23 = vrot.slane %v13918_v37, 2  ;;  %v774_v5 = vadd.f32 %v765_v52, %v624_v51  ;;  %s9390_s17 = sld [smem:[#allocation3 + $0x7e]] }
 0x1cf   : > { %v2148_v63 = vadd.f32 %v13917_v42, %v1998_v35  ;;  %v1056_v20 = vmul.f32 %v8771_v13, %v9265_v44  ;;  %v9277_v35 = vmul.f32 %v9205_v58, %v9265_v44  ;;  %v13921_v41 = vrot.slane %v9053_v1, 2  ;;  %v13922_v13 = vld [vmem:[#allocation34_spill] sm:$0xff]  ;;  %v13938_v58 = vld [vmem:[#allocation73_spill] sm:$0xff] }
 0x1d0   : > { %v1178_v21 = vadd.f32 %v13919_v23, %v1028_v16  ;;  %v915_v19 = vsel %vm512_vm0, %v913_v40, %v12985_v0  ;;  %v9287_v42 = vstv %s9198_s18  ;;  %v9290_v16 = vstv %s9213_s19  ;;  %s9404_s18 = sld [smem:[#allocation3 + $0x7f]] }
 0x1d1   : > { %13920 = vst [vmem:[#allocation33_spill] sm:$0xff] %v9277_v35  ;;  %v2298_v62 = vadd.f32 %v13921_v41, %v2148_v63  ;;  %v13923_v51 = vrot.slane %v13922_v13, 2  ;;  %v924_v37 = vadd.f32 %v915_v19, %v774_v5  ;;  %v1064_v23 = vrot.slane %v1056_v20, 2  ;;  %s9414_s19 = sld [smem:[#allocation3 + $0x81]] }
 0x1d2   : > { %v12989_v31 = vrot.slane %v9277_v35, 2  ;;  %v13924_v63 = vrot.slane %v9061_v55, 2  ;;  %v1206_v40 = vmul.f32 %v13898_v9, %v9287_v42  ;;  %v9303_v0 = vmul.f32 %v9219_v26, %v9287_v42 }
 0x1d3   : > { %v1328_v52 = vadd.f32 %v13923_v51, %v1178_v21  ;;  %v1356_v38 = vmul.f32 %v8786_v17, %v9290_v16  ;;  %v9315_v9 = vmul.f32 %v9245_v11, %v9290_v16  ;;  %v9318_v20 = vstv %s9235_s20  ;;  %s9421_s20 = sld [smem:[#allocation3 + $0x80]] }
 0x1d4   : > { %v2448_v41 = vadd.f32 %v13924_v63, %v2298_v62  ;;  %13925 = vst [vmem:[#allocation35_spill] sm:$0xff] %v9303_v0  ;;  %v1066_v5 = vsel %vm963_vm1, %v1064_v23, %v12989_v31  ;;  %v1214_v17 = vrot.slane %v1206_v40, 2  ;;  %v12988_v13 = vrot.slane %v9303_v0, 2 }
 0x1d5   : > { %v1448_v21 = vadd.f32 %v9144_v15, %v1328_v52  ;;  %13926 = vst [vmem:[#allocation38_spill] sm:$0xff] %v9315_v9  ;;  %v1075_v19 = vadd.f32 %v1066_v5, %v924_v37  ;;  %v1364_v15 = vrot.slane %v1356_v38, 2  ;;  %v12987_v52 = vrot.slane %v9315_v9, 2  ;;  %v9373_v9 = vld [vmem:[%s5641_s16 + $0x88] sm:$0xff] }
 0x1d6   : > { %v2553_v62 = vadd.f32 %v9073_v36, %v2448_v41  ;;  %v1461_v23 = vmul.f32 %v8822_v18, %v9318_v20  ;;  %v1216_v36 = vsel %vm963_vm1, %v1214_v17, %v12988_v13  ;;  %v9331_v37 = vstv %s9259_s21  ;;  %13933 = vst [vmem:[#allocation135_spill] sm:$0xff] %v9373_v9  ;;  %s9435_s21 = sld [smem:[#allocation3 + $0x82]] }
 0x1d7   : > { %v1508_v51 = vadd.f32 %v9149_v46, %v1448_v21  ;;  %v9334_v41 = vstv %s9267_s22  ;;  %v1225_v38 = vadd.f32 %v1216_v36, %v1075_v19  ;;  %v1366_v40 = vsel %vm963_vm1, %v1364_v15, %v12987_v52  ;;  %v13928_v19 = vld [vmem:[#allocation67_spill] sm:$0xff]  ;;  %s9442_s22 = sld [smem:[#allocation3 + $0x83]] }
 0x1d8   : > { %v2613_v63 = vadd.f32 %v9085_v8, %v2553_v62  ;;  %13927 = vst [vmem:[#allocation102_spill] sm:$0xff] %v9334_v41  ;;  %v1521_v8 = vmul.f32 %v8835_v29, %v9331_v37  ;;  %v1581_v5 = vmul.f32 %v8840_v49, %v9334_v41  ;;  %v9350_v62 = vstv %s9279_s23  ;;  %v9362_v52 = vld [vmem:[%s5641_s16 + $0x68] sm:$0xff]  ;;  %s9453_s23 = sld [smem:[#allocation3 + $0x84]] }
 0x1d9   : > { %v1568_v46 = vadd.f32 %v9153_v22, %v1508_v51  ;;  %v9353_v22 = vstv %s9292_s29  ;;  %v13929_v17 = vrot.slane %v13928_v19, 1  ;;  %v1375_v15 = vadd.f32 %v1366_v40, %v1225_v38  ;;  %13930 = vst [vmem:[#allocation41_spill] sm:$0xff] %v9362_v52  ;;  %v13935_v40 = vld [vmem:[#allocation69_spill] sm:$0xff]  ;;  %s9491_s29 = sld [smem:[#allocation3 + $0x85]] }
 0x1da   : > { %v2673_v21 = vadd.f32 %v9092_v57, %v2613_v63  ;;  %v1701_v36 = vmul.f32 %v8822_v18, %v9350_v62  ;;  %v9366_v57 = vmul.f32 %v9362_v52, %v9350_v62  ;;  %v13932_v63 = vrot.slane %v9099_v47, 1 }
 0x1db   : > { %v1673_v51 = vadd.f32 %v13929_v17, %v1568_v46  ;;  %v1851_v31 = vmul.f32 %v8835_v29, %v9353_v22  ;;  %v9377_v46 = vmul.f32 %v9373_v9, %v9353_v22  ;;  %v9380_v38 = vstv %s9307_s8  ;;  %s9513_s8 = sld [smem:[#allocation3 + $0x86]] }
 0x1dc   : > { %13931 = vst [vmem:[#allocation118_spill] sm:$0xff] %v9366_v57  ;;  %v2793_v13 = vadd.f32 %v13932_v63, %v2673_v21  ;;  %v13936_v19 = vrot.slane %v13935_v40, 1  ;;  %v1465_v0 = vadd.f32 %v1461_v23, %v1375_v15  ;;  %v1709_v35 = vrot.slane %v1701_v36, 1  ;;  %v9398_v15 = vld [vmem:[%s5641_s16 + $0xa8] sm:$0xff] }
 0x1dd   : > { %13934 = vst [vmem:[#allocation18_spill] sm:$0xff] %v9377_v46  ;;  %v13003_v21 = vrot.slane %v9366_v57, 1  ;;  %v13937_v63 = vrot.slane %v9103_v43, 1  ;;  %v1859_v60 = vrot.slane %v1851_v31, 1  ;;  %v13004_v11 = vrot.slane %v9377_v46, 1 }
 0x1de   : > { %v1823_v17 = vadd.f32 %v13936_v19, %v1673_v51  ;;  %v2001_v26 = vmul.f32 %v8840_v49, %v9380_v38  ;;  %v13939_v41 = vrot.slane %v13938_v58, 1  ;;  %v1525_v51 = vadd.f32 %v1521_v8, %v1465_v0  ;;  %13940 = vst [vmem:[#allocation13_spill] sm:$0xff] %v9398_v15 }
 0x1df   : > { %v2943_v34 = vadd.f32 %v13937_v63, %v2793_v13  ;;  %v1711_v23 = vsel %vm512_vm0, %v1709_v35, %v13003_v21  ;;  %v9402_v31 = vmul.f32 %v9398_v15, %v9380_v38  ;;  %v13942_v13 = vrot.slane %v9107_v48, 1  ;;  %v13943_v35 = vld [vmem:[#allocation75_spill] sm:$0xff] }
 0x1e0   : > { %v1973_v40 = vadd.f32 %v13939_v41, %v1823_v17  ;;  %v1861_v58 = vsel %vm512_vm0, %v1859_v60, %v13004_v11  ;;  %v2009_v0 = vrot.slane %v2001_v26, 1  ;;  %v9412_v41 = vstv %s9336_s13  ;;  %s10021_s13 = sld [smem:[#allocation3 + $0x87]] }
 0x1e1   : > { %13941 = vst [vmem:[#allocation42_spill] sm:$0xff] %v9402_v31  ;;  %v3093_v36 = vadd.f32 %v13942_v13, %v2943_v34  ;;  %v13944_v8 = vrot.slane %v13943_v35, 2  ;;  %v1585_v17 = vadd.f32 %v1581_v5, %v1525_v51  ;;  %v13010_v63 = vrot.slane %v9402_v31, 1  ;;  %v13947_v5 = vld [vmem:[#allocation79_spill] sm:$0xff] }
 0x1e2   : > { %v2151_v21 = vmul.f32 %v8822_v18, %v9412_v41  ;;  %v13945_v34 = vrot.slane %v9115_v61, 2  ;;  %v9427_v26 = vmul.f32 %v9362_v52, %v9412_v41  ;;  %v9430_v60 = vstv %s9344_s14  ;;  %v9537_v52 = vld [vmem:[%s5641_s16 + $0x108] sm:$0xff]  ;;  %s10033_s14 = sld [smem:[#allocation3 + $0x88]] }
 0x1e3   : > { %v2123_v19 = vadd.f32 %v13944_v8, %v1973_v40  ;;  %v9433_v11 = vstv %s9355_s15  ;;  %v13948_v40 = vrot.slane %v13947_v5, 2  ;;  %v1720_v35 = vadd.f32 %v1711_v23, %v1585_v17  ;;  %v13951_v23 = vld [vmem:[#allocation81_spill] sm:$0xff]  ;;  %13967 = vst [vmem:[#allocation166_spill] sm:$0xff] %v9537_v52  ;;  %s10038_s15 = sld [smem:[#allocation3 + $0x89]] }
 0x1e4   : > { %v3243_v13 = vadd.f32 %v13945_v34, %v3093_v36  ;;  %13946 = vst [vmem:[#allocation119_spill] sm:$0xff] %v9427_v26  ;;  %v2011_v18 = vsel %vm512_vm0, %v2009_v0, %v13010_v63  ;;  %v2159_v8 = vrot.slane %v2151_v21, 2  ;;  %v13949_v36 = vrot.slane %v9119_v24, 2 }
 0x1e5   : > { %v2273_v51 = vadd.f32 %v13948_v40, %v2123_v19  ;;  %v13009_v46 = vrot.slane %v9427_v26, 2  ;;  %v2301_v57 = vmul.f32 %v8835_v29, %v9430_v60  ;;  %v9451_v5 = vmul.f32 %v9373_v9, %v9430_v60 }
 0x1e6   : > { %v3393_v34 = vadd.f32 %v13949_v36, %v3243_v13  ;;  %v13952_v0 = vrot.slane %v13951_v23, 2  ;;  %v1870_v19 = vadd.f32 %v1861_v58, %v1720_v35  ;;  %v2451_v17 = vmul.f32 %v8840_v49, %v9433_v11 }
 0x1e7   : > { %13950 = vst [vmem:[#allocation110_spill] sm:$0xff] %v9451_v5  ;;  %v9461_v13 = vmul.f32 %v9398_v15, %v9433_v11  ;;  %v13954_v29 = vrot.slane %v9135_v59, 2  ;;  %v2161_v36 = vsel %vm963_vm1, %v2159_v8, %v13009_v46  ;;  %v2309_v23 = vrot.slane %v2301_v57, 2  ;;  %v9518_v46 = vld [vmem:[%s5641_s16 + $0xe8] sm:$0xff] }
 0x1e8   : > { %v2423_v21 = vadd.f32 %v13952_v0, %v2273_v51  ;;  %v13008_v51 = vrot.slane %v9451_v5, 2  ;;  %v2020_v49 = vadd.f32 %v2011_v18, %v1870_v19  ;;  %v2459_v35 = vrot.slane %v2451_v17, 2  ;;  %13962 = vst [vmem:[#allocation155_spill] sm:$0xff] %v9518_v46 }
 0x1e9   : > { %13953 = vst [vmem:[#allocation133_spill] sm:$0xff] %v9461_v13  ;;  %v9465_v40 = vadd.f32 %v13954_v29, %v3393_v34  ;;  %v13007_v0 = vrot.slane %v9461_v13, 2  ;;  %v9479_v8 = vstv %s9390_s17  ;;  %v9482_v57 = vstv %s9404_s18  ;;  %s10050_s17 = sld [smem:[#allocation3 + $0x8a]] }
 0x1ea   : > { %v2543_v58 = vadd.f32 %v9158_v45, %v2423_v21  ;;  %v2311_v34 = vsel %vm963_vm1, %v2309_v23, %v13008_v51  ;;  %13956 = vst [vmem:[#allocation146_spill] sm:$0xff] %v9479_v8  ;;  %v2170_v45 = vadd.f32 %v2161_v36, %v2020_v49  ;;  %v9489_v21 = vstv %s9421_s20  ;;  %s10060_s18 = sld [smem:[#allocation3 + $0x8b]] }
 0x1eb   : > { %13955 = vst [vmem:[#allocation136_spill] sm:$0xff] %v9465_v40  ;;  %4038 = vrot.lane.b32.xlu0 %v9465_v40, %s5523_s9  ;;  %v2461_v18 = vsel %vm963_vm1, %v2459_v35, %v13007_v0  ;;  %v2556_v19 = vmul.f32 %v8895_v6, %v9479_v8  ;;  %v2616_v17 = vmul.f32 %v8916_v53, %v9482_v57  ;;  %v9498_v23 = vstv %s9414_s19  ;;  %v9507_v35 = vld [vmem:[%s5641_s16 + $0xc8] sm:$0xff]  ;;  %s10071_s19 = sld [smem:[#allocation3 + $0x8c]] }
 0x1ec   : > { %13957 = vst [vmem:[#allocation149_spill] sm:$0xff] %v9482_v57  ;;  %v2603_v29 = vadd.f32 %v9176_v33, %v2543_v58  ;;  %v9501_v33 = vstv %s9435_s21  ;;  %v2320_v58 = vadd.f32 %v2311_v34, %v2170_v45  ;;  %v2796_v49 = vmul.f32 %v8895_v6, %v9498_v23  ;;  %v13965_v45 = vld [vmem:[#allocation93_spill] sm:$0xff]  ;;  %v13969_v57 = vld [vmem:[#allocation95_spill] sm:$0xff]  ;;  %s10108_s20 = sld [smem:[#allocation3 + $0x8d]] }
 0x1ed   : > { %13958 = vst [vmem:[#allocation115_spill] sm:$0xff] %v9489_v21  ;;  %v9511_v0 = vmul.f32 %v9507_v35, %v9498_v23  ;;  %v2946_v51 = vmul.f32 %v8916_v53, %v9501_v33  ;;  %v9525_v34 = vstv %s9442_s22  ;;  %v13966_v63 = vrot.slane %v13965_v45, 1  ;;  %s10142_s21 = sld [smem:[#allocation3 + $0x8e]] }
 0x1ee   : > { %13959 = vst [vmem:[#allocation116_spill] sm:$0xff] %v9501_v33  ;;  %v2663_v36 = vadd.f32 %v9196_v32, %v2603_v29  ;;  %v9522_v32 = vmul.f32 %v9518_v46, %v9501_v33  ;;  %v9528_v29 = vstv %s9453_s23  ;;  %v2470_v13 = vadd.f32 %v2461_v18, %v2320_v58  ;;  %s10160_s22 = sld [smem:[#allocation3 + $0x8f]] }
 0x1ef   : > { %13960 = vst [vmem:[#allocation153_spill] sm:$0xff] %v9507_v35  ;;  %v2804_v5 = vrot.slane %v2796_v49, 1  ;;  %v13032_v26 = vrot.slane %v9511_v0, 1  ;;  %v2954_v31 = vrot.slane %v2946_v51, 1  ;;  %v3096_v9 = vmul.f32 %v8933_v30, %v9525_v34  ;;  %s10186_s23 = sld [smem:[#allocation3 + $0x90]] }
 0x1f0   : > { %13961 = vst [vmem:[#allocation117_spill] sm:$0xff] %v9511_v0  ;;  %v2768_v40 = vadd.f32 %v13966_v63, %v2663_v36  ;;  %v13031_v15 = vrot.slane %v9522_v32, 1  ;;  %v9541_v33 = vmul.f32 %v9537_v52, %v9525_v34  ;;  %v13970_v45 = vrot.slane %v13969_v57, 1 }
 0x1f1   : > { %13963 = vst [vmem:[#allocation164_spill] sm:$0xff] %v9522_v32  ;;  %v2560_v18 = vadd.f32 %v2556_v19, %v2470_v13  ;;  %v2676_v36 = vmul.f32 %v8933_v30, %v9489_v21  ;;  %v3246_v51 = vmul.f32 %v8895_v6, %v9528_v29  ;;  %v2806_v58 = vsel %vm512_vm0, %v2804_v5, %v13032_v26  ;;  %v13972_v13 = vld [vmem:[#allocation97_spill] sm:$0xff]  ;;  %v13979_v6 = vld [vmem:[#allocation103_spill] sm:$0xff] }
 0x1f2   : > { %13964 = vst [vmem:[#allocation165_spill] sm:$0xff] %v9525_v34  ;;  %v2918_v63 = vadd.f32 %v13970_v45, %v2768_v40  ;;  %v2956_v49 = vsel %vm512_vm0, %v2954_v31, %v13031_v15  ;;  %v9557_v40 = vmul.f32 %v9507_v35, %v9528_v29  ;;  %v13973_v57 = vrot.slane %v13972_v13, 1  ;;  %v13976_v15 = vld [vmem:[#allocation100_spill] sm:$0xff] }
 0x1f3   : > { %13968 = vst [vmem:[#allocation168_spill] sm:$0xff] %v9541_v33  ;;  %v2620_v45 = vadd.f32 %v2616_v17, %v2560_v18  ;;  %v3104_v34 = vrot.slane %v3096_v9, 1  ;;  %v9562_v21 = vstv %s9491_s29  ;;  %v3254_v0 = vrot.slane %v3246_v51, 2  ;;  %v9577_v9 = vld [vmem:[%s5641_s16 + $0x10] sm:$0xff]  ;;  %s10197_s29 = sld [smem:[#allocation3 + $0x91]] }
 0x1f4   : > { %13971 = vst [vmem:[#allocation51_spill] sm:$0xff] %v9557_v40  ;;  %v3068_v19 = vadd.f32 %v13973_v57, %v2918_v63  ;;  %v3396_v5 = vmul.f32 %v8916_v53, %v9562_v21  ;;  %v9569_v31 = vmul.f32 %v9518_v46, %v9562_v21  ;;  %v13977_v26 = vrot.slane %v13976_v15, 2  ;;  %v9600_v46 = vld [vmem:[%s5641_s16 + $0x50] sm:$0xff] }
 0x1f5   : > { %13974 = vst [vmem:[#allocation55_spill] sm:$0xff] %v9562_v21  ;;  %v2680_v63 = vadd.f32 %v2676_v36, %v2620_v45  ;;  %v9574_v17 = vstv %s9513_s8  ;;  %v356_v18 = vmul.f32 %v9577_v9, %v8071_v2  ;;  %v13980_v15 = vrot.slane %v13979_v6, 2  ;;  %v9592_v45 = vld [vmem:[%s5641_s16 + $0x30] sm:$0xff]  ;;  %s10201_s8 = sld [smem:[#allocation3 + $0x93]] }
 0x1f6   : > { %13975 = vst [vmem:[#allocation24_spill] sm:$0xff] %v9569_v31  ;;  %v3218_v32 = vadd.f32 %v13977_v26, %v3068_v19  ;;  %v3404_v13 = vrot.slane %v3396_v5, 2  ;;  %v3546_v57 = vmul.f32 %v8933_v30, %v9574_v17  ;;  %v9589_v36 = vmul.f32 %v9537_v52, %v9574_v17  ;;  %v13983_v30 = vld [vmem:[#allocation94_spill] sm:$0xff] }
 0x1f7   : > { %13978 = vst [vmem:[#allocation36_spill] sm:$0xff] %v9574_v17  ;;  %v2815_v19 = vadd.f32 %v2806_v58, %v2680_v63  ;;  %v416_v2 = vmul.f32 %v9592_v45, %v8074_v27  ;;  %v13982_v5 = vrot.slane %v9541_v33, 1  ;;  %v13984_v58 = vld [vmem:[#allocation107_spill] sm:$0xff]  ;;  %v13987_v27 = vrot.slane %v9557_v40, 2 }
 0x1f8   : > { %v3368_v26 = vadd.f32 %v13980_v15, %v3218_v32  ;;  %13981 = vst [vmem:[#allocation56_spill] sm:$0xff] %v9589_v36  ;;  %v3554_v51 = vrot.slane %v3546_v57, 2  ;;  %v476_v32 = vmul.f32 %v9600_v46, %v13983_v30  ;;  %v13985_v6 = vrot.slane %v13984_v58, 2  ;;  %v13991_v17 = vld [vmem:[#allocation99_spill] sm:$0xff] }
 0x1f9   : > { %v3106_v53 = vsel %vm512_vm0, %v3104_v34, %v13982_v5  ;;  %v2965_v15 = vadd.f32 %v2956_v49, %v2815_v19  ;;  %v420_v35 = vadd.f32 %v416_v2, %v356_v18  ;;  %v3256_v33 = vsel %vm963_vm1, %v3254_v0, %v13987_v27  ;;  %v13989_v5 = vld [vmem:[#allocation19_spill] sm:$0xff]  ;;  %v13995_v19 = vld [vmem:[#allocation106_spill] sm:$0xff]  ;;  %v13997_v27 = vld [vmem:[#allocation21_spill] sm:$0xff] }
 0x1fa   : > { %v9606_v63 = vadd.f32 %v13985_v6, %v3368_v26  ;;  %v13988_v34 = vrot.slane %v9569_v31, 2  ;;  %v13990_v30 = vrot.slane %v13989_v5, 1  ;;  %v13992_v58 = vrot.slane %v13991_v17, 1  ;;  %v13993_v6 = vld [vmem:[#allocation44_spill] sm:$0xff]  ;;  %v14001_v31 = vld [vmem:[#allocation46_spill] sm:$0xff] }
 0x1fb   : > { %v13994_v49 = vrot.slane %v13993_v6, 1  ;;  %v13996_v52 = vrot.slane %v13995_v19, 1  ;;  %v3115_v0 = vadd.f32 %v3106_v53, %v2965_v15  ;;  %v480_v2 = vadd.f32 %v476_v32, %v420_v35  ;;  %v14008_v53 = vld [vmem:[#allocation134_spill] sm:$0xff] }
 0x1fc   : > { %13986 = vst [vmem:[#allocation120_spill] sm:$0xff] %v9606_v63  ;;  %v3406_v57 = vsel %vm963_vm1, %v3404_v13, %v13988_v34  ;;  %v594_v26 = vsel %vm512_vm0, %v13992_v58, %v13990_v30  ;;  %3900 = vrot.lane.b32.xlu2 %v9606_v63, %s5523_s9  ;;  %v13998_v13 = vrot.slane %v13997_v27, 1  ;;  %v13999_v34 = vld [vmem:[#allocation131_spill] sm:$0xff]  ;;  %v14002_v30 = vrot.slane %v14001_v31, 2  ;;  %v14003_v58 = vld [vmem:[#allocation132_spill] sm:$0xff]  ;;  %v14011_v27 = vld [vmem:[#allocation137_spill] sm:$0xff] }
 0x1fd   : > { %v744_v18 = vsel %vm512_vm0, %v13996_v52, %v13994_v49  ;;  %v14000_v5 = vrot.slane %v13999_v34, 1  ;;  %v14004_v6 = vrot.slane %v14003_v58, 2  ;;  %v14005_v40 = vrot.slane %v9589_v36, 2  ;;  %v14006_v49 = vld [vmem:[#allocation20_spill] sm:$0xff] }
 0x1fe   : > { %v14007_v63 = vrot.slane %v14006_v49, 2  ;;  %v14009_v35 = vrot.slane %v14008_v53, 2  ;;  %v14010_v15 = vrot.slane %v9008_v25, 2  ;;  %v9651_v34 = vld [vmem:[%s5641_s16 + $0x70] sm:$0xff]  ;;  %v3265_v58 = vadd.f32 %v3256_v33, %v3115_v0 }
 0x1ff   : > { %v894_v17 = vsel %vm512_vm0, %v14000_v5, %v13998_v13  ;;  %v1045_v19 = vsel %vm963_vm1, %v14004_v6, %v14002_v30  ;;  %v3556_v52 = vsel %vm963_vm1, %v3554_v51, %v14005_v40  ;;  %v14012_v13 = vrot.slane %v14011_v27, 2  ;;  %v14013_v5 = vld [vmem:[#allocation138_spill] sm:$0xff]  ;;  %v9656_v51 = vld [vmem:[%s5641_s16 + $0x90] sm:$0xff] }
 0x200   : > { %v1195_v32 = vsel %vm963_vm1, %v14009_v35, %v14007_v63  ;;  %v1453_v30 = vmul.f32 %v9651_v34, %v14013_v5  ;;  %v601_v40 = vadd.f32 %v594_v26, %v480_v2  ;;  %v14014_v6 = vld [vmem:[#allocation139_spill] sm:$0xff]  ;;  %v14015_v25 = vld [vmem:[#allocation140_spill] sm:$0xff]  ;;  %v14016_v35 = vrot.slane %v9032_v50, 1  ;;  %v14020_v26 = vld [vmem:[#allocation145_spill] sm:$0xff] }
 0x201   : > { %v1345_v31 = vsel %vm963_vm1, %v14012_v13, %v14010_v15  ;;  %v1513_v49 = vmul.f32 %v9656_v51, %v14014_v6  ;;  %v9661_v63 = vld [vmem:[%s5641_s16 + $0xb0] sm:$0xff]  ;;  %v14019_v33 = vrot.slane %v9039_v14, 1  ;;  %v14021_v0 = vrot.slane %v14020_v26, 1 }
 0x202   : > { %v9665_v53 = vmul.f32 %v9661_v63, %v14015_v25  ;;  %v14017_v15 = vld [vmem:[#allocation144_spill] sm:$0xff]  ;;  %v14022_v5 = vrot.slane %v9043_v56, 1  ;;  %v14023_v6 = vld [vmem:[#allocation147_spill] sm:$0xff]  ;;  %v14025_v50 = vrot.slane %v9049_v7, 2  ;;  %v3415_v14 = vadd.f32 %v3406_v57, %v3265_v58 }
 0x203   : > { %v14018_v27 = vrot.slane %v14017_v15, 1  ;;  %v9679_v2 = vsel %vm512_vm0, %v14021_v0, %v14019_v33  ;;  %v14024_v25 = vrot.slane %v14023_v6, 1  ;;  %v14026_v15 = vld [vmem:[#allocation150_spill] sm:$0xff]  ;;  %v14028_v26 = vrot.slane %v9053_v1, 2 }
 0x204   : > { %v14027_v21 = vrot.slane %v14026_v15, 2  ;;  %v14029_v33 = vld [vmem:[#allocation154_spill] sm:$0xff]  ;;  %v14031_v6 = vrot.slane %v9061_v55, 2  ;;  %v9710_v15 = vld [vmem:[%s5641_s16 + $0xd0] sm:$0xff]  ;;  %v366_v1 = vmul.f32 %v9577_v9, %v9161_v4  ;;  %v486_v55 = vmul.f32 %v9600_v46, %v9171_v54 }
 0x205   : > { %v9672_v13 = vsel %vm512_vm0, %v14018_v27, %v14016_v35  ;;  %v9686_v36 = vsel %vm512_vm0, %v14024_v25, %v14022_v5  ;;  %v751_v27 = vadd.f32 %v744_v18, %v601_v40  ;;  %v14030_v0 = vrot.slane %v14029_v33, 2  ;;  %v14032_v5 = vld [vmem:[#allocation156_spill] sm:$0xff] }
 0x206   : > { %v9693_v35 = vsel %vm963_vm1, %v14027_v21, %v14025_v50  ;;  %v14033_v25 = vrot.slane %v14032_v5, 2  ;;  %v14034_v21 = vld [vmem:[#allocation157_spill] sm:$0xff]  ;;  %v426_v18 = vmul.f32 %v9592_v45, %v9168_v28  ;;  %v9722_v58 = vadd.f32 %v3556_v52, %v3415_v14  ;;  %v9725_v50 = vld [vmem:[%s5641_s16 + $0xf0] sm:$0xff] }
 0x207   : > { %v9700_v56 = vsel %vm963_vm1, %v14030_v0, %v14028_v26  ;;  %v9714_v57 = vmul.f32 %v9710_v15, %v14034_v21  ;;  %v901_v40 = vadd.f32 %v894_v17, %v751_v27  ;;  %v14036_v26 = vld [vmem:[#allocation158_spill] sm:$0xff]  ;;  %v9733_v0 = vmul.f32 %v9577_v9, %v9184_v10  ;;  %v14039_v17 = vld [vmem:[#allocation59_spill] sm:$0xff] }
 0x208   : > { %v9707_v7 = vsel %vm963_vm1, %v14033_v25, %v14031_v6  ;;  %14035 = vst [vmem:[#allocation121_spill] sm:$0xff] %v9722_v58  ;;  %v9729_v33 = vmul.f32 %v9725_v50, %v14036_v26  ;;  %v430_v6 = vadd.f32 %v426_v18, %v366_v1  ;;  %v9737_v5 = vmul.f32 %v8949_v12, %v9184_v10  ;;  %v9750_v25 = vld [vmem:[%s5641_s16 + $0x110] sm:$0xff]  ;;  %v14046_v10 = vld [vmem:[#allocation37_spill] sm:$0xff] }
 0x209   : > { %14037 = vst [vmem:[#allocation122_spill] sm:$0xff] %v9733_v0  ;;  %v9741_v52 = vmul.f32 %v9592_v45, %v9187_v3  ;;  %v9745_v14 = vmul.f32 %v14039_v17, %v9187_v3  ;;  %4170 = vrot.lane.b32.xlu1 %v9722_v58, %s5523_s9  ;;  %v1052_v27 = vadd.f32 %v1045_v19, %v901_v40  ;;  %v14040_v21 = vld [vmem:[#allocation159_spill] sm:$0xff]  ;;  %v14043_v40 = vrot.slane %v9099_v47, 1 }
 0x20a   : > { %v9754_v1 = vmul.f32 %v9750_v25, %v14040_v21  ;;  %v9759_v18 = vmul.f32 %v9600_v46, %v9233_v39  ;;  %v490_v26 = vadd.f32 %v486_v55, %v430_v6  ;;  %v13056_v3 = vrot.slane %v9737_v5, 1  ;;  %v14044_v28 = vld [vmem:[#allocation83_spill] sm:$0xff] }
 0x20b   : > { %14038 = vst [vmem:[#allocation123_spill] sm:$0xff] %v9741_v52  ;;  %v13058_v58 = vrot.slane %v9745_v14, 1  ;;  %v1202_v19 = vadd.f32 %v1195_v32, %v1052_v27  ;;  %v14045_v4 = vrot.slane %v14044_v28, 1  ;;  %v14047_v6 = vrot.slane %v9733_v0, 1 }
 0x20c   : > { %14041 = vst [vmem:[#allocation124_spill] sm:$0xff] %v9754_v1  ;;  %v9773_v1 = vmul.f32 %v14046_v10, %v9233_v39  ;;  %v14048_v47 = vrot.slane %v9741_v52, 1  ;;  %v9792_v39 = vmul.f32 %v8949_v12, %v9265_v44  ;;  %v14050_v27 = vrot.slane %v9103_v43, 1 }
 0x20d   : > { %14042 = vst [vmem:[#allocation32_spill] sm:$0xff] %v9759_v18  ;;  %v9769_v21 = vsel %vm512_vm0, %v14045_v4, %v14043_v40  ;;  %v619_v54 = vsel %vm512_vm0, %v14047_v6, %v13056_v3  ;;  %v9788_v4 = vmul.f32 %v9577_v9, %v9265_v44  ;;  %v1352_v32 = vadd.f32 %v1345_v31, %v1202_v19  ;;  %v14051_v40 = vld [vmem:[#allocation87_spill] sm:$0xff]  ;;  %v14055_v19 = vld [vmem:[#allocation88_spill] sm:$0xff] }
 0x20e   : > { %v769_v28 = vsel %vm512_vm0, %v14048_v47, %v13058_v58  ;;  %v14052_v55 = vrot.slane %v14051_v40, 1  ;;  %v626_v3 = vadd.f32 %v619_v54, %v490_v26  ;;  %v13062_v52 = vrot.slane %v9773_v1, 1 }
 0x20f   : > { %14049 = vst [vmem:[#allocation61_spill] sm:$0xff] %v9788_v4  ;;  %v13060_v47 = vrot.slane %v9788_v4, 2  ;;  %v13061_v58 = vrot.slane %v9792_v39, 2  ;;  %v9806_v0 = vmul.f32 %v9592_v45, %v9287_v42  ;;  %v9810_v44 = vmul.f32 %v14039_v17, %v9287_v42 }
 0x210   : > { %v9799_v6 = vsel %vm512_vm0, %v14052_v55, %v14050_v27  ;;  %v1457_v43 = vadd.f32 %v1453_v30, %v1352_v32  ;;  %v14054_v31 = vrot.slane %v9107_v48, 1  ;;  %v14056_v55 = vrot.slane %v14055_v19, 1 }
 0x211   : > { %14053 = vst [vmem:[#allocation62_spill] sm:$0xff] %v9806_v0  ;;  %v776_v26 = vadd.f32 %v769_v28, %v626_v3  ;;  %v14057_v27 = vrot.slane %v9759_v18, 1  ;;  %v1070_v42 = vsel %vm963_vm1, %v13060_v47, %v13061_v58  ;;  %v9833_v32 = vmul.f32 %v9600_v46, %v9290_v16 }
 0x212   : > { %v9817_v54 = vsel %vm512_vm0, %v14056_v55, %v14054_v31  ;;  %v1517_v3 = vadd.f32 %v1513_v49, %v1457_v43  ;;  %v14059_v28 = vrot.slane %v9115_v61, 2  ;;  %v14060_v31 = vld [vmem:[#allocation169_spill] sm:$0xff]  ;;  %v9844_v47 = vmul.f32 %v14046_v10, %v9290_v16 }
 0x213   : > { %v919_v40 = vsel %vm512_vm0, %v14057_v27, %v13062_v52  ;;  %14058 = vst [vmem:[#allocation63_spill] sm:$0xff] %v9833_v32  ;;  %v14061_v19 = vrot.slane %v14060_v31, 2  ;;  %v14062_v58 = vrot.slane %v9119_v24, 2  ;;  %v14063_v52 = vld [vmem:[#allocation172_spill] sm:$0xff]  ;;  %v14065_v49 = vrot.slane %v9135_v59, 2  ;;  %v14066_v61 = vld [vmem:[#allocation173_spill] sm:$0xff] }
 0x214   : > { %v926_v27 = vadd.f32 %v919_v40, %v776_v26  ;;  %v14064_v48 = vrot.slane %v14063_v52, 2  ;;  %v14067_v43 = vrot.slane %v14066_v61, 2  ;;  %v14068_v26 = vrot.slane %v9810_v44, 2  ;;  %v14073_v61 = vld [vmem:[#allocation52_spill] sm:$0xff] }
 0x215   : > { %v9840_v55 = vsel %vm963_vm1, %v14061_v19, %v14059_v28  ;;  %v14069_v40 = vrot.slane %v9806_v0, 2  ;;  %v13064_v24 = vrot.slane %v9833_v32, 2  ;;  %v1577_v52 = vadd.f32 %v9665_v53, %v1517_v3  ;;  %v14075_v0 = vld [vmem:[#allocation54_spill] sm:$0xff] }
 0x216   : > { %v9851_v30 = vsel %vm963_vm1, %v14064_v48, %v14062_v58  ;;  %v9858_v31 = vsel %vm963_vm1, %v14067_v43, %v14065_v49  ;;  %v1077_v28 = vadd.f32 %v1070_v42, %v926_v27  ;;  %v13065_v58 = vrot.slane %v9844_v47, 2  ;;  %v14071_v48 = vld [vmem:[#allocation50_spill] sm:$0xff] }
 0x217   : > { %v1220_v16 = vsel %vm963_vm1, %v14069_v40, %v14068_v26  ;;  %v9870_v59 = vmul.f32 %v9651_v34, %v9350_v62  ;;  %v9874_v19 = vmul.f32 %v14071_v48, %v9350_v62  ;;  %v9878_v49 = vmul.f32 %v9656_v51, %v9353_v22 }
 0x218   : > { %v9882_v43 = vmul.f32 %v14073_v61, %v9353_v22  ;;  %v9886_v53 = vmul.f32 %v9661_v63, %v9380_v38  ;;  %v1697_v42 = vadd.f32 %v9672_v13, %v1577_v52  ;;  %v1227_v3 = vadd.f32 %v1220_v16, %v1077_v28 }
 0x219   : > { %14070 = vst [vmem:[#allocation64_spill] sm:$0xff] %v9870_v59  ;;  %v1370_v62 = vsel %vm963_vm1, %v13064_v24, %v13065_v58  ;;  %v1463_v27 = vmul.f32 %v9651_v34, %v9318_v20  ;;  %v1523_v22 = vmul.f32 %v9656_v51, %v9331_v37  ;;  %v9902_v13 = vmul.f32 %v14075_v0, %v9380_v38 }
 0x21a   : > { %14072 = vst [vmem:[#allocation65_spill] sm:$0xff] %v9878_v49  ;;  %v1847_v16 = vadd.f32 %v9679_v2, %v1697_v42  ;;  %v1377_v52 = vadd.f32 %v1370_v62, %v1227_v3  ;;  %v9908_v24 = vmul.f32 %v9651_v34, %v9412_v41  ;;  %v9915_v40 = vmul.f32 %v14071_v48, %v9412_v41  ;;  %v14079_v42 = vld [vmem:[#allocation102_spill] sm:$0xff] }
 0x21b   : > { %14074 = vst [vmem:[#allocation70_spill] sm:$0xff] %v9886_v53  ;;  %v1583_v3 = vmul.f32 %v9661_v63, %v14079_v42  ;;  %v9922_v62 = vmul.f32 %v9656_v51, %v9430_v60  ;;  %v9928_v26 = vmul.f32 %v14073_v61, %v9430_v60  ;;  %v9932_v41 = vmul.f32 %v9661_v63, %v9433_v11 }
 0x21c   : > { %14076 = vst [vmem:[#allocation71_spill] sm:$0xff] %v9902_v13  ;;  %v1997_v38 = vadd.f32 %v9686_v36, %v1847_v16  ;;  %v1467_v2 = vadd.f32 %v1463_v27, %v1377_v52  ;;  %v14082_v16 = vrot.slane %v9874_v19, 1  ;;  %v14083_v52 = vrot.slane %v9870_v59, 1 }
 0x21d   : > { %14077 = vst [vmem:[#allocation125_spill] sm:$0xff] %v9908_v24  ;;  %v9942_v28 = vmul.f32 %v14075_v0, %v9433_v11  ;;  %v14084_v60 = vrot.slane %v9882_v43, 1  ;;  %v14085_v32 = vrot.slane %v9878_v49, 1  ;;  %v14086_v18 = vrot.slane %v9902_v13, 1 }
 0x21e   : > { %14078 = vst [vmem:[#allocation126_spill] sm:$0xff] %v9915_v40  ;;  %v2147_v36 = vadd.f32 %v9693_v35, %v1997_v38  ;;  %v1527_v27 = vadd.f32 %v1523_v22, %v1467_v2  ;;  %v1715_v58 = vsel %vm512_vm0, %v14083_v52, %v14082_v16  ;;  %v14087_v35 = vrot.slane %v9886_v53, 1  ;;  %v14092_v52 = vld [vmem:[#allocation149_spill] sm:$0xff]  ;;  %v14093_v38 = vld [vmem:[#allocation116_spill] sm:$0xff]  ;;  %v14096_v53 = vld [vmem:[#allocation115_spill] sm:$0xff] }
 0x21f   : > { %14080 = vst [vmem:[#allocation127_spill] sm:$0xff] %v9922_v62  ;;  %v1865_v4 = vsel %vm512_vm0, %v14085_v32, %v14084_v60  ;;  %v13076_v2 = vrot.slane %v9928_v26, 2  ;;  %v14088_v49 = vrot.slane %v9915_v40, 2  ;;  %v14089_v32 = vrot.slane %v9908_v24, 2 }
 0x220   : > { %14081 = vst [vmem:[#allocation17_spill] sm:$0xff] %v9928_v26  ;;  %v2015_v22 = vsel %vm512_vm0, %v14087_v35, %v14086_v18  ;;  %v2297_v16 = vadd.f32 %v9700_v56, %v2147_v36  ;;  %v1587_v11 = vadd.f32 %v1583_v3, %v1527_v27  ;;  %v2558_v18 = vmul.f32 %v9710_v15, %v9479_v8  ;;  %v14091_v56 = vld [vmem:[#allocation27_spill] sm:$0xff] }
 0x221   : > { %v2165_v60 = vsel %vm963_vm1, %v14089_v32, %v14088_v49  ;;  %v9968_v35 = vmul.f32 %v9710_v15, %v9498_v23  ;;  %v9972_v3 = vmul.f32 %v14091_v56, %v9498_v23  ;;  %v2618_v59 = vmul.f32 %v9725_v50, %v14092_v52  ;;  %v14104_v8 = vld [vmem:[#allocation55_spill] sm:$0xff] }
 0x222   : > { %v2447_v36 = vadd.f32 %v9707_v7, %v2297_v16  ;;  %v1722_v27 = vadd.f32 %v1715_v58, %v1587_v11  ;;  %v9979_v49 = vmul.f32 %v9725_v50, %v14093_v38  ;;  %v14095_v32 = vrot.slane %v9922_v62, 2  ;;  %v14097_v7 = vld [vmem:[#allocation112_spill] sm:$0xff]  ;;  %v14098_v16 = vld [vmem:[#allocation165_spill] sm:$0xff] }
 0x223   : > { %14090 = vst [vmem:[#allocation76_spill] sm:$0xff] %v9968_v35  ;;  %v9988_v23 = vmul.f32 %v9750_v25, %v14096_v53  ;;  %v9992_v58 = vmul.f32 %v14097_v7, %v14093_v38  ;;  %v9996_v11 = vmul.f32 %v9750_v25, %v14098_v16  ;;  %v14100_v26 = vrot.slane %v9942_v28, 2 }
 0x224   : > { %14094 = vst [vmem:[#allocation128_spill] sm:$0xff] %v9979_v49  ;;  %v2315_v24 = vsel %vm963_vm1, %v14095_v32, %v13076_v2  ;;  %v2552_v52 = vadd.f32 %v9714_v57, %v2447_v36  ;;  %v1872_v40 = vadd.f32 %v1865_v4, %v1722_v27  ;;  %v14101_v62 = vrot.slane %v9932_v41, 2  ;;  %v14102_v2 = vld [vmem:[#allocation29_spill] sm:$0xff]  ;;  %v14107_v27 = vld [vmem:[#allocation36_spill] sm:$0xff] }
 0x225   : > { %14099 = vst [vmem:[#allocation77_spill] sm:$0xff] %v9996_v11  ;;  %v10006_v53 = vmul.f32 %v14102_v2, %v14098_v16  ;;  %v10013_v57 = vmul.f32 %v9710_v15, %v9528_v29  ;;  %v10027_v38 = vmul.f32 %v9725_v50, %v14104_v8  ;;  %v10044_v13 = vmul.f32 %v9750_v25, %v14107_v27 }
 0x226   : > { %v2465_v32 = vsel %vm963_vm1, %v14101_v62, %v14100_v26  ;;  %v2612_v4 = vadd.f32 %v9729_v33, %v2552_v52  ;;  %v2022_v36 = vadd.f32 %v2015_v22, %v1872_v40  ;;  %v10019_v26 = vmul.f32 %v14091_v56, %v9528_v29  ;;  %v14106_v40 = vld [vmem:[#allocation124_spill] sm:$0xff]  ;;  %v14111_v62 = vld [vmem:[#allocation113_spill] sm:$0xff] }
 0x227   : > { %14103 = vst [vmem:[#allocation82_spill] sm:$0xff] %v10013_v57  ;;  %v10031_v33 = vmul.f32 %v14097_v7, %v14104_v8  ;;  %v10048_v8 = vmul.f32 %v14102_v2, %v14107_v27  ;;  %v367_v16 = vmul.f32 %v8949_v12, %v14111_v62  ;;  %v14112_v52 = vrot.slane %v9992_v58, 1 }
 0x228   : > { %14105 = vst [vmem:[#allocation85_spill] sm:$0xff] %v10027_v38  ;;  %v2672_v22 = vadd.f32 %v14106_v40, %v2612_v4  ;;  %v2172_v29 = vadd.f32 %v2165_v60, %v2022_v36  ;;  %v14109_v4 = vrot.slane %v9972_v3, 1  ;;  %v14110_v36 = vrot.slane %v9968_v35, 1 }
 0x229   : > { %14108 = vst [vmem:[#allocation86_spill] sm:$0xff] %v10044_v13  ;;  %v14113_v2 = vrot.slane %v9979_v49, 1  ;;  %v14116_v56 = vrot.slane %v9996_v11, 1  ;;  %v14119_v49 = vrot.slane %v10013_v57, 2  ;;  %v14120_v35 = vrot.slane %v10031_v33, 2 }
 0x22a   : > { %v2792_v60 = vadd.f32 %v9769_v21, %v2672_v22  ;;  %v2322_v7 = vadd.f32 %v2315_v24, %v2172_v29  ;;  %v2810_v40 = vsel %vm512_vm0, %v14110_v36, %v14109_v4  ;;  %v14114_v22 = vld [vmem:[#allocation31_spill] sm:$0xff]  ;;  %v14115_v36 = vrot.slane %v10006_v53, 1 }
 0x22b   : > { %v2960_v27 = vsel %vm512_vm0, %v14113_v2, %v14112_v52  ;;  %v427_v29 = vmul.f32 %v14039_v17, %v14114_v22  ;;  %v14117_v2 = vld [vmem:[#allocation114_spill] sm:$0xff]  ;;  %v14118_v24 = vrot.slane %v10019_v26, 2  ;;  %v10134_v57 = vstv %s10050_s17  ;;  %s10267_s17 = sld [smem:[#allocation3 + $0x96]] }
 0x22c   : > { %v2942_v12 = vadd.f32 %v9799_v6, %v2792_v60  ;;  %v2472_v4 = vadd.f32 %v2465_v32, %v2322_v7  ;;  %v3110_v52 = vsel %vm512_vm0, %v14116_v56, %v14115_v36  ;;  %v487_v21 = vmul.f32 %v14046_v10, %v14117_v2  ;;  %14128 = vst [vmem:[#allocation129_spill] sm:$0xff] %v10134_v57 }
 0x22d   : > { %v3260_v17 = vsel %vm963_vm1, %v14119_v49, %v14118_v24  ;;  %v14121_v6 = vrot.slane %v10027_v38, 2  ;;  %v431_v60 = vadd.f32 %v427_v29, %v367_v16  ;;  %v10095_v56 = vmul.f32 %v14071_v48, %v9318_v20 }
 0x22e   : > { %v3092_v10 = vadd.f32 %v9817_v54, %v2942_v12  ;;  %v2562_v7 = vadd.f32 %v2558_v18, %v2472_v4  ;;  %v14122_v36 = vrot.slane %v10048_v8, 2  ;;  %v14123_v49 = vrot.slane %v10044_v13, 2  ;;  %v14124_v54 = vld [vmem:[#allocation15_spill] sm:$0xff]  ;;  %v14125_v4 = vld [vmem:[#allocation28_spill] sm:$0xff] }
 0x22f   : > { %v10091_v32 = vsel %vm963_vm1, %v14121_v6, %v14120_v35  ;;  %v10106_v38 = vstv %s10021_s13  ;;  %v491_v35 = vadd.f32 %v487_v21, %v431_v60  ;;  %v10112_v48 = vmul.f32 %v14073_v61, %v9331_v37  ;;  %s10218_s13 = sld [smem:[#allocation3 + $0x92]] }
 0x230   : > { %v10103_v24 = vsel %vm963_vm1, %v14123_v49, %v14122_v36  ;;  %v375_v16 = vmul.f32 %v14124_v54, %v10106_v38  ;;  %v10117_v18 = vstv %s10033_s14  ;;  %v3242_v29 = vadd.f32 %v9840_v55, %v3092_v10  ;;  %v14127_v49 = vld [vmem:[#allocation105_spill] sm:$0xff]  ;;  %s10228_s14 = sld [smem:[#allocation3 + $0x94]] }
 0x231   : > { %v2622_v12 = vadd.f32 %v2618_v59, %v2562_v7  ;;  %v435_v6 = vmul.f32 %v14125_v4, %v10117_v18  ;;  %v10123_v36 = vstv %s10038_s15  ;;  %v14126_v21 = vrot.slane %v9737_v5, 1  ;;  %s10238_s15 = sld [smem:[#allocation3 + $0x95]] }
 0x232   : > { %v10129_v61 = vmul.f32 %v14075_v0, %v14079_v42  ;;  %v495_v13 = vmul.f32 %v14127_v49, %v10123_v36  ;;  %v3392_v55 = vadd.f32 %v9851_v30, %v3242_v29  ;;  %v10140_v7 = vmul.f32 %v14124_v54, %v10134_v57 }
 0x233   : > { %v627_v60 = vadd.f32 %v14126_v21, %v491_v35  ;;  %v2682_v59 = vadd.f32 %v9988_v23, %v2622_v12  ;;  %v439_v10 = vadd.f32 %v435_v6, %v375_v16  ;;  %v14129_v5 = vrot.slane %v9745_v14, 1 }
 0x234   : > { %v10148_v35 = vmul.f32 %v9577_v9, %v10134_v57  ;;  %v10151_v21 = vstv %s10060_s18  ;;  %v10154_v30 = vstv %s10071_s19  ;;  %v10157_v23 = vadd.f32 %v9858_v31, %v3392_v55  ;;  %s10289_s18 = sld [smem:[#allocation3 + $0x97]] }
 0x235   : > { %v777_v0 = vadd.f32 %v14129_v5, %v627_v60  ;;  %14131 = vst [vmem:[#allocation90_spill] sm:$0xff] %v10154_v30  ;;  %v2817_v16 = vadd.f32 %v2810_v40, %v2682_v59  ;;  %v499_v29 = vadd.f32 %v495_v13, %v439_v10  ;;  %v13088_v12 = vrot.slane %v10140_v7, 1  ;;  %s10313_s19 = sld [smem:[#allocation3 + $0x98]] }
 0x236   : > { %14130 = vst [vmem:[#allocation89_spill] sm:$0xff] %v10148_v35  ;;  %v14133_v14 = vrot.slane %v9773_v1, 1  ;;  %v13087_v60 = vrot.slane %v10148_v35, 1  ;;  %v10167_v5 = vmul.f32 %v14125_v4, %v10151_v21  ;;  %v10171_v11 = vmul.f32 %v9592_v45, %v10151_v21  ;;  %4036 = vrot.lane.b32.xlu2 %v10157_v23, %s5523_s9 }
 0x237   : > { %14132 = vst [vmem:[#allocation130_spill] sm:$0xff] %v10157_v23  ;;  %v2967_v31 = vadd.f32 %v2960_v27, %v2817_v16  ;;  %v10177_v13 = vmul.f32 %v14127_v49, %v10154_v30  ;;  %v10181_v1 = vmul.f32 %v9600_v46, %v10154_v30  ;;  %v10184_v40 = vstv %s10108_s20  ;;  %s10323_s20 = sld [smem:[#allocation3 + $0x99]] }
 0x238   : > { %v927_v6 = vadd.f32 %v14133_v14, %v777_v0  ;;  %14134 = vst [vmem:[#allocation91_spill] sm:$0xff] %v10171_v11  ;;  %v14136_v55 = vrot.slane %v9792_v39, 2  ;;  %v642_v27 = vsel %vm512_vm0, %v13088_v12, %v13087_v60  ;;  %v13096_v10 = vrot.slane %v10167_v5, 1 }
 0x239   : > { %14135 = vst [vmem:[#allocation98_spill] sm:$0xff] %v10181_v1  ;;  %v13091_v0 = vrot.slane %v10171_v11, 1  ;;  %v3117_v16 = vadd.f32 %v3110_v52, %v2967_v31  ;;  %v650_v14 = vadd.f32 %v642_v27, %v499_v29  ;;  %v13095_v23 = vrot.slane %v10177_v13, 1 }
 0x23a   : > { %v1078_v59 = vadd.f32 %v14136_v55, %v927_v6  ;;  %v13090_v39 = vrot.slane %v10181_v1, 1  ;;  %v14137_v6 = vrot.slane %v9810_v44, 2  ;;  %v10212_v12 = vmul.f32 %v14124_v54, %v10184_v40 }
 0x23b   : > { %v792_v60 = vsel %vm512_vm0, %v13096_v10, %v13091_v0  ;;  %v10216_v52 = vmul.f32 %v9577_v9, %v10184_v40  ;;  %v3267_v29 = vadd.f32 %v3260_v17, %v3117_v16  ;;  %v14139_v54 = vrot.slane %v9844_v47, 2 }
 0x23c   : > { %v1228_v55 = vadd.f32 %v14137_v6, %v1078_v59  ;;  %v800_v44 = vadd.f32 %v792_v60, %v650_v14  ;;  %v942_v31 = vsel %vm512_vm0, %v13095_v23, %v13090_v39  ;;  %v10226_v59 = vstv %s10142_s21  ;;  %s10335_s21 = sld [smem:[#allocation3 + $0x9a]] }
 0x23d   : > { %14138 = vst [vmem:[#allocation101_spill] sm:$0xff] %v10216_v52  ;;  %v13092_v9 = vrot.slane %v10212_v12, 2  ;;  %v13089_v6 = vrot.slane %v10216_v52, 2  ;;  %v10236_v17 = vmul.f32 %v14125_v4, %v10226_v59  ;;  %v3417_v60 = vadd.f32 %v10091_v32, %v3267_v29  ;;  %v14158_v52 = vld [vmem:[#allocation146_spill] sm:$0xff] }
 0x23e   : > { %v1378_v27 = vadd.f32 %v14139_v54, %v1228_v55  ;;  %v950_v16 = vadd.f32 %v942_v31, %v800_v44  ;;  %v10243_v14 = vmul.f32 %v9592_v45, %v10226_v59  ;;  %v10246_v47 = vstv %s10160_s22  ;;  %s10347_s22 = sld [smem:[#allocation3 + $0x9c]] }
 0x23f   : > { %v1093_v4 = vsel %vm963_vm1, %v13092_v9, %v13089_v6  ;;  %v13094_v54 = vrot.slane %v10236_v17, 2  ;;  %v10257_v32 = vmul.f32 %v14127_v49, %v10246_v47  ;;  %v10260_v29 = vadd.f32 %v10103_v24, %v3417_v60 }
 0x240   : > { %14140 = vst [vmem:[#allocation66_spill] sm:$0xff] %v10243_v14  ;;  %v1468_v55 = vadd.f32 %v10095_v56, %v1378_v27  ;;  %v1101_v45 = vadd.f32 %v1093_v4, %v950_v16  ;;  %v13093_v44 = vrot.slane %v10243_v14, 2  ;;  %v10265_v56 = vmul.f32 %v9600_v46, %v10246_v47  ;;  %v14146_v16 = vld [vmem:[#allocation135_spill] sm:$0xff] }
 0x241   : > { %14141 = vst [vmem:[#allocation68_spill] sm:$0xff] %v10257_v32  ;;  %v13099_v27 = vrot.slane %v10257_v32, 2  ;;  %v10272_v49 = vstv %s10186_s23  ;;  %v10275_v6 = vstv %s10197_s29  ;;  %4174 = vrot.lane.b32.xlu0 %v10260_v29, %s5523_s9  ;;  %v10293_v0 = vstv %s10218_s13  ;;  %s10359_s23 = sld [smem:[#allocation3 + $0x9b]] }
 0x242   : > { %14142 = vst [vmem:[#allocation104_spill] sm:$0xff] %v10260_v29  ;;  %v1528_v31 = vadd.f32 %v10112_v48, %v1468_v55  ;;  %v1243_v46 = vsel %vm963_vm1, %v13094_v54, %v13093_v44  ;;  %v13098_v24 = vrot.slane %v10265_v56, 2  ;;  %v14145_v48 = vld [vmem:[#allocation41_spill] sm:$0xff]  ;;  %v1532_v55 = vmul.f32 %v14146_v16, %v10275_v6  ;;  %s10369_s29 = sld [smem:[#allocation3 + $0x9d]] }
 0x243   : > { %14143 = vst [vmem:[#allocation72_spill] sm:$0xff] %v10265_v56  ;;  %v1472_v60 = vmul.f32 %v14145_v48, %v10272_v49  ;;  %v1251_v39 = vadd.f32 %v1243_v46, %v1101_v45  ;;  %v10296_v9 = vstv %s10201_s8  ;;  %v14148_v54 = vld [vmem:[#allocation13_spill] sm:$0xff]  ;;  %v14151_v45 = vrot.slane %v9874_v19, 1  ;;  %s10383_s8 = sld [smem:[#allocation3 + $0x9e]] }
 0x244   : > { %14144 = vst [vmem:[#allocation74_spill] sm:$0xff] %v10275_v6  ;;  %v1588_v4 = vadd.f32 %v10129_v61, %v1528_v31  ;;  %v1393_v44 = vsel %vm963_vm1, %v13099_v27, %v13098_v24  ;;  %v1592_v23 = vmul.f32 %v14148_v54, %v10293_v0  ;;  %v10307_v10 = vmul.f32 %v14145_v48, %v10296_v9  ;;  %v10350_v56 = vld [vmem:[%s5641_s16 + $0xd8] sm:$0xff]  ;;  %s10435_s13 = sld [smem:[#allocation3 + $0x9f]] }
 0x245   : > { %14147 = vst [vmem:[#allocation78_spill] sm:$0xff] %v10293_v0  ;;  %v10311_v61 = vmul.f32 %v9651_v34, %v10296_v9  ;;  %v1401_v46 = vadd.f32 %v1393_v44, %v1251_v39  ;;  %v10318_v29 = vstv %s10228_s14  ;;  %v10321_v24 = vstv %s10238_s15  ;;  %s10451_s14 = sld [smem:[#allocation3 + $0xa0]] }
 0x246   : > { %14149 = vst [vmem:[#allocation80_spill] sm:$0xff] %v10307_v10  ;;  %v1723_v31 = vadd.f32 %v14151_v45, %v1588_v4  ;;  %v10329_v14 = vmul.f32 %v14146_v16, %v10318_v29  ;;  %v10333_v19 = vmul.f32 %v9656_v51, %v10318_v29  ;;  %v14154_v39 = vrot.slane %v9882_v43, 1  ;;  %s10459_s15 = sld [smem:[#allocation3 + $0xa1]] }
 0x247   : > { %14150 = vst [vmem:[#allocation96_spill] sm:$0xff] %v10311_v61  ;;  %v1476_v4 = vadd.f32 %v1472_v60, %v1401_v46  ;;  %v10341_v45 = vmul.f32 %v14148_v54, %v10321_v24  ;;  %v10345_v27 = vmul.f32 %v9661_v63, %v10321_v24  ;;  %v2559_v1 = vmul.f32 %v10350_v56, %v14158_v52  ;;  %v14159_v46 = vld [vmem:[#allocation71_spill] sm:$0xff] }
 0x248   : > { %14152 = vst [vmem:[#allocation141_spill] sm:$0xff] %v10329_v14  ;;  %v1873_v44 = vadd.f32 %v14154_v39, %v1723_v31  ;;  %v10357_v31 = vstv %s10267_s17  ;;  %v14160_v39 = vrot.slane %v14159_v46, 1  ;;  %v14161_v0 = vrot.slane %v10311_v61, 1  ;;  %s3633_s17 = sld [smem:[#allocation6]] }
 0x249   : > { %14153 = vst [vmem:[#allocation142_spill] sm:$0xff] %v10333_v19  ;;  %v1536_v35 = vadd.f32 %v1532_v55, %v1476_v4  ;;  %v14162_v6 = vrot.slane %v10307_v10, 1  ;;  %v10374_v60 = vmul.f32 %v14145_v48, %v10357_v31  ;;  %v10378_v55 = vmul.f32 %v9651_v34, %v10357_v31  ;;  %v14177_v34 = vld [vmem:[#allocation149_spill] sm:$0xff] }
 0x24a   : > { %14155 = vst [vmem:[#allocation143_spill] sm:$0xff] %v10341_v45  ;;  %v2023_v11 = vadd.f32 %v14160_v39, %v1873_v44  ;;  %v10381_v44 = vstv %s10289_s18  ;;  %v14168_v39 = vrot.slane %v10333_v19, 1  ;;  %s5233_s18 = sld [smem:[#allocation6 + $0x2]] }
 0x24b   : > { %14156 = vst [vmem:[#allocation148_spill] sm:$0xff] %v10345_v27  ;;  %v1738_v32 = vsel %vm512_vm0, %v14162_v6, %v14161_v0  ;;  %v14166_v0 = vld [vmem:[#allocation126_spill] sm:$0xff]  ;;  %v1596_v46 = vadd.f32 %v1592_v23, %v1536_v35  ;;  %v10394_v43 = vmul.f32 %v14146_v16, %v10381_v44  ;;  %v14173_v35 = vld [vmem:[#allocation17_spill] sm:$0xff] }
 0x24c   : > { %14157 = vst [vmem:[#allocation151_spill] sm:$0xff] %v10350_v56  ;;  %v14167_v6 = vrot.slane %v14166_v0, 2  ;;  %v14169_v56 = vrot.slane %v10329_v14, 1  ;;  %v10400_v0 = vmul.f32 %v9656_v51, %v10381_v44  ;;  %v14174_v23 = vrot.slane %v14173_v35, 2 }
 0x24d   : > { %14163 = vst [vmem:[#allocation152_spill] sm:$0xff] %v10374_v60  ;;  %v1746_v19 = vadd.f32 %v1738_v32, %v1596_v46  ;;  %v14178_v51 = vrot.slane %v10345_v27, 1  ;;  %v14179_v14 = vrot.slane %v10341_v45, 1  ;;  %v10454_v45 = vstv %s10335_s21  ;;  %s5235_s21 = sld [smem:[#allocation6 + $0x4]] }
 0x24e   : > { %14164 = vst [vmem:[#allocation160_spill] sm:$0xff] %v10378_v55  ;;  %v2173_v4 = vadd.f32 %v14167_v6, %v2023_v11  ;;  %v1888_v48 = vsel %vm512_vm0, %v14169_v56, %v14168_v39  ;;  %v10403_v11 = vstv %s10313_s19  ;;  %v10413_v39 = vld [vmem:[%s5641_s16 + $0xf8] sm:$0xff]  ;;  %v13123_v32 = vrot.slane %v10400_v0, 2  ;;  %v14183_v56 = vld [vmem:[#allocation115_spill] sm:$0xff]  ;;  %s5524_s19 = smov 16  }
 0x24f   : > { %14165 = vst [vmem:[#allocation161_spill] sm:$0xff] %v10381_v44  ;;  %v10410_v16 = vmul.f32 %v14148_v54, %v10403_v11  ;;  %v2619_v61 = vmul.f32 %v10413_v39, %v14177_v34  ;;  %v2038_v35 = vsel %vm512_vm0, %v14179_v14, %v14178_v51  ;;  %v14181_v54 = vrot.slane %v9942_v28, 2 }
 0x250   : > { %14170 = vst [vmem:[#allocation162_spill] sm:$0xff] %v10394_v43  ;;  %v2323_v6 = vadd.f32 %v14174_v23, %v2173_v4  ;;  %v10425_v4 = vmul.f32 %v9661_v63, %v10403_v11  ;;  %v10430_v23 = vld [vmem:[%s5641_s16 + $0x118] sm:$0xff]  ;;  %v1896_v27 = vadd.f32 %v1888_v48, %v1746_v19  ;;  %v14184_v51 = vrot.slane %v10378_v55, 2 }
 0x251   : > { %14171 = vst [vmem:[#allocation167_spill] sm:$0xff] %v10400_v0  ;;  %v14185_v63 = vrot.slane %v10374_v60, 2  ;;  %v10449_v19 = vstv %s10323_s20  ;;  %v10457_v55 = vstv %s10359_s23  ;;  %v10473_v0 = vstv %s10383_s8  ;;  %s5232_s20 = sld [smem:[#allocation6 + $0x1]]  ;;  %s13184_s23 = smov 80  }
 0x252   : > { %14172 = vst [vmem:[#allocation170_spill] sm:$0xff] %v10403_v11  ;;  %v2473_v46 = vadd.f32 %v14181_v54, %v2323_v6  ;;  %v14186_v6 = vrot.slane %v10394_v43, 2  ;;  %v2046_v14 = vadd.f32 %v2038_v35, %v1896_v27  ;;  %v14194_v35 = vld [vmem:[#allocation153_spill] sm:$0xff]  ;;  %s13182_s8 = smov 96  }
 0x253   : > { %14175 = vst [vmem:[#allocation45_spill] sm:$0xff] %v10410_v16  ;;  %v2188_v28 = vsel %vm963_vm1, %v14185_v63, %v14184_v51  ;;  %v14190_v51 = vrot.slane %v10410_v16, 2 }
 0x254   : > { %14176 = vst [vmem:[#allocation171_spill] sm:$0xff] %v10413_v39  ;;  %v2679_v39 = vmul.f32 %v10430_v23, %v14183_v56  ;;  %v2338_v54 = vsel %vm963_vm1, %v14186_v6, %v13123_v32  ;;  %v2563_v48 = vadd.f32 %v2559_v1, %v2473_v46  ;;  %v10467_v6 = vstv %s10347_s22  ;;  %s13187_s22 = smov 32  }
 0x255   : > { %14180 = vst [vmem:[#allocation47_spill] sm:$0xff] %v10425_v4  ;;  %v10470_v32 = vstv %s10369_s29  ;;  %v2196_v27 = vadd.f32 %v2188_v28, %v2046_v14  ;;  %v10477_v46 = vmul.f32 %v14194_v35, %v10467_v6  ;;  %v10481_v43 = vmul.f32 %v9710_v15, %v10467_v6  ;;  %s5527_s29 = smov 48  }
 0x256   : > { %14182 = vst [vmem:[#allocation49_spill] sm:$0xff] %v10430_v23  ;;  %v13127_v23 = vrot.slane %v10425_v4, 2  ;;  %v2623_v1 = vadd.f32 %v2619_v61, %v2563_v48  ;;  %v14197_v4 = vld [vmem:[#allocation155_spill] sm:$0xff]  ;;  %v14199_v61 = vld [vmem:[#allocation166_spill] sm:$0xff]  ;;  %v10497_v28 = vmul.f32 %v9750_v25, %v10473_v0 }
 0x257   : > { %14187 = vst [vmem:[#allocation14_spill] sm:$0xff] %v10449_v19  ;;  %v10493_v14 = vmul.f32 %v14199_v61, %v10473_v0  ;;  %v2346_v16 = vadd.f32 %v2338_v54, %v2196_v27  ;;  %v2627_v60 = vmul.f32 %v14197_v4, %v10454_v45  ;;  %v13147_v11 = vrot.slane %v10481_v43, 1  ;;  %v5389_v27 = vld [vmem:[%s5641_s16 + $0x8] sm:$0xff] }
 0x258   : > { %14188 = vst [vmem:[#allocation53_spill] sm:$0xff] %v10454_v45  ;;  %v2488_v63 = vsel %vm963_vm1, %v14190_v51, %v13127_v23  ;;  %v10485_v51 = vmul.f32 %v14197_v4, %v10470_v32  ;;  %v10489_v23 = vmul.f32 %v9725_v50, %v10470_v32  ;;  %v2683_v48 = vadd.f32 %v2679_v39, %v2623_v1 }
 0x259   : > { %14189 = vst [vmem:[#allocation39_spill] sm:$0xff] %v10457_v55  ;;  %v14202_v39 = vrot.slane %v9972_v3, 1  ;;  %v2496_v1 = vadd.f32 %v2488_v63, %v2346_v16  ;;  %v14206_v3 = vrot.slane %v9992_v58, 1  ;;  %v14209_v45 = vrot.slane %v10477_v46, 1 }
 0x25a   : > { %14191 = vst [vmem:[#allocation40_spill] sm:$0xff] %v10467_v6  ;;  %v2567_v6 = vmul.f32 %v14194_v35, %v10449_v19  ;;  %v10512_v19 = vstv %s10435_s13  ;;  %s13186_s13 = smov 64  }
 0x25b   : > { %14192 = vst [vmem:[#allocation30_spill] sm:$0xff] %v10470_v32  ;;  %v2687_v32 = vmul.f32 %v14199_v61, %v10457_v55  ;;  %v2818_v54 = vadd.f32 %v14202_v39, %v2683_v48  ;;  %v10518_v55 = vmul.f32 %v14194_v35, %v10512_v19  ;;  %v10522_v10 = vmul.f32 %v9710_v15, %v10512_v19 }
 0x25c   : > { %14193 = vst [vmem:[#allocation57_spill] sm:$0xff] %v10473_v0  ;;  %v2571_v63 = vadd.f32 %v2567_v6, %v2496_v1  ;;  %v10527_v48 = vstv %s10451_s14  ;;  %v10530_v39 = vstv %s10459_s15  ;;  %v2833_v44 = vsel %vm512_vm0, %v14209_v45, %v13147_v11  ;;  %v5390_v0 = vld [vmem:[%s5641_s16 + $0x28] sm:$0xff]  ;;  %s5236_s14 = sld [smem:[#allocation6 + $0x5]] }
 0x25d   : > { %14195 = vst [vmem:[#allocation34_spill] sm:$0xff] %v10477_v46  ;;  %v2968_v16 = vadd.f32 %v14206_v3, %v2818_v54  ;;  %v10540_v15 = vmul.f32 %v14197_v4, %v10527_v48  ;;  %v10544_v58 = vmul.f32 %v9725_v50, %v10527_v48  ;;  %v14212_v6 = vrot.slane %v10006_v53, 1 }
 0x25e   : > { %14196 = vst [vmem:[#allocation67_spill] sm:$0xff] %v10481_v43  ;;  %v2631_v1 = vadd.f32 %v2627_v60, %v2571_v63  ;;  %v10550_v3 = vmul.f32 %v14199_v61, %v10530_v39  ;;  %v10554_v45 = vmul.f32 %v9750_v25, %v10530_v39  ;;  %v365_v53 = vmul.f32 %v5389_v27, %v14111_v62 }
 0x25f   : > { %14198 = vst [vmem:[#allocation69_spill] sm:$0xff] %v10489_v23  ;;  %v3118_v54 = vadd.f32 %v14212_v6, %v2968_v16  ;;  %v14215_v16 = vrot.slane %v10019_v26, 2  ;;  %v14216_v25 = vrot.slane %v10489_v23, 1  ;;  %v14217_v46 = vrot.slane %v10485_v51, 1 }
 0x260   : > { %14200 = vst [vmem:[#allocation73_spill] sm:$0xff] %v10493_v14  ;;  %v2691_v63 = vadd.f32 %v2687_v32, %v2631_v1  ;;  %v13156_v43 = vrot.slane %v10554_v45, 2  ;;  %v425_v50 = vmul.f32 %v5390_v0, %v14114_v22  ;;  %v14218_v26 = vrot.slane %v10031_v33, 2 }
 0x261   : > { %14201 = vst [vmem:[#allocation75_spill] sm:$0xff] %v10497_v28  ;;  %v3268_v60 = vadd.f32 %v14215_v16, %v3118_v54  ;;  %v2983_v11 = vsel %vm512_vm0, %v14217_v46, %v14216_v25  ;;  %v14219_v54 = vrot.slane %v10497_v28, 1  ;;  %v14220_v1 = vrot.slane %v10493_v14, 1 }
 0x262   : > { %14203 = vst [vmem:[#allocation79_spill] sm:$0xff] %v10512_v19  ;;  %v2841_v32 = vadd.f32 %v2833_v44, %v2691_v63  ;;  %v14221_v6 = vrot.slane %v10522_v10, 2  ;;  %v14222_v46 = vrot.slane %v10518_v55, 2  ;;  %v14223_v0 = vrot.slane %v10544_v58, 2  ;;  %v14227_v63 = vld [vmem:[#allocation26_spill] sm:$0xff] }
 0x263   : > { %14204 = vst [vmem:[#allocation81_spill] sm:$0xff] %v10518_v55  ;;  %v3418_v27 = vadd.f32 %v14218_v26, %v3268_v60  ;;  %v3133_v16 = vsel %vm512_vm0, %v14220_v1, %v14219_v54  ;;  %v429_v44 = vadd.f32 %v425_v50, %v365_v53  ;;  %v14228_v25 = vrot.slane %v14227_v63, 1  ;;  %v14234_v53 = vld [vmem:[#allocation25_spill] sm:$0xff] }
 0x264   : > { %14205 = vst [vmem:[#allocation93_spill] sm:$0xff] %v10522_v10  ;;  %v3283_v22 = vsel %vm963_vm1, %v14222_v46, %v14221_v6  ;;  %v14229_v54 = vrot.slane %v10048_v8, 2  ;;  %v2991_v6 = vadd.f32 %v2983_v11, %v2841_v32  ;;  %v14231_v46 = vrot.slane %v10550_v3, 2  ;;  %v14238_v8 = vld [vmem:[#allocation108_spill] sm:$0xff]  ;;  %v14240_v11 = vld [vmem:[#allocation61_spill] sm:$0xff] }
 0x265   : > { %14207 = vst [vmem:[#allocation95_spill] sm:$0xff] %v10527_v48  ;;  %v14241_v32 = vrot.slane %v14240_v11, 2 }
 0x266   : > { %14208 = vst [vmem:[#allocation97_spill] sm:$0xff] %v10530_v39  ;;  %v5391_v39 = vld [vmem:[%s5641_s16 + $0x48] sm:$0xff]  ;;  %v10598_v1 = vadd.f32 %v14229_v54, %v3418_v27  ;;  %v14239_v27 = vrot.slane %v14238_v8, 1 }
 0x267   : > { %14210 = vst [vmem:[#allocation100_spill] sm:$0xff] %v10540_v15  ;;  %v485_v62 = vmul.f32 %v5391_v39, %v14117_v2  ;;  %v14224_v2 = vrot.slane %v10540_v15, 2  ;;  %v14225_v39 = vld [vmem:[#allocation122_spill] sm:$0xff] }
 0x268   : > { %14211 = vst [vmem:[#allocation103_spill] sm:$0xff] %v10544_v58  ;;  %v14226_v60 = vrot.slane %v14225_v39, 1  ;;  %v14235_v39 = vrot.slane %v14234_v53, 1  ;;  %4176 = vrot.lane.b32.xlu1 %v10598_v1, %s5523_s9  ;;  %v5393_v8 = vld [vmem:[%s5641_s16 + $0x88] sm:$0xff] }
 0x269   : > { %14213 = vst [vmem:[#allocation94_spill] sm:$0xff] %v10550_v3  ;;  %v3433_v33 = vsel %vm963_vm1, %v14224_v2, %v14223_v0  ;;  %v3583_v0 = vsel %vm963_vm1, %v14231_v46, %v13156_v43  ;;  %v14232_v2 = vld [vmem:[#allocation123_spill] sm:$0xff]  ;;  %v489_v58 = vadd.f32 %v485_v62, %v429_v44  ;;  %v14244_v46 = vld [vmem:[#allocation62_spill] sm:$0xff]  ;;  %v3141_v62 = vadd.f32 %v3133_v16, %v2991_v6  ;;  %v14252_v16 = vld [vmem:[#allocation64_spill] sm:$0xff] }
 0x26a   : > { %14214 = vst [vmem:[#allocation107_spill] sm:$0xff] %v10554_v45  ;;  %v617_v26 = vsel %vm512_vm0, %v14228_v25, %v14226_v60  ;;  %v14233_v50 = vrot.slane %v14232_v2, 1  ;;  %v14236_v60 = vld [vmem:[#allocation32_spill] sm:$0xff]  ;;  %v14242_v45 = vld [vmem:[#allocation33_spill] sm:$0xff]  ;;  %v14245_v43 = vrot.slane %v14244_v46, 2  ;;  %v14246_v2 = vld [vmem:[#allocation35_spill] sm:$0xff] }
 0x26b   : > { %14230 = vst [vmem:[#allocation19_spill] sm:$0xff] %v10598_v1  ;;  %v14237_v25 = vrot.slane %v14236_v60, 1  ;;  %v14243_v15 = vrot.slane %v14242_v45, 2  ;;  %v14247_v10 = vrot.slane %v14246_v2, 2  ;;  %v14248_v44 = vld [vmem:[#allocation63_spill] sm:$0xff]  ;;  %v14253_v6 = vrot.slane %v14252_v16, 1 }
 0x26c   : > { %v767_v63 = vsel %vm512_vm0, %v14235_v39, %v14233_v50  ;;  %v14249_v50 = vrot.slane %v14248_v44, 2  ;;  %v14250_v39 = vld [vmem:[#allocation38_spill] sm:$0xff]  ;;  %v14256_v44 = vld [vmem:[#allocation65_spill] sm:$0xff] }
 0x26d   : > { %v917_v54 = vsel %vm512_vm0, %v14239_v27, %v14237_v25  ;;  %v1068_v3 = vsel %vm963_vm1, %v14243_v15, %v14241_v32  ;;  %v1218_v53 = vsel %vm963_vm1, %v14247_v10, %v14245_v43  ;;  %v14251_v60 = vrot.slane %v14250_v39, 2  ;;  %v5392_v45 = vld [vmem:[%s5641_s16 + $0x68] sm:$0xff] }
 0x26e   : > { %v1462_v15 = vmul.f32 %v5392_v45, %v9318_v20  ;;  %v10636_v27 = vmul.f32 %v5393_v8, %v9331_v37  ;;  %v625_v10 = vadd.f32 %v617_v26, %v489_v58  ;;  %v5394_v43 = vld [vmem:[%s5641_s16 + $0xa8] sm:$0xff]  ;;  %v3291_v37 = vadd.f32 %v3283_v22, %v3141_v62 }
 0x26f   : > { %v1368_v25 = vsel %vm963_vm1, %v14251_v60, %v14249_v50  ;;  %v10640_v11 = vmul.f32 %v5394_v43, %v14079_v42  ;;  %v14254_v32 = vld [vmem:[#allocation118_spill] sm:$0xff]  ;;  %v14257_v50 = vrot.slane %v14256_v44, 1  ;;  %v14264_v43 = vld [vmem:[#allocation125_spill] sm:$0xff] }
 0x270   : > { %v14255_v46 = vrot.slane %v14254_v32, 1  ;;  %v14258_v20 = vld [vmem:[#allocation18_spill] sm:$0xff]  ;;  %v14265_v16 = vrot.slane %v14264_v43, 2  ;;  %v14266_v32 = vld [vmem:[#allocation119_spill] sm:$0xff]  ;;  %v3441_v1 = vadd.f32 %v3433_v33, %v3291_v37 }
 0x271   : > { %v14259_v39 = vrot.slane %v14258_v20, 1  ;;  %v14260_v58 = vld [vmem:[#allocation70_spill] sm:$0xff] }
 0x272   : > { %v10647_v2 = vsel %vm512_vm0, %v14255_v46, %v14253_v6  ;;  %v14261_v26 = vrot.slane %v14260_v58, 1  ;;  %v14262_v45 = vld [vmem:[#allocation42_spill] sm:$0xff]  ;;  %v14267_v6 = vrot.slane %v14266_v32, 2  ;;  %v10694_v55 = vadd.f32 %v3583_v0, %v3441_v1 }
 0x273   : > { %v10654_v60 = vsel %vm512_vm0, %v14259_v39, %v14257_v50  ;;  %v14263_v42 = vrot.slane %v14262_v45, 1  ;;  %v5395_v44 = vld [vmem:[%s5641_s16] sm:$0xff]  ;;  %v775_v50 = vadd.f32 %v767_v63, %v625_v10  ;;  %v14268_v39 = vld [vmem:[#allocation127_spill] sm:$0xff]  ;;  %v14277_v0 = vrot.slane %v10167_v5, 1 }
 0x274   : > { %v10668_v46 = vsel %vm963_vm1, %v14267_v6, %v14265_v16  ;;  %v374_v20 = vmul.f32 %v5395_v44, %v10106_v38  ;;  %v14269_v22 = vrot.slane %v14268_v39, 2  ;;  %v14270_v62 = vld [vmem:[#allocation110_spill] sm:$0xff]  ;;  %v630_v16 = vmul.f32 %v5395_v44, %v10134_v57  ;;  %14275 = vst [vmem:[#allocation99_spill] sm:$0xff] %v10694_v55  ;;  %4308 = vrot.lane.b32.xlu0 %v10694_v55, %s5523_s9 }
 0x275   : > { %v10661_v8 = vsel %vm512_vm0, %v14263_v42, %v14261_v26  ;;  %v14271_v58 = vrot.slane %v14270_v62, 2  ;;  %v5396_v26 = vld [vmem:[%s5641_s16 + $0x20] sm:$0xff]  ;;  %v925_v10 = vadd.f32 %v917_v54, %v775_v50  ;;  %v14272_v39 = vrot.slane %v9932_v41, 2 }
 0x276   : > { %v434_v42 = vmul.f32 %v5396_v26, %v10117_v18  ;;  %v5397_v43 = vld [vmem:[%s5641_s16 + $0x40] sm:$0xff]  ;;  %v780_v6 = vmul.f32 %v5396_v26, %v10151_v21  ;;  %v1081_v23 = vmul.f32 %v5395_v44, %v10184_v40  ;;  %v638_v33 = vrot.slane %v630_v16, 1 }
 0x277   : > { %v10677_v45 = vsel %vm963_vm1, %v14271_v58, %v14269_v22  ;;  %v494_v32 = vmul.f32 %v5397_v43, %v10123_v36  ;;  %v930_v63 = vmul.f32 %v5397_v43, %v10154_v30  ;;  %v14273_v62 = vld [vmem:[#allocation133_spill] sm:$0xff]  ;;  %v1076_v57 = vadd.f32 %v1068_v3, %v925_v10 }
 0x278   : > { %v14274_v28 = vrot.slane %v14273_v62, 2  ;;  %v438_v58 = vadd.f32 %v434_v42, %v374_v20  ;;  %v788_v37 = vrot.slane %v780_v6, 1  ;;  %v10698_v30 = vmul.f32 %v14194_v35, %v14158_v52  ;;  %v14280_v50 = vld [vmem:[#allocation117_spill] sm:$0xff]  ;;  %v14289_v62 = vld [vmem:[#allocation168_spill] sm:$0xff] }
 0x279   : > { %v938_v14 = vrot.slane %v930_v63, 1  ;;  %v10702_v41 = vmul.f32 %v14197_v4, %v14177_v34  ;;  %v1089_v44 = vrot.slane %v1081_v23, 2  ;;  %v1231_v52 = vmul.f32 %v5396_v26, %v10226_v59  ;;  %v14278_v4 = vld [vmem:[#allocation76_spill] sm:$0xff]  ;;  %v14287_v10 = vld [vmem:[#allocation77_spill] sm:$0xff] }
 0x27a   : > { %v10691_v22 = vsel %vm963_vm1, %v14274_v28, %v14272_v39  ;;  %v498_v54 = vadd.f32 %v494_v32, %v438_v58  ;;  %v14276_v28 = vrot.slane %v10140_v7, 1  ;;  %v790_v3 = vsel %vm512_vm0, %v788_v37, %v14277_v0  ;;  %v14282_v32 = vld [vmem:[#allocation128_spill] sm:$0xff]  ;;  %v14291_v37 = vld [vmem:[#allocation82_spill] sm:$0xff] }
 0x27b   : > { %v1226_v35 = vadd.f32 %v1218_v53, %v1076_v57  ;;  %v10715_v34 = vmul.f32 %v14199_v61, %v14183_v56  ;;  %v14279_v20 = vrot.slane %v14278_v4, 1  ;;  %v14281_v7 = vrot.slane %v14280_v50, 1  ;;  %v14284_v23 = vld [vmem:[#allocation164_spill] sm:$0xff]  ;;  %v5399_v4 = vld [vmem:[%s5641_s16 + $0x80] sm:$0xff] }
 0x27c   : > { %v640_v1 = vsel %vm512_vm0, %v638_v33, %v14276_v28  ;;  %v14283_v16 = vrot.slane %v14282_v32, 1  ;;  %v14285_v6 = vrot.slane %v14284_v23, 1  ;;  %v14286_v57 = vrot.slane %v10177_v13, 1  ;;  %v14293_v28 = vld [vmem:[#allocation51_spill] sm:$0xff] }
 0x27d   : > { %v10722_v42 = vsel %vm512_vm0, %v14281_v7, %v14279_v20  ;;  %v649_v5 = vadd.f32 %v640_v1, %v498_v54  ;;  %v1239_v61 = vrot.slane %v1231_v52, 2  ;;  %v1381_v53 = vmul.f32 %v5397_v43, %v10246_v47  ;;  %v5398_v52 = vld [vmem:[%s5641_s16 + $0x60] sm:$0xff] }
 0x27e   : > { %v10729_v26 = vsel %vm512_vm0, %v14285_v6, %v14283_v16  ;;  %v940_v56 = vsel %vm512_vm0, %v938_v14, %v14286_v57  ;;  %v1376_v63 = vadd.f32 %v1368_v25, %v1226_v35  ;;  %v14288_v39 = vrot.slane %v14287_v10, 1  ;;  %v5400_v16 = vld [vmem:[%s5641_s16 + $0xa0] sm:$0xff] }
 0x27f   : > { %v14290_v58 = vrot.slane %v14289_v62, 1  ;;  %v14292_v54 = vrot.slane %v14291_v37, 2  ;;  %v14294_v1 = vrot.slane %v14293_v28, 2  ;;  %v799_v14 = vadd.f32 %v790_v3, %v649_v5 }
 0x280   : > { %v14295_v0 = vrot.slane %v10212_v12, 2  ;;  %v1389_v25 = vrot.slane %v1381_v53, 2  ;;  %v1726_v35 = vmul.f32 %v5398_v52, %v10296_v9  ;;  %v1876_v20 = vmul.f32 %v5399_v4, %v10318_v29 }
 0x281   : > { %v10740_v33 = vsel %vm512_vm0, %v14290_v58, %v14288_v39  ;;  %v10747_v13 = vsel %vm963_vm1, %v14294_v1, %v14292_v54  ;;  %v1466_v50 = vadd.f32 %v1462_v15, %v1376_v63  ;;  %v949_v7 = vadd.f32 %v940_v56, %v799_v14  ;;  %v14297_v39 = vld [vmem:[#allocation161_spill] sm:$0xff]  ;;  %v14298_v56 = vld [vmem:[#allocation68_spill] sm:$0xff]  ;;  %v14300_v58 = vld [vmem:[#allocation74_spill] sm:$0xff] }
 0x282   : > { %v1091_v43 = vsel %vm963_vm1, %v1089_v44, %v14295_v0  ;;  %v1471_v32 = vmul.f32 %v5398_v52, %v10272_v49  ;;  %v2026_v23 = vmul.f32 %v5400_v16, %v10321_v24  ;;  %v14296_v3 = vrot.slane %v10236_v17, 2  ;;  %v14301_v54 = vld [vmem:[#allocation170_spill] sm:$0xff]  ;;  %v14302_v1 = vld [vmem:[#allocation85_spill] sm:$0xff] }
 0x283   : > { %v1734_v5 = vrot.slane %v1726_v35, 1  ;;  %v1884_v44 = vrot.slane %v1876_v20, 1  ;;  %v2176_v6 = vmul.f32 %v5398_v52, %v10357_v31  ;;  %v1526_v57 = vadd.f32 %v10636_v27, %v1466_v50  ;;  %v14304_v27 = vld [vmem:[#allocation24_spill] sm:$0xff]  ;;  %v14306_v35 = vld [vmem:[#allocation78_spill] sm:$0xff] }
 0x284   : > { %v1241_v12 = vsel %vm963_vm1, %v1239_v61, %v14296_v3  ;;  %v1100_v53 = vadd.f32 %v1091_v43, %v949_v7  ;;  %v2034_v10 = vrot.slane %v2026_v23, 1  ;;  %v2326_v15 = vmul.f32 %v5399_v4, %v14297_v39  ;;  %v14307_v20 = vld [vmem:[#allocation86_spill] sm:$0xff]  ;;  %v14309_v50 = vld [vmem:[#allocation56_spill] sm:$0xff] }
 0x285   : > { %v14299_v63 = vrot.slane %v14298_v56, 2  ;;  %v1531_v37 = vmul.f32 %v5399_v4, %v14300_v58  ;;  %v2184_v17 = vrot.slane %v2176_v6, 2  ;;  %v2476_v61 = vmul.f32 %v5400_v16, %v14301_v54  ;;  %v14312_v3 = vld [vmem:[#allocation80_spill] sm:$0xff] }
 0x286   : > { %v1586_v28 = vadd.f32 %v10640_v11, %v1526_v57  ;;  %v14303_v14 = vrot.slane %v14302_v1, 2  ;;  %v14305_v0 = vrot.slane %v14304_v27, 2  ;;  %v1250_v52 = vadd.f32 %v1241_v12, %v1100_v53  ;;  %v14314_v57 = vld [vmem:[#allocation141_spill] sm:$0xff]  ;;  %v14316_v1 = vld [vmem:[#allocation143_spill] sm:$0xff]  ;;  %v14318_v27 = vld [vmem:[#allocation152_spill] sm:$0xff] }
 0x287   : > { %v1391_v62 = vsel %vm963_vm1, %v1389_v25, %v14299_v63  ;;  %v1591_v25 = vmul.f32 %v5400_v16, %v14306_v35  ;;  %v14308_v4 = vrot.slane %v14307_v20, 2  ;;  %v14310_v7 = vrot.slane %v14309_v50, 2 }
 0x288   : > { %v10776_v43 = vsel %vm963_vm1, %v14305_v0, %v14303_v14  ;;  %v14313_v11 = vrot.slane %v14312_v3, 1  ;;  %v14315_v56 = vrot.slane %v14314_v57, 1  ;;  %v14317_v14 = vrot.slane %v14316_v1, 1  ;;  %v14321_v57 = vld [vmem:[#allocation30_spill] sm:$0xff]  ;;  %v14322_v1 = vld [vmem:[#allocation57_spill] sm:$0xff] }
 0x289   : > { %v10784_v23 = vsel %vm963_vm1, %v14310_v7, %v14308_v4  ;;  %v1721_v16 = vadd.f32 %v10647_v2, %v1586_v28  ;;  %v1400_v53 = vadd.f32 %v1391_v62, %v1250_v52  ;;  %v14319_v0 = vrot.slane %v14318_v27, 2  ;;  %v5401_v7 = vld [vmem:[%s5641_s16 + $0xc0] sm:$0xff] }
 0x28a   : > { %14311 = vst [vmem:[#allocation44_spill] sm:$0xff] %v10784_v23  ;;  %v1736_v6 = vsel %vm512_vm0, %v1734_v5, %v14313_v11  ;;  %v1886_v63 = vsel %vm512_vm0, %v1884_v44, %v14315_v56  ;;  %v2036_v12 = vsel %vm512_vm0, %v2034_v10, %v14317_v14  ;;  %v2334_v4 = vrot.slane %v2326_v15, 2  ;;  %v14320_v5 = vld [vmem:[#allocation40_spill] sm:$0xff]  ;;  %v5402_v11 = vld [vmem:[%s5641_s16 + $0xe0] sm:$0xff] }
 0x28b   : > { %v10799_v20 = vsel %vm963_vm1, %v2184_v17, %v14319_v0  ;;  %v2484_v50 = vrot.slane %v2476_v61, 2  ;;  %v2821_v3 = vmul.f32 %v5401_v7, %v14320_v5  ;;  %v2971_v44 = vmul.f32 %v5402_v11, %v14321_v57  ;;  %v5403_v56 = vld [vmem:[%s5641_s16 + $0x100] sm:$0xff] }
 0x28c   : > { %v3121_v55 = vmul.f32 %v5403_v56, %v14322_v1  ;;  %v1871_v10 = vadd.f32 %v10654_v60, %v1721_v16  ;;  %v1475_v2 = vadd.f32 %v1471_v32, %v1400_v53  ;;  %v3271_v62 = vmul.f32 %v5401_v7, %v10512_v19  ;;  %v14323_v17 = vld [vmem:[#allocation14_spill] sm:$0xff]  ;;  %v14324_v61 = vld [vmem:[#allocation53_spill] sm:$0xff]  ;;  %v14327_v53 = vld [vmem:[#allocation39_spill] sm:$0xff] }
 0x28d   : > { %v10810_v28 = vmul.f32 %v5402_v11, %v10527_v48  ;;  %v10813_v15 = vmul.f32 %v5401_v7, %v14323_v17  ;;  %v10816_v52 = vmul.f32 %v5402_v11, %v14324_v61  ;;  %v2829_v14 = vrot.slane %v2821_v3, 1  ;;  %v14325_v60 = vld [vmem:[#allocation162_spill] sm:$0xff]  ;;  %v14328_v7 = vld [vmem:[#allocation45_spill] sm:$0xff] }
 0x28e   : > { %v2979_v27 = vrot.slane %v2971_v44, 1  ;;  %v2021_v0 = vadd.f32 %v10661_v8, %v1871_v10  ;;  %v1535_v23 = vadd.f32 %v1531_v37, %v1475_v2  ;;  %v14326_v32 = vrot.slane %v14325_v60, 2  ;;  %v14330_v44 = vld [vmem:[#allocation97_spill] sm:$0xff]  ;;  %v14331_v10 = vld [vmem:[#allocation34_spill] sm:$0xff] }
 0x28f   : > { %v10823_v48 = vmul.f32 %v5403_v56, %v14327_v53  ;;  %v14329_v17 = vrot.slane %v14328_v7, 2  ;;  %v3129_v61 = vrot.slane %v3121_v55, 1  ;;  %v3279_v3 = vrot.slane %v3271_v62, 2  ;;  %v5404_v62 = vld [vmem:[%s5641_s16 + $0x10] sm:$0xff]  ;;  %v14334_v7 = vld [vmem:[#allocation129_spill] sm:$0xff] }
 0x290   : > { %v2336_v16 = vsel %vm963_vm1, %v2334_v4, %v14326_v32  ;;  %v10831_v19 = vmul.f32 %v5403_v56, %v14330_v44  ;;  %v2171_v8 = vadd.f32 %v10668_v46, %v2021_v0  ;;  %v1595_v37 = vadd.f32 %v1591_v25, %v1535_v23  ;;  %v5406_v25 = vld [vmem:[%s5641_s16 + $0x50] sm:$0xff]  ;;  %v10853_v32 = vld [vmem:[%s5641_s16 + $0x18] sm:$0xff] }
 0x291   : > { %v10828_v11 = vsel %vm963_vm1, %v2484_v50, %v14329_v17  ;;  %v14332_v4 = vrot.slane %v14331_v10, 1  ;;  %v14333_v50 = vrot.slane %v10485_v51, 1  ;;  %v376_v56 = vmul.f32 %v5404_v62, %v10106_v38  ;;  %v5405_v17 = vld [vmem:[%s5641_s16 + $0x30] sm:$0xff]  ;;  %v14335_v62 = vld [vmem:[#allocation90_spill] sm:$0xff] }
 0x292   : > { %v436_v46 = vmul.f32 %v5405_v17, %v10117_v18  ;;  %v496_v23 = vmul.f32 %v5406_v25, %v10123_v36  ;;  %v1745_v0 = vadd.f32 %v1736_v6, %v1595_v37  ;;  %v10857_v51 = vmul.f32 %v10853_v32, %v14334_v7  ;;  %v14342_v25 = vld [vmem:[#allocation81_spill] sm:$0xff] }
 0x293   : > { %v10837_v2 = vsel %vm512_vm0, %v2829_v14, %v14332_v4  ;;  %v10843_v55 = vsel %vm512_vm0, %v2979_v27, %v14333_v50  ;;  %v2321_v14 = vadd.f32 %v10677_v45, %v2171_v8  ;;  %v10860_v27 = vld [vmem:[%s5641_s16 + $0x38] sm:$0xff]  ;;  %v10875_v45 = vmul.f32 %v10853_v32, %v10184_v40 }
 0x294   : > { %v10864_v10 = vmul.f32 %v10860_v27, %v10151_v21  ;;  %v440_v4 = vadd.f32 %v436_v46, %v376_v56  ;;  %v10867_v50 = vld [vmem:[%s5641_s16 + $0x58] sm:$0xff]  ;;  %v10879_v6 = vmul.f32 %v10860_v27, %v10226_v59  ;;  %v1895_v37 = vadd.f32 %v1886_v63, %v1745_v0 }
 0x295   : > { %v10871_v17 = vmul.f32 %v10867_v50, %v14335_v62  ;;  %v2471_v8 = vadd.f32 %v10691_v22, %v2321_v14  ;;  %v13176_v21 = vrot.slane %v10857_v51, 1  ;;  %v14336_v59 = vld [vmem:[#allocation89_spill] sm:$0xff]  ;;  %v14338_v14 = vld [vmem:[#allocation91_spill] sm:$0xff] }
 0x296   : > { %v13169_v56 = vrot.slane %v10864_v10, 1  ;;  %v500_v46 = vadd.f32 %v496_v23, %v440_v4  ;;  %v2045_v60 = vadd.f32 %v2036_v12, %v1895_v37  ;;  %v14337_v22 = vrot.slane %v14336_v59, 1  ;;  %v14340_v4 = vld [vmem:[#allocation73_spill] sm:$0xff] }
 0x297   : > { %v2561_v40 = vadd.f32 %v10698_v30, %v2471_v8  ;;  %v14339_v23 = vrot.slane %v14338_v14, 1  ;;  %v14341_v7 = vrot.slane %v14340_v4, 1  ;;  %v14343_v30 = vrot.slane %v14342_v25, 2  ;;  %v14387_v8 = vld [vmem:[#allocation94_spill] sm:$0xff] }
 0x298   : > { %v644_v63 = vsel %vm512_vm0, %v14337_v22, %v13176_v21  ;;  %v2195_v22 = vadd.f32 %v10799_v20, %v2045_v60  ;;  %v14344_v14 = vrot.slane %v10871_v17, 1  ;;  %v10918_v25 = vmul.f32 %v10867_v50, %v10246_v47  ;;  %v14351_v60 = vld [vmem:[#allocation66_spill] sm:$0xff] }
 0x299   : > { %v794_v0 = vsel %vm512_vm0, %v14339_v23, %v13169_v56  ;;  %v10901_v62 = vsel %vm512_vm0, %v3129_v61, %v14341_v7  ;;  %v10906_v12 = vsel %vm963_vm1, %v3279_v3, %v14343_v30  ;;  %v651_v37 = vadd.f32 %v644_v63, %v500_v46  ;;  %v14345_v23 = vld [vmem:[#allocation98_spill] sm:$0xff]  ;;  %v14348_v46 = vld [vmem:[#allocation101_spill] sm:$0xff] }
 0x29a   : > { %v2621_v59 = vadd.f32 %v10702_v41, %v2561_v40  ;;  %v14346_v4 = vrot.slane %v14345_v23, 1  ;;  %v14347_v7 = vrot.slane %v10875_v45, 2  ;;  %v14349_v63 = vrot.slane %v14348_v46, 2  ;;  %v10931_v23 = vld [vmem:[%s5641_s16 + $0x78] sm:$0xff] }
 0x29b   : > { %v801_v3 = vadd.f32 %v794_v0, %v651_v37  ;;  %v14350_v20 = vrot.slane %v10879_v6, 2  ;;  %v14352_v40 = vrot.slane %v14351_v60, 2  ;;  %v2345_v0 = vadd.f32 %v2336_v16, %v2195_v22  ;;  %v10949_v60 = vld [vmem:[%s5641_s16 + $0xb8] sm:$0xff] }
 0x29c   : > { %v944_v61 = vsel %vm512_vm0, %v14346_v4, %v14344_v14  ;;  %v1095_v41 = vsel %vm963_vm1, %v14349_v63, %v14347_v7  ;;  %v10935_v14 = vmul.f32 %v10931_v23, %v10296_v9  ;;  %v2681_v47 = vadd.f32 %v10715_v34, %v2621_v59  ;;  %v10940_v4 = vld [vmem:[%s5641_s16 + $0x98] sm:$0xff]  ;;  %v5412_v63 = vld [vmem:[%s5641_s16 + $0x70] sm:$0xff] }
 0x29d   : > { %v1245_v30 = vsel %vm963_vm1, %v14352_v40, %v14350_v20  ;;  %v13168_v37 = vrot.slane %v10918_v25, 2  ;;  %v10944_v7 = vmul.f32 %v10940_v4, %v10318_v29  ;;  %v951_v46 = vadd.f32 %v944_v61, %v801_v3  ;;  %v14353_v3 = vld [vmem:[#allocation72_spill] sm:$0xff] }
 0x29e   : > { %v1473_v20 = vmul.f32 %v5412_v63, %v10272_v49  ;;  %v10953_v9 = vmul.f32 %v10949_v60, %v10321_v24  ;;  %v10957_v34 = vmul.f32 %v10931_v23, %v10357_v31  ;;  %v2816_v16 = vadd.f32 %v10722_v42, %v2681_v47  ;;  %v14355_v47 = vld [vmem:[#allocation142_spill] sm:$0xff] }
 0x29f   : > { %v2495_v59 = vadd.f32 %v10828_v11, %v2345_v0  ;;  %v13175_v29 = vrot.slane %v10935_v14, 1  ;;  %v13172_v22 = vrot.slane %v10944_v7, 1  ;;  %v1102_v61 = vadd.f32 %v1095_v41, %v951_v46 }
 0x2a0   : > { %v14354_v40 = vrot.slane %v14353_v3, 2  ;;  %v13170_v63 = vrot.slane %v10953_v9, 1  ;;  %v13171_v31 = vrot.slane %v10957_v34, 2  ;;  %v2966_v42 = vadd.f32 %v10729_v26, %v2816_v16  ;;  %v14359_v26 = vld [vmem:[#allocation160_spill] sm:$0xff] }
 0x2a1   : > { %v2570_v11 = vadd.f32 %v10813_v15, %v2495_v59  ;;  %v14356_v0 = vrot.slane %v14355_v47, 1  ;;  %v10979_v46 = vmul.f32 %v10940_v4, %v14297_v39  ;;  %v1252_v3 = vadd.f32 %v1245_v30, %v1102_v61  ;;  %v5414_v61 = vld [vmem:[%s5641_s16 + $0x90] sm:$0xff] }
 0x2a2   : > { %v1395_v24 = vsel %vm963_vm1, %v14354_v40, %v13168_v37  ;;  %v14357_v40 = vld [vmem:[#allocation148_spill] sm:$0xff]  ;;  %v14360_v15 = vrot.slane %v14359_v26, 2  ;;  %v10993_v59 = vmul.f32 %v10949_v60, %v14301_v54  ;;  %v3116_v39 = vadd.f32 %v10740_v33, %v2966_v42  ;;  %v14363_v42 = vld [vmem:[#allocation167_spill] sm:$0xff] }
 0x2a3   : > { %v1890_v41 = vsel %vm512_vm0, %v14356_v0, %v13172_v22  ;;  %v14358_v37 = vrot.slane %v14357_v40, 1  ;;  %v2630_v30 = vadd.f32 %v10816_v52, %v2570_v11  ;;  %v1533_v47 = vmul.f32 %v5414_v61, %v14300_v58  ;;  %v5415_v40 = vld [vmem:[%s5641_s16 + $0xb0] sm:$0xff] }
 0x2a4   : > { %v2190_v16 = vsel %vm963_vm1, %v14360_v15, %v13171_v31  ;;  %v13174_v0 = vrot.slane %v10979_v46, 2  ;;  %v14361_v26 = vld [vmem:[#allocation96_spill] sm:$0xff]  ;;  %v13173_v31 = vrot.slane %v10993_v59, 2  ;;  %v3266_v33 = vadd.f32 %v10747_v13, %v3116_v39  ;;  %v14368_v13 = vld [vmem:[#allocation171_spill] sm:$0xff]  ;;  %v14369_v39 = vld [vmem:[#allocation49_spill] sm:$0xff] }
 0x2a5   : > { %v2040_v56 = vsel %vm512_vm0, %v14358_v37, %v13170_v63  ;;  %v1402_v37 = vadd.f32 %v1395_v24, %v1252_v3  ;;  %v1593_v63 = vmul.f32 %v5415_v40, %v14306_v35  ;;  %v14362_v15 = vrot.slane %v14361_v26, 1  ;;  %v14365_v3 = vld [vmem:[#allocation151_spill] sm:$0xff] }
 0x2a6   : > { %v2690_v52 = vadd.f32 %v10823_v48, %v2630_v30  ;;  %v14364_v11 = vrot.slane %v14363_v42, 2  ;;  %v11017_v61 = vmul.f32 %v14365_v3, %v14320_v5  ;;  %v14366_v26 = vld [vmem:[#allocation47_spill] sm:$0xff]  ;;  %v11026_v48 = vmul.f32 %v14368_v13, %v14321_v57 }
 0x2a7   : > { %v1740_v54 = vsel %vm512_vm0, %v14362_v15, %v13175_v29  ;;  %v1477_v40 = vadd.f32 %v1473_v20, %v1402_v37  ;;  %v14367_v15 = vrot.slane %v14366_v26, 2  ;;  %v11030_v30 = vmul.f32 %v14369_v39, %v14322_v1  ;;  %v14370_v37 = vld [vmem:[#allocation79_spill] sm:$0xff]  ;;  %v14372_v1 = vld [vmem:[#allocation44_spill] sm:$0xff] }
 0x2a8   : > { %v2340_v24 = vsel %vm963_vm1, %v14364_v11, %v13174_v0  ;;  %v3416_v42 = vadd.f32 %v10776_v43, %v3266_v33  ;;  %v2840_v5 = vadd.f32 %v10837_v2, %v2690_v52  ;;  %v13179_v20 = vrot.slane %v11017_v61, 1  ;;  %v14374_v2 = vld [vmem:[#allocation67_spill] sm:$0xff] }
 0x2a9   : > { %v2490_v22 = vsel %vm963_vm1, %v14367_v15, %v13173_v31  ;;  %v11037_v11 = vmul.f32 %v14365_v3, %v14370_v37  ;;  %v1537_v26 = vadd.f32 %v1533_v47, %v1477_v40  ;;  %v13178_v15 = vrot.slane %v11026_v48, 1  ;;  %v14371_v31 = vld [vmem:[#allocation95_spill] sm:$0xff]  ;;  %v14376_v37 = vld [vmem:[#allocation69_spill] sm:$0xff] }
 0x2aa   : > { %v13177_v57 = vrot.slane %v11030_v30, 1  ;;  %v11043_v0 = vmul.f32 %v14368_v13, %v14371_v31  ;;  %v11046_v29 = vadd.f32 %v14372_v1, %v3416_v42  ;;  %v2990_v43 = vadd.f32 %v10843_v55, %v2840_v5  ;;  %v14378_v55 = vld [vmem:[#allocation75_spill] sm:$0xff] }
 0x2ab   : > { %v14375_v33 = vrot.slane %v14374_v2, 1  ;;  %v13180_v47 = vrot.slane %v11037_v11, 2  ;;  %v1597_v40 = vadd.f32 %v1593_v63, %v1537_v26  ;;  %v14377_v31 = vrot.slane %v14376_v37, 1  ;;  %v14380_v26 = vld [vmem:[#allocation93_spill] sm:$0xff] }
 0x2ac   : > { %14373 = vst [vmem:[#allocation106_spill] sm:$0xff] %v11046_v29  ;;  %v14379_v42 = vrot.slane %v14378_v55, 1  ;;  %v3434_v1 = vrot.slane %v11043_v0, 2  ;;  %4172 = vrot.lane.b32.xlu2 %v11046_v29, %s5523_s9  ;;  %v3140_v63 = vadd.f32 %v10901_v62, %v2990_v43  ;;  %v14381_v2 = vrot.slane %v14380_v26, 2  ;;  %v14382_v55 = vld [vmem:[#allocation100_spill] sm:$0xff]  ;;  %v14385_v62 = vld [vmem:[#allocation103_spill] sm:$0xff] }
 0x2ad   : > { %v11054_v52 = vsel %vm512_vm0, %v14375_v33, %v13179_v20  ;;  %v11062_v21 = vsel %vm512_vm0, %v14377_v31, %v13178_v15  ;;  %v11084_v37 = vmul.f32 %v14369_v39, %v14330_v44  ;;  %v3599_v31 = vpop.permute.xlu0 %3598  ;;  %v1747_v20 = vadd.f32 %v1740_v54, %v1597_v40 }
 0x2ae   : > { %v11069_v5 = vsel %vm512_vm0, %v14379_v42, %v13177_v57  ;;  %v11080_v33 = vsel %vm963_vm1, %v14381_v2, %v13180_v47  ;;  %v14383_v42 = vrot.slane %v14382_v55, 2  ;;  %v14384_v57 = vrot.slane %v10810_v28, 2  ;;  %v3603_v47 = vpop.permute.xlu1 %3602 }
 0x2af   : > { %v14386_v43 = vrot.slane %v14385_v62, 2  ;;  %v3290_v2 = vadd.f32 %v10906_v12, %v3140_v63  ;;  %v3584_v44 = vrot.slane %v11084_v37, 2  ;;  %v14388_v29 = vrot.slane %v14387_v8, 2  ;;  %v14423_v37 = vld [vmem:[#allocation120_spill] sm:$0xff] }
 0x2b0   : > { %v3431_v15 = vsel %vm963_vm1, %v14384_v57, %v14383_v42  ;;  %v14389_v55 = vrot.slane %v10831_v19, 2  ;;  %v1897_v57 = vadd.f32 %v1890_v41, %v1747_v20  ;;  %v377_v54 = vmul.f32 %v10853_v32, %v10106_v38  ;;  %v14390_v42 = vld [vmem:[#allocation107_spill] sm:$0xff] }
 0x2b1   : > { %v11096_v26 = vsel %vm963_vm1, %v14386_v43, %v3434_v1  ;;  %v3440_v40 = vadd.f32 %v3431_v15, %v3290_v2  ;;  %v14391_v62 = vrot.slane %v14390_v42, 2  ;;  %v437_v63 = vmul.f32 %v10860_v27, %v10117_v18  ;;  %v14392_v32 = vld [vmem:[#allocation43_spill] sm:$0xff]  ;;  %v14393_v27 = vld [vmem:[#allocation14_spill] sm:$0xff] }
 0x2b2   : > { %v3581_v28 = vsel %vm963_vm1, %v14389_v55, %v14388_v29  ;;  %v497_v19 = vmul.f32 %v10867_v50, %v10123_v36  ;;  %v2047_v8 = vadd.f32 %v2040_v56, %v1897_v57  ;;  %v3610_v20 = vmax.f32 %v14392_v32, %v3599_v31  ;;  %v5416_v18 = vld [vmem:[%s5641_s16 + $0xd0] sm:$0xff]  ;;  %v11123_v36 = vpop.permute.xlu2 %3756  ;;  %v14396_v31 = vld [vmem:[#allocation53_spill] sm:$0xff] }
 0x2b3   : > { %v3585_v12 = vsel %vm963_vm1, %v14391_v62, %v3584_v44  ;;  %v11116_v29 = vadd.f32 %v3581_v28, %v3440_v40  ;;  %v441_v41 = vadd.f32 %v437_v63, %v377_v54  ;;  %v2568_v55 = vmul.f32 %v5416_v18, %v14393_v27  ;;  %v14394_v50 = vld [vmem:[#allocation48_spill] sm:$0xff]  ;;  %v14398_v32 = vld [vmem:[#allocation23_spill] sm:$0xff] }
 0x2b4   : > { %v2197_v38 = vadd.f32 %v2190_v16, %v2047_v8  ;;  %v14395_v28 = vrot.slane %v10857_v51, 1  ;;  %v5417_v54 = vld [vmem:[%s5641_s16 + $0xf0] sm:$0xff]  ;;  %v3618_v42 = vrot.slane %v3610_v20, 1  ;;  %v14397_v8 = vrot.slane %v10864_v10, 1 }
 0x2b5   : > { %4306 = vrot.lane.b32.xlu2 %v11116_v29, %s5523_s9  ;;  %v3601_v15 = vpop.permute.xlu0 %3600  ;;  %v501_v43 = vadd.f32 %v497_v19, %v441_v41  ;;  %v2628_v40 = vmul.f32 %v5417_v54, %v14396_v31  ;;  %v5418_v63 = vld [vmem:[%s5641_s16 + $0x110] sm:$0xff]  ;;  %v11140_v51 = vstv %s3633_s17  ;;  %v14401_v10 = vrot.slane %v10875_v45, 2  ;;  %s5234_s16 = sld [smem:[#allocation6 + $0x3]]  ;;  %s5469_s17 = scalar_lea.hbm %s12502_s7, 2 }
 0x2b6   : > { %v2347_v2 = vadd.f32 %v2340_v24, %v2197_v38  ;;  %v11126_v56 = vmax.f32 %v14394_v50, %v3601_v15  ;;  %v2688_v24 = vmul.f32 %v5418_v63, %v14327_v53  ;;  %v3605_v19 = vpop.permute.xlu1 %3604  ;;  %v1534_v45 = vmul.f32 %v10940_v4, %v14300_v58 }
 0x2b7   : > { %v652_v16 = vadd.f32 %v14395_v28, %v501_v43  ;;  %v11138_v15 = vmax.f32 %v14398_v32, %v3605_v19  ;;  %v14400_v28 = vld [vmem:[#allocation58_spill] sm:$0xff]  ;;  %v14402_v19 = vrot.slane %v10879_v6, 2 }
 0x2b8   : > { %v2497_v57 = vadd.f32 %v2490_v22, %v2347_v2  ;;  %v3619_v62 = vrot.slane %v11126_v56, 1  ;;  %v14399_v2 = vrot.slane %v10871_v17, 1  ;;  %v3612_v54 = vmax.f32 %v14400_v28, %v3603_v47 }
 0x2b9   : > { %v802_v41 = vadd.f32 %v14397_v8, %v652_v16  ;;  %v14403_v47 = vrot.slane %v10918_v25, 2 }
 0x2ba   : > { %v2572_v38 = vadd.f32 %v2568_v55, %v2497_v57  ;;  %v3620_v22 = vsel %vm512_vm0, %v3618_v42, %v3619_v62  ;;  %v3623_v57 = vrot.slane %v11138_v15, 1  ;;  %v11155_v42 = vpop.permute.xlu2 %3758 }
 0x2bb   : > { %v3629_v43 = vmax.f32 %v3610_v20, %v3620_v22  ;;  %v952_v18 = vadd.f32 %v14399_v2, %v802_v41  ;;  %v1474_v20 = vmul.f32 %v10931_v23, %v10272_v49  ;;  %v1594_v49 = vmul.f32 %v10949_v60, %v14306_v35 }
 0x2bc   : > { %v2632_v50 = vadd.f32 %v2628_v40, %v2572_v38  ;;  %v3621_v40 = vrot.slane %v3612_v54, 1 }
 0x2bd   : > { %v3635_v63 = vadd.f32 %v11140_v51, %v3629_v43  ;;  %v1103_v16 = vadd.f32 %v14401_v10, %v952_v18  ;;  %v14404_v43 = vrot.slane %v10935_v14, 1  ;;  %v303_v18 = vlaneseq  ;;  %v3761_v28 = vpop.permute.xlu0 %3760 }
 0x2be   : > { %v2692_v55 = vadd.f32 %v2688_v24, %v2632_v50  ;;  %v3624_v6 = vsel %vm512_vm0, %v3621_v40, %v3623_v57  ;;  %v11179_v60 = vpop.permute.xlu1 %3762  ;;  %v14408_v14 = vrot.slane %v10953_v9, 1  ;;  %v14409_v10 = vrot.slane %v10957_v34, 2 }
 0x2bf   : > { %3643 = vst [vmem:[#allocation1] sm:$0xff] %v3635_v63  ;;  %v1253_v8 = vadd.f32 %v14402_v19, %v1103_v16  ;;  %vm11186_vm2 = vcmp.lt.s32.totalorder %v303_v18, 16  ;;  %v14410_v19 = vrot.slane %v10979_v46, 2  ;;  %v2569_v9 = vmul.f32 %v14365_v3, %v14393_v27 }
 0x2c0   : > { %v2842_v17 = vadd.f32 %v11054_v52, %v2692_v55  ;;  %v3631_v52 = vmax.f32 %v3612_v54, %v3624_v6  ;;  %3641 = vst.msk [vmem:[#allocation2] sm:$0x1] %vm11186_vm2, %v3635_v63  ;;  %v2689_v46 = vmul.f32 %v14369_v39, %v14327_v53  ;;  %v14415_v53 = vrot.slane %v11026_v48, 1 }
 0x2c1   : > { %v1403_v41 = vadd.f32 %v14403_v47, %v1253_v8  ;;  %v14411_v47 = vrot.slane %v10993_v59, 2  ;;  %vm3649_vm3 = vcmp.ge.s32.totalorder %v303_v18, 16  ;;  %vm3650_vm4 = vcmp.lt.s32.totalorder %v303_v18, 32 }
 0x2c2   : > { %v2992_v24 = vadd.f32 %v11062_v21, %v2842_v17  ;;  %v11173_v4 = vadd.f32 %v11140_v51, %v3631_v52  ;;  %vm11506_vm5 = vmand %vm3649_vm3, %vm3650_vm4  ;;  %vm3659_vm6 = vcmp.ge.s32.totalorder %v303_v18, 32  ;;  %vm3660_vm7 = vcmp.lt.s32.totalorder %v303_v18, 48 }
 0x2c3   : > { %v1478_v38 = vadd.f32 %v1474_v20, %v1403_v41  ;;  %vm11516_vm8 = vmand %vm3659_vm6, %vm3660_vm7  ;;  %vm3669_vm9 = vcmp.ge.s32.totalorder %v303_v18, 48  ;;  %vm3670_vm10 = vcmp.lt.s32.totalorder %v303_v18, 64  ;;  %vm3677_vm11 = vcmp.ge.s32.totalorder %v303_v18, 64 }
 0x2c4   : > { %v3142_v23 = vadd.f32 %v11069_v5, %v2992_v24  ;;  %v11181_v5 = vpop.permute.xlu2 %3894  ;;  %3710 = vst.msk [vmem:[#allocation2 + $0x1] sm:$0x1] %vm11186_vm2, %v11173_v4  ;;  %v14412_v24 = vrot.slane %v11017_v61, 1  ;;  %v14416_v61 = vrot.slane %v11030_v30, 1  ;;  %vm3678_vm12 = vcmp.lt.s32.totalorder %v303_v18, 80  ;;  %vm11549_vm13 = vmand %vm3669_vm9, %vm3670_vm10 }
 0x2c5   : > { %v1538_v32 = vadd.f32 %v1534_v45, %v1478_v38  ;;  %v14414_v38 = vld [vmem:[#allocation130_spill] sm:$0xff]  ;;  %vm3687_vm14 = vcmp.ge.s32.totalorder %v303_v18, 80  ;;  %vm3688_vm15 = vcmp.lt.s32.totalorder %v303_v18, 96  ;;  %vm3697_vm3 = vcmp.ge.s32.totalorder %v303_v18, 96 }
 0x2c6   : > { %v3292_v25 = vadd.f32 %v11080_v33, %v3142_v23  ;;  %v11169_v22 = vld [vmem:[#allocation1 + $0x2] ss:$9 sm:$0xff]  ;;  %v14405_v33 = vrot.slane %v10944_v7, 1  ;;  %v3622_v7 = vsel %vm512_vm0, %v3619_v62, %v3621_v40  ;;  %v3899_v20 = vpop.permute.xlu1 %3898  ;;  %v2629_v62 = vmul.f32 %v14368_v13, %v14396_v31  ;;  %vm11561_vm1 = vmand %vm3687_vm14, %vm3688_vm15 }
 0x2c7   : > { %3653 = vst [vmem:[#allocation1] sm:$0xff] %v3635_v63  ;;  %v1598_v58 = vadd.f32 %v1594_v49, %v1538_v32  ;;  %v3630_v55 = vmax.f32 %v11126_v56, %v3622_v7  ;;  %v14413_v31 = vld [vmem:[#allocation12_spill] sm:$0xff]  ;;  %v14419_v7 = vld [vmem:[#allocation111_spill] sm:$0xff]  ;;  %vm3698_vm4 = vcmp.lt.s32.totalorder %v303_v18, 112  ;;  %vm11572_vm6 = vcmp.lt.s32.totalorder %v303_v18, 128 }
 0x2c8   : > { %v3442_v21 = vadd.f32 %v11096_v26, %v3292_v25  ;;  %vm3707_vm7 = vcmp.ge.s32.totalorder %v303_v18, 112  ;;  %vm11580_vm9 = vmand %vm3697_vm3, %vm3698_vm4 }
 0x2c9   : > { %v1748_v2 = vadd.f32 %v14404_v43, %v1598_v58  ;;  %v11214_v34 = vadd.f32 %v11140_v51, %v3630_v55  ;;  %vm11586_vm10 = vmand %vm3707_vm7, %vm11572_vm6 }
 0x2ca   : > { %v11177_v35 = vadd.f32 %v3585_v12, %v3442_v21 }
 0x2cb   : > { %v1898_v50 = vadd.f32 %v14405_v33, %v1748_v2  ;;  %v14417_v2 = vrot.slane %v11037_v11, 2  ;;  %v11243_v33 = vstv %s5234_s16 }
 0x2cc   : > { %4310 = vrot.lane.b32.xlu1 %v11177_v35, %s5523_s9  ;;  %v3901_v17 = vpop.permute.xlu2 %3900 }
 0x2cd   : > { %v2048_v12 = vadd.f32 %v14408_v14, %v1898_v50  ;;  %v14418_v14 = vld [vmem:[#allocation16_spill] sm:$0xff] }
 0x2ce   : > { %v11200_v54 = vld [vmem:[#allocation1 + $0x4] ss:$9 sm:$0xff]  ;;  %v4035_v59 = vpop.permute.xlu1 %4034 }
 0x2cf   : > { %3663 = vst [vmem:[#allocation1] sm:$0xff] %v3635_v63  ;;  %v2198_v16 = vadd.f32 %v14409_v10, %v2048_v12  ;;  %v3897_v63 = vpop.permute.xlu0 %3896  ;;  %v11224_v6 = vmax.f32 %v14413_v31, %v4035_v59  ;;  %v11250_v12 = vmax.f32 %v14418_v14, %v11155_v42  ;;  %v3908_v10 = vmax.f32 %v14419_v7, %v3899_v20  ;;  %v14422_v20 = vld [vmem:[#allocation84_spill] sm:$0xff] }
 0x2d1   : > { %v2348_v8 = vadd.f32 %v14410_v19, %v2198_v16  ;;  %v4053_v52 = vrot.slane %v11224_v6, 1  ;;  %v14420_v16 = vld [vmem:[#allocation163_spill] sm:$0xff] }
 0x2d2   : > { %v11256_v55 = vmax.f32 %v14420_v16, %v3897_v63 }
 0x2d3   : > { %v2498_v41 = vadd.f32 %v14411_v47, %v2348_v8  ;;  %v3917_v8 = vrot.slane %v3908_v10, 1  ;;  %v3770_v47 = vmax.f32 %v14422_v20, %v3761_v28  ;;  %v11280_v28 = vstv %s5233_s18  ;;  %s14450_s18 = smov 96  }
 0x2d4   : > { %v4037_v45 = vpop.permute.xlu2 %4036  ;;  %v3915_v42 = vrot.slane %v11256_v55, 1 }
 0x2d5   : > { %v2573_v40 = vadd.f32 %v2569_v9, %v2498_v41  ;;  %v4046_v49 = vmax.f32 %v14414_v38, %v4037_v45  ;;  %v14421_v9 = vld [vmem:[#allocation136_spill] sm:$0xff] }
 0x2d6   : > { %v11218_v56 = vld [vmem:[#allocation1 + $0x6] ss:$9 sm:$0xff]  ;;  %v11269_v41 = vpop.permute.xlu1 %4170  ;;  %v3918_v63 = vsel %vm512_vm0, %v3915_v42, %v3917_v8 }
 0x2d7   : > { %3681 = vst [vmem:[#allocation1] sm:$0xff] %v11214_v34  ;;  %v2633_v3 = vadd.f32 %v2629_v62, %v2573_v40  ;;  %v11227_v23 = vpop.permute.xlu0 %4032  ;;  %v4055_v32 = vrot.slane %v4046_v49, 1  ;;  %v3777_v62 = vrot.slane %v11250_v12, 1  ;;  %v3779_v40 = vrot.slane %v3770_v47, 1 }
 0x2d9   : > { %v2693_v27 = vadd.f32 %v2689_v46, %v2633_v3  ;;  %v4056_v21 = vsel %vm512_vm0, %v4053_v52, %v4055_v32  ;;  %v3926_v46 = vmax.f32 %v11256_v55, %v3918_v63 }
 0x2da   : > { %v4064_v43 = vmax.f32 %v11224_v6, %v4056_v21 }
 0x2db   : > { %v2843_v13 = vadd.f32 %v14412_v24, %v2693_v27  ;;  %v3780_v27 = vsel %vm512_vm0, %v3777_v62, %v3779_v40  ;;  %v11286_v45 = vadd.f32 %v11280_v28, %v3926_v46 }
 0x2dc   : > { %v11246_v50 = vadd.f32 %v11243_v33, %v4064_v43  ;;  %v3788_v31 = vmax.f32 %v11250_v12, %v3780_v27 }
 0x2dd   : > { %v2993_v39 = vadd.f32 %v14415_v53, %v2843_v13 }
 0x2de   : > { %v11232_v25 = vld [vmem:[#allocation1 + $0x2] ss:$9 sm:$0xff]  ;;  %4098 = vrot.lane.b32.xlu0 %v11246_v50, %s5524_s19  ;;  %v4177_v53 = vpop.permute.xlu1 %4176 }
 0x2df   : > { %3691 = vst [vmem:[#allocation1] sm:$0xff] %v11214_v34  ;;  %v3143_v58 = vadd.f32 %v14416_v61, %v2993_v39  ;;  %v4039_v11 = vpop.permute.xlu0 %4038  ;;  %v14424_v39 = vld [vmem:[#allocation60_spill] sm:$0xff] }
 0x2e0   : > { %v4047_v0 = vmax.f32 %v14421_v9, %v4039_v11  ;;  %v3771_v61 = vmax.f32 %v14424_v39, %v11179_v60 }
 0x2e1   : > { %v3293_v48 = vadd.f32 %v14417_v2, %v3143_v58  ;;  %v11297_v58 = vstv %s5232_s20  ;;  %s4949_s20 = scalar_lea.hbm %s12502_s7, %s5592_s28 }
 0x2e2   : > { %v4057_v3 = vrot.slane %v4047_v0, 1  ;;  %v11312_v60 = vadd.f32 %v11297_v58, %v3788_v31  ;;  %v3781_v7 = vrot.slane %v3771_v61, 1 }
 0x2e3   : > { %v3443_v30 = vadd.f32 %v3434_v1, %v3293_v48 }
 0x2e4   : > { %v4066_v24 = vmax.f32 %v4047_v0, %v4057_v3  ;;  %v3790_v46 = vmax.f32 %v3771_v61, %v3781_v7 }
 0x2e5   : > { %v11262_v19 = vadd.f32 %v3584_v44, %v3443_v30  ;;  %v3909_v44 = vmax.f32 %v14423_v37, %v3901_v17  ;;  %v4058_v17 = vsel %vm512_vm0, %v4055_v32, %v4057_v3  ;;  %v3782_v37 = vsel %vm512_vm0, %v3779_v40, %v3781_v7 }
 0x2e6   : > { %v11266_v1 = vld [vmem:[#allocation1 + $0x4] ss:$9 sm:$0xff]  ;;  %v4065_v38 = vmax.f32 %v4046_v49, %v4058_v17  ;;  %3960 = vrot.lane.b32.xlu0 %v11286_v45, %s13187_s22  ;;  %v11301_v21 = vadd.f32 %v11243_v33, %v4066_v24  ;;  %v3789_v3 = vmax.f32 %v3770_v47, %v3782_v37  ;;  %v3632_v24 = vmax.f32 %v11138_v15, %v3623_v57 }
 0x2e7   : > { %3701 = vst [vmem:[#allocation1] sm:$0xff] %v11214_v34  ;;  %4312 = vrot.lane.b32.xlu2 %v11262_v19, %s5523_s9  ;;  %v3919_v59 = vrot.slane %v3909_v44, 1  ;;  %v14425_v49 = vld [vmem:[#allocation19_spill] sm:$0xff]  ;;  %v4175_v0 = vpop.permute.xlu0 %4174  ;;  %v14429_v15 = vld [vmem:[#allocation92_spill] sm:$0xff] }
 0x2e8   : > { %v11304_v43 = vadd.f32 %v11243_v33, %v4065_v38  ;;  %v4185_v2 = vmax.f32 %v14425_v49, %v4177_v53  ;;  %4148 = vrot.lane.b32.xlu1 %v11301_v21, %s5524_s19  ;;  %v11342_v17 = vadd.f32 %v11297_v58, %v3789_v3  ;;  %v14427_v38 = vld [vmem:[#allocation121_spill] sm:$0xff]  ;;  %v3768_v57 = vmax.f32 %v14429_v15, %v11123_v36 }
 0x2e9   : > { %v3920_v32 = vsel %vm512_vm0, %v3917_v8, %v3919_v59  ;;  %v3928_v48 = vmax.f32 %v3909_v44, %v3919_v59  ;;  %v4206_v8 = vstv %s5235_s21  ;;  %v14426_v44 = vld [vmem:[#allocation104_spill] sm:$0xff]  ;;  %v11337_v59 = vadd.f32 %v11297_v58, %v3790_v46  ;;  %s14452_s21 = smov 64  }
 0x2ea   : > { %v3927_v14 = vmax.f32 %v3908_v10, %v3920_v32  ;;  %v4195_v30 = vrot.slane %v4185_v2, 1  ;;  %v4184_v63 = vmax.f32 %v14426_v44, %v4175_v0  ;;  %v4182_v53 = vmax.f32 %v14427_v38, %v11269_v41  ;;  %v14431_v0 = vld [vmem:[#allocation99_spill] sm:$0xff] }
 0x2eb   : > { %v11315_v11 = vadd.f32 %v11280_v28, %v3928_v48  ;;  %v14430_v48 = vld [vmem:[#allocation106_spill] sm:$0xff] }
 0x2ec   : > { %v4204_v16 = vmax.f32 %v4185_v2, %v4195_v30  ;;  %v11322_v10 = vadd.f32 %v11280_v28, %v3927_v14  ;;  %v4193_v27 = vrot.slane %v4184_v63, 1  ;;  %v4190_v2 = vrot.slane %v4182_v53, 1 }
 0x2ee   : > { %v11289_v13 = vld [vmem:[#allocation1 + $0x6] ss:$9 sm:$0xff]  ;;  %3822 = vrot.lane.b32.xlu0 %v11312_v60, %s5527_s29  ;;  %v11324_v20 = vadd.f32 %v4206_v8, %v4204_v16  ;;  %v4196_v47 = vsel %vm512_vm0, %v4193_v27, %v4195_v30 }
 0x2ef   : > { %3712 = vst [vmem:[#allocation1] sm:$0xff] %v11173_v4  ;;  %4124 = vrot.lane.b32.xlu2 %v11304_v43, %s13184_s23  ;;  %v4203_v31 = vmax.f32 %v4184_v63, %v4196_v47  ;;  %v4309_v30 = vpop.permute.xlu0 %4308  ;;  %v14432_v63 = vld [vmem:[#allocation109_spill] sm:$0xff] }
 0x2f0   : > { %4286 = vst.msk [vmem:[#allocation2 + $0x9] sm:$0x1] %vm11186_vm2, %v11324_v20  ;;  %4010 = vrot.lane.b32.xlu1 %v11315_v11, %s13187_s22  ;;  %v11371_v37 = vmax.f32 %v14431_v0, %v4309_v30  ;;  %v3906_v46 = vmax.f32 %v14432_v63, %v11181_v5 }
 0x2f1   : > { %v11360_v32 = vadd.f32 %v4206_v8, %v4203_v31 }
 0x2f2   : > { %v3914_v6 = vrot.slane %v3906_v46, 1 }
 0x2f6   : > { %v11317_v9 = vld [vmem:[#allocation1 + $0x2] ss:$9 sm:$0xff]  ;;  %3674 = vrot.lane.b32.xlu0 %v11214_v34, %s13186_s13  ;;  %v3638_v34 = vadd.f32 %v11140_v51, %v3632_v24  ;;  %v3776_v51 = vrot.slane %v3768_v57, 1 }
 0x2f7   : > { %3719 = vst [vmem:[#allocation1] sm:$0xff] %v11173_v4  ;;  %3986 = vrot.lane.b32.xlu2 %v11322_v10, %s13182_s8 }
 0x2f8   : > { %3872 = vrot.lane.b32.xlu1 %v11337_v59, %s5527_s29 }
 0x2fe   : > { %v11339_v40 = vld [vmem:[#allocation1 + $0x4] ss:$9 sm:$0xff] }
 0x2ff   : > { %3726 = vst [vmem:[#allocation1] sm:$0xff] %v11173_v4  ;;  %3848 = vrot.lane.b32.xlu2 %v11342_v17, %s5523_s9  ;;  %v14428_v4 = vld [vmem:[#allocation22_spill] sm:$0xff] }
 0x300   : > { %v4044_v61 = vmax.f32 %v14428_v4, %v11227_v23  ;;  %3734 = vrot.lane.b32.xlu1 %v3638_v34, %s13186_s13  ;;  %v4327_v4 = vrot.slane %v11371_v37, 1 }
 0x302   : > { %v4052_v41 = vrot.slane %v4044_v61, 1 }
 0x304   : > { %v4054_v3 = vsel %vm512_vm0, %v4052_v41, %v4053_v52 }
 0x305   : > { %v4063_v5 = vmax.f32 %v4044_v61, %v4054_v3  ;;  %v3916_v61 = vsel %vm512_vm0, %v3914_v6, %v3915_v42 }
 0x306   : > { %v3728_v39 = vld [vmem:[#allocation1 + $0x6] ss:$9 sm:$0xff]  ;;  %v4173_v49 = vpop.permute.xlu2 %4172 }
 0x307   : > { %3738 = vst [vmem:[#allocation1] sm:$0xff] %v3638_v34  ;;  %v4183_v14 = vmax.f32 %v14430_v48, %v4173_v49  ;;  %4261 = vrot.lane.b32.xlu2 %v11360_v32, %s13186_s13 }
 0x309   : > { %v4191_v7 = vrot.slane %v4183_v14, 1 }
 0x30b   : > { %v4192_v23 = vsel %vm512_vm0, %v4190_v2, %v4191_v7  ;;  %v4194_v16 = vsel %vm512_vm0, %v4191_v7, %v4193_v27  ;;  %v3778_v27 = vsel %vm512_vm0, %v3776_v51, %v3777_v62 }
 0x30c   : > { %v4201_v36 = vmax.f32 %v4182_v53, %v4192_v23  ;;  %v4202_v44 = vmax.f32 %v4183_v14, %v4194_v16  ;;  %v3787_v12 = vmax.f32 %v3768_v57, %v3778_v27 }
 0x30e   : > { %v3740_v47 = vld [vmem:[#allocation1 + $0x2] ss:$9 sm:$0xff]  ;;  %v11378_v24 = vadd.f32 %v4206_v8, %v4202_v44  ;;  %v11380_v38 = vadd.f32 %v4206_v8, %v4201_v36  ;;  %v11395_v8 = vstv %s5236_s14  ;;  %v3793_v2 = vadd.f32 %v11297_v58, %v3787_v12 }
 0x30f   : > { %v4307_v31 = vpop.permute.xlu2 %4306  ;;  %3745 = vst [vmem:[#allocation1] sm:$0xff] %v3638_v34  ;;  %3656 = vrot.lane.b32.xlu2 %v11200_v54, %s13187_s22  ;;  %v3925_v54 = vmax.f32 %v3906_v46, %v3916_v61 }
 0x310   : > { %v4318_v53 = vmax.f32 %v11116_v29, %v4307_v31  ;;  %4212 = vrot.lane.b32.xlu1 %v11380_v38, %s13186_s13  ;;  %4237 = vst.msk [vmem:[#allocation2 + $0x8] sm:$0x1] %vm11186_vm2, %v11378_v24  ;;  %v11398_v29 = vadd.f32 %v11243_v33, %v4063_v5 }
 0x311   : > { %v11414_v33 = vadd.f32 %v11280_v28, %v3925_v54 }
 0x312   : > { %v4326_v52 = vrot.slane %v4318_v53, 1 }
 0x314   : > { %v4328_v62 = vsel %vm512_vm0, %v4326_v52, %v4327_v4 }
 0x315   : > { %v4337_v34 = vmax.f32 %v4318_v53, %v4328_v62  ;;  %v4913_v62 = vld [vmem:[%s12500_s5 + $0x58] sm:$0xff] }
 0x316   : > { %v3747_v49 = vld [vmem:[#allocation1 + $0x4] ss:$9 sm:$0xff] }
 0x317   : > { %v11404_v15 = vadd.f32 %v11395_v8, %v4337_v34  ;;  %3802 = vst [vmem:[#allocation1] sm:$0xff] %v3793_v2  ;;  %3684 = vrot.lane.b32.xlu2 %v11232_v25, %s13184_s23 }
 0x318   : > { %4074 = vrot.lane.b32.xlu1 %v11398_v29, %s13184_s23 }
 0x319   : > { %4348 = vrot.lane.b32.xlu0 %v11404_v15, %s5527_s29 }
 0x31e   : > { %v3804_v55 = vld [vmem:[#allocation1 + $0x2] ss:$9 sm:$0xff] }
 0x31f   : > { %3729 = vrot.lane.b32.xlu2 %v3728_v39, %s5527_s29  ;;  %3807 = vst [vmem:[#allocation1] sm:$0xff] %v3793_v2 }
 0x320   : > { %3936 = vrot.lane.b32.xlu1 %v11414_v33, %s13182_s8  ;;  %3806 = vst.msk [vmem:[#allocation2 + $0x2] sm:$0x1] %vm11186_vm2, %v3804_v55 }
 0x321   : > { %3646 = vrot.lane.b32.xlu0 %v11169_v22, %s5524_s19 }
 0x326   : > { %v3809_v25 = vld [vmem:[#allocation1 + $0x4] ss:$9 sm:$0xff] }
 0x327   : > { %3748 = vrot.lane.b32.xlu2 %v3747_v49, %s13182_s8  ;;  %3814 = vst [vmem:[#allocation1] sm:$0xff] %v3793_v2  ;;  %v4624_v49 = vld [vmem:[%s12498_s3 + $0x5b0] sm:$0xff] }
 0x328   : > { %3798 = vrot.lane.b32.xlu1 %v3793_v2, %s5523_s9 }
 0x329   : > { %3704 = vrot.lane.b32.xlu0 %v11289_v13, %s5523_s9 }
 0x32e   : > { %v3816_v22 = vld [vmem:[#allocation1 + $0x6] ss:$9 sm:$0xff] }
 0x32f   : > { %3810 = vrot.lane.b32.xlu2 %v3809_v25, %s5524_s19  ;;  %3826 = vst [vmem:[#allocation1] sm:$0xff] %v11312_v60 }
 0x331   : > { %3722 = vrot.lane.b32.xlu0 %v11339_v40, %s13187_s22 }
 0x336   : > { %v3828_v13 = vld [vmem:[#allocation1 + $0x2] ss:$9 sm:$0xff] }
 0x337   : > { %3833 = vst [vmem:[#allocation1] sm:$0xff] %v11312_v60  ;;  %3829 = vrot.lane.b32.xlu2 %v3828_v13, %s13186_s13 }
 0x339   : > { %3741 = vrot.lane.b32.xlu0 %v3740_v47, %s13184_s23 }
 0x33e   : > { %v4311_v42 = vpop.permute.xlu1 %4310  ;;  %v3835_v7 = vld [vmem:[#allocation1 + $0x4] ss:$9 sm:$0xff] }
 0x33f   : > { %v4320_v28 = vmax.f32 %v11177_v35, %v4311_v42  ;;  %3840 = vst [vmem:[#allocation1] sm:$0xff] %v11312_v60 }
 0x341   : > { %v4329_v58 = vrot.slane %v4320_v28, 1  ;;  %v4313_v39 = vpop.permute.xlu2 %4312 }
 0x342   : > { %v4321_v57 = vmax.f32 %v11262_v19, %v4313_v39 }
 0x343   : > { %v11437_v40 = vsel %vm512_vm0, %v4327_v4, %v4329_v58 }
 0x344   : > { %v4331_v48 = vrot.slane %v4321_v57, 1 }
 0x346   : > { %v4332_v14 = vsel %vm512_vm0, %v4329_v58, %v4331_v48  ;;  %v11440_v30 = vmax.f32 %v4321_v57, %v4331_v48  ;;  %v3842_v19 = vld [vmem:[#allocation1 + $0x6] ss:$9 sm:$0xff]  ;;  %vm11555_vm0 = vmand %vm3677_vm11, %vm3678_vm12 }
 0x347   : > { %v4339_v41 = vmax.f32 %v4320_v28, %v4332_v14  ;;  %3852 = vst [vmem:[#allocation1] sm:$0xff] %v11342_v17  ;;  %3843 = vrot.lane.b32.xlu0 %v3842_v19, %s13182_s8  ;;  %v4572_v48 = vld [vmem:[%s12498_s3 + $0x410] sm:$0xff] }
 0x349   : > { %v11444_v35 = vadd.f32 %v11395_v8, %v4339_v41  ;;  %v11448_v51 = vpop.permute.xlu2 %4124 }
 0x34b   : > { %4398 = vrot.lane.b32.xlu1 %v11444_v35, %s5527_s29 }
 0x34e   : > { %v3854_v16 = vld [vmem:[#allocation1 + $0x2] ss:$9 sm:$0xff] }
 0x34f   : > { %3857 = vst [vmem:[#allocation1] sm:$0xff] %v11342_v17 }
 0x350   : > { %3856 = vst.msk [vmem:[#allocation2 + $0x3] sm:$0x1] %vm11186_vm2, %v3854_v16 }
 0x351   : > { %v11454_v23 = vpop.permute.xlu2 %3986 }
 0x353   : > { %3666 = vrot.lane.b32.xlu1 %v11218_v56, %s5527_s29  ;;  %v11467_v56 = vpop.permute.xlu0 %4098 }
 0x356   : > { %v3859_v0 = vld [vmem:[#allocation1 + $0x4] ss:$9 sm:$0xff] }
 0x357   : > { %3864 = vst [vmem:[#allocation1] sm:$0xff] %v11342_v17  ;;  %3860 = vrot.lane.b32.xlu0 %v3859_v0, %s5524_s19  ;;  %v4909_v0 = vld [vmem:[%s12500_s5 + $0x38] sm:$0xff] }
 0x359   : > { %v11461_v60 = vpop.permute.xlu2 %3848 }
 0x35a   : > { %v11474_v63 = vpop.permute.xlu1 %4148 }
 0x35b   : > { %3694 = vrot.lane.b32.xlu1 %v11266_v1, %s13182_s8  ;;  %v11476_v17 = vpop.permute.xlu0 %3960 }
 0x35e   : > { %v3866_v44 = vld [vmem:[#allocation1 + $0x6] ss:$9 sm:$0xff] }
 0x35f   : > { %3876 = vst [vmem:[#allocation1] sm:$0xff] %v11337_v59  ;;  %3867 = vrot.lane.b32.xlu2 %v3866_v44, %s13187_s22 }
 0x361   : > { %v11469_v36 = vpop.permute.xlu2 %4261 }
 0x362   : > { %v11483_v47 = vpop.permute.xlu1 %4010 }
 0x363   : > { %3715 = vrot.lane.b32.xlu1 %v11317_v9, %s5524_s19  ;;  %v11485_v31 = vpop.permute.xlu0 %3822 }
 0x366   : > { %v3878_v46 = vld [vmem:[#allocation1 + $0x2] ss:$9 sm:$0xff] }
 0x367   : > { %3883 = vst [vmem:[#allocation1] sm:$0xff] %v11337_v59  ;;  %3879 = vrot.lane.b32.xlu0 %v3878_v46, %s13186_s13 }
 0x369   : > { %v3657_v1 = vpop.permute.xlu2 %3656 }
 0x36a   : > { %v11493_v59 = vpop.permute.xlu1 %3872 }
 0x36b   : > { %3817 = vrot.lane.b32.xlu1 %v3816_v22, %s13187_s22  ;;  %v3675_v4 = vpop.permute.xlu0 %3674 }
 0x36e   : > { %v3885_v3 = vld [vmem:[#allocation1 + $0x4] ss:$9 sm:$0xff] }
 0x36f   : > { %3940 = vst [vmem:[#allocation1] sm:$0xff] %v11414_v33  ;;  %3886 = vrot.lane.b32.xlu2 %v3885_v3, %s13184_s23 }
 0x371   : > { %v11481_v9 = vpop.permute.xlu2 %3684 }
 0x372   : > { %v11502_v52 = vpop.permute.xlu1 %3734 }
 0x373   : > { %3836 = vrot.lane.b32.xlu1 %v3835_v7, %s13184_s23  ;;  %v4914_v7 = vld [vmem:[%s12500_s5 + $0x60] sm:$0xff] }
 0x376   : > { %v3942_v53 = vld [vmem:[#allocation1 + $0x2] ss:$9 sm:$0xff] }
 0x377   : > { %3947 = vst [vmem:[#allocation1] sm:$0xff] %v11414_v33  ;;  %3943 = vrot.lane.b32.xlu0 %v3942_v53, %s5523_s9 }
 0x379   : > { %v11489_v27 = vpop.permute.xlu2 %3729 }
 0x37e   : > { %v3949_v6 = vld [vmem:[#allocation1 + $0x4] ss:$9 sm:$0xff] }
 0x37f   : > { %3952 = vst [vmem:[#allocation1] sm:$0xff] %v11414_v33 }
 0x380   : > { %3951 = vst.msk [vmem:[#allocation2 + $0x4] sm:$0x1] %vm11186_vm2, %v3949_v6 }
 0x381   : > { %v11495_v5 = vpop.permute.xlu2 %3748 }
 0x382   : > { %v11522_v54 = vpop.permute.xlu1 %4212 }
 0x386   : > { %v3954_v61 = vld [vmem:[#allocation1 + $0x6] ss:$9 sm:$0xff] }
 0x387   : > { %3964 = vst [vmem:[#allocation1] sm:$0xff] %v11286_v45  ;;  %3955 = vrot.lane.b32.xlu1 %v3954_v61, %s5524_s19 }
 0x389   : > { %v3811_v34 = vpop.permute.xlu2 %3810 }
 0x38a   : > { %3813 = vst.msk [vmem:[#allocation2 + $0x2] sm:$0x1] %vm11506_vm5, %v3811_v34  ;;  %v11528_v25 = vpop.permute.xlu1 %4074 }
 0x38b   : > { %v11504_v12 = vpop.permute.xlu0 %4348 }
 0x38e   : > { %v3966_v33 = vld [vmem:[#allocation1 + $0x2] ss:$9 sm:$0xff] }
 0x38f   : > { %3971 = vst [vmem:[#allocation1] sm:$0xff] %v11286_v45  ;;  %3967 = vrot.lane.b32.xlu2 %v3966_v33, %s5527_s29 }
 0x391   : > { %v3830_v53 = vpop.permute.xlu2 %3829 }
 0x392   : > { %v11534_v42 = vpop.permute.xlu1 %3936 }
 0x393   : > { %v3647_v2 = vpop.permute.xlu0 %3646 }
 0x394   : > { %3652 = vst.msk [vmem:[#allocation2] sm:$0x1] %vm11506_vm5, %v3647_v2 }
 0x395   : > { %3662 = vst.msk [vmem:[#allocation2] sm:$0x1] %vm11516_vm8, %v3657_v1 }
 0x396   : > { %v3973_v55 = vld [vmem:[#allocation1 + $0x4] ss:$9 sm:$0xff] }
 0x397   : > { %3978 = vst [vmem:[#allocation1] sm:$0xff] %v11286_v45  ;;  %3974 = vrot.lane.b32.xlu1 %v3973_v55, %s13186_s13 }
 0x39a   : > { %v3799_v13 = vpop.permute.xlu1 %3798 }
 0x39b   : > { %v3705_v45 = vpop.permute.xlu0 %3704 }
 0x39e   : > { %v3980_v22 = vld [vmem:[#allocation1 + $0x6] ss:$9 sm:$0xff] }
 0x39f   : > { %3990 = vst [vmem:[#allocation1] sm:$0xff] %v11322_v10  ;;  %3981 = vrot.lane.b32.xlu0 %v3980_v22, %s13184_s23 }
 0x3a3   : > { %v3723_v14 = vpop.permute.xlu0 %3722 }
 0x3a6   : > { %v3992_v28 = vld [vmem:[#allocation1 + $0x2] ss:$9 sm:$0xff] }
 0x3a7   : > { %3997 = vst [vmem:[#allocation1] sm:$0xff] %v11322_v10  ;;  %3993 = vrot.lane.b32.xlu1 %v3992_v28, %s5523_s9 }
 0x3ab   : > { %v3742_v18 = vpop.permute.xlu0 %3741 }
 0x3ae   : > { %v3999_v58 = vld [vmem:[#allocation1 + $0x4] ss:$9 sm:$0xff] }
 0x3af   : > { %4002 = vst [vmem:[#allocation1] sm:$0xff] %v11322_v10  ;;  %v4591_v10 = vld [vmem:[%s12498_s3 + $0x4a8] sm:$0xff] }
 0x3b0   : > { %4001 = vst.msk [vmem:[#allocation2 + $0x5] sm:$0x1] %vm11186_vm2, %v3999_v58 }
 0x3b6   : > { %v4004_v57 = vld [vmem:[#allocation1 + $0x6] ss:$9 sm:$0xff] }
 0x3b7   : > { %4014 = vst [vmem:[#allocation1] sm:$0xff] %v11315_v11  ;;  %4005 = vrot.lane.b32.xlu2 %v4004_v57, %s5524_s19 }
 0x3b9   : > { %v3844_v3 = vpop.permute.xlu0 %3843 }
 0x3bd   : > { %v11541_v39 = vpop.permute.xlu1 %4398 }
 0x3be   : > { %v4016_v19 = vld [vmem:[#allocation1 + $0x2] ss:$9 sm:$0xff] }
 0x3bf   : > { %4021 = vst [vmem:[#allocation1] sm:$0xff] %v11315_v11  ;;  %4017 = vrot.lane.b32.xlu0 %v4016_v19, %s5527_s29  ;;  %v4908_v11 = vld [vmem:[%s12500_s5 + $0x30] sm:$0xff] }
 0x3c5   : > { %v3667_v41 = vpop.permute.xlu1 %3666 }
 0x3c6   : > { %3672 = vst.msk [vmem:[#allocation2] sm:$0x1] %vm11549_vm13, %v3667_v41  ;;  %v4023_v1 = vld [vmem:[#allocation1 + $0x4] ss:$9 sm:$0xff] }
 0x3c7   : > { %3680 = vst.msk [vmem:[#allocation2] sm:$0x1] %vm11555_vm0, %v3675_v4  ;;  %4024 = vrot.lane.b32.xlu2 %v4023_v1, %s13186_s13  ;;  %v4457_v1 = vld [vmem:[%s12498_s3 + $0x78] sm:$0xff] }
 0x3c8   : > { %3690 = vst.msk [vmem:[#allocation2] sm:$0x1] %vm11561_vm1, %v11481_v9  ;;  %4661 = vmatpush.msra.mxu0 %v4457_v1  ;;  %v4496_v1 = vld [vmem:[%s12498_s3 + $0x1b0] sm:$0xff] }
 0x3c9   : > { %4078 = vst [vmem:[#allocation1] sm:$0xff] %v11398_v29  ;;  %v3861_v6 = vpop.permute.xlu0 %3860 }
 0x3ca   : > { %3863 = vst.msk [vmem:[#allocation2 + $0x3] sm:$0x1] %vm11506_vm5, %v3861_v6  ;;  %v4455_v6 = vld [vmem:[%s12498_s3 + $0x68] sm:$0xff] }
 0x3cd   : > { %v3695_v44 = vpop.permute.xlu1 %3694 }
 0x3ce   : > { %3700 = vst.msk [vmem:[#allocation2] sm:$0x1] %vm11580_vm9, %v3695_v44 }
 0x3cf   : > { %3709 = vst.msk [vmem:[#allocation2] sm:$0x1] %vm11586_vm10, %v3705_v45 }
 0x3d0   : > { %v4080_v9 = vld [vmem:[#allocation1 + $0x2] ss:$9 sm:$0xff] }
 0x3d1   : > { %4085 = vst [vmem:[#allocation1] sm:$0xff] %v11398_v29  ;;  %4081 = vrot.lane.b32.xlu0 %v4080_v9, %s13182_s8 }
 0x3d5   : > { %v3716_v46 = vpop.permute.xlu1 %3715 }
 0x3d6   : > { %3718 = vst.msk [vmem:[#allocation2 + $0x1] sm:$0x1] %vm11506_vm5, %v3716_v46  ;;  %v4505_v46 = vld [vmem:[%s12498_s3 + $0x1f8] sm:$0xff] }
 0x3d7   : > { %3725 = vst.msk [vmem:[#allocation2 + $0x1] sm:$0x1] %vm11516_vm8, %v3723_v14  ;;  %4721 = vmatpush.msra.mxu3 %v4505_v46  ;;  %v4479_v46 = vld [vmem:[%s12498_s3 + $0x128] sm:$0xff] }
 0x3d8   : > { %3732 = vst.msk [vmem:[#allocation2 + $0x1] sm:$0x1] %vm11549_vm13, %v11489_v27  ;;  %v4087_v27 = vld [vmem:[#allocation1 + $0x4] ss:$9 sm:$0xff] }
 0x3d9   : > { %3737 = vst.msk [vmem:[#allocation2 + $0x1] sm:$0x1] %vm11555_vm0, %v11502_v52  ;;  %4088 = vrot.lane.b32.xlu2 %v4087_v27, %s5523_s9  ;;  %v3880_v52 = vpop.permute.xlu0 %3879  ;;  %v4488_v27 = vld [vmem:[%s12498_s3 + $0x170] sm:$0xff] }
 0x3da   : > { %3744 = vst.msk [vmem:[#allocation2 + $0x1] sm:$0x1] %vm11561_vm1, %v3742_v18  ;;  %v4473_v18 = vld [vmem:[%s12498_s3 + $0xf8] sm:$0xff] }
 0x3db   : > { %3751 = vst.msk [vmem:[#allocation2 + $0x1] sm:$0x1] %vm11580_vm9, %v11495_v5  ;;  %v3868_v5 = vpop.permute.xlu2 %3867  ;;  %4681 = vmatpush.msra.mxu1 %v4473_v18  ;;  %v4447_v18 = vld [vmem:[%s12498_s3 + $0x28] sm:$0xff] }
 0x3dc   : > { %3801 = vst.msk [vmem:[#allocation2 + $0x1] sm:$0x1] %vm11586_vm10, %v3799_v13 }
 0x3dd   : > { %v3818_v4 = vpop.permute.xlu1 %3817  ;;  %4092 = vst [vmem:[#allocation1] sm:$0xff] %v11398_v29 }
 0x3de   : > { %3820 = vst.msk [vmem:[#allocation2 + $0x2] sm:$0x1] %vm11516_vm8, %v3818_v4  ;;  %v4472_v4 = vld [vmem:[%s12498_s3 + $0xf0] sm:$0xff] }
 0x3df   : > { %3825 = vst.msk [vmem:[#allocation2 + $0x2] sm:$0x1] %vm11549_vm13, %v11485_v31  ;;  %4682 = vmatpush.msra.mxu1 %v4472_v4 }
 0x3e0   : > { %3832 = vst.msk [vmem:[#allocation2 + $0x2] sm:$0x1] %vm11555_vm0, %v3830_v53  ;;  %v4456_v53 = vld [vmem:[%s12498_s3 + $0x70] sm:$0xff] }
 0x3e1   : > { %3870 = vst.msk [vmem:[#allocation2 + $0x3] sm:$0x1] %vm11516_vm8, %v3868_v5  ;;  %4662 = vmatpush.msra.mxu0 %v4456_v53  ;;  %v4471_v5 = vld [vmem:[%s12498_s3 + $0xe8] sm:$0xff]  ;;  %v4462_v53 = vld [vmem:[%s12498_s3 + $0xa0] sm:$0xff] }
 0x3e2   : > { %3875 = vst.msk [vmem:[#allocation2 + $0x3] sm:$0x1] %vm11549_vm13, %v11493_v59  ;;  %4683 = vmatpush.msra.mxu1 %v4471_v5  ;;  %v4445_v5 = vld [vmem:[%s12498_s3 + $0x18] sm:$0xff] }
 0x3e3   : > { %v3887_v59 = vpop.permute.xlu2 %3886  ;;  %3882 = vst.msk [vmem:[#allocation2 + $0x3] sm:$0x1] %vm11555_vm0, %v3880_v52  ;;  %v4454_v52 = vld [vmem:[%s12498_s3 + $0x60] sm:$0xff]  ;;  %4663 = vmatpush.msra.mxu0 %v4455_v6 }
 0x3e4   : > { %v4094_v29 = vld [vmem:[#allocation1 + $0x6] ss:$9 sm:$0xff]  ;;  %3889 = vst.msk [vmem:[#allocation2 + $0x3] sm:$0x1] %vm11561_vm1, %v3887_v59 }
 0x3e5   : > { %v3837_v31 = vpop.permute.xlu1 %3836  ;;  %4096 = vst.msk [vmem:[#allocation2 + $0x6] sm:$0x1] %vm11186_vm2, %v4094_v29  ;;  %v4503_v29 = vld [vmem:[%s12498_s3 + $0x1e8] sm:$0xff]  ;;  %v4470_v59 = vld [vmem:[%s12498_s3 + $0xe0] sm:$0xff]  ;;  %4664 = vmatpush.msra.mxu0 %v4454_v52  ;;  %v4493_v52 = vld [vmem:[%s12498_s3 + $0x198] sm:$0xff] }
 0x3e6   : > { %3839 = vst.msk [vmem:[#allocation2 + $0x2] sm:$0x1] %vm11561_vm1, %v3837_v31  ;;  %v4487_v31 = vld [vmem:[%s12498_s3 + $0x168] sm:$0xff]  ;;  %4684 = vmatpush.msra.mxu1 %v4470_v59  ;;  %v4444_v59 = vld [vmem:[%s12498_s3 + $0x10] sm:$0xff] }
 0x3e7   : > { %3846 = vst.msk [vmem:[#allocation2 + $0x2] sm:$0x1] %vm11580_vm9, %v3844_v3 }
 0x3e8   : > { %4101 = vst.msk [vmem:[#allocation2 + $0x6] sm:$0x1] %vm11506_vm5, %v11467_v56 }
 0x3e9   : > { %4102 = vst [vmem:[#allocation1] sm:$0xff] %v11246_v50  ;;  %v3944_v61 = vpop.permute.xlu0 %3943 }
 0x3ea   : > { %3851 = vst.msk [vmem:[#allocation2 + $0x2] sm:$0x1] %vm11586_vm10, %v11461_v60 }
 0x3eb   : > { %3939 = vst.msk [vmem:[#allocation2 + $0x3] sm:$0x1] %vm11580_vm9, %v11534_v42  ;;  %v3968_v33 = vpop.permute.xlu2 %3967 }
 0x3ec   : > { %3946 = vst.msk [vmem:[#allocation2 + $0x3] sm:$0x1] %vm11586_vm10, %v3944_v61  ;;  %v4453_v61 = vld [vmem:[%s12498_s3 + $0x58] sm:$0xff] }
 0x3ed   : > { %4665 = vmatpush.msra.mxu0 %v4453_v61  ;;  %v4492_v61 = vld [vmem:[%s12498_s3 + $0x190] sm:$0xff] }
 0x3f0   : > { %v4104_v34 = vld [vmem:[#allocation1 + $0x2] ss:$9 sm:$0xff] }
 0x3f1   : > { %4109 = vst [vmem:[#allocation1] sm:$0xff] %v11246_v50  ;;  %4105 = vrot.lane.b32.xlu2 %v4104_v34, %s13187_s22  ;;  %v4486_v34 = vld [vmem:[%s12498_s3 + $0x160] sm:$0xff] }
 0x3f8   : > { %v4111_v56 = vld [vmem:[#allocation1 + $0x4] ss:$9 sm:$0xff] }
 0x3f9   : > { %4116 = vst [vmem:[#allocation1] sm:$0xff] %v11246_v50  ;;  %4112 = vrot.lane.b32.xlu1 %v4111_v56, %s5527_s29  ;;  %v3956_v2 = vpop.permute.xlu1 %3955  ;;  %v4502_v56 = vld [vmem:[%s12498_s3 + $0x1e0] sm:$0xff] }
 0x3fa   : > { %3958 = vst.msk [vmem:[#allocation2 + $0x4] sm:$0x1] %vm11506_vm5, %v3956_v2  ;;  %v4485_v2 = vld [vmem:[%s12498_s3 + $0x158] sm:$0xff] }
 0x3fb   : > { %3963 = vst.msk [vmem:[#allocation2 + $0x4] sm:$0x1] %vm11516_vm8, %v11476_v17 }
 0x3fc   : > { %3970 = vst.msk [vmem:[#allocation2 + $0x4] sm:$0x1] %vm11549_vm13, %v3968_v33  ;;  %v4501_v33 = vld [vmem:[%s12498_s3 + $0x1d8] sm:$0xff] }
 0x400   : > { %v4118_v60 = vld [vmem:[#allocation1 + $0x6] ss:$9 sm:$0xff] }
 0x401   : > { %4128 = vst [vmem:[#allocation1] sm:$0xff] %v11304_v43  ;;  %4119 = vrot.lane.b32.xlu0 %v4118_v60, %s13186_s13  ;;  %v4469_v60 = vld [vmem:[%s12498_s3 + $0xd8] sm:$0xff] }
 0x402   : > { %4685 = vmatpush.msra.mxu1 %v4469_v60  ;;  %v4443_v60 = vld [vmem:[%s12498_s3 + $0x8] sm:$0xff] }
 0x408   : > { %v4130_v50 = vld [vmem:[#allocation1 + $0x2] ss:$9 sm:$0xff] }
 0x409   : > { %4135 = vst [vmem:[#allocation1] sm:$0xff] %v11304_v43  ;;  %4131 = vrot.lane.b32.xlu1 %v4130_v50, %s13182_s8  ;;  %v3975_v22 = vpop.permute.xlu1 %3974 }
 0x40a   : > { %3977 = vst.msk [vmem:[#allocation2 + $0x4] sm:$0x1] %vm11555_vm0, %v3975_v22  ;;  %v4452_v22 = vld [vmem:[%s12498_s3 + $0x50] sm:$0xff] }
 0x40b   : > { %4666 = vmatpush.msra.mxu0 %v4452_v22 }
 0x410   : > { %v4137_v55 = vld [vmem:[#allocation1 + $0x4] ss:$9 sm:$0xff] }
 0x411   : > { %4142 = vst [vmem:[#allocation1] sm:$0xff] %v11304_v43  ;;  %4138 = vrot.lane.b32.xlu0 %v4137_v55, %s5523_s9  ;;  %v4006_v17 = vpop.permute.xlu2 %4005  ;;  %v3982_v28 = vpop.permute.xlu0 %3981 }
 0x412   : > { %4008 = vst.msk [vmem:[#allocation2 + $0x5] sm:$0x1] %vm11506_vm5, %v4006_v17  ;;  %v4484_v17 = vld [vmem:[%s12498_s3 + $0x150] sm:$0xff] }
 0x413   : > { %4013 = vst.msk [vmem:[#allocation2 + $0x5] sm:$0x1] %vm11516_vm8, %v11483_v47 }
 0x414   : > { %3984 = vst.msk [vmem:[#allocation2 + $0x4] sm:$0x1] %vm11561_vm1, %v3982_v28  ;;  %v4500_v28 = vld [vmem:[%s12498_s3 + $0x1d0] sm:$0xff] }
 0x415   : > { %3989 = vst.msk [vmem:[#allocation2 + $0x4] sm:$0x1] %vm11580_vm9, %v11454_v23 }
 0x418   : > { %v4144_v42 = vld [vmem:[#allocation1 + $0x6] ss:$9 sm:$0xff] }
 0x419   : > { %4146 = vst.msk [vmem:[#allocation2 + $0x7] sm:$0x1] %vm11186_vm2, %v4144_v42  ;;  %v3994_v43 = vpop.permute.xlu1 %3993  ;;  %v4468_v42 = vld [vmem:[%s12498_s3 + $0xd0] sm:$0xff] }
 0x41a   : > { %4151 = vst.msk [vmem:[#allocation2 + $0x7] sm:$0x1] %vm11506_vm5, %v11474_v63  ;;  %4686 = vmatpush.msra.mxu1 %v4468_v42  ;;  %v4458_v42 = vld [vmem:[%s12498_s3 + $0x80] sm:$0xff] }
 0x41b   : > { %4152 = vst [vmem:[#allocation1] sm:$0xff] %v11301_v21 }
 0x41c   : > { %3996 = vst.msk [vmem:[#allocation2 + $0x4] sm:$0x1] %vm11586_vm10, %v3994_v43  ;;  %v4451_v43 = vld [vmem:[%s12498_s3 + $0x48] sm:$0xff] }
 0x41d   : > { %4667 = vmatpush.msra.mxu0 %v4451_v43  ;;  %v4521_v43 = vld [vmem:[%s12498_s3 + $0x278] sm:$0xff] }
 0x421   : > { %v4025_v45 = vpop.permute.xlu2 %4024 }
 0x422   : > { %v4154_v13 = vld [vmem:[#allocation1 + $0x2] ss:$9 sm:$0xff] }
 0x423   : > { %4155 = vrot.lane.b32.xlu0 %v4154_v13, %s13187_s22  ;;  %4159 = vst [vmem:[#allocation1] sm:$0xff] %v11301_v21  ;;  %v4467_v13 = vld [vmem:[%s12498_s3 + $0xc8] sm:$0xff] }
 0x424   : > { %4687 = vmatpush.msra.mxu1 %v4467_v13  ;;  %v4537_v13 = vld [vmem:[%s12498_s3 + $0x2f8] sm:$0xff] }
 0x42a   : > { %v4161_v63 = vld [vmem:[#allocation1 + $0x4] ss:$9 sm:$0xff] }
 0x42b   : > { %4162 = vrot.lane.b32.xlu2 %v4161_v63, %s5527_s29  ;;  %4216 = vst [vmem:[#allocation1] sm:$0xff] %v11380_v38  ;;  %v4483_v63 = vld [vmem:[%s12498_s3 + $0x148] sm:$0xff] }
 0x431   : > { %v4018_v23 = vpop.permute.xlu0 %4017 }
 0x432   : > { %v4218_v47 = vld [vmem:[#allocation1 + $0x2] ss:$9 sm:$0xff]  ;;  %4020 = vst.msk [vmem:[#allocation2 + $0x5] sm:$0x1] %vm11549_vm13, %v4018_v23 }
 0x433   : > { %4219 = vrot.lane.b32.xlu0 %v4218_v47, %s13184_s23  ;;  %4223 = vst [vmem:[#allocation1] sm:$0xff] %v11380_v38  ;;  %v4089_v57 = vpop.permute.xlu2 %4088  ;;  %v4450_v47 = vld [vmem:[%s12498_s3 + $0x40] sm:$0xff] }
 0x434   : > { %4027 = vst.msk [vmem:[#allocation2 + $0x5] sm:$0x1] %vm11555_vm0, %v4025_v45  ;;  %v4466_v23 = vld [vmem:[%s12498_s3 + $0xc0] sm:$0xff]  ;;  %4668 = vmatpush.msra.mxu0 %v4450_v47  ;;  %v4520_v47 = vld [vmem:[%s12498_s3 + $0x270] sm:$0xff] }
 0x435   : > { %4077 = vst.msk [vmem:[#allocation2 + $0x5] sm:$0x1] %vm11561_vm1, %v11528_v25  ;;  %v4482_v45 = vld [vmem:[%s12498_s3 + $0x140] sm:$0xff]  ;;  %4688 = vmatpush.msra.mxu1 %v4466_v23  ;;  %v4536_v23 = vld [vmem:[%s12498_s3 + $0x2f0] sm:$0xff] }
 0x43a   : > { %v4225_v58 = vld [vmem:[#allocation1 + $0x4] ss:$9 sm:$0xff] }
 0x43b   : > { %4226 = vrot.lane.b32.xlu2 %v4225_v58, %s13182_s8  ;;  %4230 = vst [vmem:[#allocation1] sm:$0xff] %v11380_v38 }
 0x442   : > { %v4232_v21 = vld [vmem:[#allocation1 + $0x6] ss:$9 sm:$0xff] }
 0x443   : > { %4233 = vrot.lane.b32.xlu1 %v4232_v21, %s5523_s9  ;;  %4239 = vst [vmem:[#allocation1] sm:$0xff] %v11378_v24  ;;  %v4082_v14 = vpop.permute.xlu0 %4081  ;;  %v4498_v21 = vld [vmem:[%s12498_s3 + $0x1c0] sm:$0xff] }
 0x444   : > { %4084 = vst.msk [vmem:[#allocation2 + $0x5] sm:$0x1] %vm11580_vm9, %v4082_v14  ;;  %v4449_v14 = vld [vmem:[%s12498_s3 + $0x38] sm:$0xff] }
 0x445   : > { %4091 = vst.msk [vmem:[#allocation2 + $0x5] sm:$0x1] %vm11586_vm10, %v4089_v57  ;;  %4669 = vmatpush.msra.mxu0 %v4449_v14  ;;  %v4551_v14 = vld [vmem:[%s12498_s3 + $0x368] sm:$0xff] }
 0x44a   : > { %v4241_v41 = vld [vmem:[#allocation1 + $0x2] ss:$9 sm:$0xff] }
 0x44b   : > { %4242 = vrot.lane.b32.xlu2 %v4241_v41, %s5524_s19  ;;  %4246 = vst [vmem:[#allocation1] sm:$0xff] %v11378_v24  ;;  %v4106_v38 = vpop.permute.xlu2 %4105  ;;  %v4465_v41 = vld [vmem:[%s12498_s3 + $0xb8] sm:$0xff] }
 0x44c   : > { %4108 = vst.msk [vmem:[#allocation2 + $0x6] sm:$0x1] %vm11516_vm8, %v4106_v38  ;;  %v4481_v38 = vld [vmem:[%s12498_s3 + $0x138] sm:$0xff]  ;;  %4689 = vmatpush.msra.mxu1 %v4465_v41  ;;  %v4567_v41 = vld [vmem:[%s12498_s3 + $0x3e8] sm:$0xff] }
 0x452   : > { %v4248_v25 = vld [vmem:[#allocation1 + $0x4] ss:$9 sm:$0xff] }
 0x453   : > { %4249 = vrot.lane.b32.xlu2 %v4248_v25, %s13187_s22  ;;  %4253 = vst [vmem:[#allocation1] sm:$0xff] %v11378_v24  ;;  %v4489_v24 = vld [vmem:[%s12498_s3 + $0x178] sm:$0xff]  ;;  %v4448_v25 = vld [vmem:[%s12498_s3 + $0x30] sm:$0xff] }
 0x454   : > { %4701 = vmatpush.msra.mxu2 %v4489_v24  ;;  %4670 = vmatpush.msra.mxu0 %v4448_v25  ;;  %v4463_v24 = vld [vmem:[%s12498_s3 + $0xa8] sm:$0xff]  ;;  %v4534_v25 = vld [vmem:[%s12498_s3 + $0x2e0] sm:$0xff] }
 0x456   : > { %4702 = vmatpush.msra.mxu2 %v4488_v27  ;;  %4671 = vmatpush.msra.mxu0 %v4447_v18  ;;  %v4478_v27 = vld [vmem:[%s12498_s3 + $0x120] sm:$0xff]  ;;  %v4533_v18 = vld [vmem:[%s12498_s3 + $0x2d8] sm:$0xff] }
 0x458   : > { %4703 = vmatpush.msra.mxu2 %v4487_v31  ;;  %v4461_v31 = vld [vmem:[%s12498_s3 + $0x98] sm:$0xff] }
 0x45a   : > { %v4255_v19 = vld [vmem:[#allocation1 + $0x6] ss:$9 sm:$0xff]  ;;  %4704 = vmatpush.msra.mxu2 %v4486_v34 }
 0x45b   : > { %4256 = vrot.lane.b32.xlu2 %v4255_v19, %s5527_s29  ;;  %4265 = vst [vmem:[#allocation1] sm:$0xff] %v11360_v32  ;;  %v4464_v19 = vld [vmem:[%s12498_s3 + $0xb0] sm:$0xff] }
 0x45c   : > { %4705 = vmatpush.msra.mxu2 %v4485_v2  ;;  %4690 = vmatpush.msra.mxu1 %v4464_v19  ;;  %v4460_v34 = vld [vmem:[%s12498_s3 + $0x90] sm:$0xff]  ;;  %v4459_v2 = vld [vmem:[%s12498_s3 + $0x88] sm:$0xff]  ;;  %v4550_v19 = vld [vmem:[%s12498_s3 + $0x360] sm:$0xff] }
 0x45e   : > { %4706 = vmatpush.msra.mxu2 %v4484_v17  ;;  %4691 = vmatpush.msra.mxu1 %v4463_v24  ;;  %v4474_v17 = vld [vmem:[%s12498_s3 + $0x100] sm:$0xff] }
 0x460   : > { %4707 = vmatpush.msra.mxu2 %v4483_v63  ;;  %4692 = vmatpush.msra.mxu1 %v4462_v53  ;;  %v4553_v63 = vld [vmem:[%s12498_s3 + $0x378] sm:$0xff]  ;;  %v4548_v53 = vld [vmem:[%s12498_s3 + $0x350] sm:$0xff] }
 0x462   : > { %v4267_v44 = vld [vmem:[#allocation1 + $0x2] ss:$9 sm:$0xff]  ;;  %4708 = vmatpush.msra.mxu2 %v4482_v45  ;;  %4693 = vmatpush.msra.mxu1 %v4461_v31 }
 0x463   : > { %4268 = vrot.lane.b32.xlu2 %v4267_v44, %s13184_s23  ;;  %4272 = vst [vmem:[#allocation1] sm:$0xff] %v11360_v32  ;;  %v4480_v44 = vld [vmem:[%s12498_s3 + $0x130] sm:$0xff]  ;;  %v4563_v31 = vld [vmem:[%s12498_s3 + $0x3c8] sm:$0xff]  ;;  %s14451_s23 = smov 32  }
 0x464   : > { %4709 = vmatpush.msra.mxu2 %v4481_v38  ;;  %4694 = vmatpush.msra.mxu1 %v4460_v34  ;;  %v4568_v45 = vld [vmem:[%s12498_s3 + $0x3f0] sm:$0xff]  ;;  %v4562_v34 = vld [vmem:[%s12498_s3 + $0x3c0] sm:$0xff] }
 0x466   : > { %4710 = vmatpush.msra.mxu2 %v4480_v44  ;;  %4695 = vmatpush.msra.mxu1 %v4459_v2  ;;  %v4566_v44 = vld [vmem:[%s12498_s3 + $0x3e0] sm:$0xff]  ;;  %v4545_v2 = vld [vmem:[%s12498_s3 + $0x338] sm:$0xff] }
 0x468   : > { %4711 = vmatpush.msra.mxu2 %v4479_v46  ;;  %4696 = vmatpush.msra.mxu1 %v4458_v42  ;;  %v4560_v42 = vld [vmem:[%s12498_s3 + $0x3b0] sm:$0xff] }
 0x46a   : > { %v4274_v9 = vld [vmem:[#allocation1 + $0x4] ss:$9 sm:$0xff]  ;;  %4712 = vmatpush.msra.mxu2 %v4478_v27  ;;  %4761 = vmatpush.msrb.mxu1 %v4537_v13 }
 0x46b   : > { %4275 = vrot.lane.b32.xlu2 %v4274_v9, %s13182_s8  ;;  %4279 = vst [vmem:[#allocation1] sm:$0xff] %v11360_v32  ;;  %v4113_v3 = vpop.permute.xlu1 %4112  ;;  %v4504_v32 = vld [vmem:[%s12498_s3 + $0x1f0] sm:$0xff]  ;;  %v4495_v9 = vld [vmem:[%s12498_s3 + $0x1a8] sm:$0xff]  ;;  %s14449_s8 = smov 80  }
 0x46c   : > { %4115 = vst.msk [vmem:[#allocation2 + $0x6] sm:$0x1] %vm11549_vm13, %v4113_v3  ;;  %4722 = vmatpush.msra.mxu3 %v4504_v32  ;;  %v4446_v3 = vld [vmem:[%s12498_s3 + $0x20] sm:$0xff]  ;;  %4762 = vmatpush.msrb.mxu1 %v4536_v23  ;;  %v4515_v27 = vld [vmem:[%s12498_s3 + $0x248] sm:$0xff] }
 0x46d   : > { %v4494_v32 = vld [vmem:[%s12498_s3 + $0x1a0] sm:$0xff]  ;;  %4672 = vmatpush.msra.mxu0 %v4446_v3  ;;  %v4565_v3 = vld [vmem:[%s12498_s3 + $0x3d8] sm:$0xff]  ;;  %v4543_v13 = vld [vmem:[%s12498_s3 + $0x328] sm:$0xff] }
 0x46e   : > { %4723 = vmatpush.msra.mxu3 %v4503_v29  ;;  %v4477_v29 = vld [vmem:[%s12498_s3 + $0x118] sm:$0xff]  ;;  %v4542_v23 = vld [vmem:[%s12498_s3 + $0x320] sm:$0xff] }
 0x46f   : > { %4673 = vmatpush.msra.mxu0 %v4445_v5  ;;  %4713 = vmatpush.msra.mxu2 %v4477_v29  ;;  %v4547_v5 = vld [vmem:[%s12498_s3 + $0x348] sm:$0xff]  ;;  %v4514_v29 = vld [vmem:[%s12498_s3 + $0x240] sm:$0xff] }
 0x470   : > { %4724 = vmatpush.msra.mxu3 %v4502_v56  ;;  %v4476_v56 = vld [vmem:[%s12498_s3 + $0x110] sm:$0xff] }
 0x471   : > { %4674 = vmatpush.msra.mxu0 %v4444_v59  ;;  %4714 = vmatpush.msra.mxu2 %v4476_v56  ;;  %v4546_v59 = vld [vmem:[%s12498_s3 + $0x340] sm:$0xff]  ;;  %v4513_v56 = vld [vmem:[%s12498_s3 + $0x238] sm:$0xff] }
 0x472   : > { %v4281_v50 = vld [vmem:[#allocation1 + $0x6] ss:$9 sm:$0xff]  ;;  %4725 = vmatpush.msra.mxu3 %v4501_v33 }
 0x473   : > { %4282 = vrot.lane.b32.xlu2 %v4281_v50, %s5523_s9  ;;  %4288 = vst [vmem:[#allocation1] sm:$0xff] %v11324_v20  ;;  %v4120_v55 = vpop.permute.xlu0 %4119  ;;  %v4475_v33 = vld [vmem:[%s12498_s3 + $0x108] sm:$0xff]  ;;  %4675 = vmatpush.msra.mxu0 %v4443_v60  ;;  %v4529_v60 = vld [vmem:[%s12498_s3 + $0x2b8] sm:$0xff] }
 0x474   : > { %4122 = vst.msk [vmem:[#allocation2 + $0x6] sm:$0x1] %vm11555_vm0, %v4120_v55  ;;  %4726 = vmatpush.msra.mxu3 %v4500_v28  ;;  %v4491_v50 = vld [vmem:[%s12498_s3 + $0x188] sm:$0xff]  ;;  %v4442_v55 = vld [vmem:[%s12498_s3] sm:$0xff]  ;;  %4715 = vmatpush.msra.mxu2 %v4475_v33  ;;  %v4561_v33 = vld [vmem:[%s12498_s3 + $0x3b8] sm:$0xff] }
 0x475   : > { %4127 = vst.msk [vmem:[#allocation2 + $0x6] sm:$0x1] %vm11561_vm1, %v11448_v51  ;;  %v4499_v51 = vld [vmem:[%s12498_s3 + $0x1c8] sm:$0xff]  ;;  %v4490_v28 = vld [vmem:[%s12498_s3 + $0x180] sm:$0xff]  ;;  %4676 = vmatpush.msra.mxu0 %v4442_v55  ;;  %v4528_v55 = vld [vmem:[%s12498_s3 + $0x2b0] sm:$0xff] }
 0x476   : > { %4727 = vmatpush.msra.mxu3 %v4499_v51  ;;  %4716 = vmatpush.msra.mxu2 %v4474_v17  ;;  %v4569_v51 = vld [vmem:[%s12498_s3 + $0x3f8] sm:$0xff]  ;;  %v4511_v17 = vld [vmem:[%s12498_s3 + $0x228] sm:$0xff] }
 0x477   : > { %4741 = vmatpush.msrb.mxu0 %v4521_v43 }
 0x478   : > { %4728 = vmatpush.msra.mxu3 %v4498_v21  ;;  %4781 = vmatpush.msrb.mxu2 %v4553_v63  ;;  %v4519_v21 = vld [vmem:[%s12498_s3 + $0x268] sm:$0xff] }
 0x479   : > { %4742 = vmatpush.msrb.mxu0 %v4520_v47  ;;  %v4559_v63 = vld [vmem:[%s12498_s3 + $0x3a8] sm:$0xff]  ;;  %v4526_v47 = vld [vmem:[%s12498_s3 + $0x2a0] sm:$0xff] }
 0x47a   : > { %v4290_v58 = vld [vmem:[#allocation1 + $0x2] ss:$9 sm:$0xff] }
 0x47b   : > { %4291 = vrot.lane.b32.xlu0 %v4290_v58, %s5524_s19  ;;  %4295 = vst [vmem:[#allocation1] sm:$0xff] %v11324_v20  ;;  %v4132_v57 = vpop.permute.xlu1 %4131  ;;  %v4497_v20 = vld [vmem:[%s12498_s3 + $0x1b8] sm:$0xff]  ;;  %v4552_v58 = vld [vmem:[%s12498_s3 + $0x370] sm:$0xff]  ;;  %4743 = vmatpush.msrb.mxu0 %v4519_v21 }
 0x47c   : > { %4134 = vst.msk [vmem:[#allocation2 + $0x6] sm:$0x1] %vm11580_vm9, %v4132_v57  ;;  %4729 = vmatpush.msra.mxu3 %v4497_v20  ;;  %v4535_v57 = vld [vmem:[%s12498_s3 + $0x2e8] sm:$0xff]  ;;  %4782 = vmatpush.msrb.mxu2 %v4552_v58  ;;  %v4518_v20 = vld [vmem:[%s12498_s3 + $0x260] sm:$0xff] }
 0x47d   : > { %4763 = vmatpush.msrb.mxu1 %v4535_v57  ;;  %4744 = vmatpush.msrb.mxu0 %v4518_v20  ;;  %v4558_v58 = vld [vmem:[%s12498_s3 + $0x3a0] sm:$0xff]  ;;  %v4509_v57 = vld [vmem:[%s12498_s3 + $0x218] sm:$0xff]  ;;  %v4508_v20 = vld [vmem:[%s12498_s3 + $0x210] sm:$0xff] }
 0x47e   : > { %4730 = vmatpush.msra.mxu3 %v4496_v1  ;;  %4783 = vmatpush.msrb.mxu2 %v4551_v14  ;;  %v4517_v1 = vld [vmem:[%s12498_s3 + $0x258] sm:$0xff] }
 0x47f   : > { %4764 = vmatpush.msrb.mxu1 %v4534_v25  ;;  %4745 = vmatpush.msrb.mxu0 %v4517_v1  ;;  %v4525_v14 = vld [vmem:[%s12498_s3 + $0x298] sm:$0xff]  ;;  %v4524_v25 = vld [vmem:[%s12498_s3 + $0x290] sm:$0xff]  ;;  %v4507_v1 = vld [vmem:[%s12498_s3 + $0x208] sm:$0xff] }
 0x480   : > { %4731 = vmatpush.msra.mxu3 %v4495_v9  ;;  %v4549_v9 = vld [vmem:[%s12498_s3 + $0x358] sm:$0xff]  ;;  %4784 = vmatpush.msrb.mxu2 %v4550_v19  ;;  %v4540_v19 = vld [vmem:[%s12498_s3 + $0x310] sm:$0xff] }
 0x481   : > { %4765 = vmatpush.msrb.mxu1 %v4533_v18 }
 0x482   : > { %v4297_v4 = vld [vmem:[#allocation1 + $0x4] ss:$9 sm:$0xff]  ;;  %4732 = vmatpush.msra.mxu3 %v4494_v32  ;;  %4785 = vmatpush.msrb.mxu2 %v4549_v9 }
 0x483   : > { %4298 = vrot.lane.b32.xlu0 %v4297_v4, %s13187_s22  ;;  %4352 = vst [vmem:[#allocation1] sm:$0xff] %v11404_v15  ;;  %v4139_v6 = vpop.permute.xlu0 %4138  ;;  %v4564_v4 = vld [vmem:[%s12498_s3 + $0x3d0] sm:$0xff]  ;;  %v4506_v9 = vld [vmem:[%s12498_s3 + $0x200] sm:$0xff]  ;;  %s296_s22 = sand.u32 1, %s5511_s25  }
 0x484   : > { %4141 = vst.msk [vmem:[#allocation2 + $0x6] sm:$0x1] %vm11586_vm10, %v4139_v6  ;;  %4733 = vmatpush.msra.mxu3 %v4493_v52  ;;  %v4531_v6 = vld [vmem:[%s12498_s3 + $0x2c8] sm:$0xff]  ;;  %4786 = vmatpush.msrb.mxu2 %v4548_v53  ;;  %v4530_v52 = vld [vmem:[%s12498_s3 + $0x2c0] sm:$0xff] }
 0x485   : > { %v4163_v24 = vpop.permute.xlu2 %4162  ;;  %v4554_v53 = vld [vmem:[%s12498_s3 + $0x380] sm:$0xff] }
 0x486   : > { %4734 = vmatpush.msra.mxu3 %v4492_v61  ;;  %4787 = vmatpush.msrb.mxu2 %v4547_v5 }
 0x488   : > { %4735 = vmatpush.msra.mxu3 %v4491_v50  ;;  %4788 = vmatpush.msrb.mxu2 %v4546_v59  ;;  %v4512_v50 = vld [vmem:[%s12498_s3 + $0x230] sm:$0xff] }
 0x48a   : > { %v4354_v22 = vld [vmem:[#allocation1 + $0x2] ss:$9 sm:$0xff]  ;;  %4736 = vmatpush.msra.mxu3 %v4490_v28  ;;  %4789 = vmatpush.msrb.mxu2 %v4545_v2 }
 0x48b   : > { %4355 = vrot.lane.b32.xlu0 %v4354_v22, %s13186_s13  ;;  %4359 = vst [vmem:[#allocation1] sm:$0xff] %v11404_v15  ;;  %v4544_v22 = vld [vmem:[%s12498_s3 + $0x330] sm:$0xff]  ;;  %v4527_v28 = vld [vmem:[%s12498_s3 + $0x2a8] sm:$0xff] }
 0x48c   : > { %4801 = vmatpush.msrb.mxu3 %v4569_v51  ;;  %4790 = vmatpush.msrb.mxu2 %v4544_v22  ;;  %v4510_v51 = vld [vmem:[%s12498_s3 + $0x220] sm:$0xff]  ;;  %v5530_v22 = vmov 0.0  }
 0x48d   : > { %307 = vst.msk [vmem:[#allocation2 + $0xb] sm:$0x1] %vm11572_vm6, %v5530_v22  ;;  %v4573_v22 = vld [vmem:[%s12498_s3 + $0x418] sm:$0xff] }
 0x48e   : > { %4802 = vmatpush.msrb.mxu3 %v4568_v45  ;;  %4791 = vmatpush.msrb.mxu2 %v4543_v13  ;;  %v4633_v13 = vld [vmem:[%s12498_s3 + $0x5f8] sm:$0xff] }
 0x490   : > { %4803 = vmatpush.msrb.mxu3 %v4567_v41  ;;  %v4541_v41 = vld [vmem:[%s12498_s3 + $0x318] sm:$0xff]  ;;  %4792 = vmatpush.msrb.mxu2 %v4542_v23  ;;  %v4632_v23 = vld [vmem:[%s12498_s3 + $0x5f0] sm:$0xff] }
 0x492   : > { %v4361_v38 = vld [vmem:[#allocation1 + $0x4] ss:$9 sm:$0xff]  ;;  %4804 = vmatpush.msrb.mxu3 %v4566_v44  ;;  %4793 = vmatpush.msrb.mxu2 %v4541_v41 }
 0x493   : > { %4362 = vrot.lane.b32.xlu0 %v4361_v38, %s14449_s8  ;;  %4366 = vst [vmem:[#allocation1] sm:$0xff] %v11404_v15  ;;  %v4338_v15 = vmax.f32 %v11371_v37, %v11437_v40  ;;  %v4516_v37 = vld [vmem:[%s12498_s3 + $0x250] sm:$0xff]  ;;  %v4557_v38 = vld [vmem:[%s12498_s3 + $0x398] sm:$0xff]  ;;  %v4582_v41 = vld [vmem:[%s12498_s3 + $0x460] sm:$0xff] }
 0x494   : > { %v4532_v40 = vld [vmem:[%s12498_s3 + $0x2d0] sm:$0xff]  ;;  %4805 = vmatpush.msrb.mxu3 %v4565_v3  ;;  %4746 = vmatpush.msrb.mxu0 %v4516_v37  ;;  %v4522_v3 = vld [vmem:[%s12498_s3 + $0x280] sm:$0xff] }
 0x495   : > { %v4156_v46 = vpop.permute.xlu0 %4155  ;;  %v12021_v32 = vadd.f32 %v11395_v8, %v4338_v15  ;;  %4766 = vmatpush.msrb.mxu1 %v4532_v40  ;;  %v4227_v61 = vpop.permute.xlu2 %4226  ;;  %v4556_v44 = vld [vmem:[%s12498_s3 + $0x390] sm:$0xff]  ;;  %v4523_v15 = vld [vmem:[%s12498_s3 + $0x288] sm:$0xff]  ;;  %4794 = vmatpush.msrb.mxu2 %v4540_v19  ;;  %v4538_v37 = vld [vmem:[%s12498_s3 + $0x300] sm:$0xff] }
 0x496   : > { %4158 = vst.msk [vmem:[#allocation2 + $0x7] sm:$0x1] %vm11516_vm8, %v4156_v46  ;;  %4806 = vmatpush.msrb.mxu3 %v4564_v4  ;;  %4747 = vmatpush.msrb.mxu0 %v4515_v27  ;;  %v4555_v46 = vld [vmem:[%s12498_s3 + $0x388] sm:$0xff]  ;;  %v4581_v19 = vld [vmem:[%s12498_s3 + $0x458] sm:$0xff] }
 0x497   : > { %4165 = vst.msk [vmem:[#allocation2 + $0x7] sm:$0x1] %vm11549_vm13, %v4163_v24  ;;  %4767 = vmatpush.msrb.mxu1 %v4531_v6  ;;  %v4539_v24 = vld [vmem:[%s12498_s3 + $0x308] sm:$0xff] }
 0x498   : > { %4215 = vst.msk [vmem:[#allocation2 + $0x7] sm:$0x1] %vm11555_vm0, %v11522_v54  ;;  %4807 = vmatpush.msrb.mxu3 %v4563_v31  ;;  %4748 = vmatpush.msrb.mxu0 %v4514_v29 }
 0x499   : > { %4768 = vmatpush.msrb.mxu1 %v4530_v52  ;;  %4795 = vmatpush.msrb.mxu2 %v4539_v24  ;;  %v4596_v24 = vld [vmem:[%s12498_s3 + $0x4d0] sm:$0xff] }
 0x49a   : > { %v4368_v54 = vld [vmem:[#allocation1 + $0x6] ss:$9 sm:$0xff]  ;;  %4808 = vmatpush.msrb.mxu3 %v4562_v34  ;;  %4749 = vmatpush.msrb.mxu0 %v4513_v56 }
 0x49b   : > { %4369 = vrot.lane.b32.xlu0 %v4368_v54, %s14450_s18  ;;  %4378 = vst [vmem:[#allocation1] sm:$0xff] %v12021_v32  ;;  %4769 = vmatpush.msrb.mxu1 %v4529_v60 }
 0x49c   : > { %4809 = vmatpush.msrb.mxu3 %v4561_v33  ;;  %4750 = vmatpush.msrb.mxu0 %v4512_v50  ;;  %v4346_v33 = vadd.f32 %v11395_v8, %v11440_v30 }
 0x49d   : > { %4770 = vmatpush.msrb.mxu1 %v4528_v55  ;;  %4796 = vmatpush.msrb.mxu2 %v4538_v37  ;;  %v4579_v37 = vld [vmem:[%s12498_s3 + $0x448] sm:$0xff] }
 0x49e   : > { %4810 = vmatpush.msrb.mxu3 %v4560_v42  ;;  %4751 = vmatpush.msrb.mxu0 %v4511_v17 }
 0x49f   : > { %4771 = vmatpush.msrb.mxu1 %v4527_v28  ;;  %v4585_v28 = vld [vmem:[%s12498_s3 + $0x478] sm:$0xff] }
 0x4a0   : > { %4811 = vmatpush.msrb.mxu3 %v4559_v63  ;;  %4752 = vmatpush.msrb.mxu0 %v4510_v51  ;;  %v4584_v63 = vld [vmem:[%s12498_s3 + $0x470] sm:$0xff] }
 0x4a1   : > { %4772 = vmatpush.msrb.mxu1 %v4526_v47  ;;  %v4600_v51 = vld [vmem:[%s12498_s3 + $0x4f0] sm:$0xff] }
 0x4a2   : > { %v4380_v43 = vld [vmem:[#allocation1 + $0x2] ss:$9 sm:$0xff]  ;;  %4812 = vmatpush.msrb.mxu3 %v4558_v58  ;;  %4753 = vmatpush.msrb.mxu0 %v4509_v57 }
 0x4a3   : > { %4374 = vrot.lane.b32.xlu0 %v12021_v32, %s5523_s9  ;;  %4383 = vst [vmem:[#allocation1] sm:$0xff] %v12021_v32  ;;  %4773 = vmatpush.msrb.mxu1 %v4525_v14  ;;  %v4616_v47 = vld [vmem:[%s12498_s3 + $0x570] sm:$0xff]  ;;  %v4615_v57 = vld [vmem:[%s12498_s3 + $0x568] sm:$0xff] }
 0x4a4   : > { %4382 = vst.msk [vmem:[#allocation2 + $0xa] sm:$0x1] %vm11186_vm2, %v4380_v43  ;;  %4813 = vmatpush.msrb.mxu3 %v4557_v38  ;;  %4754 = vmatpush.msrb.mxu0 %v4508_v20  ;;  %v4617_v43 = vld [vmem:[%s12498_s3 + $0x578] sm:$0xff]  ;;  %v4631_v14 = vld [vmem:[%s12498_s3 + $0x5e8] sm:$0xff]  ;;  %v4598_v38 = vld [vmem:[%s12498_s3 + $0x4e0] sm:$0xff] }
 0x4a5   : > { %v4243_v45 = vpop.permute.xlu2 %4242  ;;  %v4220_v21 = vpop.permute.xlu0 %4219  ;;  %4774 = vmatpush.msrb.mxu1 %v4524_v25  ;;  %v4614_v20 = vld [vmem:[%s12498_s3 + $0x560] sm:$0xff] }
 0x4a6   : > { %4245 = vst.msk [vmem:[#allocation2 + $0x8] sm:$0x1] %vm11506_vm5, %v4243_v45  ;;  %4814 = vmatpush.msrb.mxu3 %v4556_v44  ;;  %4755 = vmatpush.msrb.mxu0 %v4507_v1  ;;  %v4583_v45 = vld [vmem:[%s12498_s3 + $0x468] sm:$0xff]  ;;  %v4630_v25 = vld [vmem:[%s12498_s3 + $0x5e0] sm:$0xff]  ;;  %v4597_v44 = vld [vmem:[%s12498_s3 + $0x4d8] sm:$0xff] }
 0x4a7   : > { %4222 = vst.msk [vmem:[#allocation2 + $0x7] sm:$0x1] %vm11561_vm1, %v4220_v21  ;;  %4775 = vmatpush.msrb.mxu1 %v4523_v15  ;;  %v4599_v21 = vld [vmem:[%s12498_s3 + $0x4e8] sm:$0xff]  ;;  %v4613_v1 = vld [vmem:[%s12498_s3 + $0x558] sm:$0xff]  ;;  %v4580_v15 = vld [vmem:[%s12498_s3 + $0x450] sm:$0xff] }
 0x4a8   : > { %4229 = vst.msk [vmem:[#allocation2 + $0x7] sm:$0x1] %vm11580_vm9, %v4227_v61  ;;  %4815 = vmatpush.msrb.mxu3 %v4555_v46  ;;  %4756 = vmatpush.msrb.mxu0 %v4506_v9  ;;  %v4612_v46 = vld [vmem:[%s12498_s3 + $0x550] sm:$0xff] }
 0x4a9   : > { %4776 = vmatpush.msrb.mxu1 %v4522_v3  ;;  %v4628_v9 = vld [vmem:[%s12498_s3 + $0x5d0] sm:$0xff] }
 0x4aa   : > { %v4385_v18 = vld [vmem:[#allocation1 + $0x4] ss:$9 sm:$0xff]  ;;  %4816 = vmatpush.msrb.mxu3 %v4554_v53 }
 0x4ab   : > { %4386 = vrot.lane.b32.xlu1 %v4385_v18, %s5524_s19  ;;  %4390 = vst [vmem:[#allocation1] sm:$0xff] %v12021_v32  ;;  %v4629_v18 = vld [vmem:[%s12498_s3 + $0x5d8] sm:$0xff]  ;;  %v4611_v53 = vld [vmem:[%s12498_s3 + $0x548] sm:$0xff] }
 0x4ad   : > { %v4250_v40 = vpop.permute.xlu2 %4249 }
 0x4ae   : > { %4252 = vst.msk [vmem:[#allocation2 + $0x8] sm:$0x1] %vm11516_vm8, %v4250_v40  ;;  %v4595_v40 = vld [vmem:[%s12498_s3 + $0x4c8] sm:$0xff] }
 0x4b2   : > { %v4392_v4 = vld [vmem:[#allocation1 + $0x6] ss:$9 sm:$0xff] }
 0x4b3   : > { %4393 = vrot.lane.b32.xlu1 %v4392_v4, %s14451_s23  ;;  %4402 = vst [vmem:[#allocation1] sm:$0xff] %v11444_v35  ;;  %v4627_v4 = vld [vmem:[%s12498_s3 + $0x5c8] sm:$0xff] }
 0x4b5   : > { %v4234_v27 = vpop.permute.xlu1 %4233  ;;  %v4257_v32 = vpop.permute.xlu2 %4256 }
 0x4b6   : > { %4236 = vst.msk [vmem:[#allocation2 + $0x7] sm:$0x1] %vm11586_vm10, %v4234_v27  ;;  %v4578_v27 = vld [vmem:[%s12498_s3 + $0x440] sm:$0xff] }
 0x4b7   : > { %4259 = vst.msk [vmem:[#allocation2 + $0x8] sm:$0x1] %vm11549_vm13, %v4257_v32  ;;  %v4594_v32 = vld [vmem:[%s12498_s3 + $0x4c0] sm:$0xff] }
 0x4b8   : > { %4264 = vst.msk [vmem:[#allocation2 + $0x8] sm:$0x1] %vm11555_vm0, %v11469_v36 }
 0x4ba   : > { %v4404_v6 = vld [vmem:[#allocation1 + $0x2] ss:$9 sm:$0xff] }
 0x4bb   : > { %4405 = vrot.lane.b32.xlu1 %v4404_v6, %s14452_s21  ;;  %4409 = vst [vmem:[#allocation1] sm:$0xff] %v11444_v35  ;;  %v4610_v6 = vld [vmem:[%s12498_s3 + $0x540] sm:$0xff] }
 0x4bd   : > { %v4269_v5 = vpop.permute.xlu2 %4268  ;;  %v4440_v54 = vld [vmem:[#allocation2] sm:$0xff] }
 0x4be   : > { %4271 = vst.msk [vmem:[#allocation2 + $0x8] sm:$0x1] %vm11561_vm1, %v4269_v5  ;;  %v4637_v31 = vperm.slane %v4440_v54, 0  ;;  %v4638_v29 = vperm.slane %v4440_v54, 1  ;;  %v4639_v52 = vperm.slane %v4440_v54, 2  ;;  %v4640_v59 = vperm.slane %v4440_v54, 3 }
 0x4bf   : > { %v4641_v56 = vperm.slane %v4440_v54, 4  ;;  %v4642_v61 = vperm.slane %v4440_v54, 5  ;;  %v4643_v60 = vperm.slane %v4440_v54, 6  ;;  %v4644_v2 = vperm.slane %v4440_v54, 7  ;;  %v4626_v5 = vld [vmem:[%s12498_s3 + $0x5c0] sm:$0xff]  ;;  %v4577_v54 = vld [vmem:[%s12498_s3 + $0x438] sm:$0xff] }
 0x4c0   : > { %4677 = vmatmul.f32.vlgmr.msra.gmra.mxu0 %v4637_v31  ;;  %4697 = vmatmul.f32.vlgmr.msra.gmra.mxu1 %v4638_v29  ;;  %v4593_v31 = vld [vmem:[%s12498_s3 + $0x4b8] sm:$0xff] }
 0x4c1   : > { %4717 = vmatmul.f32.vlgmr.msra.gmra.mxu2 %v4639_v52  ;;  %4737 = vmatmul.f32.vlgmr.msra.gmra.mxu3 %v4640_v59  ;;  %v4609_v29 = vld [vmem:[%s12498_s3 + $0x538] sm:$0xff] }
 0x4c2   : > { %v4411_v34 = vld [vmem:[#allocation1 + $0x4] ss:$9 sm:$0xff]  ;;  %4821 = vmatpush.msra.mxu0 %v4585_v28  ;;  %4861 = vmatpush.msra.mxu2 %v4617_v43 }
 0x4c3   : > { %4412 = vrot.lane.b32.xlu1 %v4411_v34, %s14449_s8  ;;  %4416 = vst [vmem:[#allocation1] sm:$0xff] %v11444_v35  ;;  %4881 = vmatpush.msra.mxu3 %v4633_v13  ;;  %v4625_v52 = vld [vmem:[%s12498_s3 + $0x5b8] sm:$0xff]  ;;  %v4576_v34 = vld [vmem:[%s12498_s3 + $0x430] sm:$0xff]  ;;  %v4571_v28 = vld [vmem:[%s12498_s3 + $0x408] sm:$0xff]  ;;  %s4953_s8 = sshll.u32 %s4949_s20, 4  ;;  %s4954_s8 = int_to_ptr.hbm [resolvable:$true] %s4953_s8 }
 0x4c4   : > { %4822 = vmatpush.msra.mxu0 %v4584_v63  ;;  %4862 = vmatpush.msra.mxu2 %v4616_v47  ;;  %v4603_v43 = vld [vmem:[%s12498_s3 + $0x508] sm:$0xff]  ;;  %v4570_v63 = vld [vmem:[%s12498_s3 + $0x400] sm:$0xff]  ;;  %s5463_s29 = sshra.s32 %s4954_s8, 4  ;;  %s5464_s29 = int_to_ptr.hbm [resolvable:$true] %s5463_s29 }
 0x4c5   : > { %v4276_v36 = vpop.permute.xlu2 %4275  ;;  %4882 = vmatpush.msra.mxu3 %v4632_v23  ;;  %v4619_v13 = vld [vmem:[%s12498_s3 + $0x588] sm:$0xff]  ;;  %v4602_v47 = vld [vmem:[%s12498_s3 + $0x500] sm:$0xff]  ;;  %s5465_s14 = scalar_lea.hbm %s5464_s29, 1  ;;  %p5470_p3 = scmp.lt.s32.totalorder %s5464_s29, %s12502_s7 }
 0x4c6   : > { %4278 = vst.msk [vmem:[#allocation2 + $0x8] sm:$0x1] %vm11580_vm9, %v4276_v36  ;;  %4823 = vmatpush.msra.mxu0 %v4583_v45  ;;  %4863 = vmatpush.msra.mxu2 %v4615_v57  ;;  %v4592_v36 = vld [vmem:[%s12498_s3 + $0x4b0] sm:$0xff]  ;;  %v4618_v23 = vld [vmem:[%s12498_s3 + $0x580] sm:$0xff]  ;;  %p5466_p0 = scmp.ne.s32.totalorder %s5464_s29, %s5465_s14  ;;  %p5471_p4 = scmp.lt.s32.totalorder %s5469_s17, %s5465_s14 }
 0x4c7   : > { %4883 = vmatpush.msra.mxu3 %v4631_v14  ;;  %v4916_v57 = vld [vmem:[%s12500_s5 + $0x70] sm:$0xff]  ;;  %v4915_v14 = vld [vmem:[%s12500_s5 + $0x68] sm:$0xff] }
 0x4c8   : > { %4757 = vmatmul.f32.vlgmr.msrb.gmra.mxu0 %v4641_v56  ;;  %4777 = vmatmul.f32.vlgmr.msrb.gmra.mxu1 %v4642_v61  ;;  %v4608_v56 = vld [vmem:[%s12498_s3 + $0x530] sm:$0xff]  ;;  %v4607_v61 = vld [vmem:[%s12498_s3 + $0x528] sm:$0xff]  ;;  %p5467_p1 = pnand %p5466_p0, %p5609_p5  ;;  %p5472_p7 = por %p5471_p4, %p5470_p3 }
 0x4c9   : > { %4797 = vmatmul.f32.vlgmr.msrb.gmra.mxu2 %v4643_v60  ;;  %4817 = vmatmul.f32.vlgmr.msrb.gmra.mxu3 %v4644_v2  ;;  %v4623_v60 = vld [vmem:[%s12498_s3 + $0x5a8] sm:$0xff]  ;;  %v4574_v2 = vld [vmem:[%s12498_s3 + $0x420] sm:$0xff] }
 0x4ca   : > { %v4418_v50 = vld [vmem:[#allocation1 + $0x6] ss:$9 sm:$0xff]  ;;  %4824 = vmatpush.msra.mxu0 %v4582_v41  ;;  %4864 = vmatpush.msra.mxu2 %v4614_v20  ;;  %p5468_p2 = pneg %p5467_p1 }
 0x4cb   : > { %4419 = vrot.lane.b32.xlu1 %v4418_v50, %s14450_s18  ;;  %4428 = vst [vmem:[#allocation1] sm:$0xff] %v4346_v33  ;;  %4884 = vmatpush.msra.mxu3 %v4630_v25  ;;  %v4911_v20 = vld [vmem:[%s12500_s5 + $0x48] sm:$0xff]  ;;  %v4910_v25 = vld [vmem:[%s12500_s5 + $0x40] sm:$0xff]  ;;  %s4941_s18 = scalar_lea.sflag [#allocation4], %s296_s22 }
 0x4cc   : > { %4825 = vmatpush.msra.mxu0 %v4581_v19  ;;  %4865 = vmatpush.msra.mxu2 %v4613_v1  ;;  %p5473_p8 = pnand %p5472_p7, %p5468_p2 }
 0x4cd   : > { %v4283_v35 = vpop.permute.xlu2 %4282  ;;  %4885 = vmatpush.msra.mxu3 %v4629_v18 }
 0x4ce   : > { %4285 = vst.msk [vmem:[#allocation2 + $0x8] sm:$0x1] %vm11586_vm10, %v4283_v35  ;;  %4826 = vmatpush.msra.mxu0 %v4580_v15  ;;  %4866 = vmatpush.msra.mxu2 %v4612_v46  ;;  %v4606_v35 = vld [vmem:[%s12498_s3 + $0x520] sm:$0xff] }
 0x4cf   : > { %4886 = vmatpush.msra.mxu3 %v4628_v9  ;;  %v4634_v46 = vld [vmem:[%s12499_s4] sm:$0x1] }
 0x4d0   : > { %4827 = vmatpush.msra.mxu0 %v4579_v37  ;;  %4867 = vmatpush.msra.mxu2 %v4611_v53  ;;  %v4906_v37 = vld [vmem:[%s12500_s5 + $0x20] sm:$0xff] }
 0x4d1   : > { %4887 = vmatpush.msra.mxu3 %v4627_v4 }
 0x4d2   : > { %v4430_v55 = vld [vmem:[#allocation1 + $0x2] ss:$9 sm:$0xff]  ;;  %4828 = vmatpush.msra.mxu0 %v4578_v27  ;;  %4868 = vmatpush.msra.mxu2 %v4610_v6 }
 0x4d3   : > { %4424 = vrot.lane.b32.xlu1 %v4346_v33, %s5523_s9  ;;  %4433 = vst [vmem:[#allocation1] sm:$0xff] %v4346_v33  ;;  %4888 = vmatpush.msra.mxu3 %v4626_v5  ;;  %v4590_v33 = vld [vmem:[%s12498_s3 + $0x4a0] sm:$0xff]  ;;  %v4905_v6 = vld [vmem:[%s12500_s5 + $0x18] sm:$0xff]  ;;  %v4904_v5 = vld [vmem:[%s12500_s5 + $0x10] sm:$0xff]  ;;  %s297_s9 = scalar_lea.vmem [#allocation8], %s296_s22 }
 0x4d4   : > { %4432 = vst.msk [vmem:[#allocation2 + $0xb] sm:$0x1] %vm11186_vm2, %v4430_v55  ;;  %4829 = vmatpush.msra.mxu0 %v4577_v54  ;;  %4869 = vmatpush.msra.mxu2 %v4609_v29  ;;  %v4622_v55 = vld [vmem:[%s12498_s3 + $0x5a0] sm:$0xff]  ;;  %v4903_v54 = vld [vmem:[%s12500_s5 + $0x8] sm:$0xff] }
 0x4d5   : > { %4889 = vmatpush.msra.mxu3 %v4625_v52  ;;  %v4902_v52 = vld [vmem:[%s12500_s5] sm:$0xff] }
 0x4d6   : > { %4830 = vmatpush.msra.mxu0 %v4576_v34  ;;  %4870 = vmatpush.msra.mxu2 %v4608_v56 }
 0x4d7   : > { %4890 = vmatpush.msra.mxu3 %v4624_v49 }
 0x4d8   : > { %4871 = vmatpush.msra.mxu2 %v4607_v61 }
 0x4d9   : > { %4891 = vmatpush.msra.mxu3 %v4623_v60 }
 0x4da   : > { %v4435_v8 = vld [vmem:[#allocation1 + $0x4] ss:$9 sm:$0xff]  ;;  %4872 = vmatpush.msra.mxu2 %v4606_v35 }
 0x4db   : > { %4436 = vrot.lane.b32.xlu2 %v4435_v8, %s5524_s19  ;;  %v4589_v8 = vld [vmem:[%s12498_s3 + $0x498] sm:$0xff]  ;;  %4892 = vmatpush.msra.mxu3 %v4622_v55  ;;  %s4951_s19 = sshll.u32 %s297_s9, 4  ;;  %s4952_s19 = int_to_ptr.vmem [resolvable:$true] %s4951_s19 }
 0x4ed   : > { %v4292_v30 = vpop.permute.xlu0 %4291 }
 0x4ee   : > { %4294 = vst.msk [vmem:[#allocation2 + $0x9] sm:$0x1] %vm11506_vm5, %v4292_v30  ;;  %v4605_v30 = vld [vmem:[%s12498_s3 + $0x518] sm:$0xff] }
 0x4ef   : > { %4873 = vmatpush.msra.mxu2 %v4605_v30 }
 0x4f5   : > { %v4299_v42 = vpop.permute.xlu0 %4298 }
 0x4f6   : > { %4301 = vst.msk [vmem:[#allocation2 + $0x9] sm:$0x1] %vm11516_vm8, %v4299_v42  ;;  %v4621_v42 = vld [vmem:[%s12498_s3 + $0x598] sm:$0xff] }
 0x4f7   : > { %4351 = vst.msk [vmem:[#allocation2 + $0x9] sm:$0x1] %vm11549_vm13, %v11504_v12  ;;  %v4601_v12 = vld [vmem:[%s12498_s3 + $0x4f8] sm:$0xff]  ;;  %4893 = vmatpush.msra.mxu3 %v4621_v42  ;;  %v4918_v42 = vld [vmem:[%s12501_s6] sm:$0x1] }
 0x4f8   : > { %4841 = vmatpush.msra.mxu1 %v4601_v12  ;;  %v4587_v12 = vld [vmem:[%s12498_s3 + $0x488] sm:$0xff] }
 0x4fa   : > { %4842 = vmatpush.msra.mxu1 %v4600_v51  ;;  %v4586_v51 = vld [vmem:[%s12498_s3 + $0x480] sm:$0xff] }
 0x4fc   : > { %4843 = vmatpush.msra.mxu1 %v4599_v21  ;;  %v4917_v21 = vld [vmem:[%s12500_s5 + $0x78] sm:$0xff] }
 0x4fd   : > { %v4356_v16 = vpop.permute.xlu0 %4355 }
 0x4fe   : > { %4358 = vst.msk [vmem:[#allocation2 + $0x9] sm:$0x1] %vm11555_vm0, %v4356_v16  ;;  %4844 = vmatpush.msra.mxu1 %v4598_v38  ;;  %v4588_v16 = vld [vmem:[%s12498_s3 + $0x490] sm:$0xff] }
 0x4ff   : > { %v4912_v38 = vld [vmem:[%s12500_s5 + $0x50] sm:$0xff] }
 0x500   : > { %4845 = vmatpush.msra.mxu1 %v4597_v44 }
 0x502   : > { %4846 = vmatpush.msra.mxu1 %v4596_v24 }
 0x504   : > { %4847 = vmatpush.msra.mxu1 %v4595_v40 }
 0x505   : > { %v4363_v26 = vpop.permute.xlu0 %4362 }
 0x506   : > { %4365 = vst.msk [vmem:[#allocation2 + $0x9] sm:$0x1] %vm11561_vm1, %v4363_v26  ;;  %4848 = vmatpush.msra.mxu1 %v4594_v32  ;;  %v4604_v26 = vld [vmem:[%s12498_s3 + $0x510] sm:$0xff] }
 0x507   : > { %4874 = vmatpush.msra.mxu2 %v4604_v26 }
 0x508   : > { %4849 = vmatpush.msra.mxu1 %v4593_v31 }
 0x509   : > { %4875 = vmatpush.msra.mxu2 %v4603_v43 }
 0x50a   : > { %4850 = vmatpush.msra.mxu1 %v4592_v36 }
 0x50b   : > { %4876 = vmatpush.msra.mxu2 %v4602_v47 }
 0x50c   : > { %4851 = vmatpush.msra.mxu1 %v4591_v10 }
 0x50d   : > { %v4370_v17 = vpop.permute.xlu0 %4369 }
 0x50e   : > { %4372 = vst.msk [vmem:[#allocation2 + $0x9] sm:$0x1] %vm11580_vm9, %v4370_v17  ;;  %4852 = vmatpush.msra.mxu1 %v4590_v33  ;;  %v4620_v17 = vld [vmem:[%s12498_s3 + $0x590] sm:$0xff] }
 0x50f   : > { %4894 = vmatpush.msra.mxu3 %v4620_v17 }
 0x510   : > { %4853 = vmatpush.msra.mxu1 %v4589_v8 }
 0x511   : > { %4895 = vmatpush.msra.mxu3 %v4619_v13 }
 0x512   : > { %4854 = vmatpush.msra.mxu1 %v4588_v16 }
 0x513   : > { %4896 = vmatpush.msra.mxu3 %v4618_v23 }
 0x514   : > { %4855 = vmatpush.msra.mxu1 %v4587_v12 }
 0x515   : > { %v4375_v58 = vpop.permute.xlu0 %4374 }
 0x516   : > { %4377 = vst.msk [vmem:[#allocation2 + $0x9] sm:$0x1] %vm11586_vm10, %v4375_v58  ;;  %4856 = vmatpush.msra.mxu1 %v4586_v51 }
 0x51d   : > { %v4387_v3 = vpop.permute.xlu1 %4386 }
 0x51e   : > { %4389 = vst.msk [vmem:[#allocation2 + $0xa] sm:$0x1] %vm11506_vm5, %v4387_v3  ;;  %v4907_v3 = vld [vmem:[%s12500_s5 + $0x28] sm:$0xff] }
 0x525   : > { %v4394_v59 = vpop.permute.xlu1 %4393 }
 0x526   : > { %4396 = vst.msk [vmem:[#allocation2 + $0xa] sm:$0x1] %vm11516_vm8, %v4394_v59 }
 0x527   : > { %4401 = vst.msk [vmem:[#allocation2 + $0xa] sm:$0x1] %vm11549_vm13, %v11541_v39  ;;  %v4575_v39 = vld [vmem:[%s12498_s3 + $0x428] sm:$0xff] }
 0x528   : > { %4831 = vmatpush.msra.mxu0 %v4575_v39 }
 0x52a   : > { %4832 = vmatpush.msra.mxu0 %v4574_v2 }
 0x52c   : > { %4833 = vmatpush.msra.mxu0 %v4573_v22 }
 0x52d   : > { %v4406_v50 = vpop.permute.xlu1 %4405 }
 0x52e   : > { %4408 = vst.msk [vmem:[#allocation2 + $0xa] sm:$0x1] %vm11555_vm0, %v4406_v50  ;;  %4834 = vmatpush.msra.mxu0 %v4572_v48 }
 0x530   : > { %4835 = vmatpush.msra.mxu0 %v4571_v28 }
 0x532   : > { %4836 = vmatpush.msra.mxu0 %v4570_v63 }
 0x534   : > { %4919 = vmatpush.msrb.mxu0 %v4917_v21 }
 0x535   : > { %v4413_v58 = vpop.permute.xlu1 %4412  ;;  %v4437_v45 = vpop.permute.xlu2 %4436 }
 0x536   : > { %4415 = vst.msk [vmem:[#allocation2 + $0xa] sm:$0x1] %vm11561_vm1, %v4413_v58  ;;  %4920 = vmatpush.msrb.mxu0 %v4916_v57 }
 0x537   : > { %4439 = vst.msk [vmem:[#allocation2 + $0xb] sm:$0x1] %vm11506_vm5, %v4437_v45 }
 0x538   : > { %4921 = vmatpush.msrb.mxu0 %v4915_v14 }
 0x53a   : > { %4922 = vmatpush.msrb.mxu0 %v4914_v7 }
 0x53c   : > { %4923 = vmatpush.msrb.mxu0 %v4913_v62 }
 0x53d   : > { %v4420_v41 = vpop.permute.xlu1 %4419  ;;  %v4678_v9 = vpop.f32.mrf.mxu0 }
 0x53e   : > { %4422 = vst.msk [vmem:[#allocation2 + $0xa] sm:$0x1] %vm11580_vm9, %v4420_v41  ;;  %4924 = vmatpush.msrb.mxu0 %v4912_v38  ;;  %v4679_v40 = vadd.f32 %v4678_v9, %v4634_v46  ;;  %v4698_v53 = vpop.f32.mrf.mxu1 }
 0x540   : > { %4925 = vmatpush.msrb.mxu0 %v4911_v20  ;;  %v4699_v27 = vadd.f32 %v4698_v53, %v4679_v40 }
 0x542   : > { %4926 = vmatpush.msrb.mxu0 %v4910_v25 }
 0x544   : > { %4927 = vmatpush.msrb.mxu0 %v4909_v0  ;;  %v4718_v4 = vpop.f32.mrf.mxu2  ;;  %v4738_v31 = vpop.f32.mrf.mxu3 }
 0x545   : > { %v4425_v19 = vpop.permute.xlu1 %4424  ;;  %v4719_v32 = vadd.f32 %v4718_v4, %v4699_v27  ;;  %v4758_v59 = vpop.f32.mrf.mxu0 }
 0x546   : > { %4427 = vst.msk [vmem:[#allocation2 + $0xa] sm:$0x1] %vm11586_vm10, %v4425_v19  ;;  %4928 = vmatpush.msrb.mxu0 %v4908_v11  ;;  %v4778_v36 = vpop.f32.mrf.mxu1 }
 0x547   : > { %v4739_v29 = vadd.f32 %v4738_v31, %v4719_v32 }
 0x548   : > { %4929 = vmatpush.msrb.mxu0 %v4907_v3 }
 0x549   : > { %v4759_v34 = vadd.f32 %v4758_v59, %v4739_v29 }
 0x54a   : > { %4930 = vmatpush.msrb.mxu0 %v4906_v37 }
 0x54b   : > { %v4779_v56 = vadd.f32 %v4778_v36, %v4759_v34 }
 0x54c   : > { %4931 = vmatpush.msrb.mxu0 %v4905_v6  ;;  %v4798_v49 = vpop.f32.mrf.mxu2  ;;  %v4818_v10 = vpop.f32.mrf.mxu3 }
 0x54d   : > { %v4441_v44 = vld [vmem:[#allocation2 + $0x8] sm:$0xf]  ;;  %v4799_v39 = vadd.f32 %v4798_v49, %v4779_v56 }
 0x54e   : > { %v4645_v1 = vperm.slane %v4441_v44, 0  ;;  %v4646_v18 = vperm.slane %v4441_v44, 1  ;;  %v4647_v15 = vperm.slane %v4441_v44, 2  ;;  %v4648_v24 = vperm.slane %v4441_v44, 3  ;;  %4932 = vmatpush.msrb.mxu0 %v4904_v5 }
 0x54f   : > { %v4819_v61 = vadd.f32 %v4818_v10, %v4799_v39 }
 0x550   : > { %4837 = vmatmul.f32.vlgmr.msra.gmra.mxu0 %v4645_v1  ;;  %4857 = vmatmul.f32.vlgmr.msra.gmra.mxu1 %v4646_v18 }
 0x551   : > { %4877 = vmatmul.f32.vlgmr.msra.gmra.mxu2 %v4647_v15  ;;  %4897 = vmatmul.f32.vlgmr.msra.gmra.mxu3 %v4648_v24 }
 0x552   : > { %4933 = vmatpush.msrb.mxu0 %v4903_v54 }
 0x554   : > { %4934 = vmatpush.msrb.mxu0 %v4902_v52 }
 0x5cd   : > { %v4838_v60 = vpop.f32.mrf.mxu0  ;;  %v4858_v33 = vpop.f32.mrf.mxu1 }
 0x5ce   : > { %v4839_v2 = vadd.f32 %v4838_v60, %v4819_v61 }
 0x5d0   : > { %v4859_v50 = vadd.f32 %v4858_v33, %v4839_v2 }
 0x5d4   : > { %v4878_v35 = vpop.f32.mrf.mxu2  ;;  %v4898_v22 = vpop.f32.mrf.mxu3 }
 0x5d5   : > { %v4879_v55 = vadd.f32 %v4878_v35, %v4859_v50 }
 0x5d7   : > { %v4899_v8 = vadd.f32 %v4898_v22, %v4879_v55 }
 0x5d9   : > { %v4901_v30 = vmax.f32 %v4899_v8, 0.0 }
 0x5db   : > { %4935 = vmatmul.f32.vlgmr.msrb.gmra.mxu0 %v4901_v30 }
 0x658   : > { %v4936_v48 = vpop.f32.mrf.mxu0 }
 0x659   : > { %v4937_v16 = vadd.f32 %v4936_v48, %v4918_v42 }
 0x65b   : > { %4939 = vst [vmem:[%s297_s9] sm:$0x1] %v4937_v16 }
 0x65c   : > { %5476 = shalt.err (!%p5473_p8)
}
 0x65d   : > { %5248 = dma.vmem_to_hbm [thread:$0]  (%p5609_p5), %s4952_s19, 16, %s4954_s8, %s4941_s18  }
 0x65e PF: > { %p5265_p9 = scmp.ge.s32.totalorder %s5519_s27, 2  ;;  %s4965_s22 = sand.u32 1, %s5507_s24  }
 0x65f   : > { %s4966_s20 = scalar_lea.sflag [#allocation4], %s4965_s22 }
 0x660   : > { %p5258_p10 = pnand %p5265_p9, %p5613_p6 }
 0x662   : > { %p5259_p11 = pneg %p5258_p10 }
 0x664   : > { %5502 = dma.done.wait (%p5259_p11), %s4966_s20, 16  }
 0x665   : > { %5504 = vsyncadd (%p5259_p11), %s4966_s20, 4294967280  ;;  %p19_p12 = scmp.ge.s32.totalorder %s5596_s30, 4   ;;  %s14453_s24 = smov %s5511_s25 }
 0x666   : > { %s14454_s25 = smov %s5515_s26  ;;  %s14455_s26 = smov %s5607_s10 }
 0x667   : > { %s14456_s27 = smov %s5596_s30  ;;  %21 = sbr.rel (!%p19_p12) target bundleno = 5 (0x5), region = 166 }
 0x66c   :  { %4971 = vsyncpa [#allocation4], 1 }
 0x66d   :  { %4973 = vsyncpa [#allocation4 + $0x1], 1 }
 0x66e   :  { %4974 = vsyncpa [#allocation5], 1 }
 0x66f   :  { %4976 = vsyncpa [#allocation5 + $0x1], 1 }
 0x670   :  { %4977 = vsyncpa [#allocation7], 1 }

</bundles_post_ra>
